<compile_context>
chip_gen: v7x
topology: tpu7x:2x2x1
jax: 0.10.0
libtpu: 0.0.40
codegen_flags: <defaults>
</compile_context>

<pallas_src>
import functools

import jax
import jax.numpy as jnp
from jax.experimental import pallas as pl
from jax.experimental.pallas import tpu as pltpu

NEG = -1e30  # additive mask for padded logit columns (kept in f32 end to end)


def _round_up(x, m):
    return ((x + m - 1) // m) * m


def _block_size(batch):
    """Images per grid step: keep >=2 grid steps when possible (v7x 2-TC
    sharding), up to 8 images/step so conv2's per-tap matmul M reaches 512."""
    return max(1, min(8, batch // 2))


def _log_softmax(z):
    m = jnp.max(z, axis=-1, keepdims=True)
    s = z - m
    lse = jnp.log(jnp.sum(jnp.exp(s), axis=-1, keepdims=True))
    return s - lse


# ---------------------------------------------------------------------------
# Kernel A: conv1 (im2col matmul) + folded BN1 + 2x2 maxpool + ReLU, fused
# ---------------------------------------------------------------------------

def _conv1_pool_kernel(p_ref, w_ref, s_ref, t_ref, o_ref, pool_scr, *, blk):
    # conv1 as one im2col matmul: (blk*576, Kp) @ (Kp, 64) -> f32 accumulate
    acc = jnp.dot(p_ref[...], w_ref[...], preferred_element_type=jnp.float32)
    y = acc * s_ref[...] + t_ref[...]                    # folded BN1 + conv bias

    # Fused 2x2 max-pool (stride 2) + ReLU epilogue (no HBM round trip).
    # Rows are ordered (b, oh, ow); pool H by pairing adjacent oh values
    # (tile-aligned reshape: 24 and 48 are multiples of 8), then pool W with
    # strided ref loads from a VMEM scratch.
    r = y.reshape(blk * 12, 2, 24, 64)
    pool_scr[...] = jnp.maximum(r[:, 0], r[:, 1])        # (blk*12, 24, 64)
    pa = pool_scr[:, pl.ds(0, 12, stride=2), :]          # even output columns
    pb = pool_scr[:, pl.ds(1, 12, stride=2), :]          # odd  output columns
    pooled = jnp.maximum(jnp.maximum(pa, pb), 0.0)       # (blk*12, 12, 64)
    o_ref[...] = pooled.reshape(blk, 12, 12, 64).astype(o_ref.dtype)


def conv1_bn_pool_relu(patches, w, scale, shift, n_imgs, blk):
    kp = patches.shape[1]
    return pl.pallas_call(
        functools.partial(_conv1_pool_kernel, blk=blk),
        out_shape=jax.ShapeDtypeStruct((n_imgs, 12, 12, 64), jnp.bfloat16),
        grid=(n_imgs // blk,),
        in_specs=[
            pl.BlockSpec((blk * 576, kp), lambda i: (i, 0)),
            pl.BlockSpec((kp, 64), lambda i: (0, 0)),
            pl.BlockSpec((1, 64), lambda i: (0, 0)),
            pl.BlockSpec((1, 64), lambda i: (0, 0)),
        ],
        out_specs=pl.BlockSpec((blk, 12, 12, 64), lambda i: (i, 0, 0, 0)),
        scratch_shapes=[pltpu.VMEM((blk * 12, 24, 64), jnp.float32)],
        compiler_params=pltpu.CompilerParams(dimension_semantics=("parallel",)),
    )(patches, w, scale, shift)


# ---------------------------------------------------------------------------
# Kernel B: conv2 + folded BN2 + 2x2 maxpool + ReLU + BOTH classifier heads
# ---------------------------------------------------------------------------

def _conv2_heads_kernel(x_ref, w2_ref, s2_ref, t2_ref,
                        cw1_ref, cs1_ref, cb1_ref,
                        cw2_ref, cs2_ref, cb2_ref,
                        cw3_ref, cb3_ref,
                        dw1_ref, ds1_ref, db1_ref,
                        dw2_ref, db2_ref,
                        cls_ref, dom_ref, feat_ref,
                        pool_scr, *, blk):
    # ---- conv2: 5x5, 64 -> 64(padded from 50), 25 per-tap MXU matmuls ----
    acc = jnp.zeros((blk * 64, 64), jnp.float32)
    for kh in range(5):
        for kw in range(5):
            patch = x_ref[:, kh:kh + 8, kw:kw + 8, :].reshape(blk * 64, 64)
            acc = acc + jnp.dot(patch, w2_ref[kh * 5 + kw],
                                preferred_element_type=jnp.float32)
    y = acc * s2_ref[...] + t2_ref[...]                  # folded BN2 + conv bias
    # TODO(synk): f_drop1 (Dropout2d) is train-time stochastic; identity in eval.

    # ---- fused 2x2 max-pool (stride 2) + ReLU ----
    r = y.reshape(blk * 4, 2, 8, 64)
    pool_scr[...] = jnp.maximum(r[:, 0], r[:, 1])        # (blk*4, 8, 64)
    pa = pool_scr[:, pl.ds(0, 4, stride=2), :]
    pb = pool_scr[:, pl.ds(1, 4, stride=2), :]
    pooled = jnp.maximum(jnp.maximum(pa, pb), 0.0)       # (blk*4, 4, 64)
    feat_ref[...] = pooled.reshape(blk, 4, 4, 64).astype(feat_ref.dtype)

    # ---- both classifier heads, weights fully VMEM-resident ----
    # fc1 for both heads: contract over the 16 (h, w) positions of the pooled
    # map (rows of the fc1 weights were permuted at init to this order), so no
    # sublane->lane reshape of the pooled tensor is needed.
    ch = jnp.zeros((blk, 128), jnp.float32)
    dh = jnp.zeros((blk, 128), jnp.float32)
    for hw in range(16):
        h, w = hw // 4, hw % 4
        fpart = feat_ref[:, h, w, :].astype(jnp.bfloat16)          # (blk, 64)
        rows = hw * 64
        ch = ch + jnp.dot(fpart, cw1_ref[rows:rows + 64, :],
                          preferred_element_type=jnp.float32)
        dh = dh + jnp.dot(fpart, dw1_ref[rows:rows + 64, :],
                          preferred_element_type=jnp.float32)

    # class head: fc1 -> bn -> relu -> (drop: eval identity) -> fc2 -> bn
    #             -> relu -> fc3 -> log_softmax (all f32; pads masked by NEG)
    hc = jnp.maximum(ch * cs1_ref[...] + cb1_ref[...], 0.0)
    hc = jnp.dot(hc.astype(jnp.bfloat16), cw2_ref[...],
                 preferred_element_type=jnp.float32)
    hc = jnp.maximum(hc * cs2_ref[...] + cb2_ref[...], 0.0)
    zc = jnp.dot(hc.astype(jnp.bfloat16), cw3_ref[...],
                 preferred_element_type=jnp.float32) + cb3_ref[...]
    cls_ref[0] = _log_softmax(zc).astype(cls_ref.dtype)

    # domain head (ReverseLayerF is identity in the forward pass)
    hd = jnp.maximum(dh * ds1_ref[...] + db1_ref[...], 0.0)
    zd = jnp.dot(hd.astype(jnp.bfloat16), dw2_ref[...],
                 preferred_element_type=jnp.float32) + db2_ref[...]
    dom_ref[0] = _log_softmax(zd).astype(dom_ref.dtype)


def conv2_bn_pool_relu_heads(x, p, n_imgs, blk):
    weights = (p["conv2_w"], p["conv2_scale"], p["conv2_shift"],
               p["c_fc1_w"], p["c_s1"], p["c_b1"],
               p["c_fc2_w"], p["c_s2"], p["c_b2"],
               p["c_fc3_w"], p["c_b3"],
               p["d_fc1_w"], p["d_s1"], p["d_b1"],
               p["d_fc2_w"], p["d_b2"])
    in_specs = [pl.BlockSpec((blk, 12, 12, 64), lambda i: (i, 0, 0, 0))]
    for a in weights:
        # rank bound as a default arg (fixes the late-binding lambda issue)
        in_specs.append(pl.BlockSpec(a.shape, lambda i, _r=a.ndim: (0,) * _r))
    steps = n_imgs // blk
    cls, dom, feat = pl.pallas_call(
        functools.partial(_conv2_heads_kernel, blk=blk),
        out_shape=(
            jax.ShapeDtypeStruct((steps, blk, 128), jnp.float32),
            jax.ShapeDtypeStruct((steps, blk, 128), jnp.float32),
            jax.ShapeDtypeStruct((n_imgs, 4, 4, 64), jnp.float32),
        ),
        grid=(steps,),
        in_specs=in_specs,
        out_specs=(
            pl.BlockSpec((1, blk, 128), lambda i: (i, 0, 0)),
            pl.BlockSpec((1, blk, 128), lambda i: (i, 0, 0)),
            pl.BlockSpec((blk, 4, 4, 64), lambda i: (i, 0, 0, 0)),
        ),
        scratch_shapes=[pltpu.VMEM((blk * 4, 8, 64), jnp.float32)],
        compiler_params=pltpu.CompilerParams(dimension_semantics=("parallel",)),
    )(x, *weights)
    return cls.reshape(n_imgs, 128), dom.reshape(n_imgs, 128), feat


# ---------------------------------------------------------------------------
# Glue: conv1 im2col (tiny) and the full forward pass
# ---------------------------------------------------------------------------

def _im2col_conv1(x, kp):
    """x: (B,28,28,C) NHWC bf16 -> (B*576, kp) bf16 patches (K = 25*C, zero-padded)."""
    B = x.shape[0]
    C = x.shape[3]
    cols = [x[:, i:i + 24, j:j + 24, :] for i in range(5) for j in range(5)]
    patches = jnp.stack(cols, axis=3).reshape(B * 576, 25 * C)
    return jnp.pad(patches, ((0, 0), (0, kp - 25 * C)))


def cnn_model_forward(params, input_data, alpha):
    """Matches CNNModel.forward (eval mode): returns (class_output, domain_output, feature)."""
    del alpha                                   # ReverseLayerF: identity in forward
    B, cin = input_data.shape[0], input_data.shape[1]
    blk = _block_size(B)
    bp = _round_up(B, blk)

    x = jnp.transpose(input_data, (0, 2, 3, 1)).astype(jnp.bfloat16)   # NCHW -> NHWC
    if cin == 1:
        # torch .expand(B,3,28,28) makes 3 identical channels: fold it into the
        # conv1 weight (summed over its 3 input channels) -> exact, 3x less work.
        conv1_w, kp = params["conv1_w_1ch"], 32
    else:
        conv1_w, kp = params["conv1_w_3ch"], 128

    patches = _im2col_conv1(x, kp)                                     # (B*576, kp)
    if bp != B:
        patches = jnp.pad(patches, ((0, (bp - B) * 576), (0, 0)))

    h1 = conv1_bn_pool_relu(patches, conv1_w, params["conv1_scale"],
                            params["conv1_shift"], bp, blk)            # (bp,12,12,64)
    cls, dom, feat = conv2_bn_pool_relu_heads(h1, params, bp, blk)

    class_output = cls[:B, :10]
    domain_output = dom[:B, :2]
    # `feature` keeps PyTorch's NCHW flatten of the 50 real channels.
    feature = jnp.transpose(feat[:B, :, :, :50], (0, 3, 1, 2)).reshape(B, 800)
    return class_output, domain_output, feature


# ---------------------------------------------------------------------------
# Deterministic parameter initialization (synthetic, eval-mode BN folded)
# ---------------------------------------------------------------------------

def _bn_fold(key, n, eps=1e-5):
    k1, k2, k3, k4 = jax.random.split(key, 4)
    gamma = jax.random.uniform(k1, (n,), jnp.float32, 0.5, 1.5)
    beta = 0.1 * jax.random.normal(k2, (n,), jnp.float32)
    mean = 0.1 * jax.random.normal(k3, (n,), jnp.float32)
    var = jax.random.uniform(k4, (n,), jnp.float32, 0.5, 1.5)
    scale = gamma / jnp.sqrt(var + eps)
    shift = beta - mean * scale
    return scale, shift


def _pad_vec(v, n, fill=0.0):
    out = jnp.full((n,), fill, jnp.float32)
    out = out.at[: v.shape[0]].set(v.astype(jnp.float32))
    return out.reshape(1, n)


def _pad_mat(w, rows, cols):
    return jnp.pad(w, ((0, rows - w.shape[0]), (0, cols - w.shape[1])))


def _expand_fc1_weight(w_logical, cin_real=50, cin_pad=64, hw=4, n_pad=128):
    # w_logical: (800, n), rows in PyTorch NCHW flatten order (c, h, w).
    # Re-permute rows to the channel-padded NHWC flatten the kernels produce.
    n = w_logical.shape[1]
    w4 = w_logical.reshape(cin_real, hw, hw, n)        # (c, h, w, n)
    w4 = jnp.transpose(w4, (1, 2, 0, 3))               # (h, w, c, n)
    w4 = jnp.pad(w4, ((0, 0), (0, 0), (0, cin_pad - cin_real), (0, 0)))
    w2 = w4.reshape(hw * hw * cin_pad, n)
    return jnp.pad(w2, ((0, 0), (0, n_pad - n)))


def init_params(key):
    ks = jax.random.split(key, 20)
    p = {}

    # f_conv1: torch (64,3,5,5) -> (kh,kw,cin,cout)
    w = 0.05 * jax.random.normal(ks[0], (64, 3, 5, 5), jnp.float32)
    b = 0.05 * jax.random.normal(ks[1], (64,), jnp.float32)
    sc, sh = _bn_fold(ks[2], 64)
    w_hwio = jnp.transpose(w, (2, 3, 1, 0))
    w3 = w_hwio.reshape(75, 64)
    w1 = w_hwio.sum(axis=2).reshape(25, 64)            # folded .expand() weight
    p["conv1_w_3ch"] = jnp.pad(w3, ((0, 128 - 75), (0, 0))).astype(jnp.bfloat16)
    p["conv1_w_1ch"] = jnp.pad(w1, ((0, 32 - 25), (0, 0))).astype(jnp.bfloat16)
    p["conv1_scale"] = sc.reshape(1, 64)
    p["conv1_shift"] = (sh + b * sc).reshape(1, 64)

    # f_conv2: torch (50,64,5,5) -> (5,5,64,50) -> (25,64,50) -> pad Cout -> 64
    w = 0.02 * jax.random.normal(ks[3], (50, 64, 5, 5), jnp.float32)
    b = 0.05 * jax.random.normal(ks[4], (50,), jnp.float32)
    sc, sh = _bn_fold(ks[5], 50)
    w = jnp.transpose(w, (2, 3, 1, 0)).reshape(25, 64, 50)
    p["conv2_w"] = jnp.pad(w, ((0, 0), (0, 0), (0, 14))).astype(jnp.bfloat16)
    p["conv2_scale"] = _pad_vec(sc, 64, 0.0)
    p["conv2_shift"] = _pad_vec(sh + b * sc, 64, 0.0)

    # class classifier (all lane dims padded to 128)
    w1c = 0.03 * jax.random.normal(ks[6], (800, 100), jnp.float32)
    b1c = 0.05 * jax.random.normal(ks[7], (100,), jnp.float32)
    s1, h1 = _bn_fold(ks[8], 100)
    p["c_fc1_w"] = _expand_fc1_weight(w1c).astype(jnp.bfloat16)
    p["c_s1"] = _pad_vec(s1, 128, 0.0)
    p["c_b1"] = _pad_vec(h1 + b1c * s1, 128, 0.0)

    w2c = 0.1 * jax.random.normal(ks[9], (100, 100), jnp.float32)
    b2c = 0.05 * jax.random.normal(ks[10], (100,), jnp.float32)
    s2, h2 = _bn_fold(ks[11], 100)
    p["c_fc2_w"] = _pad_mat(w2c, 128, 128).astype(jnp.bfloat16)
    p["c_s2"] = _pad_vec(s2, 128, 0.0)
    p["c_b2"] = _pad_vec(h2 + b2c * s2, 128, 0.0)

    w3c = 0.1 * jax.random.normal(ks[12], (100, 10), jnp.float32)
    b3c = 0.05 * jax.random.normal(ks[13], (10,), jnp.float32)
    p["c_fc3_w"] = _pad_mat(w3c, 128, 128).astype(jnp.bfloat16)
    p["c_b3"] = _pad_vec(b3c, 128, NEG)                 # mask padded logit cols

    # domain classifier
    w1d = 0.03 * jax.random.normal(ks[14], (800, 100), jnp.float32)
    b1d = 0.05 * jax.random.normal(ks[15], (100,), jnp.float32)
    s1d, h1d = _bn_fold(ks[16], 100)
    p["d_fc1_w"] = _expand_fc1_weight(w1d).astype(jnp.bfloat16)
    p["d_s1"] = _pad_vec(s1d, 128, 0.0)
    p["d_b1"] = _pad_vec(h1d + b1d * s1d, 128, 0.0)

    w2d = 0.1 * jax.random.normal(ks[17], (100, 2), jnp.float32)
    b2d = 0.05 * jax.random.normal(ks[18], (2,), jnp.float32)
    p["d_fc2_w"] = _pad_mat(w2d, 128, 128).astype(jnp.bfloat16)
    p["d_b2"] = _pad_vec(b2d, 128, NEG)
    return p


if __name__ == "__main__":
    key = jax.random.PRNGKey(0)
    pkey, xkey = jax.random.split(key)
    params = init_params(pkey)

    # single-channel 28x28 input (MNIST DANN); expanded-to-3ch handled in forward
    x = jax.random.normal(xkey, (2, 1, 28, 28), jnp.float32)
    alpha = 0.5

    fwd = jax.jit(cnn_model_forward)
    class_out, domain_out, feature = fwd(params, x, alpha)
    jax.block_until_ready((class_out, domain_out, feature))

    assert class_out.shape == (2, 10)
    assert domain_out.shape == (2, 2)
    assert feature.shape == (2, 800)
    assert bool(jnp.all(jnp.isfinite(class_out)))
    assert bool(jnp.all(jnp.isfinite(domain_out)))
    assert bool(jnp.all(jnp.isfinite(feature)))
    print("KERNEL_OK")
</pallas_src>

<mosaic_0001>
module attributes {stable_mosaic.version = 11 : i64} {
  func.func @_conv1_pool_kernel(%arg0: i32, %arg1: memref<576x32xbf16, #tpu.memory_space<vmem>>, %arg2: memref<32x64xbf16, #tpu.memory_space<vmem>>, %arg3: memref<1x64xf32, #tpu.memory_space<vmem>>, %arg4: memref<1x64xf32, #tpu.memory_space<vmem>>, %arg5: memref<1x12x12x64xbf16, #tpu.memory_space<vmem>>, %arg6: memref<12x24x64xf32, #tpu.memory_space<vmem>>) attributes {dimension_semantics = [#tpu.dimension_semantics<parallel>], iteration_bounds = array<i64: 2>, scalar_prefetch = 0 : i64, scratch_operands = 1 : i64, tpu.core_type = #tpu.core_type<tc>, window_params = [{transform_indices = @transform_0, window_bounds = array<i64: 576, 32>}, {pipeline_mode = #tpu.pipeline_mode<synchronous>, transform_indices = @transform_1, window_bounds = array<i64: 32, 64>}, {pipeline_mode = #tpu.pipeline_mode<synchronous>, transform_indices = @transform_2, window_bounds = array<i64: 1, 64>}, {pipeline_mode = #tpu.pipeline_mode<synchronous>, transform_indices = @transform_3, window_bounds = array<i64: 1, 64>}, {transform_indices = @transform_4, window_bounds = array<i64: 1, 12, 12, 64>}]} {
    %c0 = arith.constant 0 : index
    %c0_0 = arith.constant 0 : index
    %0 = vector.load %arg1[%c0, %c0_0] : memref<576x32xbf16, #tpu.memory_space<vmem>>, vector<576x32xbf16>
    %c0_1 = arith.constant 0 : index
    %c0_2 = arith.constant 0 : index
    %1 = vector.load %arg2[%c0_1, %c0_2] : memref<32x64xbf16, #tpu.memory_space<vmem>>, vector<32x64xbf16>
    %cst = arith.constant dense<0.000000e+00> : vector<576x64xf32>
    %2 = tpu.matmul %0, %1, %cst {dimension_numbers = #tpu.dot_dimension_numbers<[1], [0], [0], [1], [0, 0, 1, 1], [], []>} : vector<576x32xbf16>, vector<32x64xbf16>, vector<576x64xf32> -> vector<576x64xf32>
    %c0_3 = arith.constant 0 : index
    %c0_4 = arith.constant 0 : index
    %3 = vector.load %arg3[%c0_3, %c0_4] : memref<1x64xf32, #tpu.memory_space<vmem>>, vector<1x64xf32>
    %4 = vector.broadcast %3 : vector<1x64xf32> to vector<576x64xf32>
    %5 = arith.mulf %2, %4 : vector<576x64xf32>
    %c0_5 = arith.constant 0 : index
    %c0_6 = arith.constant 0 : index
    %6 = vector.load %arg4[%c0_5, %c0_6] : memref<1x64xf32, #tpu.memory_space<vmem>>, vector<1x64xf32>
    %7 = vector.broadcast %6 : vector<1x64xf32> to vector<576x64xf32>
    %8 = arith.addf %5, %7 : vector<576x64xf32>
    %9 = vector.shape_cast %8 : vector<576x64xf32> to vector<12x2x24x64xf32>
    %10 = vector.extract_strided_slice %9 {offsets = [0, 0, 0, 0], sizes = [12, 1, 24, 64], strides = [1, 1, 1, 1]} : vector<12x2x24x64xf32> to vector<12x1x24x64xf32>
    %11 = vector.shape_cast %10 : vector<12x1x24x64xf32> to vector<12x24x64xf32>
    %12 = vector.extract_strided_slice %9 {offsets = [0, 1, 0, 0], sizes = [12, 1, 24, 64], strides = [1, 1, 1, 1]} : vector<12x2x24x64xf32> to vector<12x1x24x64xf32>
    %13 = vector.shape_cast %12 : vector<12x1x24x64xf32> to vector<12x24x64xf32>
    %14 = arith.maximumf %11, %13 : vector<12x24x64xf32>
    %c0_7 = arith.constant 0 : index
    %c0_8 = arith.constant 0 : index
    %c0_9 = arith.constant 0 : index
    %15 = vector.load %arg6[%c0_7, %c0_8, %c0_9] : memref<12x24x64xf32, #tpu.memory_space<vmem>>, vector<12x24x64xf32>
    tpu.vector_store %arg6[%c0_7, %c0_8, %c0_9], %14 {strides = array<i32>} : memref<12x24x64xf32, #tpu.memory_space<vmem>>, vector<12x24x64xf32>,
    %c0_10 = arith.constant 0 : index
    %c0_11 = arith.constant 0 : index
    %c0_12 = arith.constant 0 : index
    %16 = tpu.strided_load %arg6[%c0_10, %c0_11, %c0_12] {strides = array<i32: 1, 2, 1>} : memref<12x24x64xf32, #tpu.memory_space<vmem>>, vector<12x12x64xf32>
    %c0_13 = arith.constant 0 : index
    %c1 = arith.constant 1 : index
    %c0_14 = arith.constant 0 : index
    %17 = tpu.strided_load %arg6[%c0_13, %c1, %c0_14] {strides = array<i32: 1, 2, 1>} : memref<12x24x64xf32, #tpu.memory_space<vmem>>, vector<12x12x64xf32>
    %18 = arith.maximumf %16, %17 : vector<12x12x64xf32>
    %cst_15 = arith.constant 0.000000e+00 : f32
    %19 = vector.broadcast %cst_15 : f32 to vector<12x12x64xf32>
    %20 = arith.maximumf %18, %19 : vector<12x12x64xf32>
    %21 = vector.shape_cast %20 : vector<12x12x64xf32> to vector<1x12x12x64xf32>
    %22 = arith.truncf %21 : vector<1x12x12x64xf32> to vector<1x12x12x64xbf16>
    %c0_16 = arith.constant 0 : index
    %c0_17 = arith.constant 0 : index
    %c0_18 = arith.constant 0 : index
    %c0_19 = arith.constant 0 : index
    %23 = vector.load %arg5[%c0_16, %c0_17, %c0_18, %c0_19] : memref<1x12x12x64xbf16, #tpu.memory_space<vmem>>, vector<1x12x12x64xbf16>
    tpu.vector_store %arg5[%c0_16, %c0_17, %c0_18, %c0_19], %22 {strides = array<i32>} : memref<1x12x12x64xbf16, #tpu.memory_space<vmem>>, vector<1x12x12x64xbf16>,
    return
  }
  func.func @transform_0(%arg0: i32) -> (i32, i32) {
    %c0_i32 = arith.constant 0 : i32
    %c0_i32_0 = arith.constant 0 : i32
    return %arg0, %c0_i32 : i32, i32
  }
  func.func @transform_1(%arg0: i32) -> (i32, i32) {
    %c0_i32 = arith.constant 0 : i32
    %c0_i32_0 = arith.constant 0 : i32
    %c0_i32_1 = arith.constant 0 : i32
    return %c0_i32, %c0_i32_0 : i32, i32
  }
  func.func @transform_2(%arg0: i32) -> (i32, i32) {
    %c0_i32 = arith.constant 0 : i32
    %c0_i32_0 = arith.constant 0 : i32
    %c0_i32_1 = arith.constant 0 : i32
    return %c0_i32, %c0_i32_0 : i32, i32
  }
  func.func @transform_3(%arg0: i32) -> (i32, i32) {
    %c0_i32 = arith.constant 0 : i32
    %c0_i32_0 = arith.constant 0 : i32
    %c0_i32_1 = arith.constant 0 : i32
    return %c0_i32, %c0_i32_0 : i32, i32
  }
  func.func @transform_4(%arg0: i32) -> (i32, i32, i32, i32) {
    %c0_i32 = arith.constant 0 : i32
    %c0_i32_0 = arith.constant 0 : i32
    %c0_i32_1 = arith.constant 0 : i32
    %c0_i32_2 = arith.constant 0 : i32
    return %arg0, %c0_i32, %c0_i32_0, %c0_i32_1 : i32, i32, i32, i32
  }
}

module attributes {stable_mosaic.version = 11 : i64} {
  func.func @_conv2_heads_kernel(%arg0: i32, %arg1: memref<1x12x12x64xbf16, #tpu.memory_space<vmem>>, %arg2: memref<25x64x64xbf16, #tpu.memory_space<vmem>>, %arg3: memref<1x64xf32, #tpu.memory_space<vmem>>, %arg4: memref<1x64xf32, #tpu.memory_space<vmem>>, %arg5: memref<1024x128xbf16, #tpu.memory_space<vmem>>, %arg6: memref<1x128xf32, #tpu.memory_space<vmem>>, %arg7: memref<1x128xf32, #tpu.memory_space<vmem>>, %arg8: memref<128x128xbf16, #tpu.memory_space<vmem>>, %arg9: memref<1x128xf32, #tpu.memory_space<vmem>>, %arg10: memref<1x128xf32, #tpu.memory_space<vmem>>, %arg11: memref<128x128xbf16, #tpu.memory_space<vmem>>, %arg12: memref<1x128xf32, #tpu.memory_space<vmem>>, %arg13: memref<1024x128xbf16, #tpu.memory_space<vmem>>, %arg14: memref<1x128xf32, #tpu.memory_space<vmem>>, %arg15: memref<1x128xf32, #tpu.memory_space<vmem>>, %arg16: memref<128x128xbf16, #tpu.memory_space<vmem>>, %arg17: memref<1x128xf32, #tpu.memory_space<vmem>>, %arg18: memref<1x1x128xf32, #tpu.memory_space<vmem>>, %arg19: memref<1x1x128xf32, #tpu.memory_space<vmem>>, %arg20: memref<1x4x4x64xf32, #tpu.memory_space<vmem>>, %arg21: memref<4x8x64xf32, #tpu.memory_space<vmem>>) attributes {dimension_semantics = [#tpu.dimension_semantics<parallel>], iteration_bounds = array<i64: 2>, scalar_prefetch = 0 : i64, scratch_operands = 1 : i64, tpu.core_type = #tpu.core_type<tc>, window_params = [{transform_indices = @transform_0, window_bounds = array<i64: 1, 12, 12, 64>}, {pipeline_mode = #tpu.pipeline_mode<synchronous>, transform_indices = @transform_1, window_bounds = array<i64: 25, 64, 64>}, {pipeline_mode = #tpu.pipeline_mode<synchronous>, transform_indices = @transform_2, window_bounds = array<i64: 1, 64>}, {pipeline_mode = #tpu.pipeline_mode<synchronous>, transform_indices = @transform_3, window_bounds = array<i64: 1, 64>}, {pipeline_mode = #tpu.pipeline_mode<synchronous>, transform_indices = @transform_4, window_bounds = array<i64: 1024, 128>}, {pipeline_mode = #tpu.pipeline_mode<synchronous>, transform_indices = @transform_5, window_bounds = array<i64: 1, 128>}, {pipeline_mode = #tpu.pipeline_mode<synchronous>, transform_indices = @transform_6, window_bounds = array<i64: 1, 128>}, {pipeline_mode = #tpu.pipeline_mode<synchronous>, transform_indices = @transform_7, window_bounds = array<i64: 128, 128>}, {pipeline_mode = #tpu.pipeline_mode<synchronous>, transform_indices = @transform_8, window_bounds = array<i64: 1, 128>}, {pipeline_mode = #tpu.pipeline_mode<synchronous>, transform_indices = @transform_9, window_bounds = array<i64: 1, 128>}, {pipeline_mode = #tpu.pipeline_mode<synchronous>, transform_indices = @transform_10, window_bounds = array<i64: 128, 128>}, {pipeline_mode = #tpu.pipeline_mode<synchronous>, transform_indices = @transform_11, window_bounds = array<i64: 1, 128>}, {pipeline_mode = #tpu.pipeline_mode<synchronous>, transform_indices = @transform_12, window_bounds = array<i64: 1024, 128>}, {pipeline_mode = #tpu.pipeline_mode<synchronous>, transform_indices = @transform_13, window_bounds = array<i64: 1, 128>}, {pipeline_mode = #tpu.pipeline_mode<synchronous>, transform_indices = @transform_14, window_bounds = array<i64: 1, 128>}, {pipeline_mode = #tpu.pipeline_mode<synchronous>, transform_indices = @transform_15, window_bounds = array<i64: 128, 128>}, {pipeline_mode = #tpu.pipeline_mode<synchronous>, transform_indices = @transform_16, window_bounds = array<i64: 1, 128>}, {transform_indices = @transform_17, window_bounds = array<i64: 1, 1, 128>}, {transform_indices = @transform_18, window_bounds = array<i64: 1, 1, 128>}, {transform_indices = @transform_19, window_bounds = array<i64: 1, 4, 4, 64>}]} {
    %cst = arith.constant 0.000000e+00 : f32
    %0 = vector.broadcast %cst : f32 to vector<64x64xf32>
    %c0 = arith.constant 0 : index
    %c0_0 = arith.constant 0 : index
    %c0_1 = arith.constant 0 : index
    %c0_2 = arith.constant 0 : index
    %1 = vector.load %arg1[%c0, %c0_0, %c0_1, %c0_2] : memref<1x12x12x64xbf16, #tpu.memory_space<vmem>>, vector<1x8x8x64xbf16>
    %2 = vector.shape_cast %1 : vector<1x8x8x64xbf16> to vector<64x64xbf16>
    %c0_3 = arith.constant 0 : index
    %c0_4 = arith.constant 0 : index
    %c0_5 = arith.constant 0 : index
    %3 = vector.load %arg2[%c0_3, %c0_4, %c0_5] : memref<25x64x64xbf16, #tpu.memory_space<vmem>>, vector<1x64x64xbf16>
    %4 = vector.shape_cast %3 : vector<1x64x64xbf16> to vector<64x64xbf16>
    %cst_6 = arith.constant dense<0.000000e+00> : vector<64x64xf32>
    %5 = tpu.matmul %2, %4, %cst_6 {dimension_numbers = #tpu.dot_dimension_numbers<[1], [0], [0], [1], [0, 0, 1, 1], [], []>} : vector<64x64xbf16>, vector<64x64xbf16>, vector<64x64xf32> -> vector<64x64xf32>
    %6 = arith.addf %0, %5 : vector<64x64xf32>
    %c0_7 = arith.constant 0 : index
    %c0_8 = arith.constant 0 : index
    %c1 = arith.constant 1 : index
    %c0_9 = arith.constant 0 : index
    %7 = vector.load %arg1[%c0_7, %c0_8, %c1, %c0_9] : memref<1x12x12x64xbf16, #tpu.memory_space<vmem>>, vector<1x8x8x64xbf16>
    %8 = vector.shape_cast %7 : vector<1x8x8x64xbf16> to vector<64x64xbf16>
    %c1_10 = arith.constant 1 : index
    %c0_11 = arith.constant 0 : index
    %c0_12 = arith.constant 0 : index
    %9 = vector.load %arg2[%c1_10, %c0_11, %c0_12] : memref<25x64x64xbf16, #tpu.memory_space<vmem>>, vector<1x64x64xbf16>
    %10 = vector.shape_cast %9 : vector<1x64x64xbf16> to vector<64x64xbf16>
    %cst_13 = arith.constant dense<0.000000e+00> : vector<64x64xf32>
    %11 = tpu.matmul %8, %10, %cst_13 {dimension_numbers = #tpu.dot_dimension_numbers<[1], [0], [0], [1], [0, 0, 1, 1], [], []>} : vector<64x64xbf16>, vector<64x64xbf16>, vector<64x64xf32> -> vector<64x64xf32>
    %12 = arith.addf %6, %11 : vector<64x64xf32>
    %c0_14 = arith.constant 0 : index
    %c0_15 = arith.constant 0 : index
    %c2 = arith.constant 2 : index
    %c0_16 = arith.constant 0 : index
    %13 = vector.load %arg1[%c0_14, %c0_15, %c2, %c0_16] : memref<1x12x12x64xbf16, #tpu.memory_space<vmem>>, vector<1x8x8x64xbf16>
    %14 = vector.shape_cast %13 : vector<1x8x8x64xbf16> to vector<64x64xbf16>
    %c2_17 = arith.constant 2 : index
    %c0_18 = arith.constant 0 : index
    %c0_19 = arith.constant 0 : index
    %15 = vector.load %arg2[%c2_17, %c0_18, %c0_19] : memref<25x64x64xbf16, #tpu.memory_space<vmem>>, vector<1x64x64xbf16>
    %16 = vector.shape_cast %15 : vector<1x64x64xbf16> to vector<64x64xbf16>
    %cst_20 = arith.constant dense<0.000000e+00> : vector<64x64xf32>
    %17 = tpu.matmul %14, %16, %cst_20 {dimension_numbers = #tpu.dot_dimension_numbers<[1], [0], [0], [1], [0, 0, 1, 1], [], []>} : vector<64x64xbf16>, vector<64x64xbf16>, vector<64x64xf32> -> vector<64x64xf32>
    %18 = arith.addf %12, %17 : vector<64x64xf32>
    %c0_21 = arith.constant 0 : index
    %c0_22 = arith.constant 0 : index
    %c3 = arith.constant 3 : index
    %c0_23 = arith.constant 0 : index
    %19 = vector.load %arg1[%c0_21, %c0_22, %c3, %c0_23] : memref<1x12x12x64xbf16, #tpu.memory_space<vmem>>, vector<1x8x8x64xbf16>
    %20 = vector.shape_cast %19 : vector<1x8x8x64xbf16> to vector<64x64xbf16>
    %c3_24 = arith.constant 3 : index
    %c0_25 = arith.constant 0 : index
    %c0_26 = arith.constant 0 : index
    %21 = vector.load %arg2[%c3_24, %c0_25, %c0_26] : memref<25x64x64xbf16, #tpu.memory_space<vmem>>, vector<1x64x64xbf16>
    %22 = vector.shape_cast %21 : vector<1x64x64xbf16> to vector<64x64xbf16>
    %cst_27 = arith.constant dense<0.000000e+00> : vector<64x64xf32>
    %23 = tpu.matmul %20, %22, %cst_27 {dimension_numbers = #tpu.dot_dimension_numbers<[1], [0], [0], [1], [0, 0, 1, 1], [], []>} : vector<64x64xbf16>, vector<64x64xbf16>, vector<64x64xf32> -> vector<64x64xf32>
    %24 = arith.addf %18, %23 : vector<64x64xf32>
    %c0_28 = arith.constant 0 : index
    %c0_29 = arith.constant 0 : index
    %c4 = arith.constant 4 : index
    %c0_30 = arith.constant 0 : index
    %25 = vector.load %arg1[%c0_28, %c0_29, %c4, %c0_30] : memref<1x12x12x64xbf16, #tpu.memory_space<vmem>>, vector<1x8x8x64xbf16>
    %26 = vector.shape_cast %25 : vector<1x8x8x64xbf16> to vector<64x64xbf16>
    %c4_31 = arith.constant 4 : index
    %c0_32 = arith.constant 0 : index
    %c0_33 = arith.constant 0 : index
    %27 = vector.load %arg2[%c4_31, %c0_32, %c0_33] : memref<25x64x64xbf16, #tpu.memory_space<vmem>>, vector<1x64x64xbf16>
    %28 = vector.shape_cast %27 : vector<1x64x64xbf16> to vector<64x64xbf16>
    %cst_34 = arith.constant dense<0.000000e+00> : vector<64x64xf32>
    %29 = tpu.matmul %26, %28, %cst_34 {dimension_numbers = #tpu.dot_dimension_numbers<[1], [0], [0], [1], [0, 0, 1, 1], [], []>} : vector<64x64xbf16>, vector<64x64xbf16>, vector<64x64xf32> -> vector<64x64xf32>
    %30 = arith.addf %24, %29 : vector<64x64xf32>
    %c0_35 = arith.constant 0 : index
    %c1_36 = arith.constant 1 : index
    %c0_37 = arith.constant 0 : index
    %c0_38 = arith.constant 0 : index
    %31 = vector.load %arg1[%c0_35, %c1_36, %c0_37, %c0_38] : memref<1x12x12x64xbf16, #tpu.memory_space<vmem>>, vector<1x8x8x64xbf16>
    %32 = vector.shape_cast %31 : vector<1x8x8x64xbf16> to vector<64x64xbf16>
    %c5 = arith.constant 5 : index
    %c0_39 = arith.constant 0 : index
    %c0_40 = arith.constant 0 : index
    %33 = vector.load %arg2[%c5, %c0_39, %c0_40] : memref<25x64x64xbf16, #tpu.memory_space<vmem>>, vector<1x64x64xbf16>
    %34 = vector.shape_cast %33 : vector<1x64x64xbf16> to vector<64x64xbf16>
    %cst_41 = arith.constant dense<0.000000e+00> : vector<64x64xf32>
    %35 = tpu.matmul %32, %34, %cst_41 {dimension_numbers = #tpu.dot_dimension_numbers<[1], [0], [0], [1], [0, 0, 1, 1], [], []>} : vector<64x64xbf16>, vector<64x64xbf16>, vector<64x64xf32> -> vector<64x64xf32>
    %36 = arith.addf %30, %35 : vector<64x64xf32>
    %c0_42 = arith.constant 0 : index
    %c1_43 = arith.constant 1 : index
    %c1_44 = arith.constant 1 : index
    %c0_45 = arith.constant 0 : index
    %37 = vector.load %arg1[%c0_42, %c1_43, %c1_44, %c0_45] : memref<1x12x12x64xbf16, #tpu.memory_space<vmem>>, vector<1x8x8x64xbf16>
    %38 = vector.shape_cast %37 : vector<1x8x8x64xbf16> to vector<64x64xbf16>
    %c6 = arith.constant 6 : index
    %c0_46 = arith.constant 0 : index
    %c0_47 = arith.constant 0 : index
    %39 = vector.load %arg2[%c6, %c0_46, %c0_47] : memref<25x64x64xbf16, #tpu.memory_space<vmem>>, vector<1x64x64xbf16>
    %40 = vector.shape_cast %39 : vector<1x64x64xbf16> to vector<64x64xbf16>
    %cst_48 = arith.constant dense<0.000000e+00> : vector<64x64xf32>
    %41 = tpu.matmul %38, %40, %cst_48 {dimension_numbers = #tpu.dot_dimension_numbers<[1], [0], [0], [1], [0, 0, 1, 1], [], []>} : vector<64x64xbf16>, vector<64x64xbf16>, vector<64x64xf32> -> vector<64x64xf32>
    %42 = arith.addf %36, %41 : vector<64x64xf32>
    %c0_49 = arith.constant 0 : index
    %c1_50 = arith.constant 1 : index
    %c2_51 = arith.constant 2 : index
    %c0_52 = arith.constant 0 : index
    %43 = vector.load %arg1[%c0_49, %c1_50, %c2_51, %c0_52] : memref<1x12x12x64xbf16, #tpu.memory_space<vmem>>, vector<1x8x8x64xbf16>
    %44 = vector.shape_cast %43 : vector<1x8x8x64xbf16> to vector<64x64xbf16>
    %c7 = arith.constant 7 : index
    %c0_53 = arith.constant 0 : index
    %c0_54 = arith.constant 0 : index
    %45 = vector.load %arg2[%c7, %c0_53, %c0_54] : memref<25x64x64xbf16, #tpu.memory_space<vmem>>, vector<1x64x64xbf16>
    %46 = vector.shape_cast %45 : vector<1x64x64xbf16> to vector<64x64xbf16>
    %cst_55 = arith.constant dense<0.000000e+00> : vector<64x64xf32>
    %47 = tpu.matmul %44, %46, %cst_55 {dimension_numbers = #tpu.dot_dimension_numbers<[1], [0], [0], [1], [0, 0, 1, 1], [], []>} : vector<64x64xbf16>, vector<64x64xbf16>, vector<64x64xf32> -> vector<64x64xf32>
    %48 = arith.addf %42, %47 : vector<64x64xf32>
    %c0_56 = arith.constant 0 : index
    %c1_57 = arith.constant 1 : index
    %c3_58 = arith.constant 3 : index
    %c0_59 = arith.constant 0 : index
    %49 = vector.load %arg1[%c0_56, %c1_57, %c3_58, %c0_59] : memref<1x12x12x64xbf16, #tpu.memory_space<vmem>>, vector<1x8x8x64xbf16>
    %50 = vector.shape_cast %49 : vector<1x8x8x64xbf16> to vector<64x64xbf16>
    %c8 = arith.constant 8 : index
    %c0_60 = arith.constant 0 : index
    %c0_61 = arith.constant 0 : index
    %51 = vector.load %arg2[%c8, %c0_60, %c0_61] : memref<25x64x64xbf16, #tpu.memory_space<vmem>>, vector<1x64x64xbf16>
    %52 = vector.shape_cast %51 : vector<1x64x64xbf16> to vector<64x64xbf16>
    %cst_62 = arith.constant dense<0.000000e+00> : vector<64x64xf32>
    %53 = tpu.matmul %50, %52, %cst_62 {dimension_numbers = #tpu.dot_dimension_numbers<[1], [0], [0], [1], [0, 0, 1, 1], [], []>} : vector<64x64xbf16>, vector<64x64xbf16>, vector<64x64xf32> -> vector<64x64xf32>
    %54 = arith.addf %48, %53 : vector<64x64xf32>
    %c0_63 = arith.constant 0 : index
    %c1_64 = arith.constant 1 : index
    %c4_65 = arith.constant 4 : index
    %c0_66 = arith.constant 0 : index
    %55 = vector.load %arg1[%c0_63, %c1_64, %c4_65, %c0_66] : memref<1x12x12x64xbf16, #tpu.memory_space<vmem>>, vector<1x8x8x64xbf16>
    %56 = vector.shape_cast %55 : vector<1x8x8x64xbf16> to vector<64x64xbf16>
    %c9 = arith.constant 9 : index
    %c0_67 = arith.constant 0 : index
    %c0_68 = arith.constant 0 : index
    %57 = vector.load %arg2[%c9, %c0_67, %c0_68] : memref<25x64x64xbf16, #tpu.memory_space<vmem>>, vector<1x64x64xbf16>
    %58 = vector.shape_cast %57 : vector<1x64x64xbf16> to vector<64x64xbf16>
    %cst_69 = arith.constant dense<0.000000e+00> : vector<64x64xf32>
    %59 = tpu.matmul %56, %58, %cst_69 {dimension_numbers = #tpu.dot_dimension_numbers<[1], [0], [0], [1], [0, 0, 1, 1], [], []>} : vector<64x64xbf16>, vector<64x64xbf16>, vector<64x64xf32> -> vector<64x64xf32>
    %60 = arith.addf %54, %59 : vector<64x64xf32>
    %c0_70 = arith.constant 0 : index
    %c2_71 = arith.constant 2 : index
    %c0_72 = arith.constant 0 : index
    %c0_73 = arith.constant 0 : index
    %61 = vector.load %arg1[%c0_70, %c2_71, %c0_72, %c0_73] : memref<1x12x12x64xbf16, #tpu.memory_space<vmem>>, vector<1x8x8x64xbf16>
    %62 = vector.shape_cast %61 : vector<1x8x8x64xbf16> to vector<64x64xbf16>
    %c10 = arith.constant 10 : index
    %c0_74 = arith.constant 0 : index
    %c0_75 = arith.constant 0 : index
    %63 = vector.load %arg2[%c10, %c0_74, %c0_75] : memref<25x64x64xbf16, #tpu.memory_space<vmem>>, vector<1x64x64xbf16>
    %64 = vector.shape_cast %63 : vector<1x64x64xbf16> to vector<64x64xbf16>
    %cst_76 = arith.constant dense<0.000000e+00> : vector<64x64xf32>
    %65 = tpu.matmul %62, %64, %cst_76 {dimension_numbers = #tpu.dot_dimension_numbers<[1], [0], [0], [1], [0, 0, 1, 1], [], []>} : vector<64x64xbf16>, vector<64x64xbf16>, vector<64x64xf32> -> vector<64x64xf32>
    %66 = arith.addf %60, %65 : vector<64x64xf32>
    %c0_77 = arith.constant 0 : index
    %c2_78 = arith.constant 2 : index
    %c1_79 = arith.constant 1 : index
    %c0_80 = arith.constant 0 : index
    %67 = vector.load %arg1[%c0_77, %c2_78, %c1_79, %c0_80] : memref<1x12x12x64xbf16, #tpu.memory_space<vmem>>, vector<1x8x8x64xbf16>
    %68 = vector.shape_cast %67 : vector<1x8x8x64xbf16> to vector<64x64xbf16>
    %c11 = arith.constant 11 : index
    %c0_81 = arith.constant 0 : index
    %c0_82 = arith.constant 0 : index
    %69 = vector.load %arg2[%c11, %c0_81, %c0_82] : memref<25x64x64xbf16, #tpu.memory_space<vmem>>, vector<1x64x64xbf16>
    %70 = vector.shape_cast %69 : vector<1x64x64xbf16> to vector<64x64xbf16>
    %cst_83 = arith.constant dense<0.000000e+00> : vector<64x64xf32>
    %71 = tpu.matmul %68, %70, %cst_83 {dimension_numbers = #tpu.dot_dimension_numbers<[1], [0], [0], [1], [0, 0, 1, 1], [], []>} : vector<64x64xbf16>, vector<64x64xbf16>, vector<64x64xf32> -> vector<64x64xf32>
    %72 = arith.addf %66, %71 : vector<64x64xf32>
    %c0_84 = arith.constant 0 : index
    %c2_85 = arith.constant 2 : index
    %c2_86 = arith.constant 2 : index
    %c0_87 = arith.constant 0 : index
    %73 = vector.load %arg1[%c0_84, %c2_85, %c2_86, %c0_87] : memref<1x12x12x64xbf16, #tpu.memory_space<vmem>>, vector<1x8x8x64xbf16>
    %74 = vector.shape_cast %73 : vector<1x8x8x64xbf16> to vector<64x64xbf16>
    %c12 = arith.constant 12 : index
    %c0_88 = arith.constant 0 : index
    %c0_89 = arith.constant 0 : index
    %75 = vector.load %arg2[%c12, %c0_88, %c0_89] : memref<25x64x64xbf16, #tpu.memory_space<vmem>>, vector<1x64x64xbf16>
    %76 = vector.shape_cast %75 : vector<1x64x64xbf16> to vector<64x64xbf16>
    %cst_90 = arith.constant dense<0.000000e+00> : vector<64x64xf32>
    %77 = tpu.matmul %74, %76, %cst_90 {dimension_numbers = #tpu.dot_dimension_numbers<[1], [0], [0], [1], [0, 0, 1, 1], [], []>} : vector<64x64xbf16>, vector<64x64xbf16>, vector<64x64xf32> -> vector<64x64xf32>
    %78 = arith.addf %72, %77 : vector<64x64xf32>
    %c0_91 = arith.constant 0 : index
    %c2_92 = arith.constant 2 : index
    %c3_93 = arith.constant 3 : index
    %c0_94 = arith.constant 0 : index
    %79 = vector.load %arg1[%c0_91, %c2_92, %c3_93, %c0_94] : memref<1x12x12x64xbf16, #tpu.memory_space<vmem>>, vector<1x8x8x64xbf16>
    %80 = vector.shape_cast %79 : vector<1x8x8x64xbf16> to vector<64x64xbf16>
    %c13 = arith.constant 13 : index
    %c0_95 = arith.constant 0 : index
    %c0_96 = arith.constant 0 : index
    %81 = vector.load %arg2[%c13, %c0_95, %c0_96] : memref<25x64x64xbf16, #tpu.memory_space<vmem>>, vector<1x64x64xbf16>
    %82 = vector.shape_cast %81 : vector<1x64x64xbf16> to vector<64x64xbf16>
    %cst_97 = arith.constant dense<0.000000e+00> : vector<64x64xf32>
    %83 = tpu.matmul %80, %82, %cst_97 {dimension_numbers = #tpu.dot_dimension_numbers<[1], [0], [0], [1], [0, 0, 1, 1], [], []>} : vector<64x64xbf16>, vector<64x64xbf16>, vector<64x64xf32> -> vector<64x64xf32>
    %84 = arith.addf %78, %83 : vector<64x64xf32>
    %c0_98 = arith.constant 0 : index
    %c2_99 = arith.constant 2 : index
    %c4_100 = arith.constant 4 : index
    %c0_101 = arith.constant 0 : index
    %85 = vector.load %arg1[%c0_98, %c2_99, %c4_100, %c0_101] : memref<1x12x12x64xbf16, #tpu.memory_space<vmem>>, vector<1x8x8x64xbf16>
    %86 = vector.shape_cast %85 : vector<1x8x8x64xbf16> to vector<64x64xbf16>
    %c14 = arith.constant 14 : index
    %c0_102 = arith.constant 0 : index
    %c0_103 = arith.constant 0 : index
    %87 = vector.load %arg2[%c14, %c0_102, %c0_103] : memref<25x64x64xbf16, #tpu.memory_space<vmem>>, vector<1x64x64xbf16>
    %88 = vector.shape_cast %87 : vector<1x64x64xbf16> to vector<64x64xbf16>
    %cst_104 = arith.constant dense<0.000000e+00> : vector<64x64xf32>
    %89 = tpu.matmul %86, %88, %cst_104 {dimension_numbers = #tpu.dot_dimension_numbers<[1], [0], [0], [1], [0, 0, 1, 1], [], []>} : vector<64x64xbf16>, vector<64x64xbf16>, vector<64x64xf32> -> vector<64x64xf32>
    %90 = arith.addf %84, %89 : vector<64x64xf32>
    %c0_105 = arith.constant 0 : index
    %c3_106 = arith.constant 3 : index
    %c0_107 = arith.constant 0 : index
    %c0_108 = arith.constant 0 : index
    %91 = vector.load %arg1[%c0_105, %c3_106, %c0_107, %c0_108] : memref<1x12x12x64xbf16, #tpu.memory_space<vmem>>, vector<1x8x8x64xbf16>
    %92 = vector.shape_cast %91 : vector<1x8x8x64xbf16> to vector<64x64xbf16>
    %c15 = arith.constant 15 : index
    %c0_109 = arith.constant 0 : index
    %c0_110 = arith.constant 0 : index
    %93 = vector.load %arg2[%c15, %c0_109, %c0_110] : memref<25x64x64xbf16, #tpu.memory_space<vmem>>, vector<1x64x64xbf16>
    %94 = vector.shape_cast %93 : vector<1x64x64xbf16> to vector<64x64xbf16>
    %cst_111 = arith.constant dense<0.000000e+00> : vector<64x64xf32>
    %95 = tpu.matmul %92, %94, %cst_111 {dimension_numbers = #tpu.dot_dimension_numbers<[1], [0], [0], [1], [0, 0, 1, 1], [], []>} : vector<64x64xbf16>, vector<64x64xbf16>, vector<64x64xf32> -> vector<64x64xf32>
    %96 = arith.addf %90, %95 : vector<64x64xf32>
    %c0_112 = arith.constant 0 : index
    %c3_113 = arith.constant 3 : index
    %c1_114 = arith.constant 1 : index
    %c0_115 = arith.constant 0 : index
    %97 = vector.load %arg1[%c0_112, %c3_113, %c1_114, %c0_115] : memref<1x12x12x64xbf16, #tpu.memory_space<vmem>>, vector<1x8x8x64xbf16>
    %98 = vector.shape_cast %97 : vector<1x8x8x64xbf16> to vector<64x64xbf16>
    %c16 = arith.constant 16 : index
    %c0_116 = arith.constant 0 : index
    %c0_117 = arith.constant 0 : index
    %99 = vector.load %arg2[%c16, %c0_116, %c0_117] : memref<25x64x64xbf16, #tpu.memory_space<vmem>>, vector<1x64x64xbf16>
    %100 = vector.shape_cast %99 : vector<1x64x64xbf16> to vector<64x64xbf16>
    %cst_118 = arith.constant dense<0.000000e+00> : vector<64x64xf32>
    %101 = tpu.matmul %98, %100, %cst_118 {dimension_numbers = #tpu.dot_dimension_numbers<[1], [0], [0], [1], [0, 0, 1, 1], [], []>} : vector<64x64xbf16>, vector<64x64xbf16>, vector<64x64xf32> -> vector<64x64xf32>
    %102 = arith.addf %96, %101 : vector<64x64xf32>
    %c0_119 = arith.constant 0 : index
    %c3_120 = arith.constant 3 : index
    %c2_121 = arith.constant 2 : index
    %c0_122 = arith.constant 0 : index
    %103 = vector.load %arg1[%c0_119, %c3_120, %c2_121, %c0_122] : memref<1x12x12x64xbf16, #tpu.memory_space<vmem>>, vector<1x8x8x64xbf16>
    %104 = vector.shape_cast %103 : vector<1x8x8x64xbf16> to vector<64x64xbf16>
    %c17 = arith.constant 17 : index
    %c0_123 = arith.constant 0 : index
    %c0_124 = arith.constant 0 : index
    %105 = vector.load %arg2[%c17, %c0_123, %c0_124] : memref<25x64x64xbf16, #tpu.memory_space<vmem>>, vector<1x64x64xbf16>
    %106 = vector.shape_cast %105 : vector<1x64x64xbf16> to vector<64x64xbf16>
    %cst_125 = arith.constant dense<0.000000e+00> : vector<64x64xf32>
    %107 = tpu.matmul %104, %106, %cst_125 {dimension_numbers = #tpu.dot_dimension_numbers<[1], [0], [0], [1], [0, 0, 1, 1], [], []>} : vector<64x64xbf16>, vector<64x64xbf16>, vector<64x64xf32> -> vector<64x64xf32>
    %108 = arith.addf %102, %107 : vector<64x64xf32>
    %c0_126 = arith.constant 0 : index
    %c3_127 = arith.constant 3 : index
    %c3_128 = arith.constant 3 : index
    %c0_129 = arith.constant 0 : index
    %109 = vector.load %arg1[%c0_126, %c3_127, %c3_128, %c0_129] : memref<1x12x12x64xbf16, #tpu.memory_space<vmem>>, vector<1x8x8x64xbf16>
    %110 = vector.shape_cast %109 : vector<1x8x8x64xbf16> to vector<64x64xbf16>
    %c18 = arith.constant 18 : index
    %c0_130 = arith.constant 0 : index
    %c0_131 = arith.constant 0 : index
    %111 = vector.load %arg2[%c18, %c0_130, %c0_131] : memref<25x64x64xbf16, #tpu.memory_space<vmem>>, vector<1x64x64xbf16>
    %112 = vector.shape_cast %111 : vector<1x64x64xbf16> to vector<64x64xbf16>
    %cst_132 = arith.constant dense<0.000000e+00> : vector<64x64xf32>
    %113 = tpu.matmul %110, %112, %cst_132 {dimension_numbers = #tpu.dot_dimension_numbers<[1], [0], [0], [1], [0, 0, 1, 1], [], []>} : vector<64x64xbf16>, vector<64x64xbf16>, vector<64x64xf32> -> vector<64x64xf32>
    %114 = arith.addf %108, %113 : vector<64x64xf32>
    %c0_133 = arith.constant 0 : index
    %c3_134 = arith.constant 3 : index
    %c4_135 = arith.constant 4 : index
    %c0_136 = arith.constant 0 : index
    %115 = vector.load %arg1[%c0_133, %c3_134, %c4_135, %c0_136] : memref<1x12x12x64xbf16, #tpu.memory_space<vmem>>, vector<1x8x8x64xbf16>
    %116 = vector.shape_cast %115 : vector<1x8x8x64xbf16> to vector<64x64xbf16>
    %c19 = arith.constant 19 : index
    %c0_137 = arith.constant 0 : index
    %c0_138 = arith.constant 0 : index
    %117 = vector.load %arg2[%c19, %c0_137, %c0_138] : memref<25x64x64xbf16, #tpu.memory_space<vmem>>, vector<1x64x64xbf16>
    %118 = vector.shape_cast %117 : vector<1x64x64xbf16> to vector<64x64xbf16>
    %cst_139 = arith.constant dense<0.000000e+00> : vector<64x64xf32>
    %119 = tpu.matmul %116, %118, %cst_139 {dimension_numbers = #tpu.dot_dimension_numbers<[1], [0], [0], [1], [0, 0, 1, 1], [], []>} : vector<64x64xbf16>, vector<64x64xbf16>, vector<64x64xf32> -> vector<64x64xf32>
    %120 = arith.addf %114, %119 : vector<64x64xf32>
    %c0_140 = arith.constant 0 : index
    %c4_141 = arith.constant 4 : index
    %c0_142 = arith.constant 0 : index
    %c0_143 = arith.constant 0 : index
    %121 = vector.load %arg1[%c0_140, %c4_141, %c0_142, %c0_143] : memref<1x12x12x64xbf16, #tpu.memory_space<vmem>>, vector<1x8x8x64xbf16>
    %122 = vector.shape_cast %121 : vector<1x8x8x64xbf16> to vector<64x64xbf16>
    %c20 = arith.constant 20 : index
    %c0_144 = arith.constant 0 : index
    %c0_145 = arith.constant 0 : index
    %123 = vector.load %arg2[%c20, %c0_144, %c0_145] : memref<25x64x64xbf16, #tpu.memory_space<vmem>>, vector<1x64x64xbf16>
    %124 = vector.shape_cast %123 : vector<1x64x64xbf16> to vector<64x64xbf16>
    %cst_146 = arith.constant dense<0.000000e+00> : vector<64x64xf32>
    %125 = tpu.matmul %122, %124, %cst_146 {dimension_numbers = #tpu.dot_dimension_numbers<[1], [0], [0], [1], [0, 0, 1, 1], [], []>} : vector<64x64xbf16>, vector<64x64xbf16>, vector<64x64xf32> -> vector<64x64xf32>
    %126 = arith.addf %120, %125 : vector<64x64xf32>
    %c0_147 = arith.constant 0 : index
    %c4_148 = arith.constant 4 : index
    %c1_149 = arith.constant 1 : index
    %c0_150 = arith.constant 0 : index
    %127 = vector.load %arg1[%c0_147, %c4_148, %c1_149, %c0_150] : memref<1x12x12x64xbf16, #tpu.memory_space<vmem>>, vector<1x8x8x64xbf16>
    %128 = vector.shape_cast %127 : vector<1x8x8x64xbf16> to vector<64x64xbf16>
    %c21 = arith.constant 21 : index
    %c0_151 = arith.constant 0 : index
    %c0_152 = arith.constant 0 : index
    %129 = vector.load %arg2[%c21, %c0_151, %c0_152] : memref<25x64x64xbf16, #tpu.memory_space<vmem>>, vector<1x64x64xbf16>
    %130 = vector.shape_cast %129 : vector<1x64x64xbf16> to vector<64x64xbf16>
    %cst_153 = arith.constant dense<0.000000e+00> : vector<64x64xf32>
    %131 = tpu.matmul %128, %130, %cst_153 {dimension_numbers = #tpu.dot_dimension_numbers<[1], [0], [0], [1], [0, 0, 1, 1], [], []>} : vector<64x64xbf16>, vector<64x64xbf16>, vector<64x64xf32> -> vector<64x64xf32>
    %132 = arith.addf %126, %131 : vector<64x64xf32>
    %c0_154 = arith.constant 0 : index
    %c4_155 = arith.constant 4 : index
    %c2_156 = arith.constant 2 : index
    %c0_157 = arith.constant 0 : index
    %133 = vector.load %arg1[%c0_154, %c4_155, %c2_156, %c0_157] : memref<1x12x12x64xbf16, #tpu.memory_space<vmem>>, vector<1x8x8x64xbf16>
    %134 = vector.shape_cast %133 : vector<1x8x8x64xbf16> to vector<64x64xbf16>
    %c22 = arith.constant 22 : index
    %c0_158 = arith.constant 0 : index
    %c0_159 = arith.constant 0 : index
    %135 = vector.load %arg2[%c22, %c0_158, %c0_159] : memref<25x64x64xbf16, #tpu.memory_space<vmem>>, vector<1x64x64xbf16>
    %136 = vector.shape_cast %135 : vector<1x64x64xbf16> to vector<64x64xbf16>
    %cst_160 = arith.constant dense<0.000000e+00> : vector<64x64xf32>
    %137 = tpu.matmul %134, %136, %cst_160 {dimension_numbers = #tpu.dot_dimension_numbers<[1], [0], [0], [1], [0, 0, 1, 1], [], []>} : vector<64x64xbf16>, vector<64x64xbf16>, vector<64x64xf32> -> vector<64x64xf32>
    %138 = arith.addf %132, %137 : vector<64x64xf32>
    %c0_161 = arith.constant 0 : index
    %c4_162 = arith.constant 4 : index
    %c3_163 = arith.constant 3 : index
    %c0_164 = arith.constant 0 : index
    %139 = vector.load %arg1[%c0_161, %c4_162, %c3_163, %c0_164] : memref<1x12x12x64xbf16, #tpu.memory_space<vmem>>, vector<1x8x8x64xbf16>
    %140 = vector.shape_cast %139 : vector<1x8x8x64xbf16> to vector<64x64xbf16>
    %c23 = arith.constant 23 : index
    %c0_165 = arith.constant 0 : index
    %c0_166 = arith.constant 0 : index
    %141 = vector.load %arg2[%c23, %c0_165, %c0_166] : memref<25x64x64xbf16, #tpu.memory_space<vmem>>, vector<1x64x64xbf16>
    %142 = vector.shape_cast %141 : vector<1x64x64xbf16> to vector<64x64xbf16>
    %cst_167 = arith.constant dense<0.000000e+00> : vector<64x64xf32>
    %143 = tpu.matmul %140, %142, %cst_167 {dimension_numbers = #tpu.dot_dimension_numbers<[1], [0], [0], [1], [0, 0, 1, 1], [], []>} : vector<64x64xbf16>, vector<64x64xbf16>, vector<64x64xf32> -> vector<64x64xf32>
    %144 = arith.addf %138, %143 : vector<64x64xf32>
    %c0_168 = arith.constant 0 : index
    %c4_169 = arith.constant 4 : index
    %c4_170 = arith.constant 4 : index
    %c0_171 = arith.constant 0 : index
    %145 = vector.load %arg1[%c0_168, %c4_169, %c4_170, %c0_171] : memref<1x12x12x64xbf16, #tpu.memory_space<vmem>>, vector<1x8x8x64xbf16>
    %146 = vector.shape_cast %145 : vector<1x8x8x64xbf16> to vector<64x64xbf16>
    %c24 = arith.constant 24 : index
    %c0_172 = arith.constant 0 : index
    %c0_173 = arith.constant 0 : index
    %147 = vector.load %arg2[%c24, %c0_172, %c0_173] : memref<25x64x64xbf16, #tpu.memory_space<vmem>>, vector<1x64x64xbf16>
    %148 = vector.shape_cast %147 : vector<1x64x64xbf16> to vector<64x64xbf16>
    %cst_174 = arith.constant dense<0.000000e+00> : vector<64x64xf32>
    %149 = tpu.matmul %146, %148, %cst_174 {dimension_numbers = #tpu.dot_dimension_numbers<[1], [0], [0], [1], [0, 0, 1, 1], [], []>} : vector<64x64xbf16>, vector<64x64xbf16>, vector<64x64xf32> -> vector<64x64xf32>
    %150 = arith.addf %144, %149 : vector<64x64xf32>
    %c0_175 = arith.constant 0 : index
    %c0_176 = arith.constant 0 : index
    %151 = vector.load %arg3[%c0_175, %c0_176] : memref<1x64xf32, #tpu.memory_space<vmem>>, vector<1x64xf32>
    %152 = vector.broadcast %151 : vector<1x64xf32> to vector<64x64xf32>
    %153 = arith.mulf %150, %152 : vector<64x64xf32>
    %c0_177 = arith.constant 0 : index
    %c0_178 = arith.constant 0 : index
    %154 = vector.load %arg4[%c0_177, %c0_178] : memref<1x64xf32, #tpu.memory_space<vmem>>, vector<1x64xf32>
    %155 = vector.broadcast %154 : vector<1x64xf32> to vector<64x64xf32>
    %156 = arith.addf %153, %155 : vector<64x64xf32>
    %157 = vector.shape_cast %156 : vector<64x64xf32> to vector<4x2x8x64xf32>
    %158 = vector.extract_strided_slice %157 {offsets = [0, 0, 0, 0], sizes = [4, 1, 8, 64], strides = [1, 1, 1, 1]} : vector<4x2x8x64xf32> to vector<4x1x8x64xf32>
    %159 = vector.shape_cast %158 : vector<4x1x8x64xf32> to vector<4x8x64xf32>
    %160 = vector.extract_strided_slice %157 {offsets = [0, 1, 0, 0], sizes = [4, 1, 8, 64], strides = [1, 1, 1, 1]} : vector<4x2x8x64xf32> to vector<4x1x8x64xf32>
    %161 = vector.shape_cast %160 : vector<4x1x8x64xf32> to vector<4x8x64xf32>
    %162 = arith.maximumf %159, %161 : vector<4x8x64xf32>
    %c0_179 = arith.constant 0 : index
    %c0_180 = arith.constant 0 : index
    %c0_181 = arith.constant 0 : index
    %163 = vector.load %arg21[%c0_179, %c0_180, %c0_181] : memref<4x8x64xf32, #tpu.memory_space<vmem>>, vector<4x8x64xf32>
    tpu.vector_store %arg21[%c0_179, %c0_180, %c0_181], %162 {strides = array<i32>} : memref<4x8x64xf32, #tpu.memory_space<vmem>>, vector<4x8x64xf32>,
    %c0_182 = arith.constant 0 : index
    %c0_183 = arith.constant 0 : index
    %c0_184 = arith.constant 0 : index
    %164 = tpu.strided_load %arg21[%c0_182, %c0_183, %c0_184] {strides = array<i32: 1, 2, 1>} : memref<4x8x64xf32, #tpu.memory_space<vmem>>, vector<4x4x64xf32>
    %c0_185 = arith.constant 0 : index
    %c1_186 = arith.constant 1 : index
    %c0_187 = arith.constant 0 : index
    %165 = tpu.strided_load %arg21[%c0_185, %c1_186, %c0_187] {strides = array<i32: 1, 2, 1>} : memref<4x8x64xf32, #tpu.memory_space<vmem>>, vector<4x4x64xf32>
    %166 = arith.maximumf %164, %165 : vector<4x4x64xf32>
    %cst_188 = arith.constant 0.000000e+00 : f32
    %167 = vector.broadcast %cst_188 : f32 to vector<4x4x64xf32>
    %168 = arith.maximumf %166, %167 : vector<4x4x64xf32>
    %169 = vector.shape_cast %168 : vector<4x4x64xf32> to vector<1x4x4x64xf32>
    %c0_189 = arith.constant 0 : index
    %c0_190 = arith.constant 0 : index
    %c0_191 = arith.constant 0 : index
    %c0_192 = arith.constant 0 : index
    %170 = vector.load %arg20[%c0_189, %c0_190, %c0_191, %c0_192] : memref<1x4x4x64xf32, #tpu.memory_space<vmem>>, vector<1x4x4x64xf32>
    tpu.vector_store %arg20[%c0_189, %c0_190, %c0_191, %c0_192], %169 {strides = array<i32>} : memref<1x4x4x64xf32, #tpu.memory_space<vmem>>, vector<1x4x4x64xf32>,
    %cst_193 = arith.constant 0.000000e+00 : f32
    %171 = vector.broadcast %cst_193 : f32 to vector<1x128xf32>
    %cst_194 = arith.constant 0.000000e+00 : f32
    %172 = vector.broadcast %cst_194 : f32 to vector<1x128xf32>
    %c0_195 = arith.constant 0 : index
    %c0_196 = arith.constant 0 : index
    %c0_197 = arith.constant 0 : index
    %c0_198 = arith.constant 0 : index
    %173 = vector.load %arg20[%c0_195, %c0_196, %c0_197, %c0_198] : memref<1x4x4x64xf32, #tpu.memory_space<vmem>>, vector<1x1x1x64xf32>
    %174 = vector.shape_cast %173 : vector<1x1x1x64xf32> to vector<1x64xf32>
    %175 = arith.truncf %174 : vector<1x64xf32> to vector<1x64xbf16>
    %c0_199 = arith.constant 0 : index
    %c0_200 = arith.constant 0 : index
    %176 = vector.load %arg5[%c0_199, %c0_200] : memref<1024x128xbf16, #tpu.memory_space<vmem>>, vector<64x128xbf16>
    %cst_201 = arith.constant dense<0.000000e+00> : vector<1x128xf32>
    %177 = tpu.matmul %175, %176, %cst_201 {dimension_numbers = #tpu.dot_dimension_numbers<[1], [0], [0], [1], [0, 0, 1, 1], [], []>} : vector<1x64xbf16>, vector<64x128xbf16>, vector<1x128xf32> -> vector<1x128xf32>
    %178 = arith.addf %171, %177 : vector<1x128xf32>
    %c0_202 = arith.constant 0 : index
    %c0_203 = arith.constant 0 : index
    %179 = vector.load %arg13[%c0_202, %c0_203] : memref<1024x128xbf16, #tpu.memory_space<vmem>>, vector<64x128xbf16>
    %cst_204 = arith.constant dense<0.000000e+00> : vector<1x128xf32>
    %180 = tpu.matmul %175, %179, %cst_204 {dimension_numbers = #tpu.dot_dimension_numbers<[1], [0], [0], [1], [0, 0, 1, 1], [], []>} : vector<1x64xbf16>, vector<64x128xbf16>, vector<1x128xf32> -> vector<1x128xf32>
    %181 = arith.addf %172, %180 : vector<1x128xf32>
    %c0_205 = arith.constant 0 : index
    %c0_206 = arith.constant 0 : index
    %c1_207 = arith.constant 1 : index
    %c0_208 = arith.constant 0 : index
    %182 = vector.load %arg20[%c0_205, %c0_206, %c1_207, %c0_208] : memref<1x4x4x64xf32, #tpu.memory_space<vmem>>, vector<1x1x1x64xf32>
    %183 = vector.shape_cast %182 : vector<1x1x1x64xf32> to vector<1x64xf32>
    %184 = arith.truncf %183 : vector<1x64xf32> to vector<1x64xbf16>
    %c64 = arith.constant 64 : index
    %c0_209 = arith.constant 0 : index
    %185 = vector.load %arg5[%c64, %c0_209] : memref<1024x128xbf16, #tpu.memory_space<vmem>>, vector<64x128xbf16>
    %cst_210 = arith.constant dense<0.000000e+00> : vector<1x128xf32>
    %186 = tpu.matmul %184, %185, %cst_210 {dimension_numbers = #tpu.dot_dimension_numbers<[1], [0], [0], [1], [0, 0, 1, 1], [], []>} : vector<1x64xbf16>, vector<64x128xbf16>, vector<1x128xf32> -> vector<1x128xf32>
    %187 = arith.addf %178, %186 : vector<1x128xf32>
    %c64_211 = arith.constant 64 : index
    %c0_212 = arith.constant 0 : index
    %188 = vector.load %arg13[%c64_211, %c0_212] : memref<1024x128xbf16, #tpu.memory_space<vmem>>, vector<64x128xbf16>
    %cst_213 = arith.constant dense<0.000000e+00> : vector<1x128xf32>
    %189 = tpu.matmul %184, %188, %cst_213 {dimension_numbers = #tpu.dot_dimension_numbers<[1], [0], [0], [1], [0, 0, 1, 1], [], []>} : vector<1x64xbf16>, vector<64x128xbf16>, vector<1x128xf32> -> vector<1x128xf32>
    %190 = arith.addf %181, %189 : vector<1x128xf32>
    %c0_214 = arith.constant 0 : index
    %c0_215 = arith.constant 0 : index
    %c2_216 = arith.constant 2 : index
    %c0_217 = arith.constant 0 : index
    %191 = vector.load %arg20[%c0_214, %c0_215, %c2_216, %c0_217] : memref<1x4x4x64xf32, #tpu.memory_space<vmem>>, vector<1x1x1x64xf32>
    %192 = vector.shape_cast %191 : vector<1x1x1x64xf32> to vector<1x64xf32>
    %193 = arith.truncf %192 : vector<1x64xf32> to vector<1x64xbf16>
    %c128 = arith.constant 128 : index
    %c0_218 = arith.constant 0 : index
    %194 = vector.load %arg5[%c128, %c0_218] : memref<1024x128xbf16, #tpu.memory_space<vmem>>, vector<64x128xbf16>
    %cst_219 = arith.constant dense<0.000000e+00> : vector<1x128xf32>
    %195 = tpu.matmul %193, %194, %cst_219 {dimension_numbers = #tpu.dot_dimension_numbers<[1], [0], [0], [1], [0, 0, 1, 1], [], []>} : vector<1x64xbf16>, vector<64x128xbf16>, vector<1x128xf32> -> vector<1x128xf32>
    %196 = arith.addf %187, %195 : vector<1x128xf32>
    %c128_220 = arith.constant 128 : index
    %c0_221 = arith.constant 0 : index
    %197 = vector.load %arg13[%c128_220, %c0_221] : memref<1024x128xbf16, #tpu.memory_space<vmem>>, vector<64x128xbf16>
    %cst_222 = arith.constant dense<0.000000e+00> : vector<1x128xf32>
    %198 = tpu.matmul %193, %197, %cst_222 {dimension_numbers = #tpu.dot_dimension_numbers<[1], [0], [0], [1], [0, 0, 1, 1], [], []>} : vector<1x64xbf16>, vector<64x128xbf16>, vector<1x128xf32> -> vector<1x128xf32>
    %199 = arith.addf %190, %198 : vector<1x128xf32>
    %c0_223 = arith.constant 0 : index
    %c0_224 = arith.constant 0 : index
    %c3_225 = arith.constant 3 : index
    %c0_226 = arith.constant 0 : index
    %200 = vector.load %arg20[%c0_223, %c0_224, %c3_225, %c0_226] : memref<1x4x4x64xf32, #tpu.memory_space<vmem>>, vector<1x1x1x64xf32>
    %201 = vector.shape_cast %200 : vector<1x1x1x64xf32> to vector<1x64xf32>
    %202 = arith.truncf %201 : vector<1x64xf32> to vector<1x64xbf16>
    %c192 = arith.constant 192 : index
    %c0_227 = arith.constant 0 : index
    %203 = vector.load %arg5[%c192, %c0_227] : memref<1024x128xbf16, #tpu.memory_space<vmem>>, vector<64x128xbf16>
    %cst_228 = arith.constant dense<0.000000e+00> : vector<1x128xf32>
    %204 = tpu.matmul %202, %203, %cst_228 {dimension_numbers = #tpu.dot_dimension_numbers<[1], [0], [0], [1], [0, 0, 1, 1], [], []>} : vector<1x64xbf16>, vector<64x128xbf16>, vector<1x128xf32> -> vector<1x128xf32>
    %205 = arith.addf %196, %204 : vector<1x128xf32>
    %c192_229 = arith.constant 192 : index
    %c0_230 = arith.constant 0 : index
    %206 = vector.load %arg13[%c192_229, %c0_230] : memref<1024x128xbf16, #tpu.memory_space<vmem>>, vector<64x128xbf16>
    %cst_231 = arith.constant dense<0.000000e+00> : vector<1x128xf32>
    %207 = tpu.matmul %202, %206, %cst_231 {dimension_numbers = #tpu.dot_dimension_numbers<[1], [0], [0], [1], [0, 0, 1, 1], [], []>} : vector<1x64xbf16>, vector<64x128xbf16>, vector<1x128xf32> -> vector<1x128xf32>
    %208 = arith.addf %199, %207 : vector<1x128xf32>
    %c0_232 = arith.constant 0 : index
    %c1_233 = arith.constant 1 : index
    %c0_234 = arith.constant 0 : index
    %c0_235 = arith.constant 0 : index
    %209 = vector.load %arg20[%c0_232, %c1_233, %c0_234, %c0_235] : memref<1x4x4x64xf32, #tpu.memory_space<vmem>>, vector<1x1x1x64xf32>
    %210 = vector.shape_cast %209 : vector<1x1x1x64xf32> to vector<1x64xf32>
    %211 = arith.truncf %210 : vector<1x64xf32> to vector<1x64xbf16>
    %c256 = arith.constant 256 : index
    %c0_236 = arith.constant 0 : index
    %212 = vector.load %arg5[%c256, %c0_236] : memref<1024x128xbf16, #tpu.memory_space<vmem>>, vector<64x128xbf16>
    %cst_237 = arith.constant dense<0.000000e+00> : vector<1x128xf32>
    %213 = tpu.matmul %211, %212, %cst_237 {dimension_numbers = #tpu.dot_dimension_numbers<[1], [0], [0], [1], [0, 0, 1, 1], [], []>} : vector<1x64xbf16>, vector<64x128xbf16>, vector<1x128xf32> -> vector<1x128xf32>
    %214 = arith.addf %205, %213 : vector<1x128xf32>
    %c256_238 = arith.constant 256 : index
    %c0_239 = arith.constant 0 : index
    %215 = vector.load %arg13[%c256_238, %c0_239] : memref<1024x128xbf16, #tpu.memory_space<vmem>>, vector<64x128xbf16>
    %cst_240 = arith.constant dense<0.000000e+00> : vector<1x128xf32>
    %216 = tpu.matmul %211, %215, %cst_240 {dimension_numbers = #tpu.dot_dimension_numbers<[1], [0], [0], [1], [0, 0, 1, 1], [], []>} : vector<1x64xbf16>, vector<64x128xbf16>, vector<1x128xf32> -> vector<1x128xf32>
    %217 = arith.addf %208, %216 : vector<1x128xf32>
    %c0_241 = arith.constant 0 : index
    %c1_242 = arith.constant 1 : index
    %c1_243 = arith.constant 1 : index
    %c0_244 = arith.constant 0 : index
    %218 = vector.load %arg20[%c0_241, %c1_242, %c1_243, %c0_244] : memref<1x4x4x64xf32, #tpu.memory_space<vmem>>, vector<1x1x1x64xf32>
    %219 = vector.shape_cast %218 : vector<1x1x1x64xf32> to vector<1x64xf32>
    %220 = arith.truncf %219 : vector<1x64xf32> to vector<1x64xbf16>
    %c320 = arith.constant 320 : index
    %c0_245 = arith.constant 0 : index
    %221 = vector.load %arg5[%c320, %c0_245] : memref<1024x128xbf16, #tpu.memory_space<vmem>>, vector<64x128xbf16>
    %cst_246 = arith.constant dense<0.000000e+00> : vector<1x128xf32>
    %222 = tpu.matmul %220, %221, %cst_246 {dimension_numbers = #tpu.dot_dimension_numbers<[1], [0], [0], [1], [0, 0, 1, 1], [], []>} : vector<1x64xbf16>, vector<64x128xbf16>, vector<1x128xf32> -> vector<1x128xf32>
    %223 = arith.addf %214, %222 : vector<1x128xf32>
    %c320_247 = arith.constant 320 : index
    %c0_248 = arith.constant 0 : index
    %224 = vector.load %arg13[%c320_247, %c0_248] : memref<1024x128xbf16, #tpu.memory_space<vmem>>, vector<64x128xbf16>
    %cst_249 = arith.constant dense<0.000000e+00> : vector<1x128xf32>
    %225 = tpu.matmul %220, %224, %cst_249 {dimension_numbers = #tpu.dot_dimension_numbers<[1], [0], [0], [1], [0, 0, 1, 1], [], []>} : vector<1x64xbf16>, vector<64x128xbf16>, vector<1x128xf32> -> vector<1x128xf32>
    %226 = arith.addf %217, %225 : vector<1x128xf32>
    %c0_250 = arith.constant 0 : index
    %c1_251 = arith.constant 1 : index
    %c2_252 = arith.constant 2 : index
    %c0_253 = arith.constant 0 : index
    %227 = vector.load %arg20[%c0_250, %c1_251, %c2_252, %c0_253] : memref<1x4x4x64xf32, #tpu.memory_space<vmem>>, vector<1x1x1x64xf32>
    %228 = vector.shape_cast %227 : vector<1x1x1x64xf32> to vector<1x64xf32>
    %229 = arith.truncf %228 : vector<1x64xf32> to vector<1x64xbf16>
    %c384 = arith.constant 384 : index
    %c0_254 = arith.constant 0 : index
    %230 = vector.load %arg5[%c384, %c0_254] : memref<1024x128xbf16, #tpu.memory_space<vmem>>, vector<64x128xbf16>
    %cst_255 = arith.constant dense<0.000000e+00> : vector<1x128xf32>
    %231 = tpu.matmul %229, %230, %cst_255 {dimension_numbers = #tpu.dot_dimension_numbers<[1], [0], [0], [1], [0, 0, 1, 1], [], []>} : vector<1x64xbf16>, vector<64x128xbf16>, vector<1x128xf32> -> vector<1x128xf32>
    %232 = arith.addf %223, %231 : vector<1x128xf32>
    %c384_256 = arith.constant 384 : index
    %c0_257 = arith.constant 0 : index
    %233 = vector.load %arg13[%c384_256, %c0_257] : memref<1024x128xbf16, #tpu.memory_space<vmem>>, vector<64x128xbf16>
    %cst_258 = arith.constant dense<0.000000e+00> : vector<1x128xf32>
    %234 = tpu.matmul %229, %233, %cst_258 {dimension_numbers = #tpu.dot_dimension_numbers<[1], [0], [0], [1], [0, 0, 1, 1], [], []>} : vector<1x64xbf16>, vector<64x128xbf16>, vector<1x128xf32> -> vector<1x128xf32>
    %235 = arith.addf %226, %234 : vector<1x128xf32>
    %c0_259 = arith.constant 0 : index
    %c1_260 = arith.constant 1 : index
    %c3_261 = arith.constant 3 : index
    %c0_262 = arith.constant 0 : index
    %236 = vector.load %arg20[%c0_259, %c1_260, %c3_261, %c0_262] : memref<1x4x4x64xf32, #tpu.memory_space<vmem>>, vector<1x1x1x64xf32>
    %237 = vector.shape_cast %236 : vector<1x1x1x64xf32> to vector<1x64xf32>
    %238 = arith.truncf %237 : vector<1x64xf32> to vector<1x64xbf16>
    %c448 = arith.constant 448 : index
    %c0_263 = arith.constant 0 : index
    %239 = vector.load %arg5[%c448, %c0_263] : memref<1024x128xbf16, #tpu.memory_space<vmem>>, vector<64x128xbf16>
    %cst_264 = arith.constant dense<0.000000e+00> : vector<1x128xf32>
    %240 = tpu.matmul %238, %239, %cst_264 {dimension_numbers = #tpu.dot_dimension_numbers<[1], [0], [0], [1], [0, 0, 1, 1], [], []>} : vector<1x64xbf16>, vector<64x128xbf16>, vector<1x128xf32> -> vector<1x128xf32>
    %241 = arith.addf %232, %240 : vector<1x128xf32>
    %c448_265 = arith.constant 448 : index
    %c0_266 = arith.constant 0 : index
    %242 = vector.load %arg13[%c448_265, %c0_266] : memref<1024x128xbf16, #tpu.memory_space<vmem>>, vector<64x128xbf16>
    %cst_267 = arith.constant dense<0.000000e+00> : vector<1x128xf32>
    %243 = tpu.matmul %238, %242, %cst_267 {dimension_numbers = #tpu.dot_dimension_numbers<[1], [0], [0], [1], [0, 0, 1, 1], [], []>} : vector<1x64xbf16>, vector<64x128xbf16>, vector<1x128xf32> -> vector<1x128xf32>
    %244 = arith.addf %235, %243 : vector<1x128xf32>
    %c0_268 = arith.constant 0 : index
    %c2_269 = arith.constant 2 : index
    %c0_270 = arith.constant 0 : index
    %c0_271 = arith.constant 0 : index
    %245 = vector.load %arg20[%c0_268, %c2_269, %c0_270, %c0_271] : memref<1x4x4x64xf32, #tpu.memory_space<vmem>>, vector<1x1x1x64xf32>
    %246 = vector.shape_cast %245 : vector<1x1x1x64xf32> to vector<1x64xf32>
    %247 = arith.truncf %246 : vector<1x64xf32> to vector<1x64xbf16>
    %c512 = arith.constant 512 : index
    %c0_272 = arith.constant 0 : index
    %248 = vector.load %arg5[%c512, %c0_272] : memref<1024x128xbf16, #tpu.memory_space<vmem>>, vector<64x128xbf16>
    %cst_273 = arith.constant dense<0.000000e+00> : vector<1x128xf32>
    %249 = tpu.matmul %247, %248, %cst_273 {dimension_numbers = #tpu.dot_dimension_numbers<[1], [0], [0], [1], [0, 0, 1, 1], [], []>} : vector<1x64xbf16>, vector<64x128xbf16>, vector<1x128xf32> -> vector<1x128xf32>
    %250 = arith.addf %241, %249 : vector<1x128xf32>
    %c512_274 = arith.constant 512 : index
    %c0_275 = arith.constant 0 : index
    %251 = vector.load %arg13[%c512_274, %c0_275] : memref<1024x128xbf16, #tpu.memory_space<vmem>>, vector<64x128xbf16>
    %cst_276 = arith.constant dense<0.000000e+00> : vector<1x128xf32>
    %252 = tpu.matmul %247, %251, %cst_276 {dimension_numbers = #tpu.dot_dimension_numbers<[1], [0], [0], [1], [0, 0, 1, 1], [], []>} : vector<1x64xbf16>, vector<64x128xbf16>, vector<1x128xf32> -> vector<1x128xf32>
    %253 = arith.addf %244, %252 : vector<1x128xf32>
    %c0_277 = arith.constant 0 : index
    %c2_278 = arith.constant 2 : index
    %c1_279 = arith.constant 1 : index
    %c0_280 = arith.constant 0 : index
    %254 = vector.load %arg20[%c0_277, %c2_278, %c1_279, %c0_280] : memref<1x4x4x64xf32, #tpu.memory_space<vmem>>, vector<1x1x1x64xf32>
    %255 = vector.shape_cast %254 : vector<1x1x1x64xf32> to vector<1x64xf32>
    %256 = arith.truncf %255 : vector<1x64xf32> to vector<1x64xbf16>
    %c576 = arith.constant 576 : index
    %c0_281 = arith.constant 0 : index
    %257 = vector.load %arg5[%c576, %c0_281] : memref<1024x128xbf16, #tpu.memory_space<vmem>>, vector<64x128xbf16>
    %cst_282 = arith.constant dense<0.000000e+00> : vector<1x128xf32>
    %258 = tpu.matmul %256, %257, %cst_282 {dimension_numbers = #tpu.dot_dimension_numbers<[1], [0], [0], [1], [0, 0, 1, 1], [], []>} : vector<1x64xbf16>, vector<64x128xbf16>, vector<1x128xf32> -> vector<1x128xf32>
    %259 = arith.addf %250, %258 : vector<1x128xf32>
    %c576_283 = arith.constant 576 : index
    %c0_284 = arith.constant 0 : index
    %260 = vector.load %arg13[%c576_283, %c0_284] : memref<1024x128xbf16, #tpu.memory_space<vmem>>, vector<64x128xbf16>
    %cst_285 = arith.constant dense<0.000000e+00> : vector<1x128xf32>
    %261 = tpu.matmul %256, %260, %cst_285 {dimension_numbers = #tpu.dot_dimension_numbers<[1], [0], [0], [1], [0, 0, 1, 1], [], []>} : vector<1x64xbf16>, vector<64x128xbf16>, vector<1x128xf32> -> vector<1x128xf32>
    %262 = arith.addf %253, %261 : vector<1x128xf32>
    %c0_286 = arith.constant 0 : index
    %c2_287 = arith.constant 2 : index
    %c2_288 = arith.constant 2 : index
    %c0_289 = arith.constant 0 : index
    %263 = vector.load %arg20[%c0_286, %c2_287, %c2_288, %c0_289] : memref<1x4x4x64xf32, #tpu.memory_space<vmem>>, vector<1x1x1x64xf32>
    %264 = vector.shape_cast %263 : vector<1x1x1x64xf32> to vector<1x64xf32>
    %265 = arith.truncf %264 : vector<1x64xf32> to vector<1x64xbf16>
    %c640 = arith.constant 640 : index
    %c0_290 = arith.constant 0 : index
    %266 = vector.load %arg5[%c640, %c0_290] : memref<1024x128xbf16, #tpu.memory_space<vmem>>, vector<64x128xbf16>
    %cst_291 = arith.constant dense<0.000000e+00> : vector<1x128xf32>
    %267 = tpu.matmul %265, %266, %cst_291 {dimension_numbers = #tpu.dot_dimension_numbers<[1], [0], [0], [1], [0, 0, 1, 1], [], []>} : vector<1x64xbf16>, vector<64x128xbf16>, vector<1x128xf32> -> vector<1x128xf32>
    %268 = arith.addf %259, %267 : vector<1x128xf32>
    %c640_292 = arith.constant 640 : index
    %c0_293 = arith.constant 0 : index
    %269 = vector.load %arg13[%c640_292, %c0_293] : memref<1024x128xbf16, #tpu.memory_space<vmem>>, vector<64x128xbf16>
    %cst_294 = arith.constant dense<0.000000e+00> : vector<1x128xf32>
    %270 = tpu.matmul %265, %269, %cst_294 {dimension_numbers = #tpu.dot_dimension_numbers<[1], [0], [0], [1], [0, 0, 1, 1], [], []>} : vector<1x64xbf16>, vector<64x128xbf16>, vector<1x128xf32> -> vector<1x128xf32>
    %271 = arith.addf %262, %270 : vector<1x128xf32>
    %c0_295 = arith.constant 0 : index
    %c2_296 = arith.constant 2 : index
    %c3_297 = arith.constant 3 : index
    %c0_298 = arith.constant 0 : index
    %272 = vector.load %arg20[%c0_295, %c2_296, %c3_297, %c0_298] : memref<1x4x4x64xf32, #tpu.memory_space<vmem>>, vector<1x1x1x64xf32>
    %273 = vector.shape_cast %272 : vector<1x1x1x64xf32> to vector<1x64xf32>
    %274 = arith.truncf %273 : vector<1x64xf32> to vector<1x64xbf16>
    %c704 = arith.constant 704 : index
    %c0_299 = arith.constant 0 : index
    %275 = vector.load %arg5[%c704, %c0_299] : memref<1024x128xbf16, #tpu.memory_space<vmem>>, vector<64x128xbf16>
    %cst_300 = arith.constant dense<0.000000e+00> : vector<1x128xf32>
    %276 = tpu.matmul %274, %275, %cst_300 {dimension_numbers = #tpu.dot_dimension_numbers<[1], [0], [0], [1], [0, 0, 1, 1], [], []>} : vector<1x64xbf16>, vector<64x128xbf16>, vector<1x128xf32> -> vector<1x128xf32>
    %277 = arith.addf %268, %276 : vector<1x128xf32>
    %c704_301 = arith.constant 704 : index
    %c0_302 = arith.constant 0 : index
    %278 = vector.load %arg13[%c704_301, %c0_302] : memref<1024x128xbf16, #tpu.memory_space<vmem>>, vector<64x128xbf16>
    %cst_303 = arith.constant dense<0.000000e+00> : vector<1x128xf32>
    %279 = tpu.matmul %274, %278, %cst_303 {dimension_numbers = #tpu.dot_dimension_numbers<[1], [0], [0], [1], [0, 0, 1, 1], [], []>} : vector<1x64xbf16>, vector<64x128xbf16>, vector<1x128xf32> -> vector<1x128xf32>
    %280 = arith.addf %271, %279 : vector<1x128xf32>
    %c0_304 = arith.constant 0 : index
    %c3_305 = arith.constant 3 : index
    %c0_306 = arith.constant 0 : index
    %c0_307 = arith.constant 0 : index
    %281 = vector.load %arg20[%c0_304, %c3_305, %c0_306, %c0_307] : memref<1x4x4x64xf32, #tpu.memory_space<vmem>>, vector<1x1x1x64xf32>
    %282 = vector.shape_cast %281 : vector<1x1x1x64xf32> to vector<1x64xf32>
    %283 = arith.truncf %282 : vector<1x64xf32> to vector<1x64xbf16>
    %c768 = arith.constant 768 : index
    %c0_308 = arith.constant 0 : index
    %284 = vector.load %arg5[%c768, %c0_308] : memref<1024x128xbf16, #tpu.memory_space<vmem>>, vector<64x128xbf16>
    %cst_309 = arith.constant dense<0.000000e+00> : vector<1x128xf32>
    %285 = tpu.matmul %283, %284, %cst_309 {dimension_numbers = #tpu.dot_dimension_numbers<[1], [0], [0], [1], [0, 0, 1, 1], [], []>} : vector<1x64xbf16>, vector<64x128xbf16>, vector<1x128xf32> -> vector<1x128xf32>
    %286 = arith.addf %277, %285 : vector<1x128xf32>
    %c768_310 = arith.constant 768 : index
    %c0_311 = arith.constant 0 : index
    %287 = vector.load %arg13[%c768_310, %c0_311] : memref<1024x128xbf16, #tpu.memory_space<vmem>>, vector<64x128xbf16>
    %cst_312 = arith.constant dense<0.000000e+00> : vector<1x128xf32>
    %288 = tpu.matmul %283, %287, %cst_312 {dimension_numbers = #tpu.dot_dimension_numbers<[1], [0], [0], [1], [0, 0, 1, 1], [], []>} : vector<1x64xbf16>, vector<64x128xbf16>, vector<1x128xf32> -> vector<1x128xf32>
    %289 = arith.addf %280, %288 : vector<1x128xf32>
    %c0_313 = arith.constant 0 : index
    %c3_314 = arith.constant 3 : index
    %c1_315 = arith.constant 1 : index
    %c0_316 = arith.constant 0 : index
    %290 = vector.load %arg20[%c0_313, %c3_314, %c1_315, %c0_316] : memref<1x4x4x64xf32, #tpu.memory_space<vmem>>, vector<1x1x1x64xf32>
    %291 = vector.shape_cast %290 : vector<1x1x1x64xf32> to vector<1x64xf32>
    %292 = arith.truncf %291 : vector<1x64xf32> to vector<1x64xbf16>
    %c832 = arith.constant 832 : index
    %c0_317 = arith.constant 0 : index
    %293 = vector.load %arg5[%c832, %c0_317] : memref<1024x128xbf16, #tpu.memory_space<vmem>>, vector<64x128xbf16>
    %cst_318 = arith.constant dense<0.000000e+00> : vector<1x128xf32>
    %294 = tpu.matmul %292, %293, %cst_318 {dimension_numbers = #tpu.dot_dimension_numbers<[1], [0], [0], [1], [0, 0, 1, 1], [], []>} : vector<1x64xbf16>, vector<64x128xbf16>, vector<1x128xf32> -> vector<1x128xf32>
    %295 = arith.addf %286, %294 : vector<1x128xf32>
    %c832_319 = arith.constant 832 : index
    %c0_320 = arith.constant 0 : index
    %296 = vector.load %arg13[%c832_319, %c0_320] : memref<1024x128xbf16, #tpu.memory_space<vmem>>, vector<64x128xbf16>
    %cst_321 = arith.constant dense<0.000000e+00> : vector<1x128xf32>
    %297 = tpu.matmul %292, %296, %cst_321 {dimension_numbers = #tpu.dot_dimension_numbers<[1], [0], [0], [1], [0, 0, 1, 1], [], []>} : vector<1x64xbf16>, vector<64x128xbf16>, vector<1x128xf32> -> vector<1x128xf32>
    %298 = arith.addf %289, %297 : vector<1x128xf32>
    %c0_322 = arith.constant 0 : index
    %c3_323 = arith.constant 3 : index
    %c2_324 = arith.constant 2 : index
    %c0_325 = arith.constant 0 : index
    %299 = vector.load %arg20[%c0_322, %c3_323, %c2_324, %c0_325] : memref<1x4x4x64xf32, #tpu.memory_space<vmem>>, vector<1x1x1x64xf32>
    %300 = vector.shape_cast %299 : vector<1x1x1x64xf32> to vector<1x64xf32>
    %301 = arith.truncf %300 : vector<1x64xf32> to vector<1x64xbf16>
    %c896 = arith.constant 896 : index
    %c0_326 = arith.constant 0 : index
    %302 = vector.load %arg5[%c896, %c0_326] : memref<1024x128xbf16, #tpu.memory_space<vmem>>, vector<64x128xbf16>
    %cst_327 = arith.constant dense<0.000000e+00> : vector<1x128xf32>
    %303 = tpu.matmul %301, %302, %cst_327 {dimension_numbers = #tpu.dot_dimension_numbers<[1], [0], [0], [1], [0, 0, 1, 1], [], []>} : vector<1x64xbf16>, vector<64x128xbf16>, vector<1x128xf32> -> vector<1x128xf32>
    %304 = arith.addf %295, %303 : vector<1x128xf32>
    %c896_328 = arith.constant 896 : index
    %c0_329 = arith.constant 0 : index
    %305 = vector.load %arg13[%c896_328, %c0_329] : memref<1024x128xbf16, #tpu.memory_space<vmem>>, vector<64x128xbf16>
    %cst_330 = arith.constant dense<0.000000e+00> : vector<1x128xf32>
    %306 = tpu.matmul %301, %305, %cst_330 {dimension_numbers = #tpu.dot_dimension_numbers<[1], [0], [0], [1], [0, 0, 1, 1], [], []>} : vector<1x64xbf16>, vector<64x128xbf16>, vector<1x128xf32> -> vector<1x128xf32>
    %307 = arith.addf %298, %306 : vector<1x128xf32>
    %c0_331 = arith.constant 0 : index
    %c3_332 = arith.constant 3 : index
    %c3_333 = arith.constant 3 : index
    %c0_334 = arith.constant 0 : index
    %308 = vector.load %arg20[%c0_331, %c3_332, %c3_333, %c0_334] : memref<1x4x4x64xf32, #tpu.memory_space<vmem>>, vector<1x1x1x64xf32>
    %309 = vector.shape_cast %308 : vector<1x1x1x64xf32> to vector<1x64xf32>
    %310 = arith.truncf %309 : vector<1x64xf32> to vector<1x64xbf16>
    %c960 = arith.constant 960 : index
    %c0_335 = arith.constant 0 : index
    %311 = vector.load %arg5[%c960, %c0_335] : memref<1024x128xbf16, #tpu.memory_space<vmem>>, vector<64x128xbf16>
    %cst_336 = arith.constant dense<0.000000e+00> : vector<1x128xf32>
    %312 = tpu.matmul %310, %311, %cst_336 {dimension_numbers = #tpu.dot_dimension_numbers<[1], [0], [0], [1], [0, 0, 1, 1], [], []>} : vector<1x64xbf16>, vector<64x128xbf16>, vector<1x128xf32> -> vector<1x128xf32>
    %313 = arith.addf %304, %312 : vector<1x128xf32>
    %c960_337 = arith.constant 960 : index
    %c0_338 = arith.constant 0 : index
    %314 = vector.load %arg13[%c960_337, %c0_338] : memref<1024x128xbf16, #tpu.memory_space<vmem>>, vector<64x128xbf16>
    %cst_339 = arith.constant dense<0.000000e+00> : vector<1x128xf32>
    %315 = tpu.matmul %310, %314, %cst_339 {dimension_numbers = #tpu.dot_dimension_numbers<[1], [0], [0], [1], [0, 0, 1, 1], [], []>} : vector<1x64xbf16>, vector<64x128xbf16>, vector<1x128xf32> -> vector<1x128xf32>
    %316 = arith.addf %307, %315 : vector<1x128xf32>
    %c0_340 = arith.constant 0 : index
    %c0_341 = arith.constant 0 : index
    %317 = vector.load %arg6[%c0_340, %c0_341] : memref<1x128xf32, #tpu.memory_space<vmem>>, vector<1x128xf32>
    %318 = arith.mulf %313, %317 : vector<1x128xf32>
    %c0_342 = arith.constant 0 : index
    %c0_343 = arith.constant 0 : index
    %319 = vector.load %arg7[%c0_342, %c0_343] : memref<1x128xf32, #tpu.memory_space<vmem>>, vector<1x128xf32>
    %320 = arith.addf %318, %319 : vector<1x128xf32>
    %cst_344 = arith.constant 0.000000e+00 : f32
    %321 = vector.broadcast %cst_344 : f32 to vector<1x128xf32>
    %322 = arith.maximumf %320, %321 : vector<1x128xf32>
    %323 = arith.truncf %322 : vector<1x128xf32> to vector<1x128xbf16>
    %c0_345 = arith.constant 0 : index
    %c0_346 = arith.constant 0 : index
    %324 = vector.load %arg8[%c0_345, %c0_346] : memref<128x128xbf16, #tpu.memory_space<vmem>>, vector<128x128xbf16>
    %cst_347 = arith.constant dense<0.000000e+00> : vector<1x128xf32>
    %325 = tpu.matmul %323, %324, %cst_347 {dimension_numbers = #tpu.dot_dimension_numbers<[1], [0], [0], [1], [0, 0, 1, 1], [], []>} : vector<1x128xbf16>, vector<128x128xbf16>, vector<1x128xf32> -> vector<1x128xf32>
    %c0_348 = arith.constant 0 : index
    %c0_349 = arith.constant 0 : index
    %326 = vector.load %arg9[%c0_348, %c0_349] : memref<1x128xf32, #tpu.memory_space<vmem>>, vector<1x128xf32>
    %327 = arith.mulf %325, %326 : vector<1x128xf32>
    %c0_350 = arith.constant 0 : index
    %c0_351 = arith.constant 0 : index
    %328 = vector.load %arg10[%c0_350, %c0_351] : memref<1x128xf32, #tpu.memory_space<vmem>>, vector<1x128xf32>
    %329 = arith.addf %327, %328 : vector<1x128xf32>
    %cst_352 = arith.constant 0.000000e+00 : f32
    %330 = vector.broadcast %cst_352 : f32 to vector<1x128xf32>
    %331 = arith.maximumf %329, %330 : vector<1x128xf32>
    %332 = arith.truncf %331 : vector<1x128xf32> to vector<1x128xbf16>
    %c0_353 = arith.constant 0 : index
    %c0_354 = arith.constant 0 : index
    %333 = vector.load %arg11[%c0_353, %c0_354] : memref<128x128xbf16, #tpu.memory_space<vmem>>, vector<128x128xbf16>
    %cst_355 = arith.constant dense<0.000000e+00> : vector<1x128xf32>
    %334 = tpu.matmul %332, %333, %cst_355 {dimension_numbers = #tpu.dot_dimension_numbers<[1], [0], [0], [1], [0, 0, 1, 1], [], []>} : vector<1x128xbf16>, vector<128x128xbf16>, vector<1x128xf32> -> vector<1x128xf32>
    %c0_356 = arith.constant 0 : index
    %c0_357 = arith.constant 0 : index
    %335 = vector.load %arg12[%c0_356, %c0_357] : memref<1x128xf32, #tpu.memory_space<vmem>>, vector<1x128xf32>
    %336 = arith.addf %334, %335 : vector<1x128xf32>
    %cst_358 = arith.constant dense<0xFF800000> : vector<1xf32>
    %337 = vector.multi_reduction <maximumf>, %336, %cst_358 [1] : vector<1x128xf32> to vector<1xf32>
    %338 = vector.shape_cast %337 : vector<1xf32> to vector<1x1xf32>
    %339 = vector.broadcast %338 : vector<1x1xf32> to vector<1x128xf32>
    %340 = arith.subf %336, %339 : vector<1x128xf32>
    %341 = math.exp %340 : vector<1x128xf32>
    %cst_359 = arith.constant dense<0.000000e+00> : vector<1xf32>
    %342 = vector.multi_reduction <add>, %341, %cst_359 [1] : vector<1x128xf32> to vector<1xf32>
    %343 = vector.shape_cast %342 : vector<1xf32> to vector<1x1xf32>
    %344 = math.log %343 : vector<1x1xf32>
    %345 = vector.broadcast %344 : vector<1x1xf32> to vector<1x128xf32>
    %346 = arith.subf %340, %345 : vector<1x128xf32>
    %c0_360 = arith.constant 0 : index
    %c0_361 = arith.constant 0 : index
    %c0_362 = arith.constant 0 : index
    %347 = vector.load %arg18[%c0_360, %c0_361, %c0_362] : memref<1x1x128xf32, #tpu.memory_space<vmem>>, vector<1x1x128xf32>
    %348 = vector.shape_cast %347 : vector<1x1x128xf32> to vector<1x128xf32>
    %349 = vector.shape_cast %346 : vector<1x128xf32> to vector<1x1x128xf32>
    tpu.vector_store %arg18[%c0_360, %c0_361, %c0_362], %349 {strides = array<i32>} : memref<1x1x128xf32, #tpu.memory_space<vmem>>, vector<1x1x128xf32>,
    %c0_363 = arith.constant 0 : index
    %c0_364 = arith.constant 0 : index
    %350 = vector.load %arg14[%c0_363, %c0_364] : memref<1x128xf32, #tpu.memory_space<vmem>>, vector<1x128xf32>
    %351 = arith.mulf %316, %350 : vector<1x128xf32>
    %c0_365 = arith.constant 0 : index
    %c0_366 = arith.constant 0 : index
    %352 = vector.load %arg15[%c0_365, %c0_366] : memref<1x128xf32, #tpu.memory_space<vmem>>, vector<1x128xf32>
    %353 = arith.addf %351, %352 : vector<1x128xf32>
    %cst_367 = arith.constant 0.000000e+00 : f32
    %354 = vector.broadcast %cst_367 : f32 to vector<1x128xf32>
    %355 = arith.maximumf %353, %354 : vector<1x128xf32>
    %356 = arith.truncf %355 : vector<1x128xf32> to vector<1x128xbf16>
    %c0_368 = arith.constant 0 : index
    %c0_369 = arith.constant 0 : index
    %357 = vector.load %arg16[%c0_368, %c0_369] : memref<128x128xbf16, #tpu.memory_space<vmem>>, vector<128x128xbf16>
    %cst_370 = arith.constant dense<0.000000e+00> : vector<1x128xf32>
    %358 = tpu.matmul %356, %357, %cst_370 {dimension_numbers = #tpu.dot_dimension_numbers<[1], [0], [0], [1], [0, 0, 1, 1], [], []>} : vector<1x128xbf16>, vector<128x128xbf16>, vector<1x128xf32> -> vector<1x128xf32>
    %c0_371 = arith.constant 0 : index
    %c0_372 = arith.constant 0 : index
    %359 = vector.load %arg17[%c0_371, %c0_372] : memref<1x128xf32, #tpu.memory_space<vmem>>, vector<1x128xf32>
    %360 = arith.addf %358, %359 : vector<1x128xf32>
    %cst_373 = arith.constant dense<0xFF800000> : vector<1xf32>
    %361 = vector.multi_reduction <maximumf>, %360, %cst_373 [1] : vector<1x128xf32> to vector<1xf32>
    %362 = vector.shape_cast %361 : vector<1xf32> to vector<1x1xf32>
    %363 = vector.broadcast %362 : vector<1x1xf32> to vector<1x128xf32>
    %364 = arith.subf %360, %363 : vector<1x128xf32>
    %365 = math.exp %364 : vector<1x128xf32>
    %cst_374 = arith.constant dense<0.000000e+00> : vector<1xf32>
    %366 = vector.multi_reduction <add>, %365, %cst_374 [1] : vector<1x128xf32> to vector<1xf32>
    %367 = vector.shape_cast %366 : vector<1xf32> to vector<1x1xf32>
    %368 = math.log %367 : vector<1x1xf32>
    %369 = vector.broadcast %368 : vector<1x1xf32> to vector<1x128xf32>
    %370 = arith.subf %364, %369 : vector<1x128xf32>
    %c0_375 = arith.constant 0 : index
    %c0_376 = arith.constant 0 : index
    %c0_377 = arith.constant 0 : index
    %371 = vector.load %arg19[%c0_375, %c0_376, %c0_377] : memref<1x1x128xf32, #tpu.memory_space<vmem>>, vector<1x1x128xf32>
    %372 = vector.shape_cast %371 : vector<1x1x128xf32> to vector<1x128xf32>
    %373 = vector.shape_cast %370 : vector<1x128xf32> to vector<1x1x128xf32>
    tpu.vector_store %arg19[%c0_375, %c0_376, %c0_377], %373 {strides = array<i32>} : memref<1x1x128xf32, #tpu.memory_space<vmem>>, vector<1x1x128xf32>,
    return
  }
  func.func @transform_0(%arg0: i32) -> (i32, i32, i32, i32) {
    %c0_i32 = arith.constant 0 : i32
    %c0_i32_0 = arith.constant 0 : i32
    %c0_i32_1 = arith.constant 0 : i32
    %c0_i32_2 = arith.constant 0 : i32
    return %arg0, %c0_i32, %c0_i32_0, %c0_i32_1 : i32, i32, i32, i32
  }
  func.func @transform_1(%arg0: i32) -> (i32, i32, i32) {
    %c0_i32 = arith.constant 0 : i32
    %c0_i32_0 = arith.constant 0 : i32
    %c0_i32_1 = arith.constant 0 : i32
    %c0_i32_2 = arith.constant 0 : i32
    return %c0_i32, %c0_i32_0, %c0_i32_1 : i32, i32, i32
  }
  func.func @transform_2(%arg0: i32) -> (i32, i32) {
    %c0_i32 = arith.constant 0 : i32
    %c0_i32_0 = arith.constant 0 : i32
    %c0_i32_1 = arith.constant 0 : i32
    return %c0_i32, %c0_i32_0 : i32, i32
  }
  func.func @transform_3(%arg0: i32) -> (i32, i32) {
    %c0_i32 = arith.constant 0 : i32
    %c0_i32_0 = arith.constant 0 : i32
    %c0_i32_1 = arith.constant 0 : i32
    return %c0_i32, %c0_i32_0 : i32, i32
  }
  func.func @transform_4(%arg0: i32) -> (i32, i32) {
    %c0_i32 = arith.constant 0 : i32
    %c0_i32_0 = arith.constant 0 : i32
    %c0_i32_1 = arith.constant 0 : i32
    return %c0_i32, %c0_i32_0 : i32, i32
  }
  func.func @transform_5(%arg0: i32) -> (i32, i32) {
    %c0_i32 = arith.constant 0 : i32
    %c0_i32_0 = arith.constant 0 : i32
    %c0_i32_1 = arith.constant 0 : i32
    return %c0_i32, %c0_i32_0 : i32, i32
  }
  func.func @transform_6(%arg0: i32) -> (i32, i32) {
    %c0_i32 = arith.constant 0 : i32
    %c0_i32_0 = arith.constant 0 : i32
    %c0_i32_1 = arith.constant 0 : i32
    return %c0_i32, %c0_i32_0 : i32, i32
  }
  func.func @transform_7(%arg0: i32) -> (i32, i32) {
    %c0_i32 = arith.constant 0 : i32
    %c0_i32_0 = arith.constant 0 : i32
    %c0_i32_1 = arith.constant 0 : i32
    return %c0_i32, %c0_i32_0 : i32, i32
  }
  func.func @transform_8(%arg0: i32) -> (i32, i32) {
    %c0_i32 = arith.constant 0 : i32
    %c0_i32_0 = arith.constant 0 : i32
    %c0_i32_1 = arith.constant 0 : i32
    return %c0_i32, %c0_i32_0 : i32, i32
  }
  func.func @transform_9(%arg0: i32) -> (i32, i32) {
    %c0_i32 = arith.constant 0 : i32
    %c0_i32_0 = arith.constant 0 : i32
    %c0_i32_1 = arith.constant 0 : i32
    return %c0_i32, %c0_i32_0 : i32, i32
  }
  func.func @transform_10(%arg0: i32) -> (i32, i32) {
    %c0_i32 = arith.constant 0 : i32
    %c0_i32_0 = arith.constant 0 : i32
    %c0_i32_1 = arith.constant 0 : i32
    return %c0_i32, %c0_i32_0 : i32, i32
  }
  func.func @transform_11(%arg0: i32) -> (i32, i32) {
    %c0_i32 = arith.constant 0 : i32
    %c0_i32_0 = arith.constant 0 : i32
    %c0_i32_1 = arith.constant 0 : i32
    return %c0_i32, %c0_i32_0 : i32, i32
  }
  func.func @transform_12(%arg0: i32) -> (i32, i32) {
    %c0_i32 = arith.constant 0 : i32
    %c0_i32_0 = arith.constant 0 : i32
    %c0_i32_1 = arith.constant 0 : i32
    return %c0_i32, %c0_i32_0 : i32, i32
  }
  func.func @transform_13(%arg0: i32) -> (i32, i32) {
    %c0_i32 = arith.constant 0 : i32
    %c0_i32_0 = arith.constant 0 : i32
    %c0_i32_1 = arith.constant 0 : i32
    return %c0_i32, %c0_i32_0 : i32, i32
  }
  func.func @transform_14(%arg0: i32) -> (i32, i32) {
    %c0_i32 = arith.constant 0 : i32
    %c0_i32_0 = arith.constant 0 : i32
    %c0_i32_1 = arith.constant 0 : i32
    return %c0_i32, %c0_i32_0 : i32, i32
  }
  func.func @transform_15(%arg0: i32) -> (i32, i32) {
    %c0_i32 = arith.constant 0 : i32
    %c0_i32_0 = arith.constant 0 : i32
    %c0_i32_1 = arith.constant 0 : i32
    return %c0_i32, %c0_i32_0 : i32, i32
  }
  func.func @transform_16(%arg0: i32) -> (i32, i32) {
    %c0_i32 = arith.constant 0 : i32
    %c0_i32_0 = arith.constant 0 : i32
    %c0_i32_1 = arith.constant 0 : i32
    return %c0_i32, %c0_i32_0 : i32, i32
  }
  func.func @transform_17(%arg0: i32) -> (i32, i32, i32) {
    %c0_i32 = arith.constant 0 : i32
    %c0_i32_0 = arith.constant 0 : i32
    %c0_i32_1 = arith.constant 0 : i32
    return %arg0, %c0_i32, %c0_i32_0 : i32, i32, i32
  }
  func.func @transform_18(%arg0: i32) -> (i32, i32, i32) {
    %c0_i32 = arith.constant 0 : i32
    %c0_i32_0 = arith.constant 0 : i32
    %c0_i32_1 = arith.constant 0 : i32
    return %arg0, %c0_i32, %c0_i32_0 : i32, i32, i32
  }
  func.func @transform_19(%arg0: i32) -> (i32, i32, i32, i32) {
    %c0_i32 = arith.constant 0 : i32
    %c0_i32_0 = arith.constant 0 : i32
    %c0_i32_1 = arith.constant 0 : i32
    %c0_i32_2 = arith.constant 0 : i32
    return %arg0, %c0_i32, %c0_i32_0, %c0_i32_1 : i32, i32, i32, i32
  }
}

</mosaic_0001>

<bundles_post_ra>
// kernel: cnn_model_forward.2
= control target key start
LH: loop header
LB: loop body
LE: loop exit
PB: predicated region body
PF: predicated region fallthrough
CT: control target
= control target key end

     0   :  { %s1781_s15 = smov 0   ;;  %s2140_s0 = inlined_call_operand.vmem [shape: bf16[1152,32], index: 0, kind: input, shape index: {}]   ;;  %s2141_s1 = inlined_call_operand.vmem [shape: bf16[32,64], index: 1, kind: input, shape index: {}]   ;;  %s2142_s2 = inlined_call_operand.vmem [shape: f32[1,64], index: 2, kind: input, shape index: {}]   ;;  %s2143_s3 = inlined_call_operand.vmem [shape: f32[1,64], index: 3, kind: input, shape index: {}]   ;;  %s2144_s4 = inlined_call_operand.vmem [shape: bf16[2,12,12,64], index: 4, kind: output, shape index: {}]  }
   0x1 LB: > { %s1787_s16 = sadd.s32 4294967295, %s1754_s15   ;;  %p1454_p0 = scmp.ge.s32.totalorder %s1754_s15, 1  ;;  %s1754_s15 = sphi %s1781_s15, %s14_s15  }
   0x2   : > { %p163_p1 = scmp.lt.s32.totalorder %s1754_s15, 3 }
   0x4   : > { %p164_p2 = pnand %p1454_p0, %p163_p1 }
   0x5   : > { %v1710_v0 = vld [vmem:[%s2141_s1] sm:$0xff] (!%p164_p2)   ;;  %s189_s19 = smul.u32 (!%p164_p2), 72, %s1787_s16  ;;  %v1711_v1 = vld [vmem:[%s2141_s1 + $0x8] sm:$0xff] (!%p164_p2)   ;;  %vm469_vm0 = vcmask (!%p164_p2), 261120   ;;  %vm1093_vm1 = vcmask (!%p164_p2), 523264   ;;  %p195_p4 = scmp.lt.s32.totalorder (!%p164_p2), %s1787_s16, 1 }
   0x6   : > { %167 = sbr.rel (%p164_p2) target bundleno = 323 (0x143), region = 36  ;;  %1621 = vmatprep.subr.bf16.mxu0 (!%p164_p2), %v1710_v0  ;;  %1697 = vmatprep.subr.bf16.mxu1 (!%p164_p2), %v1710_v0  ;;  %v1878_v38 = vld [vmem:[%s2142_s2] ss:$0 sm:$0xff] (!%p164_p2)  ;;  %vm1369_vm2 = vcmask (!%p164_p2), 519168   ;;  %vm1371_vm3 = vcmask (!%p164_p2), 517120  }
   0x7   : > { %p190_p3 = scmp.lt.s32.totalorder (!%p164_p2), %s189_s19, 143  ;;  %1622 = vmatpush3.bf16.msra.mxu0 (!%p164_p2), %v1710_v0  ;;  %1699 = vmatpush3.bf16.msra.mxu1 (!%p164_p2), %v1710_v0  ;;  %v1883_v40 = vld [vmem:[%s2143_s3] ss:$0 sm:$0xff] (!%p164_p2) }
   0x8   : > { %1623 = vmatprep.subr.bf16.mxu0 (!%p164_p2), %v1711_v1  ;;  %1698 = vmatprep.subr.bf16.mxu1 (!%p164_p2), %v1711_v1 }
   0xb   : > { %1624 = vmatpush3.bf16.msra.mxu0 (!%p164_p2), %v1711_v1  ;;  %1700 = vmatpush3.bf16.msra.mxu1 (!%p164_p2), %v1711_v1 }
   0xd   : > { %s2146_s19 = smov (!%p190_p3, %s189_s19), 143  ;;  %s2148_s16 = smov (!%p195_p4, %s1787_s16), 1 }
   0xe   : > { %s1455_s22 = sshll.u32 %s2146_s19, 2  ;;  %s1701_s30 = smul.u32 96, %s2148_s16 }
   0xf   : > { %s1801_s25 = scalar_lea.vmem %s2140_s0, %s1455_s22 }
  0x10   : > { %v1712_v2 = vld [vmem:[%s1801_s25] sm:$0xff]   ;;  %v1713_v3 = vld [vmem:[%s1801_s25 + $0x90] sm:$0xff]   ;;  %v1714_v4 = vld [vmem:[%s1801_s25 + $0x8] sm:$0xff]   ;;  %s1954_s7 = scalar_lea.vmem %s2144_s4, %s1701_s30 }
  0x11   : > { %1625 = vmatprep.mubr.msk.bf16.mxu0 %vm469_vm0, %v1712_v2  ;;  %1661 = vmatprep.mubr.msk.bf16.mxu1 %vm469_vm0, %v1713_v3  ;;  %v1715_v5 = vld [vmem:[%s1801_s25 + $0x98] sm:$0xff]   ;;  %v1716_v6 = vld [vmem:[%s1801_s25 + $0x10] sm:$0xff]   ;;  %v1717_v7 = vld [vmem:[%s1801_s25 + $0xa0] sm:$0xff]  }
  0x12   : > { %1626 = vmatmul.mubr.msk.bf16.vlgmr.msra.gmra.mrb[0].mxu0 %vm469_vm0, %v1714_v4  ;;  %1662 = vmatmul.mubr.msk.bf16.vlgmr.msra.gmra.mrb[0].mxu1 %vm469_vm0, %v1715_v5  ;;  %v1718_v8 = vld [vmem:[%s1801_s25 + $0x18] sm:$0xff]   ;;  %v1719_v9 = vld [vmem:[%s1801_s25 + $0xa8] sm:$0xff]   ;;  %v1720_v10 = vld [vmem:[%s1801_s25 + $0x20] sm:$0xff]  }
  0x13   : > { %1629 = vmatprep.mubr.msk.bf16.mxu0 %vm469_vm0, %v1716_v6  ;;  %1665 = vmatprep.mubr.msk.bf16.mxu1 %vm469_vm0, %v1717_v7  ;;  %v1721_v11 = vld [vmem:[%s1801_s25 + $0xb0] sm:$0xff]   ;;  %v1722_v12 = vld [vmem:[%s1801_s25 + $0x28] sm:$0xff]   ;;  %v1723_v13 = vld [vmem:[%s1801_s25 + $0xb8] sm:$0xff]  }
  0x14   : > { %v1724_v14 = vld [vmem:[%s1801_s25 + $0x30] sm:$0xff]   ;;  %v1725_v15 = vld [vmem:[%s1801_s25 + $0xc0] sm:$0xff]   ;;  %v1726_v16 = vld [vmem:[%s1801_s25 + $0x38] sm:$0xff]  }
  0x15   : > { %v1727_v17 = vld [vmem:[%s1801_s25 + $0xc8] sm:$0xff]   ;;  %v1728_v18 = vld [vmem:[%s1801_s25 + $0x40] sm:$0xff]   ;;  %v1729_v19 = vld [vmem:[%s1801_s25 + $0xd0] sm:$0xff]  }
  0x16   : > { %v1730_v20 = vld [vmem:[%s1801_s25 + $0x48] sm:$0xff]   ;;  %v1731_v21 = vld [vmem:[%s1801_s25 + $0xd8] sm:$0xff]   ;;  %v1732_v22 = vld [vmem:[%s1801_s25 + $0x50] sm:$0xff]  }
  0x17   : > { %v1733_v23 = vld [vmem:[%s1801_s25 + $0xe0] sm:$0xff]   ;;  %v1734_v24 = vld [vmem:[%s1801_s25 + $0x58] sm:$0xff]   ;;  %v1735_v25 = vld [vmem:[%s1801_s25 + $0xe8] sm:$0xff]  }
  0x18   : > { %v1736_v26 = vld [vmem:[%s1801_s25 + $0x60] sm:$0xff]   ;;  %v1737_v27 = vld [vmem:[%s1801_s25 + $0xf0] sm:$0xff]   ;;  %v1738_v28 = vld [vmem:[%s1801_s25 + $0x68] sm:$0xff]  }
  0x19   : > { %v1739_v29 = vld [vmem:[%s1801_s25 + $0xf8] sm:$0xff]   ;;  %v1740_v30 = vld [vmem:[%s1801_s25 + $0x70] sm:$0xff]   ;;  %v1741_v31 = vld [vmem:[%s1801_s25 + $0x100] sm:$0xff]  }
  0x1a   : > { %1630 = vmatmul.mubr.msk.bf16.gmra.mrb[4].mxu0 %vm469_vm0, %v1718_v8  ;;  %1666 = vmatmul.mubr.msk.bf16.gmra.mrb[4].mxu1 %vm469_vm0, %v1719_v9  ;;  %v1742_v32 = vld [vmem:[%s1801_s25 + $0x78] sm:$0xff]   ;;  %v1743_v33 = vld [vmem:[%s1801_s25 + $0x108] sm:$0xff]   ;;  %v1744_v34 = vld [vmem:[%s1801_s25 + $0x80] sm:$0xff]  }
  0x1b   : > { %1633 = vmatprep.mubr.msk.bf16.mxu0 %vm469_vm0, %v1720_v10  ;;  %1669 = vmatprep.mubr.msk.bf16.mxu1 %vm469_vm0, %v1721_v11  ;;  %v1745_v35 = vld [vmem:[%s1801_s25 + $0x110] sm:$0xff]   ;;  %v1746_v36 = vld [vmem:[%s1801_s25 + $0x88] sm:$0xff]   ;;  %v1747_v37 = vld [vmem:[%s1801_s25 + $0x118] sm:$0xff]  }
  0x22   : > { %1634 = vmatmul.mubr.msk.bf16.gmra.mrb[8].mxu0 %vm469_vm0, %v1722_v12  ;;  %1670 = vmatmul.mubr.msk.bf16.gmra.mrb[8].mxu1 %vm469_vm0, %v1723_v13 }
  0x23   : > { %1637 = vmatprep.mubr.msk.bf16.mxu0 %vm469_vm0, %v1724_v14  ;;  %1673 = vmatprep.mubr.msk.bf16.mxu1 %vm469_vm0, %v1725_v15 }
  0x2a   : > { %1638 = vmatmul.mubr.msk.bf16.gmra.mrb[12].mxu0 %vm469_vm0, %v1726_v16  ;;  %1674 = vmatmul.mubr.msk.bf16.gmra.mrb[12].mxu1 %vm469_vm0, %v1727_v17 }
  0x2b   : > { %1641 = vmatprep.mubr.msk.bf16.mxu0 %vm469_vm0, %v1728_v18  ;;  %1677 = vmatprep.mubr.msk.bf16.mxu1 %vm469_vm0, %v1729_v19 }
  0x32   : > { %1642 = vmatmul.mubr.msk.bf16.gmra.mrb[16].mxu0 %vm469_vm0, %v1730_v20  ;;  %1678 = vmatmul.mubr.msk.bf16.gmra.mrb[16].mxu1 %vm469_vm0, %v1731_v21 }
  0x33   : > { %1645 = vmatprep.mubr.msk.bf16.mxu0 %vm469_vm0, %v1732_v22  ;;  %1681 = vmatprep.mubr.msk.bf16.mxu1 %vm469_vm0, %v1733_v23 }
  0x3a   : > { %1646 = vmatmul.mubr.msk.bf16.gmra.mrb[20].mxu0 %vm469_vm0, %v1734_v24  ;;  %1682 = vmatmul.mubr.msk.bf16.gmra.mrb[20].mxu1 %vm469_vm0, %v1735_v25 }
  0x3b   : > { %1649 = vmatprep.mubr.msk.bf16.mxu0 %vm469_vm0, %v1736_v26  ;;  %1685 = vmatprep.mubr.msk.bf16.mxu1 %vm469_vm0, %v1737_v27 }
  0x42   : > { %1650 = vmatmul.mubr.msk.bf16.gmra.mrb[24].mxu0 %vm469_vm0, %v1738_v28  ;;  %1686 = vmatmul.mubr.msk.bf16.gmra.mrb[24].mxu1 %vm469_vm0, %v1739_v29 }
  0x43   : > { %1653 = vmatprep.mubr.msk.bf16.mxu0 %vm469_vm0, %v1740_v30  ;;  %1689 = vmatprep.mubr.msk.bf16.mxu1 %vm469_vm0, %v1741_v31 }
  0x4a   : > { %1654 = vmatmul.mubr.msk.bf16.gmra.mrb[28].mxu0 %vm469_vm0, %v1742_v32  ;;  %1690 = vmatmul.mubr.msk.bf16.gmra.mrb[28].mxu1 %vm469_vm0, %v1743_v33 }
  0x4b   : > { %1657 = vmatprep.mubr.msk.bf16.mxu0 %vm469_vm0, %v1744_v34  ;;  %1693 = vmatprep.mubr.msk.bf16.mxu1 %vm469_vm0, %v1745_v35 }
  0x52   : > { %1658 = vmatmul.mubr.msk.bf16.gmra.mrb[32].mxu0 %vm469_vm0, %v1746_v36  ;;  %1694 = vmatmul.mubr.msk.bf16.gmra.mrb[32].mxu1 %vm469_vm0, %v1747_v37 }
  0xe5   : > { %v1627_v39 = vpop.f32.mrb[0].mxu0  ;;  %v1663_v41 = vpop.f32.mrb[0].mxu1 }
  0xe6   : > { %v612_v42 = vpop.f32.mrb[1].mxu0  ;;  %v756_v44 = vpop.f32.mrb[1].mxu1  ;;  %v908_v63 = vmul.f32 %v1627_v39, %v1878_v38  ;;  %v944_v3 = vmul.f32 %v1663_v41, %v1878_v38 }
  0xe7   : > { %v906_v43 = vmul.f32 %v1878_v38, %v612_v42  ;;  %v1628_v45 = vpop.f32.mrb[2].mxu0  ;;  %v942_v46 = vmul.f32 %v1878_v38, %v756_v44  ;;  %v1664_v48 = vpop.f32.mrb[2].mxu1 }
  0xe8   : > { %v909_v47 = vmul.f32 %v1628_v45, %v1878_v38  ;;  %v615_v49 = vpop.f32.mrb[3].mxu0  ;;  %v945_v51 = vmul.f32 %v1664_v48, %v1878_v38  ;;  %v759_v52 = vpop.f32.mrb[3].mxu1  ;;  %v987_v14 = vadd.f32 %v1883_v40, %v908_v63  ;;  %v1023_v18 = vadd.f32 %v1883_v40, %v944_v3 }
  0xe9   : > { %v985_v50 = vadd.f32 %v1883_v40, %v906_v43  ;;  %v1021_v53 = vadd.f32 %v1883_v40, %v942_v46  ;;  %v907_v58 = vmul.f32 %v1878_v38, %v615_v49  ;;  %v943_v60 = vmul.f32 %v1878_v38, %v759_v52 }
  0xea   : > { %v988_v54 = vadd.f32 %v1883_v40, %v909_v47  ;;  %v1024_v55 = vadd.f32 %v1883_v40, %v945_v51 }
  0xeb   : > { %v986_v7 = vadd.f32 %v1883_v40, %v907_v58  ;;  %v1022_v11 = vadd.f32 %v1883_v40, %v943_v60 }
  0xec   : > { %v1057_v56 = vmax.f32 %v985_v50, %v988_v54  ;;  %v1075_v57 = vmax.f32 %v1021_v53, %v1024_v55 }
  0xed   : > { %v1631_v59 = vpop.f32.mrb[4].mxu0  ;;  %v1667_v61 = vpop.f32.mrb[4].mxu1 }
  0xee   : > { %1094 = vst.msk [vmem:[#allocation2] sm:$0xff] %vm1093_vm1, %v1057_v56  ;;  %v628_v62 = vpop.f32.mrb[5].mxu0  ;;  %1112 = vst.msk [vmem:[#allocation2 + $0x90] sm:$0xff] %vm1093_vm1, %v1075_v57  ;;  %v772_v1 = vpop.f32.mrb[5].mxu1  ;;  %v912_v24 = vmul.f32 %v1631_v59, %v1878_v38  ;;  %v948_v29 = vmul.f32 %v1667_v61, %v1878_v38 }
  0xef   : > { %v910_v0 = vmul.f32 %v1878_v38, %v628_v62  ;;  %v1632_v2 = vpop.f32.mrb[6].mxu0  ;;  %v946_v4 = vmul.f32 %v1878_v38, %v772_v1  ;;  %v1668_v5 = vpop.f32.mrb[6].mxu1 }
  0xf0   : > { %v631_v6 = vpop.f32.mrb[7].mxu0  ;;  %v775_v10 = vpop.f32.mrb[7].mxu1  ;;  %v913_v16 = vmul.f32 %v1632_v2, %v1878_v38  ;;  %v949_v20 = vmul.f32 %v1668_v5, %v1878_v38  ;;  %v991_v52 = vadd.f32 %v1883_v40, %v912_v24  ;;  %v1027_v56 = vadd.f32 %v1883_v40, %v948_v29 }
  0xf1   : > { %v989_v8 = vadd.f32 %v1883_v40, %v910_v0  ;;  %v911_v9 = vmul.f32 %v1878_v38, %v631_v6  ;;  %v1025_v12 = vadd.f32 %v1883_v40, %v946_v4  ;;  %v947_v13 = vmul.f32 %v1878_v38, %v775_v10 }
  0xf2   : > { %v992_v30 = vadd.f32 %v1883_v40, %v913_v16  ;;  %v1028_v35 = vadd.f32 %v1883_v40, %v949_v20 }
  0xf3   : > { %v1058_v15 = vmax.f32 %v986_v7, %v989_v8  ;;  %v990_v17 = vadd.f32 %v1883_v40, %v911_v9  ;;  %v1076_v19 = vmax.f32 %v1022_v11, %v1025_v12  ;;  %v1026_v21 = vadd.f32 %v1883_v40, %v947_v13 }
  0xf5   : > { %1095 = vst.msk [vmem:[#allocation2 + $0x8] sm:$0xff] %vm1093_vm1, %v1058_v15  ;;  %v1059_v22 = vmax.f32 %v987_v14, %v990_v17  ;;  %v1635_v23 = vpop.f32.mrb[8].mxu0  ;;  %1113 = vst.msk [vmem:[#allocation2 + $0x98] sm:$0xff] %vm1093_vm1, %v1076_v19  ;;  %v1077_v25 = vmax.f32 %v1023_v18, %v1026_v21  ;;  %v1671_v27 = vpop.f32.mrb[8].mxu1 }
  0xf6   : > { %v916_v26 = vmul.f32 %v1635_v23, %v1878_v38  ;;  %v644_v28 = vpop.f32.mrb[9].mxu0  ;;  %v952_v31 = vmul.f32 %v1671_v27, %v1878_v38  ;;  %v788_v33 = vpop.f32.mrb[9].mxu1 }
  0xf7   : > { %1096 = vst.msk [vmem:[#allocation2 + $0x10] sm:$0xff] %vm1093_vm1, %v1059_v22  ;;  %v914_v32 = vmul.f32 %v1878_v38, %v644_v28  ;;  %v1636_v34 = vpop.f32.mrb[10].mxu0  ;;  %1114 = vst.msk [vmem:[#allocation2 + $0xa0] sm:$0xff] %vm1093_vm1, %v1077_v25  ;;  %v950_v37 = vmul.f32 %v1878_v38, %v788_v33  ;;  %v1672_v41 = vpop.f32.mrb[10].mxu1 }
  0xf8   : > { %v995_v36 = vadd.f32 %v1883_v40, %v916_v26  ;;  %v917_v39 = vmul.f32 %v1636_v34, %v1878_v38  ;;  %v647_v42 = vpop.f32.mrb[11].mxu0  ;;  %v1031_v43 = vadd.f32 %v1883_v40, %v952_v31  ;;  %v953_v45 = vmul.f32 %v1672_v41, %v1878_v38  ;;  %v791_v47 = vpop.f32.mrb[11].mxu1 }
  0xf9   : > { %v993_v44 = vadd.f32 %v1883_v40, %v914_v32  ;;  %v915_v46 = vmul.f32 %v1878_v38, %v647_v42  ;;  %v1029_v49 = vadd.f32 %v1883_v40, %v950_v37  ;;  %v951_v51 = vmul.f32 %v1878_v38, %v791_v47 }
  0xfa   : > { %v1061_v48 = vmax.f32 %v992_v30, %v995_v36  ;;  %v996_v50 = vadd.f32 %v1883_v40, %v917_v39  ;;  %v1079_v53 = vmax.f32 %v1028_v35, %v1031_v43  ;;  %v1032_v54 = vadd.f32 %v1883_v40, %v953_v45 }
  0xfb   : > { %v994_v55 = vadd.f32 %v1883_v40, %v915_v46  ;;  %v1030_v60 = vadd.f32 %v1883_v40, %v951_v51 }
  0xfc   : > { %v1130_v57 = vld [vmem:[#allocation2] ss:$2 sm:$0xff]  ;;  %v1178_v58 = vld [vmem:[#allocation2 + $0x1] ss:$2 sm:$0xff]  ;;  %1098 = vst.msk [vmem:[#allocation2 + $0x20] sm:$0xff] %vm1093_vm1, %v1061_v48  ;;  %v1062_v59 = vmax.f32 %v993_v44, %v996_v50  ;;  %1116 = vst.msk [vmem:[#allocation2 + $0xb0] sm:$0xff] %vm1093_vm1, %v1079_v53  ;;  %v1080_v0 = vmax.f32 %v1029_v49, %v1032_v54 }
  0xfd   : > { %v1225_v61 = vmax.f32 %v1130_v57, %v1178_v58  ;;  %v1154_v62 = vld [vmem:[#allocation2 + $0x90] ss:$2 sm:$0xff]  ;;  %v1202_v63 = vld [vmem:[#allocation2 + $0x91] ss:$2 sm:$0xff]  ;;  %v1060_v1 = vmax.f32 %v991_v52, %v994_v55  ;;  %v1639_v2 = vpop.f32.mrb[12].mxu0  ;;  %v1078_v6 = vmax.f32 %v1027_v56, %v1030_v60  ;;  %v1675_v10 = vpop.f32.mrb[12].mxu1 }
  0xfe   : > { %v1237_v3 = vmax.f32 %v1154_v62, %v1202_v63  ;;  %v1132_v4 = vld [vmem:[#allocation2 + $0x10] ss:$2 sm:$0xf]  ;;  %v1180_v5 = vld [vmem:[#allocation2 + $0x11] ss:$2 sm:$0xf]  ;;  %v920_v31 = vmul.f32 %v1639_v2, %v1878_v38  ;;  %v956_v32 = vmul.f32 %v1675_v10, %v1878_v38 }
  0xff   : > { %1099 = vst.msk [vmem:[#allocation2 + $0x28] sm:$0xff] %vm1093_vm1, %v1062_v59  ;;  %v1249_v7 = vmax.f32 %v1225_v61, 0.0  ;;  %v1226_v8 = vmax.f32 %v1132_v4, %v1180_v5  ;;  %v1156_v9 = vld [vmem:[#allocation2 + $0xa0] ss:$2 sm:$0xf]  ;;  %1117 = vst.msk [vmem:[#allocation2 + $0xb8] sm:$0xff] %vm1093_vm1, %v1080_v0 }
 0x100   : > { %1097 = vst.msk [vmem:[#allocation2 + $0x18] sm:$0xff] %vm1093_vm1, %v1060_v1  ;;  %v660_v11 = vpop.f32.mrb[13].mxu0  ;;  %v1261_v12 = vmax.f32 %v1237_v3, 0.0  ;;  %v1204_v13 = vld [vmem:[#allocation2 + $0xa1] ss:$2 sm:$0xf]  ;;  %v1978_v54 = vadd.f32 %v1883_v40, %v920_v31  ;;  %v1981_v55 = vadd.f32 %v1883_v40, %v956_v32 }
 0x101   : > { %1115 = vst.msk [vmem:[#allocation2 + $0xa8] sm:$0xff] %vm1093_vm1, %v1078_v6  ;;  %v918_v14 = vmul.f32 %v1878_v38, %v660_v11  ;;  %v804_v15 = vpop.f32.mrb[13].mxu1  ;;  %v1640_v16 = vpop.f32.mrb[14].mxu0  ;;  %v1559_v17 = vpack.c.bf16 %v1249_v7, %v1249_v7  ;;  %v1250_v18 = vmax.f32 %v1226_v8, 0.0  ;;  %v1238_v19 = vmax.f32 %v1156_v9, %v1204_v13 }
 0x102   : > { %v954_v20 = vmul.f32 %v1878_v38, %v804_v15  ;;  %v1676_v21 = vpop.f32.mrb[14].mxu1  ;;  %v663_v22 = vpop.f32.mrb[15].mxu0  ;;  %v1571_v23 = vpack.c.bf16 %v1261_v12, %v1261_v12  ;;  %v921_v25 = vmul.f32 %v1640_v16, %v1878_v38 }
 0x103   : > { %v997_v24 = vadd.f32 %v1883_v40, %v918_v14  ;;  %v807_v26 = vpop.f32.mrb[15].mxu1  ;;  %1370 = vst.msk [vmem:[%s1954_s7] sm:$0xf] %vm1369_vm2, %v1559_v17  ;;  %v1560_v27 = vpack.c.bf16 %v1250_v18, %v1250_v18  ;;  %v1262_v28 = vmax.f32 %v1238_v19, 0.0  ;;  %v957_v30 = vmul.f32 %v1676_v21, %v1878_v38 }
 0x104   : > { %v1033_v29 = vadd.f32 %v1883_v40, %v954_v20  ;;  %1383 = vst.msk [vmem:[%s1954_s7 + $0x30] sm:$0xf] %vm1369_vm2, %v1571_v23  ;;  %v1000_v33 = vadd.f32 %v1883_v40, %v921_v25  ;;  %v919_v39 = vmul.f32 %v1878_v38, %v663_v22  ;;  %v955_v41 = vmul.f32 %v1878_v38, %v807_v26 }
 0x105   : > { %1372 = vst.msk [vmem:[%s1954_s7 + $0x4] sm:$0x3] %vm1371_vm3, %v1560_v27  ;;  %v1572_v34 = vpack.c.bf16 %v1262_v28, %v1262_v28  ;;  %v1036_v37 = vadd.f32 %v1883_v40, %v957_v30  ;;  %v1643_v56 = vpop.f32.mrb[16].mxu0  ;;  %v1679_v57 = vpop.f32.mrb[16].mxu1 }
 0x106   : > { %v1136_v35 = vld [vmem:[#allocation2 + $0x28] ss:$2 sm:$0xf]  ;;  %v1184_v36 = vld [vmem:[#allocation2 + $0x29] ss:$2 sm:$0xf]  ;;  %v1063_v45 = vmax.f32 %v997_v24, %v1000_v33  ;;  %v998_v60 = vadd.f32 %v1883_v40, %v919_v39  ;;  %v1034_v61 = vadd.f32 %v1883_v40, %v955_v41  ;;  %v924_v8 = vmul.f32 %v1643_v56, %v1878_v38 }
 0x107   : > { %v1228_v42 = vmax.f32 %v1136_v35, %v1184_v36  ;;  %v1160_v43 = vld [vmem:[#allocation2 + $0xb8] ss:$2 sm:$0xf]  ;;  %v1208_v44 = vld [vmem:[#allocation2 + $0xb9] ss:$2 sm:$0xf]  ;;  %v1081_v50 = vmax.f32 %v1033_v29, %v1036_v37  ;;  %v960_v9 = vmul.f32 %v1679_v57, %v1878_v38 }
 0x108   : > { %1384 = vst.msk [vmem:[%s1954_s7 + $0x34] sm:$0x3] %vm1371_vm3, %v1572_v34  ;;  %v1240_v46 = vmax.f32 %v1160_v43, %v1208_v44  ;;  %v1134_v47 = vld [vmem:[#allocation2 + $0x18] ss:$2 sm:$0xff]  ;;  %v1182_v48 = vld [vmem:[#allocation2 + $0x19] ss:$2 sm:$0xff] }
 0x109   : > { %v1158_v49 = vld [vmem:[#allocation2 + $0xa8] ss:$2 sm:$0xff]  ;;  %v1252_v51 = vmax.f32 %v1228_v42, 0.0  ;;  %v1227_v52 = vmax.f32 %v1134_v47, %v1182_v48  ;;  %v1206_v53 = vld [vmem:[#allocation2 + $0xa9] ss:$2 sm:$0xff]  ;;  %1100 = vst.msk [vmem:[#allocation2 + $0x30] sm:$0xff] %vm1093_vm1, %v1063_v45  ;;  %v1039_v56 = vadd.f32 %v1883_v40, %v960_v9 }
 0x10a   : > { %v1264_v58 = vmax.f32 %v1240_v46, 0.0  ;;  %v1239_v59 = vmax.f32 %v1158_v49, %v1206_v53  ;;  %1118 = vst.msk [vmem:[#allocation2 + $0xc0] sm:$0xff] %vm1093_vm1, %v1081_v50  ;;  %v676_v62 = vpop.f32.mrb[17].mxu0  ;;  %v820_v63 = vpop.f32.mrb[17].mxu1 }
 0x10b   : > { %v1562_v0 = vpack.c.bf16 %v1252_v51, %v1252_v51  ;;  %v1251_v1 = vmax.f32 %v1227_v52, 0.0  ;;  %v922_v2 = vmul.f32 %v1878_v38, %v676_v62  ;;  %v958_v3 = vmul.f32 %v1878_v38, %v820_v63  ;;  %v1644_v4 = vpop.f32.mrb[18].mxu0  ;;  %v1680_v5 = vpop.f32.mrb[18].mxu1 }
 0x10c   : > { %v1574_v6 = vpack.c.bf16 %v1264_v58, %v1264_v58  ;;  %v1263_v7 = vmax.f32 %v1239_v59, 0.0  ;;  %v679_v10 = vpop.f32.mrb[19].mxu0  ;;  %v823_v11 = vpop.f32.mrb[19].mxu1  ;;  %v925_v15 = vmul.f32 %v1644_v4, %v1878_v38  ;;  %v961_v17 = vmul.f32 %v1680_v5, %v1878_v38 }
 0x10d   : > { %1374 = vst.msk [vmem:[%s1954_s7 + $0xc] sm:$0x3] %vm1371_vm3, %v1562_v0  ;;  %v1561_v12 = vpack.c.bf16 %v1251_v1, %v1251_v1  ;;  %v1001_v13 = vadd.f32 %v1883_v40, %v922_v2  ;;  %v1037_v14 = vadd.f32 %v1883_v40, %v958_v3  ;;  %v923_v18 = vmul.f32 %v1878_v38, %v679_v10  ;;  %v1647_v20 = vpop.f32.mrb[20].mxu0  ;;  %v1683_v25 = vpop.f32.mrb[20].mxu1 }
 0x10e   : > { %1386 = vst.msk [vmem:[%s1954_s7 + $0x3c] sm:$0x3] %vm1371_vm3, %v1574_v6  ;;  %v1573_v16 = vpack.c.bf16 %v1263_v7, %v1263_v7  ;;  %v959_v19 = vmul.f32 %v1878_v38, %v823_v11  ;;  %v1004_v23 = vadd.f32 %v1883_v40, %v925_v15  ;;  %v928_v24 = vmul.f32 %v1647_v20, %v1878_v38  ;;  %v692_v26 = vpop.f32.mrb[21].mxu0  ;;  %v836_v31 = vpop.f32.mrb[21].mxu1 }
 0x10f   : > { %1373 = vst.msk [vmem:[%s1954_s7 + $0x8] sm:$0xf] %vm1369_vm2, %v1561_v12  ;;  %v1064_v21 = vmax.f32 %v998_v60, %v1001_v13  ;;  %v1082_v22 = vmax.f32 %v1034_v61, %v1037_v14  ;;  %v1040_v27 = vadd.f32 %v1883_v40, %v961_v17  ;;  %v1002_v28 = vadd.f32 %v1883_v40, %v923_v18  ;;  %v1648_v32 = vpop.f32.mrb[22].mxu0  ;;  %v1684_v37 = vpop.f32.mrb[22].mxu1 }
 0x110   : > { %1385 = vst.msk [vmem:[%s1954_s7 + $0x38] sm:$0xf] %vm1369_vm2, %v1573_v16  ;;  %v1038_v29 = vadd.f32 %v1883_v40, %v959_v19  ;;  %v964_v30 = vmul.f32 %v1683_v25, %v1878_v38  ;;  %v1007_v33 = vadd.f32 %v1883_v40, %v928_v24  ;;  %v926_v34 = vmul.f32 %v1878_v38, %v692_v26  ;;  %v695_v39 = vpop.f32.mrb[23].mxu0  ;;  %v839_v45 = vpop.f32.mrb[23].mxu1 }
 0x111   : > { %1101 = vst.msk [vmem:[#allocation2 + $0x38] sm:$0xff] %vm1093_vm1, %v1064_v21  ;;  %1119 = vst.msk [vmem:[#allocation2 + $0xc8] sm:$0xff] %vm1093_vm1, %v1082_v22  ;;  %v962_v35 = vmul.f32 %v1878_v38, %v836_v31  ;;  %v929_v36 = vmul.f32 %v1648_v32, %v1878_v38  ;;  %v1065_v41 = vmax.f32 %v1978_v54, %v1002_v28 }
 0x112   : > { %v1083_v42 = vmax.f32 %v1981_v55, %v1038_v29  ;;  %v1043_v43 = vadd.f32 %v1883_v40, %v964_v30  ;;  %v965_v44 = vmul.f32 %v1684_v37, %v1878_v38  ;;  %v1067_v46 = vmax.f32 %v1004_v23, %v1007_v33 }
 0x113   : > { %v1005_v47 = vadd.f32 %v1883_v40, %v926_v34  ;;  %v1041_v48 = vadd.f32 %v1883_v40, %v962_v35  ;;  %v1008_v49 = vadd.f32 %v1883_v40, %v929_v36  ;;  %1102 = vst.msk [vmem:[#allocation2 + $0x40] sm:$0xff] %vm1093_vm1, %v1065_v41  ;;  %v927_v52 = vmul.f32 %v1878_v38, %v695_v39 }
 0x114   : > { %1120 = vst.msk [vmem:[#allocation2 + $0xd0] sm:$0xff] %vm1093_vm1, %v1083_v42  ;;  %v1085_v50 = vmax.f32 %v1040_v27, %v1043_v43  ;;  %v1044_v51 = vadd.f32 %v1883_v40, %v965_v44  ;;  %v963_v53 = vmul.f32 %v1878_v38, %v839_v45  ;;  %v1003_v54 = vadd.f32 %v1883_v40, %v924_v8 }
 0x115   : > { %1104 = vst.msk [vmem:[#allocation2 + $0x50] sm:$0xff] %vm1093_vm1, %v1067_v46  ;;  %v1068_v55 = vmax.f32 %v1005_v47, %v1008_v49  ;;  %v1006_v58 = vadd.f32 %v1883_v40, %v927_v52  ;;  %v1651_v60 = vpop.f32.mrb[24].mxu0  ;;  %v1687_v61 = vpop.f32.mrb[24].mxu1 }
 0x116   : > { %1122 = vst.msk [vmem:[#allocation2 + $0xe0] sm:$0xff] %vm1093_vm1, %v1085_v50  ;;  %v1086_v57 = vmax.f32 %v1041_v48, %v1044_v51  ;;  %v1042_v59 = vadd.f32 %v1883_v40, %v963_v53  ;;  %v708_v62 = vpop.f32.mrb[25].mxu0  ;;  %v852_v7 = vpop.f32.mrb[25].mxu1  ;;  %v932_v10 = vmul.f32 %v1651_v60, %v1878_v38  ;;  %v968_v22 = vmul.f32 %v1687_v61, %v1878_v38 }
 0x117   : > { %1105 = vst.msk [vmem:[#allocation2 + $0x58] sm:$0xff] %vm1093_vm1, %v1068_v55  ;;  %v1066_v2 = vmax.f32 %v1003_v54, %v1006_v58  ;;  %v930_v4 = vmul.f32 %v1878_v38, %v708_v62  ;;  %v1652_v8 = vpop.f32.mrb[26].mxu0  ;;  %v966_v11 = vmul.f32 %v1878_v38, %v852_v7  ;;  %v1688_v12 = vpop.f32.mrb[26].mxu1 }
 0x118   : > { %v1138_v63 = vld [vmem:[#allocation2 + $0x30] ss:$2 sm:$0xff]  ;;  %v1186_v0 = vld [vmem:[#allocation2 + $0x31] ss:$2 sm:$0xff]  ;;  %v1162_v1 = vld [vmem:[#allocation2 + $0xc0] ss:$2 sm:$0xff]  ;;  %v1084_v3 = vmax.f32 %v1039_v56, %v1042_v59  ;;  %v933_v17 = vmul.f32 %v1652_v8, %v1878_v38  ;;  %v969_v18 = vmul.f32 %v1688_v12, %v1878_v38  ;;  %v2056_v47 = vadd.f32 %v1883_v40, %v932_v10 }
 0x119   : > { %1123 = vst.msk [vmem:[#allocation2 + $0xe8] sm:$0xff] %vm1093_vm1, %v1086_v57  ;;  %v1229_v5 = vmax.f32 %v1138_v63, %v1186_v0  ;;  %v1210_v6 = vld [vmem:[#allocation2 + $0xc1] ss:$2 sm:$0xff]  ;;  %1103 = vst.msk [vmem:[#allocation2 + $0x48] sm:$0xff] %vm1093_vm1, %v1066_v2  ;;  %v711_v13 = vpop.f32.mrb[27].mxu0  ;;  %v1009_v16 = vadd.f32 %v1883_v40, %v930_v4  ;;  %v855_v19 = vpop.f32.mrb[27].mxu1  ;;  %v1045_v23 = vadd.f32 %v1883_v40, %v966_v11 }
 0x11a   : > { %v1241_v9 = vmax.f32 %v1162_v1, %v1210_v6  ;;  %1121 = vst.msk [vmem:[#allocation2 + $0xd8] sm:$0xff] %vm1093_vm1, %v1084_v3  ;;  %v1140_v15 = vld [vmem:[#allocation2 + $0x40] ss:$2 sm:$0xf]  ;;  %v931_v24 = vmul.f32 %v1878_v38, %v711_v13  ;;  %v1012_v29 = vadd.f32 %v1883_v40, %v933_v17  ;;  %v1048_v30 = vadd.f32 %v1883_v40, %v969_v18 }
 0x11b   : > { %v1253_v14 = vmax.f32 %v1229_v5, 0.0  ;;  %v1188_v21 = vld [vmem:[#allocation2 + $0x41] ss:$2 sm:$0xf]  ;;  %v967_v35 = vmul.f32 %v1878_v38, %v855_v19  ;;  %v2059_v48 = vadd.f32 %v1883_v40, %v968_v22 }
 0x11c   : > { %v1265_v20 = vmax.f32 %v1241_v9, 0.0  ;;  %v1230_v26 = vmax.f32 %v1140_v15, %v1188_v21  ;;  %v1164_v27 = vld [vmem:[#allocation2 + $0xd0] ss:$2 sm:$0xf]  ;;  %v1069_v41 = vmax.f32 %v1009_v16, %v1012_v29  ;;  %v1087_v42 = vmax.f32 %v1045_v23, %v1048_v30 }
 0x11d   : > { %v1563_v25 = vpack.c.bf16 %v1253_v14, %v1253_v14  ;;  %v1212_v28 = vld [vmem:[#allocation2 + $0xd1] ss:$2 sm:$0xf]  ;;  %v1655_v43 = vpop.f32.mrb[28].mxu0  ;;  %v1691_v44 = vpop.f32.mrb[28].mxu1  ;;  %v1010_v49 = vadd.f32 %v1883_v40, %v931_v24  ;;  %v1046_v63 = vadd.f32 %v1883_v40, %v967_v35 }
 0x11e   : > { %v1575_v31 = vpack.c.bf16 %v1265_v20, %v1265_v20  ;;  %v1242_v32 = vmax.f32 %v1164_v27, %v1212_v28  ;;  %v1144_v33 = vld [vmem:[#allocation2 + $0x58] ss:$2 sm:$0xf]  ;;  %v1192_v34 = vld [vmem:[#allocation2 + $0x59] ss:$2 sm:$0xf]  ;;  %v936_v0 = vmul.f32 %v1655_v43, %v1878_v38  ;;  %v972_v17 = vmul.f32 %v1691_v44, %v1878_v38 }
 0x11f   : > { %1375 = vst.msk [vmem:[%s1954_s7 + $0x10] sm:$0xf] %vm1369_vm2, %v1563_v25  ;;  %v1254_v36 = vmax.f32 %v1230_v26, 0.0  ;;  %v1232_v37 = vmax.f32 %v1144_v33, %v1192_v34  ;;  %v724_v50 = vpop.f32.mrb[29].mxu0  ;;  %v868_v51 = vpop.f32.mrb[29].mxu1 }
 0x120   : > { %v1168_v39 = vld [vmem:[#allocation2 + $0xe8] ss:$2 sm:$0xf]  ;;  %1387 = vst.msk [vmem:[%s1954_s7 + $0x40] sm:$0xf] %vm1369_vm2, %v1575_v31  ;;  %v1266_v45 = vmax.f32 %v1242_v32, 0.0  ;;  %v934_v57 = vmul.f32 %v1878_v38, %v724_v50  ;;  %v970_v9 = vmul.f32 %v1878_v38, %v868_v51 }
 0x121   : > { %v1216_v46 = vld [vmem:[#allocation2 + $0xe9] ss:$2 sm:$0xf]  ;;  %v1564_v52 = vpack.c.bf16 %v1254_v36, %v1254_v36  ;;  %v1256_v53 = vmax.f32 %v1232_v37, 0.0  ;;  %v1142_v55 = vld [vmem:[#allocation2 + $0x48] ss:$2 sm:$0xff] }
 0x122   : > { %v1244_v54 = vmax.f32 %v1168_v39, %v1216_v46  ;;  %v1190_v56 = vld [vmem:[#allocation2 + $0x49] ss:$2 sm:$0xff]  ;;  %1106 = vst.msk [vmem:[#allocation2 + $0x60] sm:$0xff] %vm1093_vm1, %v1069_v41  ;;  %1124 = vst.msk [vmem:[#allocation2 + $0xf0] sm:$0xff] %vm1093_vm1, %v1087_v42  ;;  %v1656_v58 = vpop.f32.mrb[30].mxu0  ;;  %v1576_v59 = vpack.c.bf16 %v1266_v45, %v1266_v45  ;;  %v1692_v1 = vpop.f32.mrb[30].mxu1  ;;  %v1013_v6 = vadd.f32 %v1883_v40, %v934_v57 }
 0x123   : > { %v1231_v60 = vmax.f32 %v1142_v55, %v1190_v56  ;;  %v1166_v61 = vld [vmem:[#allocation2 + $0xd8] ss:$2 sm:$0xff]  ;;  %v1214_v62 = vld [vmem:[#allocation2 + $0xd9] ss:$2 sm:$0xff]  ;;  %v727_v2 = vpop.f32.mrb[31].mxu0  ;;  %v1566_v3 = vpack.c.bf16 %v1256_v53, %v1256_v53  ;;  %v871_v7 = vpop.f32.mrb[31].mxu1  ;;  %v937_v10 = vmul.f32 %v1656_v58, %v1878_v38  ;;  %v973_v11 = vmul.f32 %v1692_v1, %v1878_v38 }
 0x124   : > { %1376 = vst.msk [vmem:[%s1954_s7 + $0x14] sm:$0x3] %vm1371_vm3, %v1564_v52  ;;  %v1268_v4 = vmax.f32 %v1244_v54, 0.0  ;;  %v1243_v5 = vmax.f32 %v1166_v61, %v1214_v62  ;;  %1388 = vst.msk [vmem:[%s1954_s7 + $0x44] sm:$0x3] %vm1371_vm3, %v1576_v59  ;;  %v1070_v14 = vmax.f32 %v1010_v49, %v1013_v6  ;;  %v935_v15 = vmul.f32 %v1878_v38, %v727_v2 }
 0x125   : > { %v1255_v8 = vmax.f32 %v1231_v60, 0.0  ;;  %1378 = vst.msk [vmem:[%s1954_s7 + $0x1c] sm:$0x3] %vm1371_vm3, %v1566_v3  ;;  %v1049_v18 = vadd.f32 %v1883_v40, %v970_v9  ;;  %v1016_v19 = vadd.f32 %v1883_v40, %v937_v10  ;;  %v1659_v20 = vpop.f32.mrb[32].mxu0  ;;  %v971_v23 = vmul.f32 %v1878_v38, %v871_v7  ;;  %v1695_v25 = vpop.f32.mrb[32].mxu1 }
 0x126   : > { %v1578_v12 = vpack.c.bf16 %v1268_v4, %v1268_v4  ;;  %v1267_v13 = vmax.f32 %v1243_v5, 0.0  ;;  %1107 = vst.msk [vmem:[#allocation2 + $0x68] sm:$0xff] %vm1093_vm1, %v1070_v14  ;;  %v1014_v22 = vadd.f32 %v1883_v40, %v935_v15  ;;  %v940_v24 = vmul.f32 %v1659_v20, %v1878_v38  ;;  %v740_v26 = vpop.f32.mrb[33].mxu0  ;;  %v884_v31 = vpop.f32.mrb[33].mxu1 }
 0x127   : > { %v1565_v16 = vpack.c.bf16 %v1255_v8, %v1255_v8  ;;  %v1088_v27 = vmax.f32 %v1046_v63, %v1049_v18  ;;  %v1052_v28 = vadd.f32 %v1883_v40, %v973_v11  ;;  %v976_v29 = vmul.f32 %v1695_v25, %v1878_v38  ;;  %v1660_v32 = vpop.f32.mrb[34].mxu0  ;;  %v1696_v37 = vpop.f32.mrb[34].mxu1 }
 0x128   : > { %1390 = vst.msk [vmem:[%s1954_s7 + $0x4c] sm:$0x3] %vm1371_vm3, %v1578_v12  ;;  %v1577_v21 = vpack.c.bf16 %v1267_v13, %v1267_v13  ;;  %v938_v30 = vmul.f32 %v1878_v38, %v740_v26  ;;  %v1071_v33 = vmax.f32 %v2056_v47, %v1014_v22  ;;  %v1050_v34 = vadd.f32 %v1883_v40, %v971_v23  ;;  %v743_v39 = vpop.f32.mrb[35].mxu0  ;;  %v887_v45 = vpop.f32.mrb[35].mxu1 }
 0x129   : > { %1377 = vst.msk [vmem:[%s1954_s7 + $0x18] sm:$0xf] %vm1369_vm2, %v1565_v16  ;;  %v1019_v35 = vadd.f32 %v1883_v40, %v940_v24  ;;  %v974_v36 = vmul.f32 %v1878_v38, %v884_v31  ;;  %v1055_v41 = vadd.f32 %v1883_v40, %v976_v29  ;;  %v941_v43 = vmul.f32 %v1660_v32, %v1878_v38 }
 0x12a   : > { %1389 = vst.msk [vmem:[%s1954_s7 + $0x48] sm:$0xf] %vm1369_vm2, %v1577_v21  ;;  %v1017_v42 = vadd.f32 %v1883_v40, %v938_v30  ;;  %v977_v44 = vmul.f32 %v1696_v37, %v1878_v38  ;;  %v1089_v46 = vmax.f32 %v2059_v48, %v1050_v34  ;;  %v939_v50 = vmul.f32 %v1878_v38, %v743_v39 }
 0x12b   : > { %1125 = vst.msk [vmem:[#allocation2 + $0xf8] sm:$0xff] %vm1093_vm1, %v1088_v27  ;;  %1108 = vst.msk [vmem:[#allocation2 + $0x70] sm:$0xff] %vm1093_vm1, %v1071_v33  ;;  %v1073_v47 = vmax.f32 %v1016_v19, %v1019_v35  ;;  %v1053_v49 = vadd.f32 %v1883_v40, %v974_v36  ;;  %v1091_v51 = vmax.f32 %v1052_v28, %v1055_v41 }
 0x12c   : > { %v1020_v52 = vadd.f32 %v1883_v40, %v941_v43  ;;  %v1056_v53 = vadd.f32 %v1883_v40, %v977_v44  ;;  %v975_v54 = vmul.f32 %v1878_v38, %v887_v45  ;;  %v1015_v55 = vadd.f32 %v1883_v40, %v936_v0  ;;  %1126 = vst.msk [vmem:[#allocation2 + $0x100] sm:$0xff] %vm1093_vm1, %v1089_v46 }
 0x12d   : > { %1110 = vst.msk [vmem:[#allocation2 + $0x80] sm:$0xff] %vm1093_vm1, %v1073_v47  ;;  %v1018_v48 = vadd.f32 %v1883_v40, %v939_v50  ;;  %v1051_v56 = vadd.f32 %v1883_v40, %v972_v17  ;;  %v1146_v57 = vld [vmem:[#allocation2 + $0x60] ss:$2 sm:$0xff]  ;;  %v1194_v58 = vld [vmem:[#allocation2 + $0x61] ss:$2 sm:$0xff]  ;;  %1128 = vst.msk [vmem:[#allocation2 + $0x110] sm:$0xff] %vm1093_vm1, %v1091_v51 }
 0x12e   : > { %v1074_v59 = vmax.f32 %v1017_v42, %v1020_v52  ;;  %v1092_v60 = vmax.f32 %v1053_v49, %v1056_v53  ;;  %v1054_v61 = vadd.f32 %v1883_v40, %v975_v54  ;;  %v1233_v62 = vmax.f32 %v1146_v57, %v1194_v58 }
 0x12f   : > { %v1072_v38 = vmax.f32 %v1015_v55, %v1018_v48 }
 0x130   : > { %1111 = vst.msk [vmem:[#allocation2 + $0x88] sm:$0xff] %vm1093_vm1, %v1074_v59  ;;  %1129 = vst.msk [vmem:[#allocation2 + $0x118] sm:$0xff] %vm1093_vm1, %v1092_v60  ;;  %v1090_v63 = vmax.f32 %v1051_v56, %v1054_v61  ;;  %v1257_v0 = vmax.f32 %v1233_v62, 0.0 }
 0x131   : > { %1109 = vst.msk [vmem:[#allocation2 + $0x78] sm:$0xff] %vm1093_vm1, %v1072_v38 }
 0x132   : > { %v1170_v1 = vld [vmem:[#allocation2 + $0xf0] ss:$2 sm:$0xff]  ;;  %v1218_v2 = vld [vmem:[#allocation2 + $0xf1] ss:$2 sm:$0xff]  ;;  %1127 = vst.msk [vmem:[#allocation2 + $0x108] sm:$0xff] %vm1093_vm1, %v1090_v63  ;;  %v1567_v40 = vpack.c.bf16 %v1257_v0, %v1257_v0 }
 0x133   : > { %v1245_v3 = vmax.f32 %v1170_v1, %v1218_v2  ;;  %v1148_v4 = vld [vmem:[#allocation2 + $0x70] ss:$2 sm:$0xf]  ;;  %v1196_v5 = vld [vmem:[#allocation2 + $0x71] ss:$2 sm:$0xf] }
 0x134   : > { %v1234_v6 = vmax.f32 %v1148_v4, %v1196_v5  ;;  %v1172_v8 = vld [vmem:[#allocation2 + $0x100] ss:$2 sm:$0xf]  ;;  %1379 = vst.msk [vmem:[%s1954_s7 + $0x20] sm:$0xf] %vm1369_vm2, %v1567_v40 }
 0x135   : > { %v1269_v7 = vmax.f32 %v1245_v3, 0.0  ;;  %v1220_v10 = vld [vmem:[#allocation2 + $0x101] ss:$2 sm:$0xf] }
 0x136   : > { %v1258_v9 = vmax.f32 %v1234_v6, 0.0  ;;  %v1246_v12 = vmax.f32 %v1172_v8, %v1220_v10 }
 0x137   : > { %v1579_v11 = vpack.c.bf16 %v1269_v7, %v1269_v7  ;;  %v1152_v14 = vld [vmem:[#allocation2 + $0x88] ss:$2 sm:$0xf]  ;;  %v1200_v15 = vld [vmem:[#allocation2 + $0x89] ss:$2 sm:$0xf] }
 0x138   : > { %v1568_v13 = vpack.c.bf16 %v1258_v9, %v1258_v9  ;;  %v1270_v16 = vmax.f32 %v1246_v12, 0.0  ;;  %v1236_v17 = vmax.f32 %v1152_v14, %v1200_v15  ;;  %v1176_v18 = vld [vmem:[#allocation2 + $0x118] ss:$2 sm:$0xf]  ;;  %v1198_v21 = vld [vmem:[#allocation2 + $0x79] ss:$2 sm:$0xff] }
 0x139   : > { %1391 = vst.msk [vmem:[%s1954_s7 + $0x50] sm:$0xf] %vm1369_vm2, %v1579_v11  ;;  %v1150_v19 = vld [vmem:[#allocation2 + $0x78] ss:$2 sm:$0xff]  ;;  %v1174_v26 = vld [vmem:[#allocation2 + $0x108] ss:$2 sm:$0xff] }
 0x13a   : > { %1380 = vst.msk [vmem:[%s1954_s7 + $0x24] sm:$0x3] %vm1371_vm3, %v1568_v13  ;;  %v1224_v20 = vld [vmem:[#allocation2 + $0x119] ss:$2 sm:$0xf]  ;;  %v1580_v22 = vpack.c.bf16 %v1270_v16, %v1270_v16  ;;  %v1260_v23 = vmax.f32 %v1236_v17, 0.0  ;;  %v1235_v25 = vmax.f32 %v1150_v19, %v1198_v21 }
 0x13b   : > { %v1248_v24 = vmax.f32 %v1176_v18, %v1224_v20  ;;  %v1222_v27 = vld [vmem:[#allocation2 + $0x109] ss:$2 sm:$0xff] }
 0x13c   : > { %v1247_v28 = vmax.f32 %v1174_v26, %v1222_v27  ;;  %1392 = vst.msk [vmem:[%s1954_s7 + $0x54] sm:$0x3] %vm1371_vm3, %v1580_v22  ;;  %v1570_v29 = vpack.c.bf16 %v1260_v23, %v1260_v23  ;;  %v1259_v31 = vmax.f32 %v1235_v25, 0.0 }
 0x13d   : > { %v1272_v30 = vmax.f32 %v1248_v24, 0.0 }
 0x13e   : > { %v1271_v32 = vmax.f32 %v1247_v28, 0.0  ;;  %1382 = vst.msk [vmem:[%s1954_s7 + $0x2c] sm:$0x3] %vm1371_vm3, %v1570_v29  ;;  %v1569_v34 = vpack.c.bf16 %v1259_v31, %v1259_v31 }
 0x13f   : > { %v1582_v33 = vpack.c.bf16 %v1272_v30, %v1272_v30 }
 0x140   : > { %v1581_v35 = vpack.c.bf16 %v1271_v32, %v1271_v32  ;;  %1381 = vst.msk [vmem:[%s1954_s7 + $0x28] sm:$0xf] %vm1369_vm2, %v1569_v34 }
 0x141   : > { %1394 = vst.msk [vmem:[%s1954_s7 + $0x5c] sm:$0x3] %vm1371_vm3, %v1582_v33 }
 0x142   : > { %1393 = vst.msk [vmem:[%s1954_s7 + $0x58] sm:$0xf] %vm1369_vm2, %v1581_v35 }
 0x143 PF: > { %s14_s15 = sadd.s32 1, %s1754_s15  }
 0x144   : > { %p11_p5 = scmp.ge.s32.totalorder %s14_s15, 4  }
 0x146   :  { %13 = sbr.rel (!%p11_p5) target bundleno = 1 (0x1), region = 113 }

// kernel: cnn_model_forward.3
= control target key start
LH: loop header
LB: loop body
LE: loop exit
PB: predicated region body
PF: predicated region fallthrough
CT: control target
= control target key end

     0   :  { %s15313_s0 = inlined_call_operand.vmem [shape: bf16[2,12,12,64], index: 0, kind: input, shape index: {}]   ;;  %s15314_s1 = inlined_call_operand.vmem [shape: bf16[25,64,64], index: 1, kind: input, shape index: {}]   ;;  %s15315_s2 = inlined_call_operand.vmem [shape: f32[1,64], index: 2, kind: input, shape index: {}]   ;;  %s15316_s3 = inlined_call_operand.vmem [shape: f32[1,64], index: 3, kind: input, shape index: {}]   ;;  %s15317_s4 = inlined_call_operand.vmem [shape: bf16[1024,128], index: 4, kind: input, shape index: {}]   ;;  %s15318_s5 = inlined_call_operand.vmem [shape: f32[1,128], index: 5, kind: input, shape index: {}]   ;;  %s15319_s6 = inlined_call_operand.vmem [shape: f32[1,128], index: 6, kind: input, shape index: {}]   ;;  %s15320_s7 = inlined_call_operand.vmem [shape: bf16[128,128], index: 7, kind: input, shape index: {}]   ;;  %s15321_s8 = inlined_call_operand.vmem [shape: f32[1,128], index: 8, kind: input, shape index: {}]   ;;  %s15322_s9 = inlined_call_operand.vmem [shape: f32[1,128], index: 9, kind: input, shape index: {}]   ;;  %s15323_s10 = inlined_call_operand.vmem [shape: bf16[128,128], index: 10, kind: input, shape index: {}]   ;;  %s15324_s11 = inlined_call_operand.vmem [shape: f32[1,128], index: 11, kind: input, shape index: {}]   ;;  %s15325_s12 = inlined_call_operand.vmem [shape: bf16[1024,128], index: 12, kind: input, shape index: {}]   ;;  %s15326_s13 = inlined_call_operand.vmem [shape: f32[1,128], index: 13, kind: input, shape index: {}]   ;;  %s15327_s14 = inlined_call_operand.vmem [shape: f32[1,128], index: 14, kind: input, shape index: {}]   ;;  %s15328_s15 = inlined_call_operand.vmem [shape: bf16[128,128], index: 15, kind: input, shape index: {}]   ;;  %s15329_s16 = inlined_call_operand.vmem [shape: f32[1,128], index: 16, kind: input, shape index: {}]   ;;  %s15330_s17 = inlined_call_operand.hbm [shape: f32[2,1,128], index: 17, kind: output, shape index: {0}]   ;;  %s15331_s18 = inlined_call_operand.hbm [shape: f32[2,1,128], index: 18, kind: output, shape index: {1}]   ;;  %s15332_s19 = inlined_call_operand.vmem [shape: f32[2,4,4,64], index: 19, kind: output, shape index: {2}]  }
   0x1   :  { %15396 = sst [smem:[#allocation70_spill]] %s15313_s0 }
   0x2   :  { %15397 = sst [smem:[#allocation71_spill]] %s15314_s1 }
   0x3   :  { %15398 = sst [smem:[#allocation72_spill]] %s15315_s2 }
   0x4   :  { %15399 = sst [smem:[#allocation73_spill]] %s15316_s3 }
   0x5   :  { %15400 = sst [smem:[#allocation74_spill]] %s15317_s4 }
   0x6   :  { %25 = vsyncpa [#allocation4], 0 }
   0x7   :  { %27 = vsyncpa [#allocation4 + $0x1], 0 }
   0x8   :  { %28 = vsyncpa [#allocation6], 0 }
   0x9   :  { %30 = vsyncpa [#allocation6 + $0x1], 0  ;;  %s11935_s0 = smov 0   ;;  %s11937_s30 = smov 0  }
   0xa   :  { %s11939_s20 = smov 0   ;;  %s11941_s21 = smov 0  }
   0xb LB: > { %15401 = sst [smem:[#allocation9_spill]] %s11817_s0  ;;  %s11956_s1 = sadd.s32 4294967295, %s11829_s21   ;;  %s11829_s21 = sphi %s11941_s21, %s15682_s21   ;;  %s11825_s20 = sphi %s11939_s20, %s15684_s20   ;;  %s11821_s30 = sphi %s11937_s30, %s15686_s30   ;;  %s11817_s0 = sphi %s11935_s0, %s15685_s0  }
   0xc   : > { %15402 = sst [smem:[#allocation10_spill]] %s11825_s20  ;;  %s8891_s22 = sadd.s32 4294967294, %s11829_s21  }
   0xd   : > { %15403 = sst [smem:[#allocation11_spill]] %s11829_s21  ;;  %s11960_s2 = sadd.s32 1, %s11829_s21  }
   0xe   : > { %15404 = sst [smem:[#allocation12_spill]] %s11960_s2  ;;  %s405_s23 = sadd.s32 1, %s11825_s20 }
   0xf   : > { %s402_s24 = ssub.s32 %s11829_s21, %s11960_s2  ;;  %p415_p0 = scmp.ne.s32.totalorder %s11825_s20, %s11821_s30 }
  0x10   : > { %p403_p1 = scmp.eq.s32.totalorder %s402_s24, 0  ;;  %p416_p2 = scmp.eq.s32.totalorder %s11956_s1, 1 }
  0x11   : > { %p421_p3 = scmp.ne.s32.totalorder %s11821_s30, %s11817_s0  ;;  %p422_p4 = scmp.eq.s32.totalorder %s8891_s22, 1 }
  0x12   : > { %s11971_s25 = scalar_select %p403_p1, %s11825_s20, %s405_s23  }
  0x13   : > { %p11973_p5 = por %p416_p2, %p415_p0  ;;  %p11977_p6 = por %p422_p4, %p421_p3 }
  0x14   : > { %15405 = sst [smem:[#allocation13_spill]] %s11971_s25  ;;  %p8894_p7 = scmp.ge.s32.totalorder %s11829_s21, 1 }
  0x15   : > { %s15407_s26 = scalar_select %p11977_p6, 1, 0 }
  0x16   : > { %p548_p8 = scmp.lt.s32.totalorder %s11829_s21, 3 }
  0x17   : > { %15408 = sst [smem:[#allocation14_spill]] %s15407_s26 }
  0x18   : > { %p549_p9 = pnand %p8894_p7, %p548_p8 }
  0x1a   : > { %552 = sbr.rel (%p549_p9) target bundleno = 2183 (0x887), region = 88 }
  0x21   : > { %s15409_s29 = sld [smem:[#allocation71_spill]]  ;;  %p612_p10 = scmp.lt.s32.totalorder %s11956_s1, 1  ;;  %vm647_vm0 = vsmask.f32 3328  ;;  %vm648_vm1 = vsmask.f32 7440 }
  0x22   : > { %s15410_s21 = sld [smem:[#allocation70_spill]]  ;;  %vm12045_vm2 = vmor %vm647_vm0, %vm648_vm1  ;;  %v15411_v29 = vmov 0  ;;  %vm807_vm3 = vcmask 523264   ;;  %vm1030_vm4 = vcmask 1042432   ;;  %vm1031_vm5 = vcmask 1046532   ;;  %s15675_s4 = sld [smem:[#allocation74_spill]] }
  0x23   : > { %s11991_s24 = scalar_select %p612_p10, %s11956_s1, 1  ;;  %v15412_v29 = vsel %vm12045_vm2, 4294967295, %v15411_v29  ;;  %vm12147_vm6 = vmor %vm1030_vm4, %vm1031_vm5  ;;  %vm1203_vm7 = vsmask.f32 2304  ;;  %vm1204_vm8 = vsmask.f32 6416 }
  0x24   : > { %15413 = vst [vmem:[#allocation15_spill] sm:$0xff] %v15412_v29  ;;  %vm12253_vm9 = vmor %vm1203_vm7, %vm1204_vm8  ;;  %vm1504_vm10 = vcmask 1041408   ;;  %vm1505_vm11 = vcmask 1045508   ;;  %vm11832_vm13 = vmmov 0   ;;  %s15676_s0 = sld [smem:[#allocation72_spill]]  ;;  %vm5966_vm14 = vcmask 519168  }
  0x25   : > { %s11408_s2 = smul.u32 96, %s11991_s24  ;;  %vm12320_vm12 = vmor %vm1504_vm10, %vm1505_vm11  ;;  %s9864_s25 = sshll.u32 %s11991_s24, 4  ;;  %vm8607_vm15 = vcmask 1040384  }
  0x26   : > { %s14486_s23 = scalar_lea.vmem %s15332_s19, %s9864_s25  ;;  %s15395_s25 = sshll.u32 %s11956_s1, 4 }
  0x27   : > { %v11455_v0 = vld [vmem:[%s15409_s29 + $0x20] sm:$0xff]   ;;  %v11456_v1 = vld [vmem:[%s15409_s29 + $0x28] sm:$0xff]   ;;  %v11457_v2 = vld [vmem:[%s15409_s29 + $0x30] sm:$0xff]   ;;  %s15238_s28 = scalar_lea.hbm %s15330_s17, %s15395_s25 }
  0x28   : > { %10252 = vmatprep.subr.bf16.mxu0 %v11455_v0  ;;  %v11458_v3 = vld [vmem:[%s15409_s29 + $0x38] sm:$0xff]   ;;  %s12003_s22 = scalar_lea.vmem %s15410_s21, %s11408_s2  ;;  %v12038_v25 = vld [vmem:[%s15409_s29] sm:$0xff]   ;;  %s15677_s2 = sld [smem:[#allocation73_spill]] }
  0x29   : > { %10253 = vmatpush3.bf16.msra.mxu0 %v11455_v0  ;;  %v12006_v4 = vld [vmem:[%s12003_s22] sm:$0xf]  ;;  %v12009_v5 = vld [vmem:[%s12003_s22 + $0x8] sm:$0xf]  ;;  %v12012_v6 = vld [vmem:[%s12003_s22 + $0x4] sm:$0x1] }
  0x2a   : > { %10254 = vmatprep.subr.bf16.mxu0 %v11456_v1  ;;  %v12015_v7 = vld [vmem:[%s12003_s22 + $0xc] sm:$0x1]  ;;  %v651_v8 = vshrl.u32 %v12006_v4, 16  ;;  %v654_v9 = vshll.u32 %v12006_v4, 16  ;;  %v660_v10 = vshll.u32 %v12012_v6, 16  ;;  %v665_v11 = vshrl.u32 %v12009_v5, 16 }
  0x2b   : > { %v668_v12 = vshll.u32 %v12009_v5, 16  ;;  %v674_v13 = vshll.u32 %v12015_v7, 16  ;;  %v12024_v14 = vld [vmem:[%s12003_s22 + $0x10] sm:$0xf]  ;;  %v12027_v19 = vld [vmem:[%s12003_s22 + $0x18] sm:$0xf] }
  0x2c   : > { %v653_v15 = vrot.slane %v651_v8, 4  ;;  %v656_v16 = vrot.slane %v654_v9, 5  ;;  %v662_v17 = vrot.slane %v660_v10, 5  ;;  %v667_v18 = vrot.slane %v665_v11, 4  ;;  %v12030_v22 = vld [vmem:[%s12003_s22 + $0x14] sm:$0x1] }
  0x2d   : > { %10255 = vmatpush3.bf16.msra.mxu0 %v11456_v1  ;;  %v670_v20 = vrot.slane %v668_v12, 5  ;;  %v676_v21 = vrot.slane %v674_v13, 5  ;;  %v12033_v23 = vld [vmem:[%s12003_s22 + $0x1c] sm:$0x1]  ;;  %v679_v26 = vshrl.u32 %v12024_v14, 16  ;;  %v682_v27 = vshll.u32 %v12024_v14, 16 }
  0x2e   : > { %10256 = vmatprep.subr.bf16.mxu0 %v11457_v2  ;;  %v657_v24 = vor.u32 %v656_v16, %v653_v15  ;;  %v688_v28 = vshll.u32 %v12030_v22, 16  ;;  %v693_v31 = vshrl.u32 %v12027_v19, 16  ;;  %v696_v32 = vshll.u32 %v12027_v19, 16  ;;  %v12053_v34 = vld [vmem:[%s12003_s22 + $0x20] sm:$0xf]  ;;  %v11460_v13 = vld [vmem:[%s15409_s29 + $0x8] sm:$0xff]  }
  0x2f   : > { %v671_v30 = vor.u32 %v670_v20, %v667_v18  ;;  %v702_v33 = vshll.u32 %v12033_v23, 16  ;;  %v681_v36 = vrot.slane %v679_v26, 4  ;;  %v684_v37 = vrot.slane %v682_v27, 5  ;;  %v12056_v38 = vld [vmem:[%s12003_s22 + $0x28] sm:$0xf]  ;;  %v11461_v26 = vld [vmem:[%s15409_s29 + $0x10] sm:$0xff]  }
  0x30   : > { %v658_v35 = vrot.slane %v657_v24, 4  ;;  %v695_v40 = vrot.slane %v693_v31, 4  ;;  %v698_v41 = vrot.slane %v696_v32, 5  ;;  %v12059_v42 = vld [vmem:[%s12003_s22 + $0x24] sm:$0x1]  ;;  %v690_v45 = vrot.slane %v688_v28, 5 }
  0x31   : > { %10257 = vmatpush3.bf16.msra.mxu0 %v11457_v2  ;;  %v672_v39 = vrot.slane %v671_v30, 4  ;;  %v685_v44 = vor.u32 %v684_v37, %v681_v36  ;;  %v704_v46 = vrot.slane %v702_v33, 5  ;;  %v12067_v49 = vld [vmem:[%s12003_s22 + $0x2c] sm:$0x1]  ;;  %v707_v50 = vshrl.u32 %v12053_v34, 16  ;;  %s11833_s21 = smov [#allocation3]  }
  0x32   : > { %10258 = vmatprep.subr.bf16.mxu0 %v11458_v3  ;;  %v663_v43 = vsel %vm12045_vm2, %v658_v35, %v662_v17  ;;  %v699_v48 = vor.u32 %v698_v41, %v695_v40  ;;  %v710_v51 = vshll.u32 %v12053_v34, 16  ;;  %v12072_v52 = vld [vmem:[%s12003_s22 + $0x30] sm:$0xf]  ;;  %v716_v55 = vshll.u32 %v12059_v42, 16  ;;  %v12077_v57 = vld [vmem:[%s12003_s22 + $0x38] sm:$0xf] }
  0x33   : > { %v677_v47 = vsel %vm12045_vm2, %v672_v39, %v676_v21  ;;  %v686_v54 = vrot.slane %v685_v44, 4  ;;  %v721_v56 = vshrl.u32 %v12056_v38, 16  ;;  %v12080_v58 = vld [vmem:[%s12003_s22 + $0x34] sm:$0x1]  ;;  %v709_v60 = vrot.slane %v707_v50, 4 }
  0x34   : > { %v8906_v53 = vcombine.low %v663_v43, %v677_v47  ;;  %v700_v59 = vrot.slane %v699_v48, 4  ;;  %v712_v61 = vrot.slane %v710_v51, 5  ;;  %v724_v62 = vshll.u32 %v12056_v38, 16  ;;  %v12084_v63 = vld [vmem:[%s12003_s22 + $0x3c] sm:$0x1]  ;;  %v11464_v51 = vld [vmem:[%s15409_s29 + $0x40] sm:$0xff]  }
  0x35   : > { %10259 = vmatpush3.bf16.msra.mxu0 %v11458_v3  ;;  %v691_v0 = vsel %vm12045_vm2, %v686_v54, %v690_v45  ;;  %v718_v1 = vrot.slane %v716_v55, 5  ;;  %v723_v2 = vrot.slane %v721_v56, 4  ;;  %v730_v3 = vshll.u32 %v12067_v49, 16  ;;  %v1007_v54 = vld [vmem:[%s12003_s22 + $0x8] sm:$0xe] }
  0x36   : > { %10268 = vmatprep.subr.bf16.mxu0 %v12038_v25  ;;  %10260 = vmatprep.mubr.msk.bf16.mxu0 %vm807_vm3, %v8906_v53  ;;  %v705_v8 = vsel %vm12045_vm2, %v700_v59, %v704_v46  ;;  %v713_v9 = vor.u32 %v712_v61, %v709_v60  ;;  %v726_v10 = vrot.slane %v724_v62, 5  ;;  %v735_v11 = vshrl.u32 %v12072_v52, 16  ;;  %v11462_v46 = vld [vmem:[%s15409_s29 + $0x18] sm:$0xff]   ;;  %v1006_v53 = vld [vmem:[%s12003_s22] sm:$0xe] }
  0x37   : > { %v8907_v12 = vcombine.low %v691_v0, %v705_v8  ;;  %v732_v15 = vrot.slane %v730_v3, 5  ;;  %v738_v16 = vshll.u32 %v12072_v52, 16  ;;  %v744_v17 = vshll.u32 %v12080_v58, 16  ;;  %v12138_v60 = vld [vmem:[%s12003_s22 + $0x20] sm:$0xe]  ;;  %v11466_v3 = vld [vmem:[%s15409_s29 + $0x48] sm:$0xff]  }
  0x38   : > { %v714_v18 = vrot.slane %v713_v9, 4  ;;  %v727_v20 = vor.u32 %v726_v10, %v723_v2  ;;  %v737_v21 = vrot.slane %v735_v11, 4  ;;  %v749_v24 = vshrl.u32 %v12077_v57, 16  ;;  %v12141_v61 = vld [vmem:[%s12003_s22 + $0x28] sm:$0xe] }
  0x39   : > { %10261 = vmatmul.mubr.msk.bf16.vlgmr.msra.gmra.mrb[0].mxu0 %vm807_vm3, %v8907_v12  ;;  %v740_v27 = vrot.slane %v738_v16, 5  ;;  %v752_v28 = vshll.u32 %v12077_v57, 16  ;;  %v758_v30 = vshll.u32 %v12084_v63, 16  ;;  %v746_v36 = vrot.slane %v744_v17, 5  ;;  %v12154_v2 = vld [vmem:[%s12003_s22 + $0x4] sm:$0x3] }
  0x3a   : > { %10269 = vmatpush3.bf16.msra.mxu0 %v12038_v25  ;;  %v719_v31 = vsel %vm12045_vm2, %v714_v18, %v718_v1  ;;  %v728_v32 = vrot.slane %v727_v20, 4  ;;  %v751_v33 = vrot.slane %v749_v24, 4  ;;  %v8918_v48 = vcombine.low %v12006_v4, %v12009_v5  ;;  %v12129_v4 = vld [vmem:[%s12003_s22 + $0x10] sm:$0xe]  ;;  %v12132_v5 = vld [vmem:[%s12003_s22 + $0x18] sm:$0xe] }
  0x3b   : > { %10270 = vmatprep.subr.bf16.mxu0 %v11460_v13  ;;  %v741_v35 = vor.u32 %v740_v27, %v737_v21  ;;  %v754_v37 = vrot.slane %v752_v28, 5  ;;  %v760_v44 = vrot.slane %v758_v30, 5  ;;  %v1035_v55 = vrot.slane %v12012_v6, 5  ;;  %v12175_v20 = vld [vmem:[%s12003_s22 + $0xc] sm:$0x3] }
  0x3c   : > { %v733_v39 = vsel %vm12045_vm2, %v728_v32, %v732_v15  ;;  %v1039_v56 = vrot.slane %v12015_v7, 5  ;;  %v8919_v59 = vcombine.low %v12024_v14, %v12027_v19  ;;  %v1043_v6 = vrot.slane %v12030_v22, 5  ;;  %v12168_v15 = vld [vmem:[%s12003_s22 + $0x30] sm:$0xe] }
  0x3d   : > { %v8908_v40 = vcombine.low %v719_v31, %v733_v39  ;;  %v742_v41 = vrot.slane %v741_v35, 4  ;;  %v755_v43 = vor.u32 %v754_v37, %v751_v33  ;;  %v1047_v7 = vrot.slane %v12033_v23, 5  ;;  %v9368_v29 = vld [vmem:[%s12003_s22 + $0x30] sm:$0xf] }
  0x3e   : > { %10271 = vmatpush3.bf16.msra.mxu0 %v11460_v13  ;;  %v8930_v62 = vrot.slane %v1006_v53, 9  ;;  %v8931_v0 = vrot.slane %v1007_v54, 9  ;;  %v15414_v1 = vmov 0  ;;  %v8932_v14 = vrot.slane %v12129_v4, 9 }
  0x3f   : > { %10264 = vmatprep.mubr.msk.bf16.mxu0 %vm807_vm3, %v8908_v40  ;;  %10272 = vmatprep.subr.bf16.mxu0 %v11461_v26  ;;  %v747_v25 = vsel %vm12045_vm2, %v742_v41, %v746_v36  ;;  %v756_v45 = vrot.slane %v755_v43, 4  ;;  %v15415_v1 = vsel %vm12147_vm6, 4294967295, %v15414_v1  ;;  %v8933_v19 = vrot.slane %v12132_v5, 9  ;;  %v11468_v36 = vld [vmem:[%s15409_s29 + $0x50] sm:$0xff]  }
  0x40   : > { %15416 = vst [vmem:[#allocation16_spill] sm:$0xff] %v15415_v1  ;;  %v1207_v22 = vshrl.u32 %v1006_v53, 16  ;;  %v1210_v23 = vshll.u32 %v1006_v53, 16  ;;  %v8934_v8 = vrot.slane %v12138_v60, 9  ;;  %v1051_v9 = vrot.slane %v12059_v42, 5 }
  0x41   : > { %v761_v47 = vsel %vm12045_vm2, %v756_v45, %v760_v44  ;;  %v8935_v10 = vrot.slane %v12141_v61, 9  ;;  %v1055_v11 = vrot.slane %v12067_v49, 5  ;;  %v8920_v12 = vcombine.low %v12053_v34, %v12056_v38  ;;  %v12214_v45 = vld [vmem:[%s12003_s22 + $0x14] sm:$0x3] }
  0x42   : > { %v8909_v50 = vcombine.low %v747_v25, %v761_v47  ;;  %10273 = vmatpush3.bf16.msra.mxu0 %v11461_v26  ;;  %v8921_v13 = vcombine.low %v12072_v52, %v12077_v57  ;;  %v1225_v16 = vshrl.u32 %v1007_v54, 16  ;;  %v1228_v17 = vshll.u32 %v1007_v54, 16  ;;  %v12188_v52 = vld [vmem:[%s12003_s22 + $0x38] sm:$0xe] }
  0x43   : > { %10274 = vmatprep.subr.bf16.mxu0 %v11462_v46  ;;  %v1036_v18 = vsel %vm12147_vm6, %v8930_v62, %v1035_v55  ;;  %v1040_v42 = vsel %vm12147_vm6, %v8931_v0, %v1039_v56  ;;  %v1216_v49 = vshrl.u32 %v12154_v2, 16  ;;  %v1219_v21 = vshll.u32 %v12154_v2, 16  ;;  %v11470_v54 = vld [vmem:[%s15409_s29 + $0x58] sm:$0xff]   ;;  %v12236_v62 = vld [vmem:[%s12003_s22 + $0x24] sm:$0x3] }
  0x44   : > { %10265 = vmatmul.mubr.msk.bf16.gmra.mrb[4].mxu0 %vm807_vm3, %v8909_v50  ;;  %v12181_v34 = vsel %vm12147_vm6, %v8932_v14, %v1043_v6  ;;  %v12185_v38 = vsel %vm12147_vm6, %v8933_v19, %v1047_v7  ;;  %v1209_v57 = vrot.slane %v1207_v22, 5  ;;  %v1212_v24 = vrot.slane %v1210_v23, 6  ;;  %v12242_v23 = vld [vmem:[%s12003_s22 + $0x2c] sm:$0x3] }
  0x45   : > { %10276 = vmatprep.mubr.msk.bf16.mxu0 %vm807_vm3, %v8918_v48  ;;  %v12193_v26 = vsel %vm12147_vm6, %v8934_v8, %v1051_v9  ;;  %v12197_v27 = vsel %vm12147_vm6, %v8935_v10, %v1055_v11  ;;  %v8936_v28 = vrot.slane %v12168_v15, 9  ;;  %v1059_v30 = vrot.slane %v12080_v58, 5 }
  0x46   : > { %10275 = vmatpush3.bf16.msra.mxu0 %v11462_v46  ;;  %v1227_v31 = vrot.slane %v1225_v16, 5  ;;  %v1230_v32 = vrot.slane %v1228_v17, 6  ;;  %v1234_v33 = vshrl.u32 %v12175_v20, 16  ;;  %v1237_v35 = vshll.u32 %v12175_v20, 16 }
  0x47   : > { %10284 = vmatprep.subr.bf16.mxu0 %v11464_v51  ;;  %v8937_v37 = vrot.slane %v12188_v52, 9  ;;  %v1063_v39 = vrot.slane %v12084_v63, 5  ;;  %v1218_v58 = vrot.slane %v1216_v49, 5  ;;  %v1221_v40 = vrot.slane %v1219_v21, 6 }
  0x48   : > { %v8946_v41 = vcombine.low %v1036_v18, %v1040_v42  ;;  %v1213_v43 = vor.u32 %v1212_v24, %v1209_v57  ;;  %v8947_v44 = vcombine.low %v12181_v34, %v12185_v38  ;;  %v8948_v25 = vcombine.low %v12193_v26, %v12197_v27  ;;  %v12291_v26 = vld [vmem:[%s12003_s22 + $0x3c] sm:$0x3] }
  0x49   : > { %v1243_v46 = vshrl.u32 %v12129_v4, 16  ;;  %v1246_v63 = vshll.u32 %v12129_v4, 16  ;;  %v1231_v47 = vor.u32 %v1230_v32, %v1227_v31  ;;  %v1236_v48 = vrot.slane %v1234_v33, 5 }
  0x4a   : > { %v1239_v50 = vrot.slane %v1237_v35, 6  ;;  %v1261_v53 = vshrl.u32 %v12132_v5, 16  ;;  %v12227_v55 = vsel %vm12147_vm6, %v8936_v28, %v1059_v30  ;;  %v12231_v56 = vsel %vm12147_vm6, %v8937_v37, %v1063_v39 }
  0x4b   : > { %v1222_v4 = vor.u32 %v1221_v40, %v1218_v58  ;;  %v1214_v6 = vrot.slane %v1213_v43, 4  ;;  %v1252_v7 = vshrl.u32 %v12214_v45, 16  ;;  %v1279_v0 = vshrl.u32 %v12138_v60, 16 }
  0x4c   : > { %10277 = vmatmul.mubr.msk.bf16.vlgmr.msra.gmra.mrb[0].mxu0 %vm807_vm3, %v8919_v59  ;;  %v1264_v59 = vshll.u32 %v12132_v5, 16  ;;  %v1282_v14 = vshll.u32 %v12138_v60, 16  ;;  %v1245_v19 = vrot.slane %v1243_v46, 5  ;;  %v1248_v22 = vrot.slane %v1246_v63, 6  ;;  %v11471_v5 = vld [vmem:[%s15409_s29 + $0x60] sm:$0xff]  }
  0x4d   : > { %10285 = vmatpush3.bf16.msra.mxu0 %v11464_v51  ;;  %10280 = vmatprep.mubr.msk.bf16.mxu0 %vm807_vm3, %v8920_v12  ;;  %v12219_v51 = vld [vmem:[%s12003_s22 + $0x1c] sm:$0x3]  ;;  %v1300_v8 = vshll.u32 %v12141_v61, 16  ;;  %v1232_v9 = vrot.slane %v1231_v47, 4  ;;  %v1240_v10 = vor.u32 %v1239_v50, %v1236_v48  ;;  %v1255_v60 = vshll.u32 %v12214_v45, 16 }
  0x4e   : > { %10286 = vmatprep.subr.bf16.mxu0 %v11466_v3  ;;  %v1263_v11 = vrot.slane %v1261_v53, 5  ;;  %v15417_v12 = vmov 0  ;;  %v1273_v16 = vshll.u32 %v12219_v51, 16  ;;  %v1288_v17 = vshrl.u32 %v12236_v62, 16 }
  0x4f   : > { %v15418_v12 = vsel %vm12253_vm9, 4294967295, %v15417_v12  ;;  %v1281_v18 = vrot.slane %v1279_v0, 5  ;;  %v1284_v42 = vrot.slane %v1282_v14, 6  ;;  %v1291_v49 = vshll.u32 %v12236_v62, 16 }
  0x50   : > { %15419 = vst [vmem:[#allocation17_spill] sm:$0xff] %v15418_v12  ;;  %v1306_v21 = vshrl.u32 %v12242_v23, 16  ;;  %v1254_v57 = vrot.slane %v1252_v7, 5  ;;  %v1302_v28 = vrot.slane %v1300_v8, 6  ;;  %v1309_v30 = vshll.u32 %v12242_v23, 16 }
  0x51   : > { %10287 = vmatpush3.bf16.msra.mxu0 %v11466_v3  ;;  %v1297_v3 = vshrl.u32 %v12141_v61, 16  ;;  %v1266_v61 = vrot.slane %v1264_v59, 6  ;;  %v1223_v31 = vsel %vm12253_vm9, %v1214_v6, %v1222_v4  ;;  %v1241_v32 = vsel %vm12253_vm9, %v1232_v9, %v1240_v10  ;;  %v11474_v9 = vld [vmem:[%s15409_s29 + $0x78] sm:$0xff]  }
  0x52   : > { %10288 = vmatprep.subr.bf16.mxu0 %v11468_v36  ;;  %v1249_v33 = vor.u32 %v1248_v22, %v1245_v19  ;;  %v1257_v35 = vrot.slane %v1255_v60, 6  ;;  %v1275_v58 = vrot.slane %v1273_v16, 6  ;;  %v1290_v40 = vrot.slane %v1288_v17, 5 }
  0x53   : > { %v1299_v24 = vrot.slane %v1297_v3, 5  ;;  %v1267_v37 = vor.u32 %v1266_v61, %v1263_v11  ;;  %v1285_v43 = vor.u32 %v1284_v42, %v1281_v18  ;;  %v1293_v46 = vrot.slane %v1291_v49, 6 }
  0x54   : > { %10281 = vmatmul.mubr.msk.bf16.gmra.mrb[4].mxu0 %vm807_vm3, %v8921_v13  ;;  %v1270_v13 = vshrl.u32 %v12219_v51, 16  ;;  %v1308_v63 = vrot.slane %v1306_v21, 5  ;;  %v1315_v47 = vshrl.u32 %v12168_v15, 16  ;;  %v1311_v50 = vrot.slane %v1309_v30, 6  ;;  %v11475_v21 = vld [vmem:[%s15409_s29 + $0x80] sm:$0xff]  }
  0x55   : > { %10289 = vmatpush3.bf16.msra.mxu0 %v11468_v36  ;;  %10292 = vmatprep.mubr.msk.bf16.mxu0 %vm807_vm3, %v8946_v41  ;;  %v11472_v36 = vld [vmem:[%s15409_s29 + $0x68] sm:$0xff]   ;;  %v12271_v41 = vld [vmem:[%s12003_s22 + $0x34] sm:$0x3]  ;;  %v1303_v48 = vor.u32 %v1302_v28, %v1299_v24  ;;  %v1318_v53 = vshll.u32 %v12168_v15, 16  ;;  %v8949_v34 = vcombine.low %v12227_v55, %v12231_v56  ;;  %v8966_v38 = vcombine.low %v1223_v31, %v1241_v32 }
  0x56   : > { %10290 = vmatprep.subr.bf16.mxu0 %v11470_v54  ;;  %v1272_v39 = vrot.slane %v1270_v13, 5  ;;  %v1336_v4 = vshll.u32 %v12188_v52, 16  ;;  %v1250_v15 = vrot.slane %v1249_v33, 4  ;;  %v1258_v59 = vor.u32 %v1257_v35, %v1254_v57  ;;  %v1480_v57 = vld [vmem:[%s12003_s22] sm:$0xc]  ;;  %v11476_v31 = vld [vmem:[%s15409_s29 + $0x88] sm:$0xff]  }
  0x57   : > { %v1268_v6 = vrot.slane %v1267_v37, 4  ;;  %v1286_v27 = vrot.slane %v1285_v43, 4  ;;  %v1324_v0 = vshrl.u32 %v12271_v41, 16  ;;  %v1327_v14 = vshll.u32 %v12271_v41, 16  ;;  %v1481_v24 = vld [vmem:[%s12003_s22 + $0x8] sm:$0xc] }
  0x58   : > { %v1276_v7 = vor.u32 %v1275_v58, %v1272_v39  ;;  %v1294_v19 = vor.u32 %v1293_v46, %v1290_v40  ;;  %v1304_v55 = vrot.slane %v1303_v48, 4  ;;  %v1312_v56 = vor.u32 %v1311_v50, %v1308_v63 }
  0x59   : > { %10291 = vmatpush3.bf16.msra.mxu0 %v11470_v54  ;;  %v11473_v54 = vld [vmem:[%s15409_s29 + $0x70] sm:$0xff]   ;;  %v1320_v22 = vrot.slane %v1318_v53, 6  ;;  %v1342_v8 = vshrl.u32 %v12291_v26, 16  ;;  %v1259_v10 = vsel %vm12253_vm9, %v1250_v15, %v1258_v59  ;;  %v1326_v13 = vrot.slane %v1324_v0, 5  ;;  %v1484_v53 = vld [vmem:[%s12003_s22 + $0x20] sm:$0xc] }
  0x5a   : > { %10300 = vmatprep.subr.bf16.mxu0 %v11471_v5  ;;  %v1277_v60 = vsel %vm12253_vm9, %v1268_v6, %v1276_v7  ;;  %v1295_v11 = vsel %vm12253_vm9, %v1286_v27, %v1294_v19  ;;  %v1313_v61 = vsel %vm12253_vm9, %v1304_v55, %v1312_v56  ;;  %v1329_v16 = vrot.slane %v1327_v14, 6  ;;  %v11478_v15 = vld [vmem:[%s15409_s29 + $0x98] sm:$0xff]   ;;  %v11479_v55 = vld [vmem:[%s15409_s29 + $0xa0] sm:$0xff]  }
  0x5b   : > { %v1344_v42 = vrot.slane %v1342_v8, 5  ;;  %v8967_v28 = vcombine.low %v1259_v10, %v1277_v60  ;;  %v8968_v30 = vcombine.low %v1295_v11, %v1313_v61  ;;  %v8978_v37 = vrot.slane %v1480_v57, 10  ;;  %v1487_v19 = vld [vmem:[%s12003_s22 + $0x38] sm:$0xc]  ;;  %v12368_v60 = vld [vmem:[%s12003_s22 + $0xc] sm:$0x1] }
  0x5c   : > { %10293 = vmatmul.mubr.msk.bf16.vlgmr.msra.gmra.mrb[0].mxu0 %vm807_vm3, %v8947_v44  ;;  %v1333_v44 = vshrl.u32 %v12188_v52, 16  ;;  %v1338_v52 = vrot.slane %v1336_v4, 6  ;;  %v1330_v33 = vor.u32 %v1329_v16, %v1326_v13  ;;  %v1509_v39 = vrot.slane %v12154_v2, 6  ;;  %v1482_v2 = vld [vmem:[%s12003_s22 + $0x10] sm:$0xc]  ;;  %v11480_v61 = vld [vmem:[%s15409_s29 + $0xa8] sm:$0xff]  }
  0x5d   : > { %10301 = vmatpush3.bf16.msra.mxu0 %v11471_v5  ;;  %10296 = vmatprep.mubr.msk.bf16.mxu0 %vm807_vm3, %v8948_v25  ;;  %v1317_v25 = vrot.slane %v1315_v47, 5  ;;  %v1345_v5 = vshll.u32 %v12291_v26, 16  ;;  %v8979_v58 = vrot.slane %v1481_v24, 10  ;;  %v1513_v40 = vrot.slane %v12175_v20, 6  ;;  %v1483_v47 = vld [vmem:[%s12003_s22 + $0x18] sm:$0xc] }
  0x5e   : > { %10302 = vmatprep.subr.bf16.mxu0 %v11472_v36  ;;  %v1335_v3 = vrot.slane %v1333_v44, 5  ;;  %v15420_v43 = vmov 0  ;;  %v11477_v20 = vld [vmem:[%s15409_s29 + $0x90] sm:$0xff]   ;;  %v1510_v48 = vsel %vm12320_vm12, %v8978_v37, %v1509_v39  ;;  %v1517_v44 = vrot.slane %v12214_v45, 6  ;;  %v9038_v13 = vld [vmem:[%s12003_s22 + $0x18] sm:$0xf] }
  0x5f   : > { %v1321_v17 = vor.u32 %v1320_v22, %v1317_v25  ;;  %v1347_v49 = vrot.slane %v1345_v5, 6  ;;  %v15421_v43 = vsel %vm12320_vm12, 4294967295, %v15420_v43  ;;  %v1514_v50 = vsel %vm12320_vm12, %v8979_v58, %v1513_v40  ;;  %v1486_v25 = vld [vmem:[%s12003_s22 + $0x30] sm:$0xc]  ;;  %v9034_v5 = vld [vmem:[%s12003_s22 + $0x8] sm:$0xf] }
  0x60   : > { %v1339_v18 = vor.u32 %v1338_v52, %v1335_v3  ;;  %15422 = vst [vmem:[#allocation18_spill] sm:$0xff] %v15421_v43  ;;  %v8981_v4 = vrot.slane %v1483_v47, 10  ;;  %v8994_v59 = vcombine.low %v1510_v48, %v1514_v50  ;;  %v1521_v6 = vrot.slane %v12219_v51, 6  ;;  %v12371_v11 = vld [vmem:[%s12003_s22 + $0x14] sm:$0x1] }
  0x61   : > { %10303 = vmatpush3.bf16.msra.mxu0 %v11472_v36  ;;  %v1322_v32 = vrot.slane %v1321_v17, 4  ;;  %v1348_v36 = vor.u32 %v1347_v49, %v1344_v42  ;;  %v8982_v7 = vrot.slane %v1484_v53, 10  ;;  %v1525_v27 = vrot.slane %v12236_v62, 6  ;;  %v9040_v49 = vld [vmem:[%s12003_s22 + $0x20] sm:$0xf] }
  0x62   : > { %10304 = vmatprep.subr.bf16.mxu0 %v11473_v54  ;;  %v1340_v35 = vrot.slane %v1339_v18, 4  ;;  %v1529_v14 = vrot.slane %v12242_v23, 6  ;;  %v1522_v51 = vsel %vm12320_vm12, %v8981_v4, %v1521_v6  ;;  %v8984_v23 = vrot.slane %v1486_v25, 10  ;;  %v11483_v37 = vld [vmem:[%s12003_s22 + $0x8] ss:$8 sps:$4 sm:$0xff]  }
  0x63   : > { %v1331_v46 = vsel %vm12253_vm9, %v1322_v32, %v1330_v33  ;;  %v1526_v62 = vsel %vm12320_vm12, %v8982_v7, %v1525_v27  ;;  %v1533_v22 = vrot.slane %v12271_v41, 6  ;;  %v8985_v3 = vrot.slane %v1487_v19, 10  ;;  %v12400_v50 = vld [vmem:[%s12003_s22 + $0x1c] sm:$0x1]  ;;  %v12404_v7 = vld [vmem:[%s12003_s22 + $0x24] sm:$0x1] }
  0x64   : > { %10297 = vmatmul.mubr.msk.bf16.gmra.mrb[4].mxu0 %vm807_vm3, %v8949_v34  ;;  %v1349_v63 = vsel %vm12253_vm9, %v1340_v35, %v1348_v36  ;;  %v1537_v52 = vrot.slane %v12291_v26, 6  ;;  %v1833_v16 = vshrl.u32 %v9034_v5, 16  ;;  %v1836_v17 = vshll.u32 %v9034_v5, 16  ;;  %v9044_v36 = vld [vmem:[%s12003_s22 + $0x30] sm:$0xf] }
  0x65   : > { %10305 = vmatpush3.bf16.msra.mxu0 %v11473_v54  ;;  %10308 = vmatprep.mubr.msk.bf16.mxu0 %vm807_vm3, %v8966_v38  ;;  %v1485_v54 = vld [vmem:[%s12003_s22 + $0x28] sm:$0xc]  ;;  %v8969_v34 = vcombine.low %v1331_v46, %v1349_v63  ;;  %v8980_v38 = vrot.slane %v1482_v2, 10  ;;  %v1534_v41 = vsel %vm12320_vm12, %v8984_v23, %v1533_v22  ;;  %v1856_v57 = vshll.u32 %v12371_v11, 16  ;;  %v11482_v63 = vld [vmem:[%s15409_s29 + $0xb8] sm:$0xff]  }
  0x66   : > { %10306 = vmatprep.subr.bf16.mxu0 %v11474_v9  ;;  %v8983_v0 = vrot.slane %v1485_v54, 10  ;;  %v1538_v26 = vsel %vm12320_vm12, %v8985_v3, %v1537_v52  ;;  %v1861_v24 = vshrl.u32 %v9038_v13, 16  ;;  %v1875_v33 = vshrl.u32 %v9040_v49, 16  ;;  %v12407_v27 = vld [vmem:[%s12003_s22 + $0x2c] sm:$0x1] }
  0x67   : > { %v1518_v45 = vsel %vm12320_vm12, %v8980_v38, %v1517_v44  ;;  %v8997_v32 = vcombine.low %v1534_v41, %v1538_v26  ;;  %v1878_v35 = vshll.u32 %v9040_v49, 16  ;;  %v1835_v39 = vrot.slane %v1833_v16, 4  ;;  %v12413_v19 = vld [vmem:[%s12003_s22 + $0x34] sm:$0x1]  ;;  %v11487_v41 = vld [vmem:[%s12003_s22 + $0x28] ss:$8 sps:$4 sm:$0xff]  }
  0x68   : > { %v1530_v56 = vsel %vm12320_vm12, %v8983_v0, %v1529_v14  ;;  %v8995_v8 = vcombine.low %v1518_v45, %v1522_v51  ;;  %v1838_v58 = vrot.slane %v1836_v17, 5  ;;  %v12397_v47 = vrot.slane %v1856_v57, 5  ;;  %v9048_v14 = vld [vmem:[%s12003_s22 + $0x40] sm:$0xf]  ;;  %v11486_v57 = vld [vmem:[%s15409_s29 + $0xc8] sm:$0xff]  }
  0x69   : > { %10307 = vmatpush3.bf16.msra.mxu0 %v11474_v9  ;;  %v9036_v9 = vld [vmem:[%s12003_s22 + $0x10] sm:$0xf]  ;;  %v8996_v10 = vcombine.low %v1526_v62, %v1530_v56  ;;  %v1863_v53 = vrot.slane %v1861_v24, 4  ;;  %v1906_v38 = vshll.u32 %v9044_v36, 16  ;;  %v1877_v44 = vrot.slane %v1875_v33, 4 }
  0x6a   : > { %10316 = vmatprep.subr.bf16.mxu0 %v11475_v21  ;;  %v1847_v18 = vshrl.u32 %v9036_v9, 16  ;;  %v1850_v42 = vshll.u32 %v9036_v9, 16  ;;  %v1880_v4 = vrot.slane %v1878_v35, 5  ;;  %v11485_v56 = vld [vmem:[%s12003_s22 + $0x18] ss:$8 sps:$4 sm:$0xff]   ;;  %v1870_v3 = vshll.u32 %v12400_v50, 16 }
  0x6b   : > { %v1908_v51 = vrot.slane %v1906_v38, 5  ;;  %v1898_v26 = vshll.u32 %v12407_v27, 16  ;;  %v13594_v43 = vld [vmem:[%s12003_s22 + $0x38] sm:$0xc] }
  0x6c   : > { %10309 = vmatmul.mubr.msk.bf16.vlgmr.msra.gmra.mrb[0].mxu0 %vm807_vm3, %v8967_v28  ;;  %v1864_v28 = vshll.u32 %v9038_v13, 16  ;;  %v1849_v40 = vrot.slane %v1847_v18, 4  ;;  %v1852_v46 = vrot.slane %v1850_v42, 5  ;;  %v1881_v52 = vor.u32 %v1880_v4, %v1877_v44  ;;  %v12425_v18 = vld [vmem:[%s12003_s22 + $0x3c] sm:$0x1]  ;;  %15492 = vst [vmem:[#allocation51_spill] sm:$0xff] %v13594_v43 }
  0x6d   : > { %10317 = vmatpush3.bf16.msra.mxu0 %v11475_v21  ;;  %10312 = vmatprep.mubr.msk.bf16.mxu0 %vm807_vm3, %v8968_v30  ;;  %v1842_v21 = vshll.u32 %v12368_v60, 16  ;;  %v9042_v30 = vld [vmem:[%s12003_s22 + $0x28] sm:$0xf]  ;;  %v1912_v13 = vshll.u32 %v12413_v19, 16  ;;  %v12428_v42 = vld [vmem:[%s12003_s22 + $0x44] sm:$0x1] }
  0x6e   : > { %10318 = vmatprep.subr.bf16.mxu0 %v11476_v31  ;;  %v1892_v48 = vshll.u32 %v9042_v30, 16  ;;  %v1866_v54 = vrot.slane %v1864_v28, 5  ;;  %v1853_v6 = vor.u32 %v1852_v46, %v1849_v40  ;;  %v1872_v28 = vrot.slane %v1870_v3, 5 }
  0x6f   : > { %v12395_v2 = vrot.slane %v1842_v21, 5  ;;  %v1926_v40 = vshll.u32 %v12425_v18, 16  ;;  %v1940_v46 = vshll.u32 %v12428_v42, 16 }
  0x70   : > { %v1894_v0 = vrot.slane %v1892_v48, 5  ;;  %v1867_v22 = vor.u32 %v1866_v54, %v1863_v53  ;;  %v1854_v9 = vrot.slane %v1853_v6, 4  ;;  %v9071_v48 = vld [vmem:[%s12003_s22 + $0x10] sm:$0xe]  ;;  %v12449_v53 = vld [vmem:[%s12003_s22 + $0x18] sm:$0xe] }
  0x71   : > { %10319 = vmatpush3.bf16.msra.mxu0 %v11476_v31  ;;  %v11481_v31 = vld [vmem:[%s15409_s29 + $0xb0] sm:$0xff]   ;;  %v11489_v54 = vld [vmem:[%s12003_s22 + $0x38] ss:$8 sps:$4 sm:$0xff]   ;;  %v12461_v6 = vrot.slane %v1940_v46, 5 }
  0x72   : > { %10320 = vmatprep.subr.bf16.mxu0 %v11477_v20  ;;  %v1868_v24 = vrot.slane %v1867_v22, 4  ;;  %v1859_v33 = vsel %vm12045_vm2, %v1854_v9, %v12397_v47  ;;  %v12476_v22 = vld [vmem:[%s12003_s22 + $0x28] sm:$0xe]  ;;  %v11491_v9 = vld [vmem:[%s15409_s29 + $0xe0] sm:$0xff]  }
  0x74   : > { %10313 = vmatmul.mubr.msk.bf16.gmra.mrb[4].mxu0 %vm807_vm3, %v8969_v34  ;;  %v1903_v34 = vshrl.u32 %v9044_v36, 16  ;;  %v1873_v38 = vsel %vm12045_vm2, %v1868_v24, %v1872_v28 }
  0x75   : > { %10321 = vmatpush3.bf16.msra.mxu0 %v11477_v20  ;;  %10324 = vmatprep.mubr.msk.bf16.mxu0 %vm807_vm3, %v8994_v59  ;;  %v1889_v20 = vshrl.u32 %v9042_v30, 16  ;;  %v1839_v59 = vor.u32 %v1838_v58, %v1835_v39  ;;  %v1882_v30 = vrot.slane %v1881_v52, 4  ;;  %v1900_v39 = vrot.slane %v1898_v26, 5 }
  0x76   : > { %10322 = vmatprep.subr.bf16.mxu0 %v11478_v15  ;;  %v1905_v45 = vrot.slane %v1903_v34, 4  ;;  %v1914_v58 = vrot.slane %v1912_v13, 5  ;;  %v2116_v26 = vrot.slane %v12407_v27, 5  ;;  %v12492_v13 = vld [vmem:[%s12003_s22 + $0xc] sm:$0x3] }
  0x77   : > { %v1891_v25 = vrot.slane %v1889_v20, 4  ;;  %v1840_v5 = vrot.slane %v1839_v59, 4  ;;  %v9070_v20 = vld [vmem:[%s12003_s22 + $0x8] sm:$0xe]  ;;  %v12459_v59 = vrot.slane %v1926_v40, 5  ;;  %v2120_v40 = vrot.slane %v12413_v19, 5 }
  0x78   : > { %v1909_v17 = vor.u32 %v1908_v51, %v1905_v45  ;;  %v9079_v51 = vrot.slane %v9071_v48, 9  ;;  %v2272_v3 = vshll.u32 %v9070_v20, 16  ;;  %v2308_v19 = vshll.u32 %v12449_v53, 16 }
  0x79   : > { %10323 = vmatpush3.bf16.msra.mxu0 %v11478_v15  ;;  %v9046_v15 = vld [vmem:[%s12003_s22 + $0x38] sm:$0xf]  ;;  %v1895_v16 = vor.u32 %v1894_v0, %v1891_v25  ;;  %v9078_v25 = vrot.slane %v9070_v20, 9  ;;  %v2100_v0 = vrot.slane %v12368_v60, 5  ;;  %v2269_v60 = vshrl.u32 %v9070_v20, 16 }
  0x7a   : > { %10332 = vmatprep.subr.bf16.mxu0 %v11479_v55  ;;  %v1917_v62 = vshrl.u32 %v9046_v15, 16  ;;  %v1920_v23 = vshll.u32 %v9046_v15, 16  ;;  %v11490_v15 = vld [vmem:[%s15409_s29 + $0xd8] sm:$0xff]  }
  0x7b   : > { %v12506_v27 = vsel %vm12147_vm6, %v9078_v25, %v2100_v0  ;;  %v12555_v0 = vld [vmem:[%s12003_s22 + $0x24] sm:$0x3] }
  0x7c   : > { %10325 = vmatmul.mubr.msk.bf16.vlgmr.msra.gmra.mrb[0].mxu0 %vm807_vm3, %v8995_v8  ;;  %v1884_v8 = vshll.u32 %v12404_v7, 16  ;;  %v1919_v49 = vrot.slane %v1917_v62, 4  ;;  %v1922_v21 = vrot.slane %v1920_v23, 5  ;;  %v2104_v62 = vrot.slane %v12371_v11, 5 }
  0x7d   : > { %10333 = vmatpush3.bf16.msra.mxu0 %v11479_v55  ;;  %10328 = vmatprep.mubr.msk.bf16.mxu0 %vm807_vm3, %v8996_v10  ;;  %v11484_v55 = vld [vmem:[%s15409_s29 + $0xc0] sm:$0xff]   ;;  %v1931_v10 = vshrl.u32 %v9048_v14, 16  ;;  %v9080_v23 = vrot.slane %v12449_v53, 9 }
  0x7e   : > { %10334 = vmatprep.subr.bf16.mxu0 %v11480_v61  ;;  %v1923_v47 = vor.u32 %v1922_v21, %v1919_v49  ;;  %v12498_v49 = vld [vmem:[%s12003_s22 + $0x40] sm:$0xe]  ;;  %v2271_v21 = vrot.slane %v2269_v60, 5  ;;  %v12510_v28 = vsel %vm12147_vm6, %v9079_v51, %v2104_v62 }
  0x7f   : > { %v1933_v35 = vrot.slane %v1931_v10, 4  ;;  %v2287_v10 = vshrl.u32 %v9071_v48, 16 }
  0x80   : > { %v12467_v45 = vrot.slane %v1923_v47, 4 }
  0x81   : > { %10335 = vmatpush3.bf16.msra.mxu0 %v11480_v61  ;;  %v1934_v61 = vshll.u32 %v9048_v14, 16  ;;  %v12465_v14 = vld [vmem:[%s12003_s22 + $0x20] sm:$0xe] }
  0x82   : > { %10336 = vmatprep.subr.bf16.mxu0 %v11481_v31  ;;  %v9081_v11 = vrot.slane %v12465_v14, 9  ;;  %v1929_v24 = vsel %vm12045_vm2, %v12467_v45, %v12459_v59  ;;  %v2323_v62 = vshrl.u32 %v12465_v14, 16 }
  0x83   : > { %v1936_v36 = vrot.slane %v1934_v61, 5  ;;  %v2290_v61 = vshll.u32 %v9071_v48, 16 }
  0x84   : > { %10329 = vmatmul.mubr.msk.bf16.gmra.mrb[4].mxu0 %vm807_vm3, %v8997_v32  ;;  %v1845_v32 = vsel %vm12045_vm2, %v1840_v5, %v12395_v2  ;;  %v1910_v2 = vrot.slane %v1909_v17, 4  ;;  %v2112_v5 = vrot.slane %v12404_v7, 5  ;;  %v12495_v17 = vld [vmem:[%s12003_s22 + $0x38] sm:$0xe] }
  0x85   : > { %10337 = vmatpush3.bf16.msra.mxu0 %v11481_v31  ;;  %10340 = vmatprep.mubr.msk.bf16.mxu0 %vm807_vm3, %v11483_v37  ;;  %v1886_v31 = vrot.slane %v1884_v8, 5  ;;  %v11488_v37 = vld [vmem:[%s15409_s29 + $0xd0] sm:$0xff]   ;;  %v9058_v34 = vcombine.low %v1845_v32, %v1859_v33  ;;  %v1937_v4 = vor.u32 %v1936_v36, %v1933_v35  ;;  %v2108_v8 = vrot.slane %v12400_v50, 5  ;;  %v11492_v32 = vld [vmem:[%s15409_s29 + $0xe8] sm:$0xff]  }
  0x86   : > { %10338 = vmatprep.subr.bf16.mxu0 %v11482_v63  ;;  %v9082_v50 = vrot.slane %v12476_v22, 9  ;;  %v2278_v33 = vshrl.u32 %v12492_v13, 16  ;;  %v2281_v35 = vshll.u32 %v12492_v13, 16  ;;  %v2289_v36 = vrot.slane %v2287_v10, 5 }
  0x87   : > { %v1887_v44 = vsel %vm12045_vm2, %v1882_v30, %v1886_v31  ;;  %v1938_v52 = vrot.slane %v1937_v4, 4  ;;  %v12514_v30 = vsel %vm12147_vm6, %v9080_v23, %v2108_v8  ;;  %v12517_v31 = vld [vmem:[%s12003_s22 + $0x14] sm:$0x3]  ;;  %v9084_v46 = vrot.slane %v12495_v17, 9 }
  0x88   : > { %v9059_v7 = vcombine.low %v1873_v38, %v1887_v44  ;;  %v2296_v20 = vshrl.u32 %v12517_v31, 16  ;;  %v2299_v48 = vshll.u32 %v12517_v31, 16  ;;  %v2128_v44 = vrot.slane %v12428_v42, 5 }
  0x89   : > { %10339 = vmatpush3.bf16.msra.mxu0 %v11482_v63  ;;  %v1896_v63 = vrot.slane %v1895_v16, 4  ;;  %v2280_v4 = vrot.slane %v2278_v33, 5  ;;  %v12552_v25 = vsel %vm12147_vm6, %v9082_v50, %v2116_v26  ;;  %v9094_v10 = vcombine.low %v12506_v27, %v12510_v28 }
  0x8a   : > { %10348 = vmatprep.subr.bf16.mxu0 %v11484_v55  ;;  %v2298_v45 = vrot.slane %v2296_v20, 5  ;;  %v2301_v51 = vrot.slane %v2299_v48, 6  ;;  %v2344_v50 = vshll.u32 %v12476_v22, 16  ;;  %v2325_v26 = vrot.slane %v2323_v62, 5 }
  0x8c   : > { %10341 = vmatmul.mubr.msk.bf16.vlgmr.msra.gmra.mrb[0].mxu0 %vm807_vm3, %v11485_v56  ;;  %v1915_v56 = vsel %vm12045_vm2, %v1910_v2, %v1914_v58  ;;  %v1943_v2 = vsel %vm12045_vm2, %v1938_v52, %v12461_v6 }
  0x8d   : > { %10349 = vmatpush3.bf16.msra.mxu0 %v11484_v55  ;;  %10344 = vmatprep.mubr.msk.bf16.mxu0 %vm807_vm3, %v11487_v41  ;;  %v1901_v55 = vsel %vm12045_vm2, %v1896_v63, %v1900_v39  ;;  %v12487_v41 = vld [vmem:[%s12003_s22 + $0x30] sm:$0xe]  ;;  %v12525_v39 = vld [vmem:[%s12003_s22 + $0x1c] sm:$0x3]  ;;  %v2124_v63 = vrot.slane %v12425_v18, 5  ;;  %v9061_v6 = vcombine.low %v1929_v24, %v1943_v2  ;;  %v2380_v2 = vshll.u32 %v12495_v17, 16 }
  0x8e   : > { %10350 = vmatprep.subr.bf16.mxu0 %v11486_v57  ;;  %v9060_v16 = vcombine.low %v1901_v55, %v1915_v56  ;;  %v9083_v58 = vrot.slane %v12487_v41, 9  ;;  %v2314_v38 = vshrl.u32 %v12525_v39, 16  ;;  %v11493_v18 = vld [vmem:[%s15409_s29 + $0xf0] sm:$0xff]   ;;  %v2310_v55 = vrot.slane %v2308_v19, 6 }
  0x8f   : > { %v2317_v60 = vshll.u32 %v12525_v39, 16  ;;  %v12588_v27 = vsel %vm12147_vm6, %v9084_v46, %v2124_v63  ;;  %v2377_v63 = vshrl.u32 %v12495_v17, 16  ;;  %v11496_v17 = vld [vmem:[%s15409_s29 + $0x108] sm:$0xff]  }
  0x90   : > { %v12558_v56 = vrot.slane %v2314_v38, 5  ;;  %v12566_v52 = vsel %vm12147_vm6, %v9083_v58, %v2120_v40  ;;  %v11495_v58 = vld [vmem:[%s15409_s29 + $0x100] sm:$0xff]   ;;  %v2395_v38 = vshrl.u32 %v12498_v49, 16 }
  0x91   : > { %10351 = vmatpush3.bf16.msra.mxu0 %v11486_v57  ;;  %v2274_v57 = vrot.slane %v2272_v3, 6  ;;  %v11494_v3 = vld [vmem:[%s15409_s29 + $0xf8] sm:$0xff]   ;;  %v9096_v24 = vcombine.low %v12552_v25, %v12566_v52  ;;  %v2319_v46 = vrot.slane %v2317_v60, 6 }
  0x92   : > { %10352 = vmatprep.subr.bf16.mxu0 %v11488_v37  ;;  %v2397_v52 = vrot.slane %v2395_v38, 5  ;;  %v2572_v38 = vrot.slane %v12517_v31, 6  ;;  %v12690_v31 = vld [vmem:[%s12003_s22 + $0x14] sm:$0x1] }
  0x93   : > { %v2275_v47 = vor.u32 %v2274_v57, %v2271_v21  ;;  %v2359_v21 = vshrl.u32 %v12487_v41, 16 }
  0x94   : > { %10345 = vmatmul.mubr.msk.bf16.gmra.mrb[4].mxu0 %vm807_vm3, %v11489_v54  ;;  %v9085_v54 = vrot.slane %v12498_v49, 9 }
  0x95   : > { %10353 = vmatpush3.bf16.msra.mxu0 %v11488_v37  ;;  %10356 = vmatprep.mubr.msk.bf16.mxu0 %vm807_vm3, %v9058_v34  ;;  %v2292_v37 = vrot.slane %v2290_v61, 6  ;;  %v2305_v34 = vshrl.u32 %v12449_v53, 16  ;;  %v12548_v53 = vsel %vm12147_vm6, %v9081_v11, %v2112_v5  ;;  %v2276_v42 = vrot.slane %v2275_v47, 4 }
  0x96   : > { %10354 = vmatprep.subr.bf16.mxu0 %v11490_v15  ;;  %v2326_v5 = vshll.u32 %v12465_v14, 16  ;;  %v2341_v61 = vshrl.u32 %v12476_v22, 16  ;;  %v2362_v14 = vshll.u32 %v12487_v41, 16  ;;  %v9095_v57 = vcombine.low %v12514_v30, %v12548_v53 }
  0x97   : > { %v2293_v59 = vor.u32 %v2292_v37, %v2289_v36  ;;  %v2307_v23 = vrot.slane %v2305_v34, 5  ;;  %v12592_v22 = vsel %vm12147_vm6, %v9085_v54, %v2128_v44  ;;  %v2302_v41 = vor.u32 %v2301_v51, %v2298_v45 }
  0x98   : > { %v2335_v30 = vshll.u32 %v12555_v0, 16  ;;  %v2343_v33 = vrot.slane %v2341_v61, 5  ;;  %v2361_v47 = vrot.slane %v2359_v21, 5  ;;  %v2364_v20 = vrot.slane %v2362_v14, 6  ;;  %v12639_v14 = vld [vmem:[%s12003_s22 + $0x10] sm:$0xc] }
  0x99   : > { %10355 = vmatpush3.bf16.msra.mxu0 %v11490_v15  ;;  %v2283_v15 = vrot.slane %v2281_v35, 6  ;;  %v2294_v11 = vrot.slane %v2293_v59, 4  ;;  %v2346_v35 = vrot.slane %v2344_v50, 6  ;;  %v2311_v40 = vor.u32 %v2310_v55, %v2307_v23  ;;  %v12624_v55 = vld [vmem:[%s12003_s22 + $0x44] sm:$0x3] }
  0x9a   : > { %10364 = vmatprep.subr.bf16.mxu0 %v11491_v9  ;;  %v2337_v44 = vrot.slane %v2335_v30, 6  ;;  %v2320_v45 = vor.u32 %v2319_v46, %v12558_v56  ;;  %v2365_v51 = vor.u32 %v2364_v20, %v2361_v47  ;;  %v11497_v56 = vld [vmem:[%s15409_s29 + $0x110] sm:$0xff]   ;;  %v12634_v50 = vld [vmem:[%s12003_s22 + $0x8] sm:$0xc]  ;;  %v2407_v21 = vshll.u32 %v12624_v55, 16 }
  0x9b   : > { %v2284_v8 = vor.u32 %v2283_v15, %v2280_v4  ;;  %v2347_v4 = vor.u32 %v2346_v35, %v2343_v33  ;;  %v12620_v53 = vsel %vm12253_vm9, %v2294_v11, %v2302_v41  ;;  %v2312_v25 = vrot.slane %v2311_v40, 4  ;;  %v12649_v30 = vld [vmem:[%s12003_s22 + $0x20] sm:$0xc]  ;;  %v11498_v40 = vld [vmem:[%s15409_s29 + $0x118] sm:$0xff]  }
  0x9c   : > { %10357 = vmatmul.mubr.msk.bf16.vlgmr.msra.gmra.mrb[0].mxu0 %vm807_vm3, %v9059_v7  ;;  %v2332_v7 = vshrl.u32 %v12555_v0, 16  ;;  %v9142_v46 = vrot.slane %v12634_v50, 10 }
  0x9d   : > { %10365 = vmatpush3.bf16.msra.mxu0 %v11491_v9  ;;  %10360 = vmatprep.mubr.msk.bf16.mxu0 %vm807_vm3, %v9060_v16  ;;  %v12570_v9 = vld [vmem:[%s12003_s22 + $0x2c] sm:$0x3]  ;;  %v12578_v16 = vld [vmem:[%s12003_s22 + $0x34] sm:$0x3]  ;;  %v12597_v28 = vsel %vm12253_vm9, %v2276_v42, %v2284_v8  ;;  %v2379_v42 = vrot.slane %v2377_v63, 5 }
  0x9e   : > { %10366 = vmatprep.subr.bf16.mxu0 %v11492_v32  ;;  %v2350_v36 = vshrl.u32 %v12570_v9, 16  ;;  %v2353_v37 = vshll.u32 %v12570_v9, 16  ;;  %v2368_v48 = vshrl.u32 %v12578_v16, 16  ;;  %v2371_v54 = vshll.u32 %v12578_v16, 16  ;;  %v12671_v63 = vld [vmem:[%s12003_s22 + $0x30] sm:$0xc] }
  0x9f   : > { %v2334_v19 = vrot.slane %v2332_v7, 5  ;;  %v2404_v7 = vshrl.u32 %v12624_v55, 16  ;;  %v9122_v41 = vcombine.low %v12597_v28, %v12620_v53 }
  0xa0   : > { %v2352_v15 = vrot.slane %v2350_v36, 5  ;;  %v2355_v59 = vrot.slane %v2353_v37, 6  ;;  %v2370_v62 = vrot.slane %v2368_v48, 5  ;;  %v2373_v23 = vrot.slane %v2371_v54, 6 }
  0xa1   : > { %10367 = vmatpush3.bf16.msra.mxu0 %v11492_v32  ;;  %v2328_v32 = vrot.slane %v2326_v5, 6  ;;  %v2338_v5 = vor.u32 %v2337_v44, %v2334_v19  ;;  %v2406_v20 = vrot.slane %v2404_v7, 5  ;;  %v2409_v48 = vrot.slane %v2407_v21, 6  ;;  %v11500_v7 = vld [vmem:[%s15409_s29 + $0x128] sm:$0xff]  }
  0xa2   : > { %10368 = vmatprep.subr.bf16.mxu0 %v11493_v18  ;;  %v2356_v61 = vor.u32 %v2355_v59, %v2352_v15  ;;  %v2374_v33 = vor.u32 %v2373_v23, %v2370_v62  ;;  %v2568_v54 = vrot.slane %v12492_v13, 6  ;;  %v9143_v19 = vrot.slane %v12639_v14, 10  ;;  %v12700_v23 = vld [vmem:[%s12003_s22 + $0x40] sm:$0xc] }
  0xa3   : > { %v2329_v34 = vor.u32 %v2328_v32, %v2325_v26  ;;  %v2366_v32 = vrot.slane %v2365_v51, 4  ;;  %v2576_v44 = vrot.slane %v12525_v39, 6  ;;  %v2580_v39 = vrot.slane %v12555_v0, 6 }
  0xa4   : > { %10361 = vmatmul.mubr.msk.bf16.gmra.mrb[4].mxu0 %vm807_vm3, %v9061_v6  ;;  %v12613_v6 = vld [vmem:[%s12003_s22 + $0x3c] sm:$0x3]  ;;  %v9147_v51 = vrot.slane %v12671_v63, 10  ;;  %v2588_v62 = vrot.slane %v12578_v16, 6 }
  0xa5   : > { %10369 = vmatpush3.bf16.msra.mxu0 %v11493_v18  ;;  %10372 = vmatprep.mubr.msk.bf16.mxu0 %vm807_vm3, %v9094_v10  ;;  %v2398_v18 = vshll.u32 %v12498_v49, 16  ;;  %v2382_v49 = vrot.slane %v2380_v2, 6  ;;  %v2386_v60 = vshrl.u32 %v12613_v6, 16  ;;  %v2330_v11 = vrot.slane %v2329_v34, 4  ;;  %v12674_v2 = vld [vmem:[%s12003_s22 + $0x38] sm:$0xc] }
  0xa6   : > { %10370 = vmatprep.subr.bf16.mxu0 %v11494_v3  ;;  %v2348_v10 = vrot.slane %v2347_v4, 4  ;;  %v9198_v34 = vld [vmem:[%s12003_s22 + $0x10] sm:$0xf]  ;;  %v11499_v4 = vld [vmem:[%s15409_s29 + $0x120] sm:$0xff]   ;;  %v2375_v15 = vsel %vm12253_vm9, %v2366_v32, %v2374_v33  ;;  %v2573_v32 = vsel %vm12320_vm12, %v9143_v19, %v2572_v38 }
  0xa7   : > { %v2400_v8 = vrot.slane %v2398_v18, 6  ;;  %v2383_v26 = vor.u32 %v2382_v49, %v2379_v42  ;;  %v2388_v35 = vrot.slane %v2386_v60, 5  ;;  %v2892_v42 = vshrl.u32 %v9198_v34, 16 }
  0xa8   : > { %v12667_v28 = vsel %vm12253_vm9, %v2348_v10, %v2356_v61  ;;  %v2895_v49 = vshll.u32 %v9198_v34, 16  ;;  %v9148_v60 = vrot.slane %v12674_v2, 10  ;;  %v2410_v10 = vor.u32 %v2409_v48, %v2406_v20  ;;  %v12715_v61 = vld [vmem:[%s12003_s22 + $0x1c] sm:$0x1]  ;;  %v12741_v48 = vld [vmem:[%s12003_s22 + $0x24] sm:$0x1] }
  0xa9   : > { %10371 = vmatpush3.bf16.msra.mxu0 %v11494_v3  ;;  %v2389_v3 = vshll.u32 %v12613_v6, 16  ;;  %v2401_v37 = vor.u32 %v2400_v8, %v2397_v52  ;;  %v2384_v47 = vrot.slane %v2383_v26, 4  ;;  %v9124_v52 = vcombine.low %v12667_v28, %v2375_v15  ;;  %v9208_v15 = vld [vmem:[%s12003_s22 + $0x38] sm:$0xf] }
  0xaa   : > { %10380 = vmatprep.subr.bf16.mxu0 %v11495_v58  ;;  %v2592_v8 = vrot.slane %v12613_v6, 6  ;;  %v2894_v21 = vrot.slane %v2892_v42, 4  ;;  %v2897_v14 = vrot.slane %v2895_v49, 5  ;;  %v9210_v42 = vld [vmem:[%s12003_s22 + $0x40] sm:$0xf] }
  0xab   : > { %v2391_v36 = vrot.slane %v2389_v3, 6  ;;  %v2402_v59 = vrot.slane %v2401_v37, 4  ;;  %v9202_v3 = vld [vmem:[%s12003_s22 + $0x20] sm:$0xf] }
  0xac   : > { %10373 = vmatmul.mubr.msk.bf16.vlgmr.msra.gmra.mrb[0].mxu0 %vm807_vm3, %v9095_v57  ;;  %v12642_v57 = vld [vmem:[%s12003_s22 + $0x18] sm:$0xc]  ;;  %v2898_v34 = vor.u32 %v2897_v14, %v2894_v21  ;;  %v2979_v21 = vshll.u32 %v9210_v42, 16 }
  0xad   : > { %10381 = vmatpush3.bf16.msra.mxu0 %v11495_v58  ;;  %10376 = vmatprep.mubr.msk.bf16.mxu0 %vm807_vm3, %v9096_v24  ;;  %v9097_v24 = vcombine.low %v12588_v27, %v12592_v22  ;;  %v12652_v58 = vld [vmem:[%s12003_s22 + $0x28] sm:$0xc]  ;;  %v12659_v27 = vsel %vm12253_vm9, %v2312_v25, %v2320_v45  ;;  %v12663_v22 = vsel %vm12253_vm9, %v2330_v11, %v2338_v5  ;;  %v9144_v18 = vrot.slane %v12642_v57, 10  ;;  %v9200_v25 = vld [vmem:[%s12003_s22 + $0x18] sm:$0xf] }
  0xae   : > { %10382 = vmatprep.subr.bf16.mxu0 %v11496_v17  ;;  %v2392_v13 = vor.u32 %v2391_v36, %v2388_v35  ;;  %v9146_v53 = vrot.slane %v12652_v58, 10  ;;  %v2584_v45 = vrot.slane %v12570_v9, 6  ;;  %v9123_v0 = vcombine.low %v12659_v27, %v12663_v22  ;;  %v9204_v11 = vld [vmem:[%s12003_s22 + $0x28] sm:$0xf]  ;;  %v9206_v27 = vld [vmem:[%s12003_s22 + $0x30] sm:$0xf] }
  0xaf   : > { %v2906_v50 = vshrl.u32 %v9200_v25, 16  ;;  %v2909_v26 = vshll.u32 %v9200_v25, 16  ;;  %v2920_v57 = vshrl.u32 %v9202_v3, 16  ;;  %v2937_v33 = vshll.u32 %v9204_v11, 16  ;;  %v11501_v22 = vld [vmem:[%s15409_s29 + $0x130] sm:$0xff]  }
  0xb0   : > { %v12712_v5 = vsel %vm12253_vm9, %v2384_v47, %v2392_v13  ;;  %v9149_v35 = vrot.slane %v12700_v23, 10  ;;  %v2596_v36 = vrot.slane %v12624_v55, 6  ;;  %v2411_v28 = vsel %vm12253_vm9, %v2402_v59, %v2410_v10 }
  0xb1   : > { %10383 = vmatpush3.bf16.msra.mxu0 %v11496_v17  ;;  %v9145_v17 = vrot.slane %v12649_v30, 10  ;;  %v2934_v30 = vshrl.u32 %v9204_v11, 16  ;;  %v2908_v47 = vrot.slane %v2906_v50, 4  ;;  %v2911_v20 = vrot.slane %v2909_v26, 5  ;;  %v9212_v11 = vld [vmem:[%s12003_s22 + $0x48] sm:$0xf] }
  0xb2   : > { %10384 = vmatprep.subr.bf16.mxu0 %v11497_v56  ;;  %v2922_v19 = vrot.slane %v2920_v57, 4  ;;  %v2939_v13 = vrot.slane %v2937_v33, 5  ;;  %v2948_v59 = vshrl.u32 %v9206_v27, 16  ;;  %v2951_v25 = vshll.u32 %v9206_v27, 16 }
  0xb3   : > { %v12763_v10 = vrot.slane %v2898_v34, 4  ;;  %v2976_v26 = vshrl.u32 %v9210_v42, 16  ;;  %v2990_v27 = vshrl.u32 %v9212_v11, 16  ;;  %v12790_v34 = vld [vmem:[%s12003_s22 + $0x44] sm:$0x1]  ;;  %v2597_v42 = vsel %vm12320_vm12, %v9149_v35, %v2596_v36 }
  0xb4   : > { %10377 = vmatmul.mubr.msk.bf16.gmra.mrb[4].mxu0 %vm807_vm3, %v9097_v24  ;;  %v2923_v24 = vshll.u32 %v9202_v3, 16  ;;  %v2965_v3 = vshll.u32 %v9208_v15, 16 }
  0xb5   : > { %10385 = vmatpush3.bf16.msra.mxu0 %v11497_v56  ;;  %10388 = vmatprep.mubr.msk.bf16.mxu0 %vm807_vm3, %v9122_v41  ;;  %v2901_v56 = vshll.u32 %v12690_v31, 16  ;;  %v2569_v41 = vsel %vm12320_vm12, %v9142_v46, %v2568_v54  ;;  %v12738_v46 = vsel %vm12320_vm12, %v9144_v18, %v2576_v44  ;;  %v12746_v54 = vsel %vm12320_vm12, %v9145_v17, %v2580_v39  ;;  %v12750_v18 = vld [vmem:[%s12003_s22 + $0x2c] sm:$0x1] }
  0xb6   : > { %10386 = vmatprep.subr.bf16.mxu0 %v11498_v40  ;;  %v2925_v38 = vrot.slane %v2923_v24, 5  ;;  %v2936_v44 = vrot.slane %v2934_v30, 4  ;;  %v2929_v17 = vshll.u32 %v12741_v48, 16  ;;  %v2962_v39 = vshrl.u32 %v9208_v15, 16  ;;  %v12770_v24 = vld [vmem:[%s12003_s22 + $0x3c] sm:$0x1] }
  0xb7   : > { %v12726_v37 = vrot.slane %v2901_v56, 5  ;;  %v2912_v56 = vor.u32 %v2911_v20, %v2908_v47  ;;  %v2943_v50 = vshll.u32 %v12750_v18, 16  ;;  %v11503_v30 = vld [vmem:[%s15409_s29 + $0x140] sm:$0xff]   ;;  %v2589_v47 = vsel %vm12320_vm12, %v9147_v51, %v2588_v62 }
  0xb8   : > { %v2926_v14 = vor.u32 %v2925_v38, %v2922_v19  ;;  %v2940_v57 = vor.u32 %v2939_v13, %v2936_v44  ;;  %v2964_v33 = vrot.slane %v2962_v39, 4  ;;  %v12794_v19 = vld [vmem:[%s12003_s22 + $0x4c] sm:$0x1]  ;;  %v2978_v58 = vrot.slane %v2976_v26, 4 }
  0xb9   : > { %10387 = vmatpush3.bf16.msra.mxu0 %v11498_v40  ;;  %v2915_v40 = vshll.u32 %v12715_v61, 16  ;;  %v2913_v20 = vrot.slane %v2912_v56, 4  ;;  %v2981_v38 = vrot.slane %v2979_v21, 5  ;;  %v2971_v63 = vshll.u32 %v12770_v24, 16 }
  0xba   : > { %10396 = vmatprep.subr.bf16.mxu0 %v11499_v4  ;;  %v2985_v51 = vshll.u32 %v12790_v34, 16  ;;  %v2992_v62 = vrot.slane %v2990_v27, 4  ;;  %v2904_v6 = vsel %vm12045_vm2, %v12763_v10, %v12726_v37  ;;  %v11505_v37 = vld [vmem:[%s15409_s29 + $0x150] sm:$0xff]   ;;  %v3163_v21 = vrot.slane %v12715_v61, 5 }
  0xbb   : > { %v12754_v49 = vrot.slane %v2915_v40, 5  ;;  %v2967_v40 = vrot.slane %v2965_v3, 5  ;;  %v12828_v36 = vrot.slane %v2971_v63, 5  ;;  %v3167_v61 = vrot.slane %v12741_v48, 5  ;;  %v12890_v63 = vld [vmem:[%s12003_s22 + $0x40] sm:$0xe] }
  0xbc   : > { %10389 = vmatmul.mubr.msk.bf16.vlgmr.msra.gmra.mrb[0].mxu0 %vm807_vm3, %v9123_v0  ;;  %v9158_v0 = vcombine.low %v2569_v41, %v2573_v32  ;;  %v2950_v41 = vrot.slane %v2948_v59, 4  ;;  %v2953_v32 = vrot.slane %v2951_v25, 5  ;;  %v2593_v59 = vsel %vm12320_vm12, %v9148_v60, %v2592_v8  ;;  %v9234_v8 = vld [vmem:[%s12003_s22 + $0x10] sm:$0xe] }
  0xbd   : > { %10397 = vmatpush3.bf16.msra.mxu0 %v11499_v4  ;;  %10392 = vmatprep.mubr.msk.bf16.mxu0 %vm807_vm3, %v9124_v52  ;;  %v9125_v4 = vcombine.low %v12712_v5, %v2411_v28  ;;  %v9159_v52 = vcombine.low %v12738_v46, %v12746_v54  ;;  %v11502_v5 = vld [vmem:[%s15409_s29 + $0x138] sm:$0xff]   ;;  %v2993_v28 = vshll.u32 %v9212_v11, 16  ;;  %v2585_v46 = vsel %vm12320_vm12, %v9146_v53, %v2584_v45  ;;  %v12845_v11 = vld [vmem:[%s12003_s22 + $0x20] sm:$0xe] }
  0xbe   : > { %10398 = vmatprep.subr.bf16.mxu0 %v11500_v7  ;;  %v2931_v54 = vrot.slane %v2929_v17, 5  ;;  %v2927_v53 = vrot.slane %v2926_v14, 4  ;;  %v2941_v45 = vrot.slane %v2940_v57, 4  ;;  %v2954_v16 = vor.u32 %v2953_v32, %v2950_v41  ;;  %v9235_v17 = vld [vmem:[%s12003_s22 + $0x18] sm:$0xe] }
  0xbf   : > { %v2968_v15 = vor.u32 %v2967_v40, %v2964_v33  ;;  %v2995_v44 = vrot.slane %v2993_v28, 5  ;;  %v9160_v13 = vcombine.low %v2585_v46, %v2589_v47  ;;  %v2999_v25 = vshll.u32 %v12794_v19, 16  ;;  %v11507_v57 = vld [vmem:[%s12003_s22 + $0x10] ss:$8 sps:$4 sm:$0xff]   ;;  %v12874_v46 = vld [vmem:[%s12003_s22 + $0x14] sm:$0x3] }
  0xc0   : > { %v2918_v2 = vsel %vm12045_vm2, %v2913_v20, %v12754_v49  ;;  %v2982_v60 = vor.u32 %v2981_v38, %v2978_v58  ;;  %v2932_v55 = vsel %vm12045_vm2, %v2927_v53, %v2931_v54  ;;  %v12835_v49 = vrot.slane %v2954_v16, 4  ;;  %v12863_v33 = vld [vmem:[%s12003_s22 + $0x38] sm:$0xe] }
  0xc1   : > { %10399 = vmatpush3.bf16.msra.mxu0 %v11500_v7  ;;  %v12767_v7 = vld [vmem:[%s12003_s22 + $0x34] sm:$0x1]  ;;  %v12837_v39 = vrot.slane %v2968_v15, 4  ;;  %v12839_v3 = vrot.slane %v2985_v51, 5  ;;  %v12842_v56 = vrot.slane %v2999_v25, 5  ;;  %v9243_v26 = vrot.slane %v9235_v17, 9 }
  0xc2   : > { %10400 = vmatprep.subr.bf16.mxu0 %v11501_v22  ;;  %v2957_v9 = vshll.u32 %v12767_v7, 16  ;;  %v12850_v10 = vrot.slane %v2982_v60, 4  ;;  %v9161_v14 = vcombine.low %v2593_v59, %v2597_v42  ;;  %v12855_v41 = vcombine.low %v2904_v6, %v2918_v2  ;;  %v11506_v40 = vld [vmem:[%s15409_s29 + $0x158] sm:$0xff]   ;;  %v11508_v51 = vld [vmem:[%s15409_s29 + $0x160] sm:$0xff]  }
  0xc3   : > { %v3328_v47 = vshrl.u32 %v9234_v8, 16  ;;  %v3331_v20 = vshll.u32 %v9234_v8, 16  ;;  %v3346_v54 = vshrl.u32 %v9235_v17, 16  ;;  %v3175_v38 = vrot.slane %v12767_v7, 5  ;;  %v12910_v59 = vld [vmem:[%s12003_s22 + $0x1c] sm:$0x3] }
  0xc4   : > { %10393 = vmatmul.mubr.msk.bf16.gmra.mrb[4].mxu0 %vm807_vm3, %v9125_v4  ;;  %v11504_v4 = vld [vmem:[%s15409_s29 + $0x148] sm:$0xff]   ;;  %v12826_v35 = vrot.slane %v2957_v9, 5  ;;  %v3171_v9 = vrot.slane %v12750_v18, 5  ;;  %v9247_v48 = vrot.slane %v12863_v33, 9  ;;  %v3179_v16 = vrot.slane %v12770_v24, 5 }
  0xc5   : > { %10401 = vmatpush3.bf16.msra.mxu0 %v11501_v22  ;;  %10404 = vmatprep.mubr.msk.bf16.mxu0 %vm807_vm3, %v9158_v0  ;;  %v2945_v22 = vrot.slane %v2943_v50, 5  ;;  %v2996_v0 = vor.u32 %v2995_v44, %v2992_v62  ;;  %v3159_v50 = vrot.slane %v12690_v31, 5  ;;  %v9244_v31 = vrot.slane %v12845_v11, 9  ;;  %v12893_v18 = vld [vmem:[%s12003_s22 + $0x48] sm:$0xe] }
  0xc6   : > { %10402 = vmatprep.subr.bf16.mxu0 %v11502_v5  ;;  %v2960_v53 = vsel %vm12045_vm2, %v12835_v49, %v12826_v35  ;;  %v3337_v15 = vshrl.u32 %v12874_v46, 16  ;;  %v12906_v44 = vsel %vm12147_vm6, %v9243_v26, %v3163_v21  ;;  %v3340_v25 = vshll.u32 %v12874_v46, 16  ;;  %v11509_v60 = vld [vmem:[%s12003_s22 + $0x20] ss:$8 sps:$4 sm:$0xff]  }
  0xc7   : > { %v2946_v23 = vsel %vm12045_vm2, %v2941_v45, %v2945_v22  ;;  %v12868_v27 = vrot.slane %v2996_v0, 4  ;;  %v3349_v22 = vshll.u32 %v9235_v17, 16  ;;  %v2974_v45 = vsel %vm12045_vm2, %v12837_v39, %v12828_v36  ;;  %v12994_v0 = vld [vmem:[%s12003_s22 + $0x44] sm:$0x3] }
  0xc8   : > { %v12857_v32 = vcombine.low %v2932_v55, %v2946_v23  ;;  %v3333_v42 = vrot.slane %v3331_v20, 6  ;;  %v3348_v6 = vrot.slane %v3346_v54, 5  ;;  %v12918_v23 = vld [vmem:[%s12003_s22 + $0x24] sm:$0x3]  ;;  %v3364_v35 = vshrl.u32 %v12845_v11, 16 }
  0xc9   : > { %10403 = vmatpush3.bf16.msra.mxu0 %v11502_v5  ;;  %v12848_v5 = vld [vmem:[%s12003_s22 + $0x28] sm:$0xe]  ;;  %v3351_v2 = vrot.slane %v3349_v22, 6  ;;  %15423 = vst [vmem:[#allocation19_spill] sm:$0xff] %v12918_v23  ;;  %v3367_v36 = vshll.u32 %v12845_v11, 16  ;;  %v12922_v17 = vcombine.low %v2960_v53, %v2974_v45  ;;  %v3187_v49 = vrot.slane %v12794_v19, 5 }
  0xca   : > { %10412 = vmatprep.subr.bf16.mxu0 %v11503_v30  ;;  %v9245_v28 = vrot.slane %v12848_v5, 9  ;;  %v12929_v39 = vrot.slane %v3337_v15, 5  ;;  %v3355_v11 = vshrl.u32 %v12910_v59, 16  ;;  %v3385_v20 = vshll.u32 %v12848_v5, 16 }
  0xcb   : > { %v3352_v21 = vor.u32 %v3351_v2, %v3348_v6 }
  0xcc   : > { %10405 = vmatmul.mubr.msk.bf16.vlgmr.msra.gmra.mrb[0].mxu0 %vm807_vm3, %v9159_v52  ;;  %v9242_v52 = vrot.slane %v9234_v8, 9  ;;  %v9248_v8 = vrot.slane %v12890_v63, 9  ;;  %v12954_v54 = vsel %vm12147_vm6, %v9245_v28, %v3171_v9  ;;  %v12962_v45 = vrot.slane %v3355_v11, 5 }
  0xcd   : > { %10413 = vmatpush3.bf16.msra.mxu0 %v11503_v30  ;;  %10408 = vmatprep.mubr.msk.bf16.mxu0 %vm807_vm3, %v9160_v13  ;;  %v12860_v30 = vld [vmem:[%s12003_s22 + $0x30] sm:$0xe]  ;;  %v3183_v13 = vrot.slane %v12790_v34, 5  ;;  %v3436_v28 = vshrl.u32 %v12890_v63, 16  ;;  %v12978_v2 = vrot.slane %v3352_v21, 4  ;;  %v3387_v11 = vrot.slane %v3385_v20, 6 }
  0xce   : > { %10414 = vmatprep.subr.bf16.mxu0 %v11504_v4  ;;  %v9246_v58 = vrot.slane %v12860_v30, 9  ;;  %v12902_v62 = vsel %vm12147_vm6, %v9242_v52, %v3159_v50  ;;  %v12935_v52 = vsel %vm12147_vm6, %v9244_v31, %v3167_v61  ;;  %v12937_v50 = vrot.slane %v3340_v25, 6 }
  0xcf   : > { %v3369_v31 = vrot.slane %v3367_v36, 6  ;;  %v3382_v61 = vshrl.u32 %v12848_v5, 16  ;;  %v3400_v22 = vshrl.u32 %v12860_v30, 16  ;;  %v3403_v53 = vshll.u32 %v12860_v30, 16  ;;  %v11512_v5 = vld [vmem:[%s15409_s29 + $0x170] sm:$0xff]  }
  0xd0   : > { %v3438_v55 = vrot.slane %v3436_v28, 5  ;;  %v13013_v20 = vsel %vm12147_vm6, %v9247_v48, %v3179_v16  ;;  %v13021_v7 = vsel %vm12147_vm6, %v9248_v8, %v3183_v13  ;;  %v3343_v30 = vor.u32 %v12937_v50, %v12929_v39  ;;  %v13039_v50 = vld [vmem:[%s12003_s22 + $0x4c] sm:$0x3] }
  0xd1   : > { %10415 = vmatpush3.bf16.msra.mxu0 %v11504_v4  ;;  %v3330_v4 = vrot.slane %v3328_v47, 5  ;;  %v3366_v47 = vrot.slane %v3364_v35, 5  ;;  %v3439_v35 = vshll.u32 %v12890_v63, 16  ;;  %v3384_v36 = vrot.slane %v3382_v61, 5 }
  0xd2   : > { %10416 = vmatprep.subr.bf16.mxu0 %v11505_v37  ;;  %v13005_v61 = vsel %vm12147_vm6, %v9246_v58, %v3175_v38  ;;  %v3457_v58 = vshll.u32 %v12893_v18, 16 }
  0xd3   : > { %v3334_v26 = vor.u32 %v3333_v42, %v3330_v4  ;;  %v3376_v4 = vshll.u32 %v12918_v23, 16  ;;  %v11513_v42 = vld [vmem:[%s12003_s22 + $0x40] ss:$8 sps:$4 sm:$0xff]   ;;  %v3388_v63 = vor.u32 %v3387_v11, %v3384_v36  ;;  %v3463_v36 = vshrl.u32 %v13039_v50, 16 }
  0xd4   : > { %10409 = vmatmul.mubr.msk.bf16.gmra.mrb[4].mxu0 %vm807_vm3, %v9161_v14  ;;  %v3358_v14 = vshll.u32 %v12910_v59, 16  ;;  %v3466_v11 = vshll.u32 %v13039_v50, 16 }
  0xd5   : > { %10417 = vmatpush3.bf16.msra.mxu0 %v11505_v37  ;;  %10420 = vmatprep.mubr.msk.bf16.mxu0 %vm807_vm3, %v11507_v57  ;;  %v2988_v37 = vsel %vm12045_vm2, %v12850_v10, %v12839_v3  ;;  %v11510_v3 = vld [vmem:[%s15409_s29 + $0x168] sm:$0xff]   ;;  %v11511_v10 = vld [vmem:[%s12003_s22 + $0x30] ss:$8 sps:$4 sm:$0xff]   ;;  %v3373_v57 = vshrl.u32 %v12918_v23, 16  ;;  %v12968_v9 = vrot.slane %v3334_v26, 4  ;;  %v13030_v34 = vrot.slane %v3376_v4, 6 }
  0xd6   : > { %10418 = vmatprep.subr.bf16.mxu0 %v11506_v40  ;;  %v12970_v15 = vrot.slane %v3358_v14, 6  ;;  %v12988_v26 = vld [vmem:[%s12003_s22 + $0x3c] sm:$0x3]  ;;  %v3402_v14 = vrot.slane %v3400_v22, 5  ;;  %v3448_v4 = vshll.u32 %v12994_v0, 16 }
  0xd7   : > { %v12972_v25 = vrot.slane %v3373_v57, 5  ;;  %v3405_v57 = vrot.slane %v3403_v53, 6  ;;  %v3427_v39 = vshrl.u32 %v12988_v26, 16  ;;  %v3430_v53 = vshll.u32 %v12988_v26, 16  ;;  %v9370_v23 = vld [vmem:[%s12003_s22 + $0x38] sm:$0xf] }
  0xd8   : > { %v3361_v24 = vor.u32 %v12970_v15, %v12962_v45  ;;  %v13161_v45 = vld [vmem:[%s12003_s22 + $0x48] sm:$0xc] }
  0xd9   : > { %10419 = vmatpush3.bf16.msra.mxu0 %v11506_v40  ;;  %v3002_v40 = vsel %vm12045_vm2, %v12868_v27, %v12842_v56  ;;  %v3418_v56 = vshrl.u32 %v12863_v33, 16  ;;  %v3421_v27 = vshll.u32 %v12863_v33, 16  ;;  %v3441_v33 = vrot.slane %v3439_v35, 6 }
  0xda   : > { %10428 = vmatprep.subr.bf16.mxu0 %v11508_v51  ;;  %v12976_v6 = vcombine.low %v2988_v37, %v3002_v40  ;;  %v11514_v37 = vld [vmem:[%s15409_s29 + $0x178] sm:$0xff]   ;;  %v13132_v19 = vsel %vm12253_vm9, %v12978_v2, %v3361_v24 }
  0xdb   : > { %v3420_v40 = vrot.slane %v3418_v56, 5  ;;  %v3423_v21 = vrot.slane %v3421_v27, 6  ;;  %v3445_v56 = vshrl.u32 %v12994_v0, 16  ;;  %v11515_v27 = vld [vmem:[%s15409_s29 + $0x180] sm:$0xff]   ;;  %v3442_v28 = vor.u32 %v3441_v33, %v3438_v55 }
  0xdc   : > { %10421 = vmatmul.mubr.msk.bf16.vlgmr.msra.gmra.mrb[0].mxu0 %vm807_vm3, %v11509_v60  ;;  %v12981_v60 = vld [vmem:[%s12003_s22 + $0x2c] sm:$0x3] }
  0xdd   : > { %10429 = vmatpush3.bf16.msra.mxu0 %v11508_v51  ;;  %10424 = vmatprep.mubr.msk.bf16.mxu0 %vm807_vm3, %v11511_v10  ;;  %15424 = vst [vmem:[#allocation20_spill] sm:$0xff] %v12981_v60  ;;  %v3370_v51 = vor.u32 %v3369_v31, %v3366_v47  ;;  %v12985_v10 = vld [vmem:[%s12003_s22 + $0x34] sm:$0x3]  ;;  %v3454_v47 = vshrl.u32 %v12893_v18, 16  ;;  %v3391_v48 = vshrl.u32 %v12981_v60, 16  ;;  %v3394_v16 = vshll.u32 %v12981_v60, 16 }
  0xde   : > { %10430 = vmatprep.subr.bf16.mxu0 %v11510_v3  ;;  %15425 = vst [vmem:[#allocation21_spill] sm:$0xff] %v12985_v10  ;;  %v3409_v13 = vshrl.u32 %v12985_v10, 16  ;;  %v3412_v8 = vshll.u32 %v12985_v10, 16  ;;  %v3424_v22 = vor.u32 %v3423_v21, %v3420_v40  ;;  %v13067_v21 = vrot.slane %v3427_v39, 5  ;;  %v9362_v31 = vld [vmem:[%s12003_s22 + $0x18] sm:$0xf] }
  0xdf   : > { %v13028_v38 = vrot.slane %v3370_v51, 4  ;;  %v13050_v51 = vld [vmem:[%s12003_s22 + $0x10] sm:$0xc]  ;;  %v13054_v35 = vrot.slane %v3394_v16, 6  ;;  %v13078_v16 = vrot.slane %v3445_v56, 5  ;;  %v3951_v15 = vshrl.u32 %v9362_v31, 16 }
  0xe0   : > { %v13063_v55 = vrot.slane %v3409_v13, 5  ;;  %v13065_v40 = vrot.slane %v3412_v8, 6  ;;  %v13083_v13 = vrot.slane %v3442_v28, 4  ;;  %v13085_v8 = vrot.slane %v3448_v4, 6  ;;  %v13098_v28 = vld [vmem:[%s12003_s22 + $0x30] sm:$0xc] }
  0xe1   : > { %10431 = vmatpush3.bf16.msra.mxu0 %v11510_v3  ;;  %v3406_v3 = vor.u32 %v3405_v57, %v3402_v14  ;;  %v13059_v14 = vld [vmem:[%s12003_s22 + $0x18] sm:$0xc]  ;;  %v13061_v57 = vrot.slane %v3388_v63, 4  ;;  %v11516_v63 = vld [vmem:[%s15409_s29 + $0x188] sm:$0xff]   ;;  %15428 = vst [vmem:[#allocation24_spill] sm:$0xff] %v13098_v28  ;;  %v11517_v4 = vld [vmem:[%s15409_s29 + $0x190] sm:$0xff]  }
  0xe2   : > { %10432 = vmatprep.subr.bf16.mxu0 %v11512_v5  ;;  %v13122_v39 = vld [vmem:[%s12003_s22 + $0x1c] sm:$0x1] }
  0xe3   : > { %v13072_v33 = vrot.slane %v3406_v3, 4  ;;  %v13089_v3 = vld [vmem:[%s12003_s22 + $0x28] sm:$0xc]  ;;  %v3960_v24 = vshll.u32 %v13122_v39, 16 }
  0xe4   : > { %10425 = vmatmul.mubr.msk.bf16.gmra.mrb[4].mxu0 %vm807_vm3, %v11513_v42  ;;  %v3459_v42 = vrot.slane %v3457_v58, 6  ;;  %v13074_v58 = vrot.slane %v3424_v22, 4  ;;  %15427 = vst [vmem:[#allocation23_spill] sm:$0xff] %v13089_v3  ;;  %v13091_v22 = vrot.slane %v3463_v36, 5  ;;  %v13116_v36 = vsel %vm12253_vm9, %v12968_v9, %v3343_v30  ;;  %v13139_v9 = vld [vmem:[%s12003_s22 + $0x38] sm:$0xc] }
  0xe5   : > { %10433 = vmatpush3.bf16.msra.mxu0 %v11512_v5  ;;  %10436 = vmatprep.mubr.msk.bf16.mxu0 %vm807_vm3, %v12855_v41  ;;  %v3456_v5 = vrot.slane %v3454_v47, 5  ;;  %v13052_v41 = vrot.slane %v3391_v48, 5  ;;  %v13070_v47 = vld [vmem:[%s12003_s22 + $0x20] sm:$0xc]  ;;  %v13076_v48 = vrot.slane %v3430_v53, 6  ;;  %v13093_v53 = vrot.slane %v3466_v11, 6 }
  0xe6   : > { %10434 = vmatprep.subr.bf16.mxu0 %v11514_v37  ;;  %15426 = vst [vmem:[#allocation22_spill] sm:$0xff] %v13070_v47  ;;  %v13142_v30 = vld [vmem:[%s12003_s22 + $0x40] sm:$0xc] }
  0xe9   : > { %10435 = vmatpush3.bf16.msra.mxu0 %v11514_v37  ;;  %v3460_v37 = vor.u32 %v3459_v42, %v3456_v5  ;;  %v15429_v5 = vrot.slane %v12893_v18, 9  ;;  %v3954_v18 = vshll.u32 %v9362_v31, 16  ;;  %v13185_v31 = vrot.slane %v3960_v24, 5 }
  0xea   : > { %10444 = vmatprep.subr.bf16.mxu0 %v11515_v27  ;;  %v4007_v24 = vshrl.u32 %v9370_v23, 16 }
  0xeb   : > { %v13111_v42 = vsel %vm12147_vm6, %v15429_v5, %v3187_v49  ;;  %v13149_v2 = vrot.slane %v3460_v37, 4  ;;  %v9366_v5 = vld [vmem:[%s12003_s22 + $0x28] sm:$0xf]  ;;  %v11518_v37 = vld [vmem:[%s15409_s29 + $0x198] sm:$0xff]   ;;  %v13181_v49 = vrot.slane %v3951_v15, 4  ;;  %v13183_v3 = vrot.slane %v3954_v18, 5 }
  0xec   : > { %10437 = vmatmul.mubr.msk.bf16.vlgmr.msra.gmra.mrb[0].mxu0 %vm807_vm3, %v12857_v32  ;;  %v3979_v56 = vshrl.u32 %v9366_v5, 16  ;;  %v3982_v28 = vshll.u32 %v9366_v5, 16  ;;  %v11519_v5 = vld [vmem:[%s15409_s29 + $0x1a0] sm:$0xff]  }
  0xed   : > { %10445 = vmatpush3.bf16.msra.mxu0 %v11515_v27  ;;  %10440 = vmatprep.mubr.msk.bf16.mxu0 %vm807_vm3, %v12922_v17  ;;  %v9364_v17 = vld [vmem:[%s12003_s22 + $0x20] sm:$0xf]  ;;  %v13153_v27 = vld [vmem:[%s12003_s22 + $0x24] sm:$0x1] }
  0xee   : > { %10446 = vmatprep.subr.bf16.mxu0 %v11516_v63  ;;  %v3965_v1 = vshrl.u32 %v9364_v17, 16  ;;  %v3968_v32 = vshll.u32 %v9364_v17, 16  ;;  %v3974_v11 = vshll.u32 %v13153_v27, 16  ;;  %v3996_v17 = vshll.u32 %v9368_v29, 16 }
  0xef   : > { %v13198_v10 = vrot.slane %v3979_v56, 4  ;;  %v13200_v18 = vrot.slane %v3982_v28, 5 }
  0xf0   : > { %v13187_v60 = vrot.slane %v3965_v1, 4  ;;  %v13194_v47 = vrot.slane %v3968_v32, 5  ;;  %v13196_v15 = vrot.slane %v3974_v11, 5  ;;  %v9260_v1 = vcombine.low %v13005_v61, %v13013_v20  ;;  %v13208_v32 = vld [vmem:[%s12003_s22 + $0x2c] sm:$0x1] }
  0xf1   : > { %10447 = vmatpush3.bf16.msra.mxu0 %v11516_v63  ;;  %v3993_v63 = vshrl.u32 %v9368_v29, 16  ;;  %v9372_v29 = vld [vmem:[%s12003_s22 + $0x40] sm:$0xf]  ;;  %v13211_v11 = vld [vmem:[%s12003_s22 + $0x34] sm:$0x1]  ;;  %v3998_v28 = vrot.slane %v3996_v17, 5  ;;  %v9261_v20 = vcombine.low %v13021_v7, %v13111_v42  ;;  %v15448_v7 = vcombine.low %v13116_v36, %v13132_v19 }
  0xf2   : > { %10448 = vmatprep.subr.bf16.mxu0 %v11517_v4  ;;  %15431 = vst [vmem:[#allocation25_spill] sm:$0xff] %v13196_v15  ;;  %15432 = vst [vmem:[#allocation26_spill] sm:$0xff] %v13211_v11  ;;  %v4024_v15 = vshll.u32 %v9372_v29, 16  ;;  %v11520_v61 = vld [vmem:[%s15409_s29 + $0x1a8] sm:$0xff]   ;;  %v15453_v36 = vld [vmem:[#allocation22_spill] sm:$0xff] }
  0xf3   : > { %v3995_v56 = vrot.slane %v3993_v63, 4  ;;  %v15434_v63 = vor.u32 %v13054_v35, %v13052_v41  ;;  %v13254_v41 = vld [vmem:[%s12003_s22 + $0x3c] sm:$0x1]  ;;  %v13257_v35 = vld [vmem:[%s12003_s22 + $0x44] sm:$0x1] }
  0xf4   : > { %10441 = vmatmul.mubr.msk.bf16.gmra.mrb[4].mxu0 %vm807_vm3, %v12976_v6  ;;  %v15430_v6 = vcombine.low %v12902_v62, %v12906_v44  ;;  %v4010_v62 = vshll.u32 %v9370_v23, 16  ;;  %v9374_v44 = vld [vmem:[%s12003_s22 + $0x48] sm:$0xf]  ;;  %v15435_v23 = vor.u32 %v13065_v40, %v13063_v55  ;;  %15437 = vst [vmem:[#allocation27_spill] sm:$0xff] %v13254_v41  ;;  %15438 = vst [vmem:[#allocation28_spill] sm:$0xff] %v13257_v35 }
  0xf5   : > { %10449 = vmatpush3.bf16.msra.mxu0 %v11517_v4  ;;  %v3451_v4 = vor.u32 %v13085_v8, %v13078_v16  ;;  %v15433_v16 = vor.u32 %v13030_v34, %v12972_v25  ;;  %v13234_v17 = vsel %vm12253_vm9, %v13061_v57, %v15434_v63  ;;  %v4035_v57 = vshrl.u32 %v9374_v44, 16 }
  0xf6   : > { %10452 = vmatprep.mubr.msk.bf16.mxu0 %vm807_vm3, %v15430_v6  ;;  %10450 = vmatprep.subr.bf16.mxu0 %v11518_v37  ;;  %v4021_v6 = vshrl.u32 %v9372_v29, 16  ;;  %v9376_v29 = vld [vmem:[%s12003_s22 + $0x50] sm:$0xf]  ;;  %v13243_v25 = vsel %vm12253_vm9, %v13072_v33, %v15435_v23  ;;  %v3469_v40 = vor.u32 %v13093_v53, %v13091_v22  ;;  %v4012_v33 = vrot.slane %v4010_v62, 5 }
  0xf7   : > { %v13226_v8 = vsel %vm12253_vm9, %v13028_v38, %v15433_v16  ;;  %v15436_v38 = vor.u32 %v13076_v48, %v13067_v21  ;;  %v13262_v55 = vsel %vm12253_vm9, %v13083_v13, %v3451_v4  ;;  %v4009_v21 = vrot.slane %v4007_v24, 4  ;;  %v13280_v24 = vld [vmem:[%s12003_s22 + $0x54] sm:$0x1] }
  0xf8   : > { %v4023_v48 = vrot.slane %v4021_v6, 4  ;;  %v4026_v23 = vrot.slane %v4024_v15, 5  ;;  %v4049_v16 = vshrl.u32 %v9376_v29, 16  ;;  %v4052_v63 = vshll.u32 %v9376_v29, 16  ;;  %15441 = vst [vmem:[#allocation30_spill] sm:$0xff] %v13280_v24  ;;  %v11522_v29 = vld [vmem:[%s15409_s29 + $0x1b8] sm:$0xff]  }
  0xf9   : > { %10451 = vmatpush3.bf16.msra.mxu0 %v11518_v37  ;;  %v13251_v34 = vsel %vm12253_vm9, %v13074_v58, %v15436_v38  ;;  %v4038_v37 = vshll.u32 %v9374_v44, 16  ;;  %v13267_v58 = vld [vmem:[%s12003_s22 + $0x4c] sm:$0x1]  ;;  %v15440_v44 = vcombine.low %v12935_v52, %v12954_v54  ;;  %v3957_v13 = vor.u32 %v13183_v3, %v13181_v49 }
  0xfa   : > { %10460 = vmatprep.subr.bf16.mxu0 %v11519_v5  ;;  %15439 = vst [vmem:[#allocation29_spill] sm:$0xff] %v13267_v58  ;;  %v3971_v4 = vor.u32 %v13194_v47, %v13187_v60  ;;  %v3988_v22 = vshll.u32 %v13208_v32, 16  ;;  %v4002_v53 = vshll.u32 %v13211_v11, 16  ;;  %v3985_v52 = vor.u32 %v13200_v18, %v13198_v10  ;;  %v11521_v60 = vld [vmem:[%s15409_s29 + $0x1b0] sm:$0xff]  }
  0xfb   : > { %v3999_v54 = vor.u32 %v3998_v28, %v3995_v56  ;;  %v4037_v15 = vrot.slane %v4035_v57, 4  ;;  %v4040_v62 = vrot.slane %v4038_v37, 5  ;;  %v4013_v47 = vor.u32 %v4012_v33, %v4009_v21 }
  0xfc   : > { %10453 = vmatmul.mubr.msk.bf16.vlgmr.msra.gmra.mrb[0].mxu0 %vm807_vm3, %v15440_v44  ;;  %v4016_v3 = vshll.u32 %v13254_v41, 16  ;;  %v4030_v49 = vshll.u32 %v13257_v35, 16  ;;  %v15443_v10 = vrot.slane %v13050_v51, 10  ;;  %v4027_v56 = vor.u32 %v4026_v23, %v4023_v48  ;;  %v13325_v44 = vld [vmem:[%s12003_s22 + $0x20] sm:$0xe] }
  0xfd   : > { %10461 = vmatpush3.bf16.msra.mxu0 %v11519_v5  ;;  %10456 = vmatprep.mubr.msk.bf16.mxu0 %vm807_vm3, %v9260_v1  ;;  %v4044_v5 = vshll.u32 %v13267_v58, 16  ;;  %v15442_v1 = vrot.slane %v12874_v46, 6  ;;  %v4051_v28 = vrot.slane %v4049_v16, 4  ;;  %v4054_v6 = vrot.slane %v4052_v63, 5  ;;  %v13322_v63 = vld [vmem:[%s12003_s22 + $0x18] sm:$0xe] }
  0xfe   : > { %10462 = vmatprep.subr.bf16.mxu0 %v11520_v61  ;;  %v13302_v38 = vrot.slane %v3957_v13, 4  ;;  %v13304_v57 = vrot.slane %v3971_v4, 4  ;;  %v13306_v37 = vrot.slane %v3988_v22, 5  ;;  %v4058_v46 = vshll.u32 %v13280_v24, 16  ;;  %v13480_v41 = vld [vmem:[%s12003_s22 + $0x34] sm:$0x3] }
  0xff   : > { %v13297_v18 = vsel %vm12320_vm12, %v15443_v10, %v15442_v1  ;;  %v15444_v51 = vrot.slane %v12910_v59, 6  ;;  %v15445_v21 = vrot.slane %v13059_v14, 10  ;;  %v13317_v48 = vrot.slane %v3985_v52, 4  ;;  %15471 = vst [vmem:[#allocation35_spill] sm:$0xff] %v13480_v41 }
 0x100   : > { %v13319_v23 = vrot.slane %v4002_v53, 5  ;;  %v4041_v16 = vor.u32 %v4040_v62, %v4037_v15  ;;  %v13329_v59 = vrot.slane %v4013_v47, 4  ;;  %v13331_v14 = vrot.slane %v4016_v3, 5  ;;  %v13345_v15 = vld [vmem:[%s12003_s22 + $0x28] sm:$0xe]  ;;  %v15457_v47 = vld [vmem:[#allocation20_spill] sm:$0xff] }
 0x101   : > { %10463 = vmatpush3.bf16.msra.mxu0 %v11520_v61  ;;  %v13315_v33 = vsel %vm12320_vm12, %v15445_v21, %v15444_v51  ;;  %v13327_v61 = vrot.slane %v3999_v54, 4  ;;  %v13333_v13 = vrot.slane %v4030_v49, 5  ;;  %v13338_v4 = vsel %vm12253_vm9, %v13149_v2, %v3469_v40  ;;  %15446 = vst [vmem:[#allocation31_spill] sm:$0xff] %v13345_v15  ;;  %v11523_v54 = vld [vmem:[%s15409_s29 + $0x1c0] sm:$0xff]   ;;  %v13360_v3 = vld [vmem:[%s12003_s22 + $0x30] sm:$0xe] }
 0x102   : > { %10464 = vmatprep.subr.bf16.mxu0 %v11521_v60  ;;  %v13340_v22 = vrot.slane %v4027_v56, 4  ;;  %v13342_v53 = vrot.slane %v4044_v5, 5  ;;  %v4055_v52 = vor.u32 %v4054_v6, %v4051_v28  ;;  %v13354_v62 = vrot.slane %v4058_v46, 5  ;;  %15447 = vst [vmem:[#allocation32_spill] sm:$0xff] %v13360_v3  ;;  %v13370_v49 = vld [vmem:[%s12003_s22 + $0x38] sm:$0xe] }
 0x103   : > { %v13366_v42 = vrot.slane %v4041_v16, 4  ;;  %15449 = vst [vmem:[#allocation33_spill] sm:$0xff] %v13370_v49  ;;  %v4387_v5 = vshrl.u32 %v13322_v63, 16  ;;  %v4390_v1 = vshll.u32 %v13322_v63, 16  ;;  %v4405_v19 = vshrl.u32 %v13325_v44, 16  ;;  %v11524_v21 = vld [vmem:[%s15409_s29 + $0x1c8] sm:$0xff]  }
 0x104   : > { %10457 = vmatmul.mubr.msk.bf16.gmra.mrb[4].mxu0 %vm807_vm3, %v9261_v20  ;;  %v4408_v10 = vshll.u32 %v13325_v44, 16  ;;  %v9287_v56 = vcombine.low %v13226_v8, %v13234_v17  ;;  %v9288_v28 = vcombine.low %v13243_v25, %v13251_v34  ;;  %v13382_v6 = vrot.slane %v4055_v52, 4  ;;  %v13386_v51 = vld [vmem:[%s12003_s22 + $0x40] sm:$0xe]  ;;  %v13404_v52 = vld [vmem:[%s12003_s22 + $0x48] sm:$0xe] }
 0x105   : > { %10465 = vmatpush3.bf16.msra.mxu0 %v11521_v60  ;;  %10468 = vmatprep.mubr.msk.bf16.mxu0 %vm807_vm3, %v15448_v7  ;;  %15450 = vst [vmem:[#allocation34_spill] sm:$0xff] %v13386_v51  ;;  %v15451_v7 = vld [vmem:[#allocation19_spill] sm:$0xff]  ;;  %v15454_v8 = vrot.slane %v15453_v36, 10  ;;  %v13407_v46 = vld [vmem:[%s12003_s22 + $0x1c] sm:$0x3]  ;;  %v15458_v36 = vrot.slane %v15457_v47, 6 }
 0x106   : > { %10466 = vmatprep.subr.bf16.mxu0 %v11522_v29  ;;  %v15452_v60 = vrot.slane %v15451_v7, 6  ;;  %15455 = vst [vmem:[#allocation19_spill] sm:$0xff] %v13404_v52  ;;  %15456 = vst [vmem:[#allocation22_spill] sm:$0xff] %v13407_v46  ;;  %v9289_v7 = vcombine.low %v13262_v55, %v13338_v4  ;;  %v15459_v20 = vld [vmem:[#allocation23_spill] sm:$0xff]  ;;  %v4389_v34 = vrot.slane %v4387_v5, 5  ;;  %v4392_v25 = vrot.slane %v4390_v1, 6 }
 0x107   : > { %v15460_v2 = vrot.slane %v15459_v20, 10  ;;  %v4407_v16 = vrot.slane %v4405_v19, 5  ;;  %v4423_v12 = vshrl.u32 %v13345_v15, 16  ;;  %v15462_v55 = vld [vmem:[#allocation21_spill] sm:$0xff]  ;;  %v15464_v47 = vld [vmem:[#allocation24_spill] sm:$0xff]  ;;  %v15467_v5 = vrot.slane %v13139_v9, 10 }
 0x108   : > { %v13399_v17 = vsel %vm12320_vm12, %v15454_v8, %v15452_v60  ;;  %v13420_v8 = vld [vmem:[%s12003_s22 + $0x24] sm:$0x3]  ;;  %v15463_v4 = vrot.slane %v15462_v55, 6  ;;  %v15465_v11 = vrot.slane %v15464_v47, 10  ;;  %v4426_v55 = vshll.u32 %v13345_v15, 16 }
 0x109   : > { %10467 = vmatpush3.bf16.msra.mxu0 %v11522_v29  ;;  %v13417_v60 = vsel %vm12320_vm12, %v15460_v2, %v15458_v36  ;;  %15461 = vst [vmem:[#allocation20_spill] sm:$0xff] %v13420_v8  ;;  %v4410_v29 = vrot.slane %v4408_v10, 6  ;;  %v15466_v2 = vrot.slane %v12988_v26, 6  ;;  %v13442_v10 = vld [vmem:[%s12003_s22 + $0x50] sm:$0xe]  ;;  %v4396_v26 = vshrl.u32 %v13407_v46, 16 }
 0x10a   : > { %10476 = vmatprep.subr.bf16.mxu0 %v11523_v54  ;;  %v13430_v20 = vsel %vm12320_vm12, %v15465_v11, %v15463_v4  ;;  %v13445_v36 = vld [vmem:[%s12003_s22 + $0x2c] sm:$0x3]  ;;  %v4399_v9 = vshll.u32 %v13407_v46, 16  ;;  %v4414_v4 = vshrl.u32 %v13420_v8, 16  ;;  %v4417_v19 = vshll.u32 %v13420_v8, 16 }
 0x10b   : > { %v13438_v1 = vsel %vm12320_vm12, %v15467_v5, %v15466_v2  ;;  %15468 = vst [vmem:[#allocation23_spill] sm:$0xff] %v13445_v36  ;;  %v4393_v5 = vor.u32 %v4392_v25, %v4389_v34  ;;  %v4411_v40 = vor.u32 %v4410_v29, %v4407_v16  ;;  %v4425_v35 = vrot.slane %v4423_v12, 5  ;;  %v11526_v34 = vld [vmem:[%s15409_s29 + $0x1d8] sm:$0xff]  }
 0x10c   : > { %10469 = vmatmul.mubr.msk.bf16.vlgmr.msra.gmra.mrb[0].mxu0 %vm807_vm3, %v9287_v56  ;;  %v11525_v56 = vld [vmem:[%s15409_s29 + $0x1d0] sm:$0xff]   ;;  %v4435_v47 = vshll.u32 %v13445_v36, 16  ;;  %v4441_v2 = vshrl.u32 %v13360_v3, 16  ;;  %v4444_v25 = vshll.u32 %v13360_v3, 16  ;;  %v13469_v11 = vrot.slane %v4396_v26, 5 }
 0x10d   : > { %10477 = vmatpush3.bf16.msra.mxu0 %v11523_v54  ;;  %10472 = vmatprep.mubr.msk.bf16.mxu0 %vm807_vm3, %v9288_v28  ;;  %v4432_v54 = vshrl.u32 %v13445_v36, 16  ;;  %v4428_v28 = vrot.slane %v4426_v55, 6  ;;  %v13471_v16 = vrot.slane %v4399_v9, 6  ;;  %v13473_v12 = vrot.slane %v4414_v4, 5  ;;  %v13489_v9 = vld [vmem:[%s12003_s22 + $0x3c] sm:$0x3] }
 0x10e   : > { %10478 = vmatprep.subr.bf16.mxu0 %v11524_v21  ;;  %v13475_v29 = vrot.slane %v4393_v5, 4  ;;  %v13477_v55 = vrot.slane %v4417_v19, 6  ;;  %v4459_v3 = vshrl.u32 %v13370_v49, 16  ;;  %v4462_v15 = vshll.u32 %v13370_v49, 16  ;;  %15474 = vst [vmem:[#allocation38_spill] sm:$0xff] %v13489_v9 }
 0x10f   : > { %v13484_v58 = vrot.slane %v4411_v40, 4  ;;  %v13486_v26 = vrot.slane %v4432_v54, 5  ;;  %v4480_v4 = vshll.u32 %v13386_v51, 16  ;;  %v4429_v19 = vor.u32 %v4428_v28, %v4425_v35  ;;  %v11527_v40 = vld [vmem:[%s15409_s29 + $0x1e0] sm:$0xff]  }
 0x110   : > { %15469 = vst [vmem:[#allocation21_spill] sm:$0xff] %v13475_v29  ;;  %15470 = vst [vmem:[#allocation24_spill] sm:$0xff] %v13477_v55  ;;  %v13493_v5 = vrot.slane %v4435_v47, 6  ;;  %v4443_v29 = vrot.slane %v4441_v2, 5  ;;  %v4446_v24 = vrot.slane %v4444_v25, 6  ;;  %v4450_v54 = vshrl.u32 %v13480_v41, 16 }
 0x111   : > { %10479 = vmatpush3.bf16.msra.mxu0 %v11524_v21  ;;  %15472 = vst [vmem:[#allocation36_spill] sm:$0xff] %v13484_v58  ;;  %15473 = vst [vmem:[#allocation37_spill] sm:$0xff] %v13486_v26  ;;  %v4477_v21 = vshrl.u32 %v13386_v51, 16  ;;  %v4453_v26 = vshll.u32 %v13480_v41, 16  ;;  %v13502_v58 = vld [vmem:[%s12003_s22 + $0x44] sm:$0x3]  ;;  %v9323_v28 = vcombine.low %v13399_v17, %v13417_v60  ;;  %v9324_v25 = vcombine.low %v13430_v20, %v13438_v1 }
 0x112   : > { %10480 = vmatprep.subr.bf16.mxu0 %v11525_v56  ;;  %15475 = vst [vmem:[#allocation39_spill] sm:$0xff] %v13493_v5  ;;  %15476 = vst [vmem:[#allocation40_spill] sm:$0xff] %v13502_v58  ;;  %v4495_v51 = vshrl.u32 %v13404_v52, 16  ;;  %v4498_v35 = vshll.u32 %v13404_v52, 16  ;;  %v4461_v47 = vrot.slane %v4459_v3, 5  ;;  %v4464_v2 = vrot.slane %v4462_v15, 6 }
 0x113   : > { %v4479_v5 = vrot.slane %v4477_v21, 5  ;;  %v4482_v49 = vrot.slane %v4480_v4, 6  ;;  %v13514_v55 = vrot.slane %v4429_v19, 4  ;;  %v4447_v52 = vor.u32 %v4446_v24, %v4443_v29  ;;  %v13522_v3 = vld [vmem:[%s12003_s22 + $0x54] sm:$0x3] }
 0x114   : > { %10473 = vmatmul.mubr.msk.bf16.gmra.mrb[4].mxu0 %vm807_vm3, %v9289_v7  ;;  %v15477_v7 = vcombine.low %v13297_v18, %v13315_v33  ;;  %v4471_v18 = vshll.u32 %v13489_v9, 16  ;;  %v13519_v33 = vld [vmem:[%s12003_s22 + $0x4c] sm:$0x3]  ;;  %15480 = vst [vmem:[#allocation43_spill] sm:$0xff] %v13522_v3  ;;  %v4497_v15 = vrot.slane %v4495_v51, 5  ;;  %v4513_v17 = vshrl.u32 %v13442_v10, 16 }
 0x115   : > { %10481 = vmatpush3.bf16.msra.mxu0 %v11525_v56  ;;  %15478 = vst [vmem:[#allocation41_spill] sm:$0xff] %v13514_v55  ;;  %v4468_v56 = vshrl.u32 %v13489_v9, 16  ;;  %15479 = vst [vmem:[#allocation42_spill] sm:$0xff] %v13519_v33  ;;  %v4516_v60 = vshll.u32 %v13442_v10, 16  ;;  %v15481_v20 = vrot.slane %v12994_v0, 6  ;;  %v15482_v24 = vrot.slane %v13142_v30, 10 }
 0x116   : > { %10484 = vmatprep.mubr.msk.bf16.mxu0 %vm807_vm3, %v15477_v7  ;;  %10482 = vmatprep.subr.bf16.mxu0 %v11526_v34  ;;  %v4500_v7 = vrot.slane %v4498_v35, 6  ;;  %v13532_v29 = vrot.slane %v4450_v54, 5  ;;  %v4465_v21 = vor.u32 %v4464_v2, %v4461_v47  ;;  %v4486_v4 = vshrl.u32 %v13502_v58, 16  ;;  %v11528_v51 = vld [vmem:[%s15409_s29 + $0x1e8] sm:$0xff]  }
 0x117   : > { %v3652_v1 = vsel %vm12320_vm12, %v15482_v24, %v15481_v20  ;;  %v4483_v19 = vor.u32 %v4482_v49, %v4479_v5  ;;  %v4504_v0 = vshrl.u32 %v13519_v33, 16  ;;  %v4507_v30 = vshll.u32 %v13519_v33, 16  ;;  %v13550_v20 = vld [vmem:[%s12003_s22 + $0x18] sm:$0xc]  ;;  %v11529_v49 = vld [vmem:[%s15409_s29 + $0x1f0] sm:$0xff]  }
 0x118   : > { %v13541_v35 = vrot.slane %v4447_v52, 4  ;;  %v13543_v54 = vrot.slane %v4453_v26, 6  ;;  %v13545_v47 = vrot.slane %v4468_v56, 5  ;;  %v13547_v2 = vrot.slane %v4471_v18, 6  ;;  %15484 = vst [vmem:[#allocation45_spill] sm:$0xff] %v13550_v20 }
 0x119   : > { %10483 = vmatpush3.bf16.msra.mxu0 %v11526_v34  ;;  %v4489_v34 = vshll.u32 %v13502_v58, 16  ;;  %v15485_v5 = vrot.slane %v13039_v50, 6  ;;  %v15486_v52 = vrot.slane %v13161_v45, 10  ;;  %v4501_v56 = vor.u32 %v4500_v7, %v4497_v15 }
 0x11a   : > { %10492 = vmatprep.subr.bf16.mxu0 %v11527_v40  ;;  %15483 = vst [vmem:[#allocation44_spill] sm:$0xff] %v13541_v35  ;;  %v4515_v24 = vrot.slane %v4513_v17, 5  ;;  %v4518_v18 = vrot.slane %v4516_v60, 6  ;;  %v13563_v35 = vld [vmem:[%s12003_s22 + $0x20] sm:$0xc]  ;;  %v13568_v55 = vrot.slane %v4486_v4, 5 }
 0x11b   : > { %v3656_v26 = vsel %vm12320_vm12, %v15486_v52, %v15485_v5  ;;  %15487 = vst [vmem:[#allocation46_spill] sm:$0xff] %v13563_v35  ;;  %v4522_v50 = vshrl.u32 %v13522_v3, 16  ;;  %v4525_v45 = vshll.u32 %v13522_v3, 16  ;;  %v13573_v5 = vld [vmem:[%s12003_s22 + $0x28] sm:$0xc]  ;;  %v13575_v15 = vrot.slane %v4483_v19, 4 }
 0x11c   : > { %10485 = vmatmul.mubr.msk.bf16.vlgmr.msra.gmra.mrb[0].mxu0 %vm807_vm3, %v9323_v28  ;;  %v13566_v28 = vrot.slane %v4465_v21, 4  ;;  %15488 = vst [vmem:[#allocation47_spill] sm:$0xff] %v13573_v5  ;;  %v13577_v7 = vrot.slane %v4489_v34, 6  ;;  %v11531_v17 = vld [vmem:[%s12003_s22 + $0x18] ss:$8 sps:$4 sm:$0xff]   ;;  %v9325_v21 = vcombine.low %v3652_v1, %v3656_v26  ;;  %v13590_v52 = vrot.slane %v4501_v56, 4 }
 0x11d   : > { %10493 = vmatpush3.bf16.msra.mxu0 %v11527_v40  ;;  %10488 = vmatprep.mubr.msk.bf16.mxu0 %vm807_vm3, %v9324_v25  ;;  %v13579_v40 = vrot.slane %v4504_v0, 5  ;;  %v13581_v25 = vrot.slane %v4507_v30, 6  ;;  %v13585_v60 = vld [vmem:[%s12003_s22 + $0x30] sm:$0xc]  ;;  %v11530_v4 = vld [vmem:[%s15409_s29 + $0x1f8] sm:$0xff]   ;;  %v4519_v19 = vor.u32 %v4518_v18, %v4515_v24  ;;  %v13596_v0 = vrot.slane %v4522_v50, 5 }
 0x11e   : > { %10494 = vmatprep.subr.bf16.mxu0 %v11528_v51  ;;  %15490 = vst [vmem:[#allocation49_spill] sm:$0xff] %v13585_v60  ;;  %15491 = vst [vmem:[#allocation50_spill] sm:$0xff] %v13590_v52  ;;  %v13598_v30 = vrot.slane %v4525_v45, 6  ;;  %v3963_v24 = vsel %vm12045_vm2, %v13302_v38, %v13185_v31  ;;  %v15495_v18 = vld [vmem:[#allocation25_spill] sm:$0xff]  ;;  %v9526_v34 = vld [vmem:[%s12003_s22 + $0x20] sm:$0xf]  ;;  %v3991_v1 = vsel %vm12045_vm2, %v13317_v48, %v13306_v37 }
 0x11f   : > { %15489 = vst [vmem:[#allocation48_spill] sm:$0xff] %v13581_v25  ;;  %v13603_v25 = vld [vmem:[%s12003_s22 + $0x40] sm:$0xc]  ;;  %v13617_v26 = vld [vmem:[%s12003_s22 + $0x24] sm:$0x1]  ;;  %v4005_v31 = vsel %vm12045_vm2, %v13327_v61, %v13319_v23  ;;  %v4019_v38 = vsel %vm12045_vm2, %v13329_v59, %v13331_v14  ;;  %v13640_v48 = vrot.slane %v4519_v19, 4 }
 0x120   : > { %15493 = vst [vmem:[#allocation52_spill] sm:$0xff] %v13603_v25  ;;  %15496 = vst [vmem:[#allocation15_spill] sm:$0xff] %v13617_v26  ;;  %v11532_v37 = vld [vmem:[%s15409_s29 + $0x200] sm:$0xff]   ;;  %v13646_v14 = vld [vmem:[%s12003_s22 + $0x48] sm:$0xc]  ;;  %v5010_v19 = vshrl.u32 %v9526_v34, 16 }
 0x121   : > { %10495 = vmatpush3.bf16.msra.mxu0 %v11528_v51  ;;  %v3977_v51 = vsel %vm12045_vm2, %v13304_v57, %v15495_v18  ;;  %v4033_v57 = vsel %vm12045_vm2, %v13340_v22, %v13333_v13  ;;  %v9528_v18 = vld [vmem:[%s12003_s22 + $0x28] sm:$0xf]  ;;  %15497 = vst [vmem:[#allocation25_spill] sm:$0xff] %v13640_v48  ;;  %15498 = vst [vmem:[#allocation53_spill] sm:$0xff] %v13646_v14  ;;  %v5013_v45 = vshll.u32 %v9526_v34, 16  ;;  %v15501_v25 = vrot.slane %v13122_v39, 5 }
 0x122   : > { %10496 = vmatprep.subr.bf16.mxu0 %v11529_v49  ;;  %v11533_v61 = vld [vmem:[%s12003_s22 + $0x28] ss:$8 sps:$4 sm:$0xff]   ;;  %v11535_v13 = vld [vmem:[%s12003_s22 + $0x38] ss:$8 sps:$4 sm:$0xff]   ;;  %v13662_v43 = vcombine.low %v3963_v24, %v3977_v51  ;;  %v13664_v22 = vcombine.low %v3991_v1, %v4005_v31  ;;  %v13666_v9 = vcombine.low %v4019_v38, %v4033_v57  ;;  %v5027_v58 = vshll.u32 %v9528_v18, 16 }
 0x123   : > { %v13658_v50 = vld [vmem:[%s12003_s22 + $0x50] sm:$0xc]  ;;  %v9532_v60 = vld [vmem:[%s12003_s22 + $0x38] sm:$0xf]  ;;  %v11534_v59 = vld [vmem:[%s15409_s29 + $0x208] sm:$0xff]   ;;  %v5012_v51 = vrot.slane %v5010_v19, 4 }
 0x124   : > { %10489 = vmatmul.mubr.msk.bf16.gmra.mrb[4].mxu0 %vm807_vm3, %v9325_v21  ;;  %v13652_v21 = vld [vmem:[%s12003_s22 + $0x2c] sm:$0x1]  ;;  %15500 = vst [vmem:[#allocation55_spill] sm:$0xff] %v13658_v50  ;;  %v9530_v34 = vld [vmem:[%s12003_s22 + $0x30] sm:$0xf]  ;;  %v5015_v31 = vrot.slane %v5013_v45, 5 }
 0x125   : > { %10497 = vmatpush3.bf16.msra.mxu0 %v11529_v49  ;;  %10500 = vmatprep.mubr.msk.bf16.mxu0 %vm807_vm3, %v11531_v17  ;;  %15499 = vst [vmem:[#allocation54_spill] sm:$0xff] %v13652_v21  ;;  %v5019_v49 = vshll.u32 %v13617_v26, 16  ;;  %v5024_v17 = vshrl.u32 %v9528_v18, 16  ;;  %v5033_v41 = vshll.u32 %v13652_v21, 16  ;;  %v9534_v38 = vld [vmem:[%s12003_s22 + $0x40] sm:$0xf] }
 0x126   : > { %10498 = vmatprep.subr.bf16.mxu0 %v11530_v4  ;;  %v5038_v57 = vshrl.u32 %v9530_v34, 16  ;;  %v5041_v5 = vshll.u32 %v9530_v34, 16  ;;  %v5052_v36 = vshrl.u32 %v9532_v60, 16  ;;  %v5055_v35 = vshll.u32 %v9532_v60, 16  ;;  %v9536_v23 = vld [vmem:[%s12003_s22 + $0x48] sm:$0xf] }
 0x127   : > { %v15502_v18 = vrot.slane %v13322_v63, 9  ;;  %v15504_v19 = vrot.slane %v13153_v27, 5  ;;  %v15505_v45 = vrot.slane %v13325_v44, 9  ;;  %v13696_v34 = vrot.slane %v5019_v49, 5  ;;  %v11536_v39 = vld [vmem:[%s15409_s29 + $0x210] sm:$0xff]   ;;  %v11566_v56 = vld [vmem:[%s15409_s29 + $0x2d8] sm:$0xff]  }
 0x128   : > { %v5026_v60 = vrot.slane %v5024_v17, 4  ;;  %v5029_v63 = vrot.slane %v5027_v58, 5  ;;  %v13705_v27 = vld [vmem:[%s12003_s22 + $0x34] sm:$0x1]  ;;  %v5066_v44 = vshrl.u32 %v9534_v38, 16  ;;  %v5016_v49 = vor.u32 %v5015_v31, %v5012_v51 }
 0x129   : > { %10499 = vmatpush3.bf16.msra.mxu0 %v11530_v4  ;;  %v13686_v4 = vsel %vm12147_vm6, %v15502_v18, %v15501_v25  ;;  %v13694_v1 = vsel %vm12147_vm6, %v15505_v45, %v15504_v19  ;;  %15506 = vst [vmem:[#allocation56_spill] sm:$0xff] %v13696_v34  ;;  %v13702_v25 = vrot.slane %v5033_v41, 5  ;;  %15508 = vst [vmem:[#allocation58_spill] sm:$0xff] %v13705_v27  ;;  %v5069_v18 = vshll.u32 %v9534_v38, 16  ;;  %v13713_v17 = vld [vmem:[%s12003_s22 + $0x3c] sm:$0x1] }
 0x12a   : > { %10508 = vmatprep.subr.bf16.mxu0 %v11532_v37  ;;  %15509 = vst [vmem:[#allocation59_spill] sm:$0xff] %v13713_v17  ;;  %v5080_v41 = vshrl.u32 %v9536_v23, 16  ;;  %v5083_v58 = vshll.u32 %v9536_v23, 16  ;;  %v9538_v19 = vld [vmem:[%s12003_s22 + $0x50] sm:$0xf]  ;;  %v5040_v24 = vrot.slane %v5038_v57, 4 }
 0x12b   : > { %15507 = vst [vmem:[#allocation57_spill] sm:$0xff] %v13702_v25  ;;  %v11537_v45 = vld [vmem:[%s12003_s22 + $0x48] ss:$8 sps:$4 sm:$0xff]   ;;  %v5043_v38 = vrot.slane %v5041_v5, 5  ;;  %v5057_v25 = vrot.slane %v5055_v35, 5  ;;  %v15511_v23 = vrot.slane %v13208_v32, 5 }
 0x12c   : > { %10501 = vmatmul.mubr.msk.bf16.vlgmr.msra.gmra.mrb[0].mxu0 %vm807_vm3, %v11533_v61  ;;  %v15512_v61 = vld [vmem:[#allocation31_spill] sm:$0xff]  ;;  %v15516_v57 = vld [vmem:[#allocation32_spill] sm:$0xff]  ;;  %v9540_v31 = vld [vmem:[%s12003_s22 + $0x58] sm:$0xf]  ;;  %v5068_v33 = vrot.slane %v5066_v44, 4  ;;  %v5071_v32 = vrot.slane %v5069_v18, 5 }
 0x12d   : > { %10509 = vmatpush3.bf16.msra.mxu0 %v11532_v37  ;;  %10504 = vmatprep.mubr.msk.bf16.mxu0 %vm807_vm3, %v11535_v13  ;;  %v5054_v37 = vrot.slane %v5052_v36, 4  ;;  %v13718_v13 = vld [vmem:[%s12003_s22 + $0x44] sm:$0x1]  ;;  %v15513_v34 = vrot.slane %v15512_v61, 9  ;;  %v15514_v36 = vld [vmem:[#allocation26_spill] sm:$0xff]  ;;  %v15517_v50 = vrot.slane %v15516_v57, 9  ;;  %v5044_v46 = vor.u32 %v5043_v38, %v5040_v24 }
 0x12e   : > { %10510 = vmatprep.subr.bf16.mxu0 %v11534_v59  ;;  %15510 = vst [vmem:[#allocation60_spill] sm:$0xff] %v13718_v13  ;;  %v15515_v35 = vrot.slane %v15514_v36, 5  ;;  %v13743_v51 = vld [vmem:[%s12003_s22 + $0x4c] sm:$0x1]  ;;  %v5094_v8 = vshrl.u32 %v9538_v19, 16  ;;  %v5097_v61 = vshll.u32 %v9538_v19, 16 }
 0x12f   : > { %v13732_v5 = vsel %vm12147_vm6, %v15513_v34, %v15511_v23  ;;  %15518 = vst [vmem:[#allocation31_spill] sm:$0xff] %v13743_v51  ;;  %v11538_v34 = vld [vmem:[%s15409_s29 + $0x218] sm:$0xff]   ;;  %v5030_v23 = vor.u32 %v5029_v63, %v5026_v60  ;;  %v5047_v36 = vshll.u32 %v13705_v27, 16  ;;  %v5082_v57 = vrot.slane %v5080_v41, 4  ;;  %v11539_v24 = vld [vmem:[%s15409_s29 + $0x220] sm:$0xff]  }
 0x130   : > { %v13740_v3 = vsel %vm12147_vm6, %v15517_v50, %v15515_v35  ;;  %v5085_v20 = vrot.slane %v5083_v58, 5  ;;  %v13751_v50 = vld [vmem:[%s12003_s22 + $0x54] sm:$0x1]  ;;  %v13753_v35 = vrot.slane %v5016_v49, 4  ;;  %v5061_v44 = vshll.u32 %v13713_v17, 16 }
 0x131   : > { %10511 = vmatpush3.bf16.msra.mxu0 %v11534_v59  ;;  %15519 = vst [vmem:[#allocation26_spill] sm:$0xff] %v13751_v50  ;;  %v13757_v18 = vld [vmem:[%s12003_s22 + $0x5c] sm:$0x1]  ;;  %v5108_v19 = vshrl.u32 %v9540_v31, 16  ;;  %v5111_v59 = vshll.u32 %v9540_v31, 16  ;;  %v5058_v48 = vor.u32 %v5057_v25, %v5054_v37  ;;  %v5075_v60 = vshll.u32 %v13718_v13, 16 }
 0x132   : > { %10512 = vmatprep.subr.bf16.mxu0 %v11536_v39  ;;  %15520 = vst [vmem:[#allocation32_spill] sm:$0xff] %v13757_v18  ;;  %v5089_v63 = vshll.u32 %v13743_v51, 16  ;;  %v5072_v41 = vor.u32 %v5071_v32, %v5068_v33  ;;  %v5096_v58 = vrot.slane %v5094_v8, 4  ;;  %v5099_v52 = vrot.slane %v5097_v61, 5  ;;  %v13774_v8 = vld [vmem:[%s12003_s22 + $0x20] sm:$0xe] }
 0x133   : > { %v5103_v49 = vshll.u32 %v13751_v50, 16  ;;  %v13768_v25 = vrot.slane %v5030_v23, 4  ;;  %v13770_v38 = vrot.slane %v5047_v36, 5  ;;  %v5086_v37 = vor.u32 %v5085_v20, %v5082_v57  ;;  %15522 = vst [vmem:[#allocation62_spill] sm:$0xff] %v13774_v8  ;;  %v13789_v57 = vld [vmem:[%s12003_s22 + $0x28] sm:$0xe] }
 0x134   : > { %10505 = vmatmul.mubr.msk.bf16.gmra.mrb[4].mxu0 %vm807_vm3, %v11537_v45  ;;  %v5117_v33 = vshll.u32 %v13757_v18, 16  ;;  %v5110_v31 = vrot.slane %v5108_v19, 4  ;;  %v5113_v32 = vrot.slane %v5111_v59, 5  ;;  %v13780_v61 = vrot.slane %v5044_v46, 4  ;;  %15525 = vst [vmem:[#allocation63_spill] sm:$0xff] %v13789_v57  ;;  %v15527_v19 = vld [vmem:[#allocation27_spill] sm:$0xff] }
 0x135   : > { %10513 = vmatpush3.bf16.msra.mxu0 %v11536_v39  ;;  %10516 = vmatprep.mubr.msk.bf16.mxu0 %vm807_vm3, %v13662_v43  ;;  %15521 = vst [vmem:[#allocation61_spill] sm:$0xff] %v13770_v38  ;;  %v4402_v39 = vor.u32 %v13471_v16, %v13469_v11  ;;  %v15523_v43 = vld [vmem:[#allocation24_spill] sm:$0xff]  ;;  %v13782_v23 = vrot.slane %v5058_v48, 4  ;;  %v13784_v36 = vrot.slane %v5061_v44, 5  ;;  %v13786_v20 = vrot.slane %v5075_v60, 5  ;;  %v15529_v59 = vld [vmem:[#allocation33_spill] sm:$0xff] }
 0x136   : > { %10514 = vmatprep.subr.bf16.mxu0 %v11538_v34  ;;  %v4420_v45 = vor.u32 %v15523_v43, %v13473_v12  ;;  %v13791_v38 = vrot.slane %v5072_v41, 4  ;;  %v13793_v11 = vrot.slane %v5089_v63, 5  ;;  %v5100_v16 = vor.u32 %v5099_v52, %v5096_v58  ;;  %v15531_v60 = vld [vmem:[#allocation28_spill] sm:$0xff]  ;;  %v13932_v13 = vld [vmem:[%s12003_s22 + $0x34] sm:$0x3] }
 0x137   : > { %15524 = vst [vmem:[#allocation24_spill] sm:$0xff] %v13786_v20  ;;  %v13795_v12 = vrot.slane %v5103_v49, 5  ;;  %v15528_v46 = vrot.slane %v15527_v19, 5  ;;  %v15530_v48 = vrot.slane %v15529_v59, 9  ;;  %v15532_v43 = vrot.slane %v15531_v60, 5  ;;  %v15533_v20 = vld [vmem:[#allocation34_spill] sm:$0xff] }
 0x138   : > { %v15534_v41 = vrot.slane %v15533_v20, 9  ;;  %v13813_v52 = vrot.slane %v5086_v37, 4  ;;  %v13817_v58 = vld [vmem:[%s12003_s22 + $0x30] sm:$0xe]  ;;  %v11540_v49 = vld [vmem:[%s15409_s29 + $0x228] sm:$0xff]   ;;  %v5114_v19 = vor.u32 %v5113_v32, %v5110_v31  ;;  %v15537_v37 = vld [vmem:[#allocation29_spill] sm:$0xff] }
 0x139   : > { %15526 = vst [vmem:[#allocation64_spill] sm:$0xff] %v13795_v12  ;;  %10515 = vmatpush3.bf16.msra.mxu0 %v11538_v34  ;;  %v13803_v44 = vsel %vm12147_vm6, %v15530_v48, %v15528_v46  ;;  %v13822_v46 = vrot.slane %v5117_v33, 5  ;;  %v13827_v48 = vld [vmem:[%s12003_s22 + $0x38] sm:$0xe]  ;;  %v15538_v60 = vrot.slane %v15537_v37, 5  ;;  %v15541_v12 = vld [vmem:[#allocation30_spill] sm:$0xff] }
 0x13a   : > { %v13811_v63 = vsel %vm12147_vm6, %v15534_v41, %v15532_v43  ;;  %15535 = vst [vmem:[#allocation27_spill] sm:$0xff] %v13813_v52  ;;  %10524 = vmatprep.subr.bf16.mxu0 %v11539_v24  ;;  %v15539_v43 = vld [vmem:[#allocation19_spill] sm:$0xff]  ;;  %v15542_v52 = vrot.slane %v15541_v12, 5  ;;  %v15543_v31 = vrot.slane %v13442_v10, 9  ;;  %v15544_v32 = vld [vmem:[#allocation21_spill] sm:$0xff]  ;;  %v15546_v37 = vld [vmem:[#allocation36_spill] sm:$0xff] }
 0x13b   : > { %15536 = vst [vmem:[#allocation33_spill] sm:$0xff] %v13822_v46  ;;  %v15540_v41 = vrot.slane %v15539_v43, 9  ;;  %v13848_v20 = vsel %vm12253_vm9, %v15544_v32, %v4402_v39  ;;  %v13853_v43 = vsel %vm12253_vm9, %v15546_v37, %v4420_v45  ;;  %v11541_v10 = vld [vmem:[%s15409_s29 + $0x230] sm:$0xff]   ;;  %v13863_v12 = vrot.slane %v5100_v16, 4  ;;  %v13889_v37 = vld [vmem:[%s12003_s22 + $0x48] sm:$0xe] }
 0x13c   : > { %v13843_v33 = vsel %vm12147_vm6, %v15543_v31, %v15542_v52  ;;  %10517 = vmatmul.mubr.msk.bf16.vlgmr.msra.gmra.mrb[0].mxu0 %vm807_vm3, %v13664_v22  ;;  %v15548_v22 = vsel %vm12045_vm2, %v13382_v6, %v13354_v62  ;;  %v15549_v45 = vsel %vm12045_vm2, %v13366_v42, %v13342_v53  ;;  %v5446_v31 = vshrl.u32 %v13774_v8, 16  ;;  %15551 = vst [vmem:[#allocation29_spill] sm:$0xff] %v13889_v37  ;;  %v15552_v52 = vld [vmem:[#allocation37_spill] sm:$0xff]  ;;  %v13901_v39 = vld [vmem:[%s12003_s22 + $0x50] sm:$0xe] }
 0x13d   : > { %v13835_v34 = vsel %vm12147_vm6, %v15540_v41, %v15538_v60  ;;  %v13856_v60 = vld [vmem:[%s12003_s22 + $0x40] sm:$0xe]  ;;  %10525 = vmatpush3.bf16.msra.mxu0 %v11539_v24  ;;  %10520 = vmatprep.mubr.msk.bf16.mxu0 %vm807_vm3, %v13666_v9  ;;  %v9389_v16 = vcombine.low %v15549_v45, %v15548_v22  ;;  %v5449_v9 = vshll.u32 %v13774_v8, 16  ;;  %v13884_v32 = vrot.slane %v5114_v19, 4  ;;  %v15553_v19 = vld [vmem:[#allocation39_spill] sm:$0xff]  ;;  %v11542_v53 = vld [vmem:[%s15409_s29 + $0x238] sm:$0xff]  }
 0x13e   : > { %15547 = vst [vmem:[#allocation28_spill] sm:$0xff] %v13856_v60  ;;  %10526 = vmatprep.subr.bf16.mxu0 %v11540_v49  ;;  %v13904_v62 = vld [vmem:[%s12003_s22 + $0x58] sm:$0xe]  ;;  %v13907_v6 = vld [vmem:[%s12003_s22 + $0x24] sm:$0x3]  ;;  %v5464_v22 = vshrl.u32 %v13789_v57, 16 }
 0x13f   : > { %15550 = vst [vmem:[#allocation34_spill] sm:$0xff] %v13884_v32  ;;  %v13914_v24 = vld [vmem:[%s12003_s22 + $0x2c] sm:$0x3]  ;;  %v5467_v45 = vshll.u32 %v13789_v57, 16  ;;  %v5448_v17 = vrot.slane %v5446_v31, 5  ;;  %v5451_v27 = vrot.slane %v5449_v9, 6 }
 0x140   : > { %v5482_v21 = vshrl.u32 %v13817_v58, 16  ;;  %v5455_v14 = vshrl.u32 %v13907_v6, 16  ;;  %v5458_v8 = vshll.u32 %v13907_v6, 16  ;;  %v5485_v57 = vshll.u32 %v13817_v58, 16  ;;  %v11543_v31 = vld [vmem:[%s15409_s29 + $0x240] sm:$0xff]   ;;  %v11574_v59 = vld [vmem:[%s15409_s29 + $0x318] sm:$0xff]  }
 0x141   : > { %10527 = vmatpush3.bf16.msra.mxu0 %v11540_v49  ;;  %v5473_v41 = vshrl.u32 %v13914_v24, 16  ;;  %v5466_v26 = vrot.slane %v5464_v22, 5  ;;  %v5469_v32 = vrot.slane %v5467_v45, 6  ;;  %v5500_v46 = vshrl.u32 %v13827_v48, 16  ;;  %v13962_v22 = vld [vmem:[%s12003_s22 + $0x44] sm:$0x3] }
 0x142   : > { %10528 = vmatprep.subr.bf16.mxu0 %v11541_v10  ;;  %v15554_v49 = vcombine.low %v13686_v4, %v13694_v1  ;;  %v5452_v9 = vor.u32 %v5451_v27, %v5448_v17  ;;  %v5484_v50 = vrot.slane %v5482_v21, 5  ;;  %v5503_v42 = vshll.u32 %v13827_v48, 16  ;;  %v13951_v1 = vld [vmem:[%s12003_s22 + $0x3c] sm:$0x3]  ;;  %v11544_v17 = vld [vmem:[%s15409_s29 + $0x248] sm:$0xff]  }
 0x143   : > { %v13946_v45 = vrot.slane %v5455_v14, 5  ;;  %v5502_v4 = vrot.slane %v5500_v46, 5  ;;  %v5476_v51 = vshll.u32 %v13914_v24, 16  ;;  %v5518_v21 = vshrl.u32 %v13856_v60, 16 }
 0x144   : > { %10521 = vmatmul.mubr.msk.bf16.gmra.mrb[4].mxu0 %vm807_vm3, %v9389_v16  ;;  %v5487_v16 = vrot.slane %v5485_v57, 6  ;;  %v5505_v27 = vrot.slane %v5503_v42, 6  ;;  %v5470_v57 = vor.u32 %v5469_v32, %v5466_v26  ;;  %v5491_v14 = vshrl.u32 %v13932_v13, 16 }
 0x145   : > { %10529 = vmatpush3.bf16.msra.mxu0 %v11541_v10  ;;  %10532 = vmatprep.mubr.msk.bf16.mxu0 %vm807_vm3, %v15554_v49  ;;  %15555 = vst [vmem:[#allocation19_spill] sm:$0xff] %v13946_v45  ;;  %v13948_v10 = vrot.slane %v5458_v8, 6  ;;  %v13953_v49 = vrot.slane %v5473_v41, 5  ;;  %v5494_v8 = vshll.u32 %v13932_v13, 16  ;;  %v13964_v46 = vrot.slane %v5452_v9, 4 }
 0x146   : > { %10530 = vmatprep.subr.bf16.mxu0 %v11542_v53  ;;  %v5488_v41 = vor.u32 %v5487_v16, %v5484_v50  ;;  %v5509_v18 = vshrl.u32 %v13951_v1, 16  ;;  %v5521_v42 = vshll.u32 %v13856_v60, 16  ;;  %v5506_v26 = vor.u32 %v5505_v27, %v5502_v4  ;;  %v13974_v45 = vld [vmem:[%s12003_s22 + $0x4c] sm:$0x3] }
 0x147   : > { %15556 = vst [vmem:[#allocation30_spill] sm:$0xff] %v13948_v10  ;;  %15557 = vst [vmem:[#allocation21_spill] sm:$0xff] %v13953_v49  ;;  %v5512_v32 = vshll.u32 %v13951_v1, 16  ;;  %v5520_v49 = vrot.slane %v5518_v21, 5  ;;  %v5536_v10 = vshrl.u32 %v13889_v37, 16  ;;  %v5527_v50 = vshrl.u32 %v13962_v22, 16 }
 0x148   : > { %15558 = vst [vmem:[#allocation17_spill] sm:$0xff] %v13964_v46  ;;  %v5530_v9 = vshll.u32 %v13962_v22, 16  ;;  %v5539_v16 = vshll.u32 %v13889_v37, 16  ;;  %v15559_v46 = vcombine.low %v13732_v5, %v13740_v3  ;;  %v13983_v4 = vrot.slane %v5470_v57, 4 }
 0x149   : > { %10531 = vmatpush3.bf16.msra.mxu0 %v11542_v53  ;;  %v5523_v53 = vrot.slane %v5521_v42, 6  ;;  %v13985_v27 = vrot.slane %v5476_v51, 6  ;;  %v13987_v21 = vrot.slane %v5491_v14, 5  ;;  %v13989_v60 = vrot.slane %v5494_v8, 6  ;;  %v11545_v51 = vld [vmem:[%s15409_s29 + $0x250] sm:$0xff]  }
 0x14a   : > { %10540 = vmatprep.subr.bf16.mxu0 %v11543_v31  ;;  %v15562_v42 = vcombine.low %v13803_v44, %v13811_v63  ;;  %v13995_v37 = vrot.slane %v5488_v41, 4  ;;  %v13997_v3 = vrot.slane %v5509_v18, 5  ;;  %v5538_v5 = vrot.slane %v5536_v10, 5  ;;  %v14009_v63 = vld [vmem:[%s12003_s22 + $0x5c] sm:$0x3] }
 0x14b   : > { %15560 = vst [vmem:[#allocation36_spill] sm:$0xff] %v13987_v21  ;;  %15561 = vst [vmem:[#allocation37_spill] sm:$0xff] %v13989_v60  ;;  %v5541_v57 = vrot.slane %v5539_v16, 6  ;;  %v5524_v14 = vor.u32 %v5523_v53, %v5520_v49  ;;  %v5545_v44 = vshrl.u32 %v13974_v45, 16  ;;  %v5554_v18 = vshrl.u32 %v13901_v39, 16 }
 0x14c   : > { %10533 = vmatmul.mubr.msk.bf16.vlgmr.msra.gmra.mrb[0].mxu0 %vm807_vm3, %v15559_v46  ;;  %15563 = vst [vmem:[#allocation39_spill] sm:$0xff] %v13995_v37  ;;  %15564 = vst [vmem:[#allocation65_spill] sm:$0xff] %v13997_v3  ;;  %v14000_v46 = vld [vmem:[%s12003_s22 + $0x54] sm:$0x3]  ;;  %v14012_v8 = vrot.slane %v5506_v26, 4  ;;  %v14014_v10 = vrot.slane %v5527_v50, 5  ;;  %v15569_v50 = vor.u32 %v15553_v19, %v15552_v52  ;;  %v15571_v52 = vor.u32 %v13543_v54, %v13532_v29 }
 0x14d   : > { %10541 = vmatpush3.bf16.msra.mxu0 %v11543_v31  ;;  %10536 = vmatprep.mubr.msk.bf16.mxu0 %vm807_vm3, %v15562_v42  ;;  %v14005_v31 = vrot.slane %v5512_v32, 6  ;;  %v14016_v41 = vrot.slane %v5530_v9, 6  ;;  %v5557_v16 = vshll.u32 %v13901_v39, 16  ;;  %v11546_v32 = vld [vmem:[%s15409_s29 + $0x258] sm:$0xff]   ;;  %v5548_v49 = vshll.u32 %v13974_v45, 16  ;;  %v15572_v19 = vld [vmem:[#allocation44_spill] sm:$0xff] }
 0x14e   : > { %10542 = vmatprep.subr.bf16.mxu0 %v11544_v17  ;;  %15566 = vst [vmem:[#allocation67_spill] sm:$0xff] %v14012_v8  ;;  %15567 = vst [vmem:[#allocation68_spill] sm:$0xff] %v14014_v10  ;;  %v5556_v53 = vrot.slane %v5554_v18, 5  ;;  %v5563_v42 = vshrl.u32 %v14000_v46, 16  ;;  %v5572_v37 = vshrl.u32 %v13904_v62, 16  ;;  %v15570_v9 = vld [vmem:[#allocation41_spill] sm:$0xff]  ;;  %v15574_v29 = vor.u32 %v13547_v2, %v13545_v47 }
 0x14f   : > { %15565 = vst [vmem:[#allocation66_spill] sm:$0xff] %v14005_v31  ;;  %15568 = vst [vmem:[#allocation69_spill] sm:$0xff] %v14016_v41  ;;  %v14026_v26 = vld [vmem:[%s12003_s22 + $0x20] sm:$0xc]  ;;  %v4439_v8 = vsel %vm12253_vm9, %v15570_v9, %v15569_v50  ;;  %v5542_v41 = vor.u32 %v5541_v57, %v5538_v5  ;;  %v5559_v10 = vrot.slane %v5557_v16, 6  ;;  %v5566_v31 = vshll.u32 %v14000_v46, 16 }
 0x150   : > { %v14035_v18 = vrot.slane %v5524_v14, 4  ;;  %v14037_v3 = vrot.slane %v5545_v44, 5  ;;  %v5574_v60 = vrot.slane %v5572_v37, 5  ;;  %v14041_v21 = vld [vmem:[%s12003_s22 + $0x28] sm:$0xc]  ;;  %v4457_v5 = vsel %vm12253_vm9, %v15572_v19, %v15571_v52 }
 0x151   : > { %10543 = vmatpush3.bf16.msra.mxu0 %v11544_v17  ;;  %v5575_v17 = vshll.u32 %v13904_v62, 16  ;;  %v5560_v57 = vor.u32 %v5559_v10, %v5556_v53  ;;  %v5581_v16 = vshrl.u32 %v14009_v63, 16  ;;  %v5584_v14 = vshll.u32 %v14009_v63, 16  ;;  %v14052_v44 = vld [vmem:[%s12003_s22 + $0x30] sm:$0xc] }
 0x152   : > { %10544 = vmatprep.subr.bf16.mxu0 %v11545_v51  ;;  %v15573_v37 = vcombine.low %v13835_v34, %v13843_v33  ;;  %v4475_v54 = vsel %vm12253_vm9, %v13566_v28, %v15574_v29  ;;  %v15575_v10 = vor.u32 %v13577_v7, %v13568_v55  ;;  %v14070_v50 = vrot.slane %v5548_v49, 6  ;;  %v14073_v33 = vld [vmem:[%s12003_s22 + $0x38] sm:$0xc]  ;;  %v14087_v7 = vld [vmem:[%s12003_s22 + $0x40] sm:$0xc] }
 0x153   : > { %v5577_v34 = vrot.slane %v5575_v17, 6  ;;  %v15576_v47 = vcombine.low %v13848_v20, %v13853_v43  ;;  %v14079_v2 = vrot.slane %v5542_v41, 4  ;;  %v14081_v55 = vrot.slane %v5563_v42, 5  ;;  %v14099_v42 = vld [vmem:[%s12003_s22 + $0x48] sm:$0xc] }
 0x154   : > { %10537 = vmatmul.mubr.msk.bf16.gmra.mrb[4].mxu0 %vm807_vm3, %v15573_v37  ;;  %v4493_v53 = vsel %vm12253_vm9, %v13575_v15, %v15575_v10  ;;  %v14083_v28 = vrot.slane %v5566_v31, 6  ;;  %v9634_v15 = vrot.slane %v14026_v26, 10  ;;  %v14092_v20 = vrot.slane %v5560_v57, 4  ;;  %v14104_v19 = vld [vmem:[%s12003_s22 + $0x50] sm:$0xc]  ;;  %v15582_v10 = vld [vmem:[#allocation45_spill] sm:$0xff] }
 0x155   : > { %10545 = vmatpush3.bf16.msra.mxu0 %v11545_v51  ;;  %10548 = vmatprep.mubr.msk.bf16.mxu0 %vm807_vm3, %v15576_v47  ;;  %v11547_v51 = vld [vmem:[%s15409_s29 + $0x260] sm:$0xff]   ;;  %v5578_v43 = vor.u32 %v5577_v34, %v5574_v60  ;;  %v14094_v41 = vrot.slane %v5581_v16, 5  ;;  %v14096_v49 = vrot.slane %v5584_v14, 6  ;;  %v9451_v31 = vcombine.low %v4439_v8, %v4457_v5  ;;  %v14107_v37 = vld [vmem:[%s12003_s22 + $0x58] sm:$0xc]  ;;  %v11548_v60 = vld [vmem:[%s15409_s29 + $0x268] sm:$0xff]  }
 0x156   : > { %10546 = vmatprep.subr.bf16.mxu0 %v11546_v32  ;;  %v9452_v9 = vcombine.low %v4475_v54, %v4493_v53  ;;  %v5745_v17 = vrot.slane %v13907_v6, 6  ;;  %v5749_v16 = vrot.slane %v13914_v24, 6  ;;  %v15577_v5 = vld [vmem:[#allocation48_spill] sm:$0xff]  ;;  %v4528_v54 = vor.u32 %v13598_v30, %v13596_v0  ;;  %v15580_v47 = vld [vmem:[#allocation22_spill] sm:$0xff] }
 0x157   : > { %v14112_v57 = vrot.slane %v5578_v43, 4  ;;  %v4510_v29 = vor.u32 %v15577_v5, %v13579_v40  ;;  %v11549_v40 = vld [vmem:[%s15409_s29 + $0x270] sm:$0xff]   ;;  %v15578_v43 = vld [vmem:[#allocation50_spill] sm:$0xff]  ;;  %v15581_v0 = vrot.slane %v15580_v47, 6  ;;  %v15583_v30 = vrot.slane %v15582_v10, 10 }
 0x158   : > { %v15585_v5 = vld [vmem:[#allocation20_spill] sm:$0xff]  ;;  %v15587_v8 = vld [vmem:[#allocation46_spill] sm:$0xff]  ;;  %v15663_v24 = vrot.slane %v13932_v13, 6  ;;  %v15664_v6 = vrot.slane %v14052_v44, 10  ;;  %v15665_v26 = vrot.slane %v13951_v1, 6  ;;  %v15669_v44 = vrot.slane %v13974_v45, 6 }
 0x159   : > { %10547 = vmatpush3.bf16.msra.mxu0 %v11546_v32  ;;  %v4511_v14 = vsel %vm12253_vm9, %v15578_v43, %v4510_v29  ;;  %v4687_v32 = vsel %vm12320_vm12, %v15583_v30, %v15581_v0  ;;  %v11551_v10 = vld [vmem:[%s15409_s29 + $0x280] sm:$0xff]   ;;  %v15673_v45 = vrot.slane %v14009_v63, 6  ;;  %v11576_v63 = vld [vmem:[%s15675_s4 + $0x28] sm:$0xff]  }
 0x15a   : > { %10556 = vmatprep.subr.bf16.mxu0 %v11547_v51  ;;  %v15591_v0 = vld [vmem:[#allocation47_spill] sm:$0xff]  ;;  %v9662_v53 = vld [vmem:[%s15676_s0] ss:$0 sm:$0xff] }
 0x15b   : > { %v15593_v30 = vld [vmem:[#allocation35_spill] sm:$0xff] }
 0x15c   : > { %10549 = vmatmul.mubr.msk.bf16.vlgmr.msra.gmra.mrb[0].mxu0 %vm807_vm3, %v9451_v31  ;;  %v15579_v31 = vld [vmem:[#allocation25_spill] sm:$0xff] }
 0x15d   : > { %10557 = vmatpush3.bf16.msra.mxu0 %v11547_v51  ;;  %10552 = vmatprep.mubr.msk.bf16.mxu0 %vm807_vm3, %v9452_v9  ;;  %v4529_v34 = vsel %vm12253_vm9, %v15579_v31, %v4528_v54  ;;  %v15586_v51 = vrot.slane %v15585_v5, 6  ;;  %v15588_v9 = vrot.slane %v15587_v8, 10  ;;  %v11550_v54 = vld [vmem:[%s15409_s29 + $0x278] sm:$0xff]   ;;  %v15589_v8 = vld [vmem:[#allocation23_spill] sm:$0xff] }
 0x15e   : > { %10558 = vmatprep.subr.bf16.mxu0 %v11548_v60  ;;  %v9453_v29 = vcombine.low %v4511_v14, %v4529_v34  ;;  %v15590_v47 = vrot.slane %v15589_v8, 6  ;;  %v15592_v14 = vrot.slane %v15591_v0, 10  ;;  %v15597_v31 = vld [vmem:[#allocation38_spill] sm:$0xff]  ;;  %v15603_v0 = vld [vmem:[#allocation52_spill] sm:$0xff] }
 0x15f   : > { %v4691_v52 = vsel %vm12320_vm12, %v15588_v9, %v15586_v51  ;;  %v15599_v51 = vld [vmem:[#allocation51_spill] sm:$0xff] }
 0x160   : > { %v9486_v43 = vcombine.low %v4687_v32, %v4691_v52  ;;  %v4695_v34 = vsel %vm12320_vm12, %v15592_v14, %v15590_v47  ;;  %v15595_v52 = vld [vmem:[#allocation49_spill] sm:$0xff]  ;;  %v15600_v9 = vrot.slane %v15599_v51, 10  ;;  %v15604_v47 = vrot.slane %v15603_v0, 10  ;;  %v15609_v51 = vld [vmem:[#allocation43_spill] sm:$0xff] }
 0x161   : > { %10559 = vmatpush3.bf16.msra.mxu0 %v11548_v60  ;;  %v15594_v60 = vrot.slane %v15593_v30, 6  ;;  %v15596_v32 = vrot.slane %v15595_v52, 10  ;;  %v11555_v0 = vld [vmem:[%s12003_s22 + $0x20] ss:$8 sps:$4 sm:$0xff]  }
 0x162   : > { %10560 = vmatprep.subr.bf16.mxu0 %v11549_v40 }
 0x163   : > { %v4699_v5 = vsel %vm12320_vm12, %v15596_v32, %v15594_v60  ;;  %v11552_v60 = vld [vmem:[%s15409_s29 + $0x288] sm:$0xff]   ;;  %v11553_v32 = vld [vmem:[%s15409_s29 + $0x290] sm:$0xff]  }
 0x164   : > { %10553 = vmatmul.mubr.msk.bf16.gmra.mrb[4].mxu0 %vm807_vm3, %v9453_v29  ;;  %v9487_v30 = vcombine.low %v4695_v34, %v4699_v5  ;;  %v15607_v5 = vld [vmem:[#allocation53_spill] sm:$0xff] }
 0x165   : > { %10561 = vmatpush3.bf16.msra.mxu0 %v11549_v40  ;;  %10564 = vmatprep.mubr.msk.bf16.mxu0 %vm807_vm3, %v9486_v43  ;;  %v15598_v40 = vrot.slane %v15597_v31, 6  ;;  %v15601_v43 = vld [vmem:[#allocation40_spill] sm:$0xff]  ;;  %v15605_v31 = vld [vmem:[#allocation42_spill] sm:$0xff] }
 0x166   : > { %10562 = vmatprep.subr.bf16.mxu0 %v11550_v54  ;;  %v15602_v8 = vrot.slane %v15601_v43, 6  ;;  %v15606_v34 = vrot.slane %v15605_v31, 6  ;;  %v11558_v31 = vld [vmem:[%s15409_s29 + $0x2a8] sm:$0xff]  }
 0x167   : > { %v4703_v29 = vsel %vm12320_vm12, %v15600_v9, %v15598_v40  ;;  %v15608_v40 = vrot.slane %v15607_v5, 10  ;;  %v15610_v9 = vrot.slane %v15609_v51, 6  ;;  %v11562_v51 = vld [vmem:[%s15409_s29 + $0x2b8] sm:$0xff]  }
 0x168   : > { %v4707_v14 = vsel %vm12320_vm12, %v15604_v47, %v15602_v8  ;;  %v11554_v47 = vld [vmem:[%s15409_s29 + $0x298] sm:$0xff]  }
 0x169   : > { %10563 = vmatpush3.bf16.msra.mxu0 %v11550_v54  ;;  %v9488_v52 = vcombine.low %v4703_v29, %v4707_v14  ;;  %v4711_v54 = vsel %vm12320_vm12, %v15608_v40, %v15606_v34  ;;  %v15611_v29 = vld [vmem:[#allocation55_spill] sm:$0xff]  ;;  %v15613_v34 = vld [vmem:[#allocation56_spill] sm:$0xff]  ;;  %v15614_v40 = vld [vmem:[#allocation57_spill] sm:$0xff] }
 0x16a   : > { %10572 = vmatprep.subr.bf16.mxu0 %v11551_v10  ;;  %v15612_v43 = vrot.slane %v15611_v29, 10  ;;  %v11556_v14 = vld [vmem:[%s15409_s29 + $0x2a0] sm:$0xff]   ;;  %v5022_v5 = vsel %vm12045_vm2, %v13753_v35, %v15613_v34  ;;  %v15615_v35 = vld [vmem:[#allocation61_spill] sm:$0xff] }
 0x16b   : > { %v11563_v29 = vld [vmem:[%s15409_s29 + $0x2c0] sm:$0xff]  }
 0x16c   : > { %10565 = vmatmul.mubr.msk.bf16.vlgmr.msra.gmra.mrb[0].mxu0 %vm807_vm3, %v9487_v30  ;;  %v4715_v8 = vsel %vm12320_vm12, %v15612_v43, %v15610_v9  ;;  %v11557_v30 = vld [vmem:[%s12003_s22 + $0x30] ss:$8 sps:$4 sm:$0xff]   ;;  %v5064_v43 = vsel %vm12045_vm2, %v13782_v23, %v13784_v36  ;;  %v15623_v34 = vld [vmem:[#allocation62_spill] sm:$0xff] }
 0x16d   : > { %10573 = vmatpush3.bf16.msra.mxu0 %v11551_v10  ;;  %10568 = vmatprep.mubr.msk.bf16.mxu0 %vm807_vm3, %v9488_v52  ;;  %v9489_v10 = vcombine.low %v4711_v54, %v4715_v8  ;;  %v11559_v52 = vld [vmem:[%s12003_s22 + $0x40] ss:$8 sps:$4 sm:$0xff]   ;;  %v5036_v54 = vsel %vm12045_vm2, %v13768_v25, %v15614_v40  ;;  %v5050_v25 = vsel %vm12045_vm2, %v13780_v61, %v15615_v35  ;;  %v15616_v8 = vld [vmem:[#allocation24_spill] sm:$0xff] }
 0x16e   : > { %10574 = vmatprep.subr.bf16.mxu0 %v11552_v60  ;;  %v9550_v9 = vcombine.low %v5022_v5, %v5036_v54  ;;  %v11564_v61 = vld [vmem:[%s15409_s29 + $0x2c8] sm:$0xff]   ;;  %v11565_v23 = vld [vmem:[%s15409_s29 + $0x2d0] sm:$0xff]   ;;  %v15624_v5 = vrot.slane %v15623_v34, 9 }
 0x16f   : > { %v15642_v34 = vld [vmem:[#allocation29_spill] sm:$0xff] }
 0x171   : > { %10575 = vmatpush3.bf16.msra.mxu0 %v11552_v60  ;;  %v11560_v60 = vld [vmem:[%s15409_s29 + $0x2b0] sm:$0xff]  }
 0x172   : > { %10576 = vmatprep.subr.bf16.mxu0 %v11553_v32 }
 0x174   : > { %10569 = vmatmul.mubr.msk.bf16.gmra.mrb[4].mxu0 %vm807_vm3, %v9489_v10  ;;  %v15617_v10 = vld [vmem:[#allocation27_spill] sm:$0xff] }
 0x175   : > { %10577 = vmatpush3.bf16.msra.mxu0 %v11553_v32  ;;  %10580 = vmatprep.mubr.msk.bf16.mxu0 %vm807_vm3, %v11555_v0  ;;  %v11561_v32 = vld [vmem:[%s12003_s22 + $0x50] ss:$8 sps:$4 sm:$0xff]   ;;  %v5078_v0 = vsel %vm12045_vm2, %v13791_v38, %v15616_v8  ;;  %v11567_v8 = vld [vmem:[%s15409_s29 + $0x2e0] sm:$0xff]  }
 0x176   : > { %10578 = vmatprep.subr.bf16.mxu0 %v11554_v47  ;;  %v15618_v38 = vld [vmem:[#allocation64_spill] sm:$0xff] }
 0x177   : > { %v5106_v36 = vsel %vm12045_vm2, %v13863_v12, %v15618_v38  ;;  %v15635_v38 = vrot.slane %v13827_v48, 9  ;;  %v11568_v48 = vld [vmem:[%s15409_s29 + $0x2e8] sm:$0xff]  }
 0x179   : > { %10579 = vmatpush3.bf16.msra.mxu0 %v11554_v47  ;;  %v5092_v47 = vsel %vm12045_vm2, %v15617_v10, %v13793_v11  ;;  %v15619_v11 = vld [vmem:[#allocation33_spill] sm:$0xff] }
 0x17a   : > { %10588 = vmatprep.subr.bf16.mxu0 %v11556_v14 }
 0x17c   : > { %10581 = vmatmul.mubr.msk.bf16.vlgmr.msra.gmra.mrb[0].mxu0 %vm807_vm3, %v11557_v30  ;;  %v9552_v30 = vcombine.low %v5078_v0, %v5092_v47  ;;  %v15630_v0 = vld [vmem:[#allocation58_spill] sm:$0xff]  ;;  %v15632_v47 = vrot.slane %v13817_v58, 9 }
 0x17d   : > { %10589 = vmatpush3.bf16.msra.mxu0 %v11556_v14  ;;  %10584 = vmatprep.mubr.msk.bf16.mxu0 %vm807_vm3, %v11559_v52  ;;  %v9551_v14 = vcombine.low %v5050_v25, %v5064_v43  ;;  %v15620_v52 = vld [vmem:[#allocation34_spill] sm:$0xff]  ;;  %v15631_v10 = vrot.slane %v15630_v0, 5  ;;  %v11569_v0 = vld [vmem:[%s15409_s29 + $0x2f0] sm:$0xff]  }
 0x17e   : > { %10590 = vmatprep.subr.bf16.mxu0 %v11558_v31 }
 0x181   : > { %10591 = vmatpush3.bf16.msra.mxu0 %v11558_v31  ;;  %v5120_v31 = vsel %vm12045_vm2, %v15620_v52, %v15619_v11  ;;  %v15636_v11 = vld [vmem:[#allocation60_spill] sm:$0xff] }
 0x182   : > { %10592 = vmatprep.subr.bf16.mxu0 %v11560_v60  ;;  %v9553_v25 = vcombine.low %v5106_v36, %v5120_v31  ;;  %v15637_v52 = vrot.slane %v15636_v11, 5 }
 0x184   : > { %10585 = vmatmul.mubr.msk.bf16.gmra.mrb[4].mxu0 %vm807_vm3, %v11561_v32 }
 0x185   : > { %10593 = vmatpush3.bf16.msra.mxu0 %v11560_v60  ;;  %10596 = vmatprep.mubr.msk.bf16.mxu0 %vm807_vm3, %v9550_v9  ;;  %v15621_v60 = vld [vmem:[#allocation15_spill] sm:$0xff] }
 0x186   : > { %10594 = vmatprep.subr.bf16.mxu0 %v11562_v51  ;;  %v15622_v32 = vrot.slane %v15621_v60, 5 }
 0x188   : > { %v5278_v54 = vsel %vm12147_vm6, %v15624_v5, %v15622_v32  ;;  %v15640_v32 = vld [vmem:[#allocation31_spill] sm:$0xff]  ;;  %v15643_v5 = vrot.slane %v15642_v34, 9  ;;  %v15658_v34 = vld [vmem:[#allocation68_spill] sm:$0xff] }
 0x189   : > { %10595 = vmatpush3.bf16.msra.mxu0 %v11562_v51  ;;  %v15626_v51 = vld [vmem:[#allocation54_spill] sm:$0xff]  ;;  %v15641_v58 = vrot.slane %v15640_v32, 5 }
 0x18a   : > { %10604 = vmatprep.subr.bf16.mxu0 %v11563_v29  ;;  %v15627_v9 = vrot.slane %v15626_v51, 5  ;;  %v15657_v32 = vld [vmem:[#allocation66_spill] sm:$0xff] }
 0x18c   : > { %10597 = vmatmul.mubr.msk.bf16.vlgmr.msra.gmra.mrb[0].mxu0 %vm807_vm3, %v9551_v14  ;;  %v5286_v14 = vsel %vm12147_vm6, %v15632_v47, %v15631_v10  ;;  %v15647_v10 = vld [vmem:[#allocation26_spill] sm:$0xff] }
 0x18d   : > { %10605 = vmatpush3.bf16.msra.mxu0 %v11563_v29  ;;  %10600 = vmatprep.mubr.msk.bf16.mxu0 %vm807_vm3, %v9552_v30  ;;  %v15628_v29 = vld [vmem:[#allocation63_spill] sm:$0xff]  ;;  %v15648_v47 = vrot.slane %v15647_v10, 5  ;;  %v5587_v10 = vor.u32 %v14096_v49, %v14094_v41  ;;  %v15662_v41 = vrot.slane %v14041_v21, 10  ;;  %v5754_v21 = vsel %vm12320_vm12, %v15664_v6, %v15663_v24 }
 0x18e   : > { %10606 = vmatprep.subr.bf16.mxu0 %v11564_v61  ;;  %v15629_v35 = vrot.slane %v15628_v29, 9  ;;  %v15633_v30 = vld [vmem:[#allocation59_spill] sm:$0xff] }
 0x18f   : > { %v15644_v29 = vld [vmem:[#allocation19_spill] sm:$0xff]  ;;  %v5750_v49 = vsel %vm12320_vm12, %v15662_v41, %v5749_v16  ;;  %v15667_v16 = vrot.slane %v13962_v22, 6  ;;  %v15671_v22 = vrot.slane %v14000_v46, 6  ;;  %v11831_v46 = vmov 0.0  }
 0x190   : > { %v5282_v12 = vsel %vm12147_vm6, %v15629_v35, %v15627_v9  ;;  %v15645_v35 = vld [vmem:[#allocation30_spill] sm:$0xff]  ;;  %10652 = vmatprep.subr.bf16.mxu1 %v11831_v46  ;;  %10660 = vmatprep.mubr.msk.bf16.mxu1 %vm11832_vm13, %v11831_v46 }
 0x191   : > { %10607 = vmatpush3.bf16.msra.mxu0 %v11564_v61  ;;  %v9586_v43 = vcombine.low %v5278_v54, %v5282_v12  ;;  %v15634_v61 = vrot.slane %v15633_v30, 5  ;;  %v5298_v54 = vsel %vm12147_vm6, %v15643_v5, %v15641_v58  ;;  %v5461_v12 = vor.u32 %v15645_v35, %v15644_v29  ;;  %v15650_v30 = vld [vmem:[#allocation32_spill] sm:$0xff]  ;;  %v15659_v5 = vld [vmem:[#allocation69_spill] sm:$0xff]  ;;  %v15661_v29 = vld [vmem:[#allocation67_spill] sm:$0xff] }
 0x192   : > { %10608 = vmatprep.subr.bf16.mxu0 %v11565_v23 }
 0x193   : > { %v5290_v36 = vsel %vm12147_vm6, %v15635_v38, %v15634_v61  ;;  %v15651_v61 = vrot.slane %v15650_v30, 5 }
 0x194   : > { %10601 = vmatmul.mubr.msk.bf16.gmra.mrb[4].mxu0 %vm807_vm3, %v9553_v25  ;;  %v9587_v51 = vcombine.low %v5286_v14, %v5290_v36  ;;  %v15646_v25 = vld [vmem:[#allocation21_spill] sm:$0xff] }
 0x195   : > { %10609 = vmatpush3.bf16.msra.mxu0 %v11565_v23  ;;  %10612 = vmatprep.mubr.msk.bf16.mxu0 %vm807_vm3, %v9586_v43  ;;  %v15638_v23 = vld [vmem:[#allocation28_spill] sm:$0xff]  ;;  %v5479_v43 = vor.u32 %v13985_v27, %v15646_v25  ;;  %v15652_v27 = vrot.slane %v13904_v62, 9  ;;  %v15653_v36 = vld [vmem:[#allocation17_spill] sm:$0xff] }
 0x196   : > { %10610 = vmatprep.subr.bf16.mxu0 %v11566_v56  ;;  %v15639_v31 = vrot.slane %v15638_v23, 9  ;;  %v15654_v62 = vld [vmem:[#allocation36_spill] sm:$0xff] }
 0x197   : > { %v5306_v38 = vsel %vm12147_vm6, %v15652_v27, %v15651_v61  ;;  %v5480_v11 = vsel %vm12253_vm9, %v13983_v4, %v5479_v43  ;;  %v5551_v4 = vor.u32 %v14070_v50, %v14037_v3  ;;  %v11572_v25 = vld [vmem:[%s15409_s29 + $0x308] sm:$0xff]  }
 0x198   : > { %v5294_v60 = vsel %vm12147_vm6, %v15639_v31, %v15637_v52  ;;  %v11570_v52 = vld [vmem:[%s15409_s29 + $0x2f8] sm:$0xff]  }
 0x199   : > { %10611 = vmatpush3.bf16.msra.mxu0 %v11566_v56  ;;  %v9588_v9 = vcombine.low %v5294_v60, %v5298_v54  ;;  %v15649_v56 = vrot.slane %v13901_v39, 9  ;;  %v15655_v31 = vld [vmem:[#allocation37_spill] sm:$0xff]  ;;  %v5533_v54 = vor.u32 %v15659_v5, %v15658_v34  ;;  %v5552_v50 = vsel %vm12253_vm9, %v14079_v2, %v5551_v4 }
 0x19a   : > { %10620 = vmatprep.subr.bf16.mxu0 %v11567_v8  ;;  %v5497_v40 = vor.u32 %v15655_v31, %v15654_v62  ;;  %v15656_v60 = vld [vmem:[#allocation65_spill] sm:$0xff] }
 0x19b   : > { %v5302_v14 = vsel %vm12147_vm6, %v15649_v56, %v15648_v47  ;;  %v5515_v58 = vor.u32 %v15657_v32, %v15656_v60  ;;  %v5534_v3 = vsel %vm12253_vm9, %v14035_v18, %v5533_v54  ;;  %v11573_v18 = vld [vmem:[%s15409_s29 + $0x310] sm:$0xff]   ;;  %v15668_v47 = vrot.slane %v14087_v7, 10 }
 0x19c   : > { %10613 = vmatmul.mubr.msk.bf16.vlgmr.msra.gmra.mrb[0].mxu0 %vm807_vm3, %v9587_v51  ;;  %v9589_v39 = vcombine.low %v5302_v14, %v5306_v38  ;;  %v11571_v51 = vld [vmem:[%s15409_s29 + $0x300] sm:$0xff]   ;;  %v9616_v43 = vcombine.low %v5534_v3, %v5552_v50  ;;  %v15670_v56 = vrot.slane %v14099_v42, 10  ;;  %v15672_v7 = vrot.slane %v14104_v19, 10  ;;  %v11577_v19 = vld [vmem:[%s15675_s4 + $0x30] sm:$0xff]  }
 0x19d   : > { %10621 = vmatpush3.bf16.msra.mxu0 %v11567_v8  ;;  %10616 = vmatprep.mubr.msk.bf16.mxu0 %vm807_vm3, %v9588_v9  ;;  %v5462_v8 = vsel %vm12253_vm9, %v15653_v36, %v5461_v12  ;;  %v5516_v35 = vsel %vm12253_vm9, %v15661_v29, %v5515_v58  ;;  %v5762_v13 = vsel %vm12320_vm12, %v15668_v47, %v15667_v16  ;;  %v15674_v42 = vrot.slane %v14107_v37, 10  ;;  %v11575_v38 = vld [vmem:[%s15675_s4 + $0x20] sm:$0xff]   ;;  %v11578_v37 = vld [vmem:[%s15675_s4 + $0x38] sm:$0xff]  }
 0x19e   : > { %10622 = vmatprep.subr.bf16.mxu0 %v11568_v48  ;;  %v9614_v23 = vcombine.low %v5462_v8, %v5480_v11  ;;  %v5766_v1 = vsel %vm12320_vm12, %v15670_v56, %v15669_v44  ;;  %v5770_v30 = vsel %vm12320_vm12, %v15672_v7, %v15671_v22  ;;  %10653 = vmatpush3.bf16.msra.mxu1 %v11575_v38  ;;  %v11579_v44 = vld [vmem:[%s15675_s4] sm:$0xff]   ;;  %v11588_v38 = vld [vmem:[%s15325_s12 + $0x8] sm:$0xff]  }
 0x19f   : > { %v5774_v61 = vsel %vm12320_vm12, %v15674_v42, %v15673_v45  ;;  %10654 = vmatprep.subr.bf16.mxu1 %v11831_v46  ;;  %v11583_v7 = vld [vmem:[%s15325_s12 + $0x20] sm:$0xff]   ;;  %v11584_v45 = vld [vmem:[%s15325_s12 + $0x28] sm:$0xff]   ;;  %v11585_v42 = vld [vmem:[%s15325_s12 + $0x30] sm:$0xff]  }
 0x1a0   : > { %v9653_v27 = vcombine.low %v5770_v30, %v5774_v61  ;;  %v11586_v61 = vld [vmem:[%s15325_s12 + $0x38] sm:$0xff]  }
 0x1a1   : > { %10623 = vmatpush3.bf16.msra.mxu0 %v11568_v48  ;;  %v15660_v48 = vld [vmem:[#allocation39_spill] sm:$0xff] }
 0x1a2   : > { %10624 = vmatprep.subr.bf16.mxu0 %v11569_v0  ;;  %v5498_v9 = vsel %vm12253_vm9, %v15660_v48, %v5497_v40  ;;  %10655 = vmatpush3.bf16.msra.mxu1 %v11576_v63  ;;  %v11589_v63 = vld [vmem:[%s15325_s12 + $0x10] sm:$0xff]  }
 0x1a3   : > { %v9615_v12 = vcombine.low %v5498_v9, %v5516_v35  ;;  %10656 = vmatprep.subr.bf16.mxu1 %v11831_v46 }
 0x1a4   : > { %10617 = vmatmul.mubr.msk.bf16.gmra.mrb[4].mxu0 %vm807_vm3, %v9589_v39  ;;  %v9663_v39 = vld [vmem:[%s15677_s2] ss:$0 sm:$0xff]  ;;  %s15229_s2 = sand.u32 1, %s11821_s30  }
 0x1a5   : > { %10625 = vmatpush3.bf16.msra.mxu0 %v11569_v0  ;;  %10628 = vmatprep.mubr.msk.bf16.mxu0 %vm807_vm3, %v9614_v23  ;;  %v5569_v0 = vor.u32 %v14083_v28, %v14081_v55  ;;  %v5588_v55 = vsel %vm12253_vm9, %v14112_v57, %v5587_v10  ;;  %v5746_v28 = vsel %vm12320_vm12, %v9634_v15, %v5745_v17  ;;  %v15666_v15 = vrot.slane %v14073_v33, 10  ;;  %s598_s26 = scalar_lea.vmem [#allocation3], %s15229_s2  ;;  %s8746_s0 = scalar_lea.sflag [#allocation4], %s15229_s2 }
 0x1a6   : > { %10626 = vmatprep.subr.bf16.mxu0 %v11570_v52  ;;  %v9650_v57 = vcombine.low %v5746_v28, %v5750_v49  ;;  %v9652_v33 = vcombine.low %v5762_v13, %v5766_v1  ;;  %10657 = vmatpush3.bf16.msra.mxu1 %v11577_v19  ;;  %v11580_v1 = vld [vmem:[%s15675_s4 + $0x8] sm:$0xff]   ;;  %v11590_v19 = vld [vmem:[%s15325_s12 + $0x18] sm:$0xff]   ;;  %s8767_s22 = sshll.u32 %s598_s26, 4  ;;  %s15240_s22 = int_to_ptr.vmem [resolvable:$true] %s8767_s22 }
 0x1a7   : > { %v5570_v2 = vsel %vm12253_vm9, %v14092_v20, %v5569_v0  ;;  %v5758_v17 = vsel %vm12320_vm12, %v15666_v15, %v15665_v26  ;;  %10658 = vmatprep.subr.bf16.mxu1 %v11831_v46  ;;  %s11735_s20 = scalar_lea.vmem %s15240_s22, 16 }
 0x1a8   : > { %v9617_v20 = vcombine.low %v5570_v2, %v5588_v55  ;;  %v9651_v14 = vcombine.low %v5754_v21, %v5758_v17  ;;  %p11736_p11 = scmp.ne.s32.totalorder %s15240_s22, %s11735_s20 }
 0x1a9   : > { %10627 = vmatpush3.bf16.msra.mxu0 %v11570_v52 }
 0x1aa   : > { %10636 = vmatprep.subr.bf16.mxu0 %v11571_v51  ;;  %10659 = vmatpush3.bf16.msra.mxu1 %v11578_v37  ;;  %v11591_v37 = vld [vmem:[%s15675_s4 + $0x40] sm:$0xff]   ;;  %p11737_p12 = pnand %p11736_p11, %p11973_p5 }
 0x1ab   : > { %10664 = vmatprep.subr.bf16.mxu1 %v11831_v46 }
 0x1ac   : > { %10629 = vmatmul.mubr.msk.bf16.vlgmr.msra.gmra.mrb[0].mxu0 %vm807_vm3, %v9615_v12  ;;  %p11738_p13 = pneg %p11737_p12 }
 0x1ad   : > { %10637 = vmatpush3.bf16.msra.mxu0 %v11571_v51  ;;  %10632 = vmatprep.mubr.msk.bf16.mxu0 %vm807_vm3, %v9616_v43 }
 0x1ae   : > { %10638 = vmatprep.subr.bf16.mxu0 %v11572_v25 }
 0x1b1   : > { %10639 = vmatpush3.bf16.msra.mxu0 %v11572_v25 }
 0x1b2   : > { %10640 = vmatprep.subr.bf16.mxu0 %v11573_v18 }
 0x1b4   : > { %10633 = vmatmul.mubr.msk.bf16.gmra.mrb[4].mxu0 %vm807_vm3, %v9617_v20 }
 0x1b5   : > { %10641 = vmatpush3.bf16.msra.mxu0 %v11573_v18  ;;  %10644 = vmatprep.mubr.msk.bf16.mxu0 %vm807_vm3, %v9650_v57 }
 0x1b6   : > { %10642 = vmatprep.subr.bf16.mxu0 %v11574_v59 }
 0x1b9   : > { %10643 = vmatpush3.bf16.msra.mxu0 %v11574_v59 }
 0x1ba   : > { %11036 = vmatprep.subr.bf16.mxu0 %v11831_v46 }
 0x1bc   : > { %10645 = vmatmul.mubr.msk.bf16.vlgmr.msra.gmra.mrb[0].mxu0 %vm807_vm3, %v9651_v14  ;;  %v11581_v14 = vld [vmem:[%s15675_s4 + $0x10] sm:$0xff]  }
 0x1bd   : > { %10648 = vmatprep.mubr.msk.bf16.mxu0 %vm807_vm3, %v9652_v33  ;;  %v11582_v33 = vld [vmem:[%s15675_s4 + $0x18] sm:$0xff]  }
 0x1c4   : > { %10649 = vmatmul.mubr.msk.bf16.gmra.mrb[4].mxu0 %vm807_vm3, %v9653_v27  ;;  %v11587_v27 = vld [vmem:[%s15325_s12] sm:$0xff]  }
 0x1c5   : > { %11052 = vmatprep.mubr.msk.bf16.mxu0 %vm11832_vm13, %v11831_v46 }
 0x28f   : > { %v10646_v36 = vpop.f32.mrb[0].mxu0 }
 0x290   : > { %v5914_v8 = vmul.f32 %v10646_v36, %v9662_v53  ;;  %v5866_v11 = vpop.f32.mrb[1].mxu0  ;;  %v11593_v36 = vld [vmem:[%s15675_s4 + $0x50] sm:$0xff]  }
 0x291   : > { %v5912_v52 = vmul.f32 %v9662_v53, %v5866_v11  ;;  %v10647_v23 = vpop.f32.mrb[2].mxu0 }
 0x292   : > { %v5915_v62 = vmul.f32 %v10647_v23, %v9662_v53  ;;  %v5869_v31 = vpop.f32.mrb[3].mxu0  ;;  %v5929_v60 = vadd.f32 %v9663_v39, %v5914_v8  ;;  %v11594_v8 = vld [vmem:[%s15675_s4 + $0x58] sm:$0xff]   ;;  %v11596_v23 = vld [vmem:[%s15325_s12 + $0x48] sm:$0xff]  }
 0x293   : > { %v5913_v40 = vmul.f32 %v9662_v53, %v5869_v31  ;;  %v5927_v58 = vadd.f32 %v9663_v39, %v5912_v52  ;;  %v11598_v31 = vld [vmem:[%s15325_s12 + $0x58] sm:$0xff]  }
 0x294   : > { %v5930_v32 = vadd.f32 %v9663_v39, %v5915_v62  ;;  %v11597_v62 = vld [vmem:[%s15325_s12 + $0x50] sm:$0xff]  }
 0x295   : > { %v5928_v34 = vadd.f32 %v9663_v39, %v5913_v40  ;;  %v11599_v40 = vld [vmem:[%s15675_s4 + $0x60] sm:$0xff]  }
 0x296   : > { %v5936_v5 = vmax.f32 %v5929_v60, %v5930_v32  ;;  %v11600_v60 = vld [vmem:[%s15675_s4 + $0x68] sm:$0xff]   ;;  %v11601_v32 = vld [vmem:[%s15675_s4 + $0x70] sm:$0xff]  }
 0x297   : > { %v5935_v54 = vmax.f32 %v5927_v58, %v5928_v34  ;;  %v10650_v4 = vpop.f32.mrb[4].mxu0  ;;  %v11602_v58 = vld [vmem:[%s15675_s4 + $0x78] sm:$0xff]  }
 0x298   : > { %5940 = vst.msk [vmem:[#allocation2 + $0x8] sm:$0xff] %vm807_vm3, %v5936_v5  ;;  %v5918_v51 = vmul.f32 %v10650_v4, %v9662_v53  ;;  %v5882_v48 = vpop.f32.mrb[5].mxu0  ;;  %v11603_v5 = vld [vmem:[%s15325_s12 + $0x60] sm:$0xff]   ;;  %v11604_v4 = vld [vmem:[%s15325_s12 + $0x68] sm:$0xff]  }
 0x299   : > { %5939 = vst.msk [vmem:[#allocation2] sm:$0xff] %vm807_vm3, %v5935_v54  ;;  %v5916_v9 = vmul.f32 %v9662_v53, %v5882_v48  ;;  %v10651_v29 = vpop.f32.mrb[6].mxu0  ;;  %v11606_v48 = vld [vmem:[%s15325_s12 + $0x78] sm:$0xff]  }
 0x29a   : > { %v5919_v35 = vmul.f32 %v10651_v29, %v9662_v53  ;;  %v5885_v3 = vpop.f32.mrb[7].mxu0  ;;  %v5933_v12 = vadd.f32 %v9663_v39, %v5918_v51  ;;  %v11605_v51 = vld [vmem:[%s15325_s12 + $0x70] sm:$0xff]   ;;  %v11608_v29 = vld [vmem:[%s15675_s4 + $0x88] sm:$0xff]  }
 0x29b   : > { %v5917_v50 = vmul.f32 %v9662_v53, %v5885_v3  ;;  %v5931_v43 = vadd.f32 %v9663_v39, %v5916_v9  ;;  %v11592_v53 = vld [vmem:[%s15675_s4 + $0x48] sm:$0xff]   ;;  %v11607_v9 = vld [vmem:[%s15675_s4 + $0x80] sm:$0xff]   ;;  %v11610_v3 = vld [vmem:[%s15675_s4 + $0x98] sm:$0xff]  }
 0x29c   : > { %v5934_v25 = vadd.f32 %v9663_v39, %v5919_v35  ;;  %v11609_v35 = vld [vmem:[%s15675_s4 + $0x90] sm:$0xff]  }
 0x29d   : > { %v5932_v0 = vadd.f32 %v9663_v39, %v5917_v50  ;;  %v11595_v39 = vld [vmem:[%s15325_s12 + $0x40] sm:$0xff]  }
 0x29e   : > { %v5938_v10 = vmax.f32 %v5933_v12, %v5934_v25  ;;  %v11611_v12 = vld [vmem:[%s15325_s12 + $0x80] sm:$0xff]  }
 0x29f   : > { %v5945_v18 = vld [vmem:[#allocation2 + $0x8] ss:$2 sm:$0xf]  ;;  %v5953_v2 = vld [vmem:[#allocation2 + $0x9] ss:$2 sm:$0xf]  ;;  %v5937_v55 = vmax.f32 %v5931_v43, %v5932_v0 }
 0x2a0   : > { %v5959_v28 = vmax.f32 %v5945_v18, %v5953_v2  ;;  %v5943_v41 = vld [vmem:[#allocation2] ss:$2 sm:$0xf]  ;;  %v5951_v49 = vld [vmem:[#allocation2 + $0x1] ss:$2 sm:$0xf] }
 0x2a1   : > { %5942 = vst.msk [vmem:[#allocation2 + $0x18] sm:$0xff] %vm807_vm3, %v5938_v10  ;;  %v5958_v20 = vmax.f32 %v5943_v41, %v5951_v49  ;;  %5941 = vst.msk [vmem:[#allocation2 + $0x10] sm:$0xff] %vm807_vm3, %v5937_v55  ;;  %v11612_v43 = vld [vmem:[%s15325_s12 + $0x88] sm:$0xff]   ;;  %v11613_v0 = vld [vmem:[%s15325_s12 + $0x90] sm:$0xff]  }
 0x2a2   : > { %v5963_v59 = vmax.f32 %v5959_v28, 0.0  ;;  %v11614_v10 = vld [vmem:[%s15325_s12 + $0x98] sm:$0xff]   ;;  %v11615_v18 = vld [vmem:[%s15675_s4 + $0xa0] sm:$0xff]   ;;  %v11616_v2 = vld [vmem:[%s15675_s4 + $0xa8] sm:$0xff]  }
 0x2a3   : > { %v5962_v57 = vmax.f32 %v5958_v20, 0.0  ;;  %v11617_v55 = vld [vmem:[%s15675_s4 + $0xb0] sm:$0xff]   ;;  %v11618_v28 = vld [vmem:[%s15675_s4 + $0xb8] sm:$0xff]   ;;  %v11619_v49 = vld [vmem:[%s15325_s12 + $0xa0] sm:$0xff]  }
 0x2a4   : > { %5968 = vst.msk [vmem:[%s14486_s23 + $0x4] sm:$0xf] %vm5966_vm14, %v5963_v59  ;;  %v11620_v59 = vld [vmem:[%s15325_s12 + $0xa8] sm:$0xff]  }
 0x2a5   : > { %5967 = vst.msk [vmem:[%s14486_s23] sm:$0xf] %vm5966_vm14, %v5962_v57  ;;  %v11621_v57 = vld [vmem:[%s15325_s12 + $0xb0] sm:$0xff]  }
 0x2a8   : > { %v5949_v24 = vld [vmem:[#allocation2 + $0x18] ss:$2 sm:$0xf]  ;;  %v5957_v6 = vld [vmem:[#allocation2 + $0x19] ss:$2 sm:$0xf] }
 0x2a9   : > { %v5961_v21 = vmax.f32 %v5949_v24, %v5957_v6  ;;  %v5947_v26 = vld [vmem:[#allocation2 + $0x10] ss:$2 sm:$0xf]  ;;  %v5955_v15 = vld [vmem:[#allocation2 + $0x11] ss:$2 sm:$0xf] }
 0x2aa   : > { %v5960_v17 = vmax.f32 %v5947_v26, %v5955_v15  ;;  %v11622_v24 = vld [vmem:[%s15325_s12 + $0xb8] sm:$0xff]   ;;  %v11623_v6 = vld [vmem:[%s15675_s4 + $0xc0] sm:$0xff]   ;;  %v11625_v26 = vld [vmem:[%s15675_s4 + $0xd0] sm:$0xff]  }
 0x2ab   : > { %v5965_v16 = vmax.f32 %v5961_v21, 0.0  ;;  %v9704_v50 = vld [vmem:[%s14486_s23 + $0x4] sm:$0x1]  ;;  %v9715_v41 = vld [vmem:[%s14486_s23 + $0x5] sm:$0x1]  ;;  %v11624_v21 = vld [vmem:[%s15675_s4 + $0xc8] sm:$0xff]  }
 0x2ac   : > { %v5964_v47 = vmax.f32 %v5960_v17, 0.0  ;;  %v5989_v13 = vld [vmem:[%s14486_s23 + $0x1] sm:$0x1]  ;;  %v5971_v22 = vld [vmem:[%s14486_s23] sm:$0x1]  ;;  %v6573_v25 = vpack.c.bf16 %v9704_v50, %v9704_v50  ;;  %v6724_v20 = vpack.c.bf16 %v9715_v41, %v9715_v41  ;;  %v11626_v15 = vld [vmem:[%s15675_s4 + $0xd8] sm:$0xff]  }
 0x2ad   : > { %5970 = vst.msk [vmem:[%s14486_s23 + $0xc] sm:$0xf] %vm5966_vm14, %v5965_v16  ;;  %v5990_v56 = vpack.c.bf16 %v5989_v13, %v5989_v13  ;;  %v5972_v30 = vpack.c.bf16 %v5971_v22, %v5971_v22  ;;  %v6269_v11 = vld [vmem:[%s14486_s23 + $0x2] sm:$0x1]  ;;  %v6420_v34 = vld [vmem:[%s14486_s23 + $0x3] sm:$0x1] }
 0x2ae   : > { %5969 = vst.msk [vmem:[%s14486_s23 + $0x8] sm:$0xf] %vm5966_vm14, %v5964_v47  ;;  %v6270_v52 = vpack.c.bf16 %v6269_v11, %v6269_v11  ;;  %v6421_v54 = vpack.c.bf16 %v6420_v34, %v6420_v34  ;;  %v9726_v17 = vld [vmem:[%s14486_s23 + $0x6] sm:$0x1]  ;;  %v11628_v13 = vld [vmem:[%s15325_s12 + $0xc8] sm:$0xff]   ;;  %v11634_v22 = vld [vmem:[%s15675_s4 + $0xf8] sm:$0xff]  }
 0x2af   : > { %10661 = vmatmul.mubr.msk.bf16.vlgmr.msra.gmra.mrb[0].mxu1 %vm807_vm3, %v5990_v56  ;;  %v11627_v16 = vld [vmem:[%s15325_s12 + $0xc0] sm:$0xff]   ;;  %v6875_v47 = vpack.c.bf16 %v9726_v17, %v9726_v17  ;;  %v11644_v11 = vld [vmem:[%s15325_s12 + $0x108] sm:$0xff]   ;;  %v11706_v17 = vld [vmem:[%s15320_s7 + $0x18] sm:$0xff]  }
 0x2b0   : > { %10665 = vmatpush3.bf16.msra.mxu1 %v11579_v44  ;;  %10672 = vmatprep.mubr.msk.bf16.mxu1 %vm11832_vm13, %v11831_v46  ;;  %v11629_v44 = vld [vmem:[%s15325_s12 + $0xd0] sm:$0xff]   ;;  %v11652_v34 = vld [vmem:[%s15325_s12 + $0x128] sm:$0xff]  }
 0x2b1   : > { %10666 = vmatprep.subr.bf16.mxu1 %v11831_v46  ;;  %v11660_v50 = vld [vmem:[%s15325_s12 + $0x148] sm:$0xff]  }
 0x2b2   : > { %v11668_v41 = vld [vmem:[%s15325_s12 + $0x168] sm:$0xff]  }
 0x2b4   : > { %10667 = vmatpush3.bf16.msra.mxu1 %v11580_v1  ;;  %v11631_v1 = vld [vmem:[%s15675_s4 + $0xe0] sm:$0xff]  }
 0x2b5   : > { %10668 = vmatprep.subr.bf16.mxu1 %v11831_v46 }
 0x2b8   : > { %10669 = vmatpush3.bf16.msra.mxu1 %v11581_v14  ;;  %v11632_v14 = vld [vmem:[%s15675_s4 + $0xe8] sm:$0xff]  }
 0x2b9   : > { %10670 = vmatprep.subr.bf16.mxu1 %v11831_v46 }
 0x2bc   : > { %10671 = vmatpush3.bf16.msra.mxu1 %v11582_v33  ;;  %v11633_v33 = vld [vmem:[%s15675_s4 + $0xf0] sm:$0xff]  }
 0x2bd   : > { %10676 = vmatprep.subr.bf16.mxu1 %v11831_v46 }
 0x2bf   : > { %10673 = vmatmul.mubr.msk.bf16.vlgmr.msra.gmra.mrb[0].mxu1 %vm807_vm3, %v5972_v30 }
 0x2c0   : > { %10677 = vmatpush3.bf16.msra.mxu1 %v11583_v7  ;;  %10684 = vmatprep.mubr.msk.bf16.mxu1 %vm11832_vm13, %v11831_v46  ;;  %v9737_v7 = vld [vmem:[%s14486_s23 + $0x7] sm:$0x1] }
 0x2c1   : > { %10678 = vmatprep.subr.bf16.mxu1 %v11831_v46 }
 0x2c4   : > { %10679 = vmatpush3.bf16.msra.mxu1 %v11584_v45  ;;  %v7026_v45 = vpack.c.bf16 %v9737_v7, %v9737_v7  ;;  %v11680_v7 = vld [vmem:[%s15675_s4 + $0x1a8] sm:$0xff]  }
 0x2c5   : > { %10680 = vmatprep.subr.bf16.mxu1 %v11831_v46 }
 0x2c8   : > { %10681 = vmatpush3.bf16.msra.mxu1 %v11585_v42  ;;  %v11636_v42 = vld [vmem:[%s15325_s12 + $0xe8] sm:$0xff]  }
 0x2c9   : > { %10682 = vmatprep.subr.bf16.mxu1 %v11831_v46 }
 0x2cc   : > { %10683 = vmatpush3.bf16.msra.mxu1 %v11586_v61  ;;  %v11637_v61 = vld [vmem:[%s15325_s12 + $0xf0] sm:$0xff]  }
 0x2cd   : > { %10688 = vmatprep.subr.bf16.mxu1 %v11831_v46 }
 0x2cf   : > { %10685 = vmatmul.mubr.msk.bf16.vlgmr.msra.gmra.mrb[4].mxu1 %vm807_vm3, %v5990_v56  ;;  %v11630_v56 = vld [vmem:[%s15325_s12 + $0xd8] sm:$0xff]  }
 0x2d0   : > { %10689 = vmatpush3.bf16.msra.mxu1 %v11587_v27  ;;  %10696 = vmatprep.mubr.msk.bf16.mxu1 %vm11832_vm13, %v11831_v46  ;;  %v11638_v27 = vld [vmem:[%s15325_s12 + $0xf8] sm:$0xff]  }
 0x2d1   : > { %10690 = vmatprep.subr.bf16.mxu1 %v11831_v46 }
 0x2d4   : > { %10691 = vmatpush3.bf16.msra.mxu1 %v11588_v38  ;;  %v11639_v38 = vld [vmem:[%s15675_s4 + $0x100] sm:$0xff]  }
 0x2d5   : > { %10692 = vmatprep.subr.bf16.mxu1 %v11831_v46 }
 0x2d8   : > { %10693 = vmatpush3.bf16.msra.mxu1 %v11589_v63  ;;  %v11640_v63 = vld [vmem:[%s15675_s4 + $0x108] sm:$0xff]  }
 0x2d9   : > { %10694 = vmatprep.subr.bf16.mxu1 %v11831_v46 }
 0x2dc   : > { %10695 = vmatpush3.bf16.msra.mxu1 %v11590_v19  ;;  %v11641_v19 = vld [vmem:[%s15675_s4 + $0x110] sm:$0xff]  }
 0x2dd   : > { %10700 = vmatprep.subr.bf16.mxu1 %v11831_v46 }
 0x2df   : > { %10697 = vmatmul.mubr.msk.bf16.vlgmr.msra.gmra.mrb[4].mxu1 %vm807_vm3, %v5972_v30  ;;  %v11635_v30 = vld [vmem:[%s15325_s12 + $0xe0] sm:$0xff]  }
 0x2e0   : > { %10701 = vmatpush3.bf16.msra.mxu1 %v11591_v37  ;;  %10708 = vmatprep.mubr.msk.bf16.mxu1 %vm11832_vm13, %v11831_v46  ;;  %v11642_v37 = vld [vmem:[%s15675_s4 + $0x118] sm:$0xff]  }
 0x2e1   : > { %10702 = vmatprep.subr.bf16.mxu1 %v11831_v46 }
 0x2e4   : > { %10703 = vmatpush3.bf16.msra.mxu1 %v11592_v53  ;;  %v9748_v53 = vld [vmem:[%s14486_s23 + $0x8] sm:$0x1] }
 0x2e5   : > { %10704 = vmatprep.subr.bf16.mxu1 %v11831_v46 }
 0x2e8   : > { %10705 = vmatpush3.bf16.msra.mxu1 %v11593_v36  ;;  %v11643_v36 = vld [vmem:[%s15325_s12 + $0x100] sm:$0xff]  }
 0x2e9   : > { %10706 = vmatprep.subr.bf16.mxu1 %v11831_v46 }
 0x2ec   : > { %10707 = vmatpush3.bf16.msra.mxu1 %v11594_v8  ;;  %v7178_v8 = vpack.c.bf16 %v9748_v53, %v9748_v53  ;;  %v11688_v53 = vld [vmem:[%s15675_s4 + $0x1c8] sm:$0xff]  }
 0x2ed   : > { %10712 = vmatprep.subr.bf16.mxu1 %v11831_v46 }
 0x2ef   : > { %10709 = vmatmul.mubr.msk.bf16.vlgmr.msra.gmra.mrb[0].mxu1 %vm807_vm3, %v6270_v52 }
 0x2f0   : > { %10713 = vmatpush3.bf16.msra.mxu1 %v11595_v39  ;;  %10720 = vmatprep.mubr.msk.bf16.mxu1 %vm11832_vm13, %v11831_v46  ;;  %v11645_v39 = vld [vmem:[%s15325_s12 + $0x110] sm:$0xff]  }
 0x2f1   : > { %10714 = vmatprep.subr.bf16.mxu1 %v11831_v46 }
 0x2f4   : > { %10715 = vmatpush3.bf16.msra.mxu1 %v11596_v23  ;;  %v11647_v23 = vld [vmem:[%s15675_s4 + $0x120] sm:$0xff]  }
 0x2f5   : > { %10716 = vmatprep.subr.bf16.mxu1 %v11831_v46 }
 0x2f8   : > { %10717 = vmatpush3.bf16.msra.mxu1 %v11597_v62  ;;  %v11648_v62 = vld [vmem:[%s15675_s4 + $0x128] sm:$0xff]  }
 0x2f9   : > { %10718 = vmatprep.subr.bf16.mxu1 %v11831_v46 }
 0x2fc   : > { %10719 = vmatpush3.bf16.msra.mxu1 %v11598_v31  ;;  %v11649_v31 = vld [vmem:[%s15675_s4 + $0x130] sm:$0xff]  }
 0x2fd   : > { %10724 = vmatprep.subr.bf16.mxu1 %v11831_v46 }
 0x2ff   : > { %10721 = vmatmul.mubr.msk.bf16.vlgmr.msra.gmra.mrb[4].mxu1 %vm807_vm3, %v6270_v52  ;;  %v11646_v52 = vld [vmem:[%s15325_s12 + $0x118] sm:$0xff]  }
 0x300   : > { %10725 = vmatpush3.bf16.msra.mxu1 %v11599_v40  ;;  %10732 = vmatprep.mubr.msk.bf16.mxu1 %vm11832_vm13, %v11831_v46  ;;  %v11650_v40 = vld [vmem:[%s15675_s4 + $0x138] sm:$0xff]  }
 0x301   : > { %10726 = vmatprep.subr.bf16.mxu1 %v11831_v46 }
 0x304   : > { %10727 = vmatpush3.bf16.msra.mxu1 %v11600_v60  ;;  %v9759_v60 = vld [vmem:[%s14486_s23 + $0x9] sm:$0x1] }
 0x305   : > { %10728 = vmatprep.subr.bf16.mxu1 %v11831_v46 }
 0x308   : > { %10729 = vmatpush3.bf16.msra.mxu1 %v11601_v32  ;;  %v11651_v32 = vld [vmem:[%s15325_s12 + $0x120] sm:$0xff]  }
 0x309   : > { %10730 = vmatprep.subr.bf16.mxu1 %v11831_v46 }
 0x30c   : > { %10731 = vmatpush3.bf16.msra.mxu1 %v11602_v58  ;;  %v7329_v58 = vpack.c.bf16 %v9759_v60, %v9759_v60  ;;  %v11696_v60 = vld [vmem:[%s15675_s4 + $0x1e8] sm:$0xff]  }
 0x30d   : > { %10736 = vmatprep.subr.bf16.mxu1 %v11831_v46 }
 0x30f   : > { %10733 = vmatmul.mubr.msk.bf16.vlgmr.msra.gmra.mrb[0].mxu1 %vm807_vm3, %v6421_v54 }
 0x310   : > { %10737 = vmatpush3.bf16.msra.mxu1 %v11603_v5  ;;  %10744 = vmatprep.mubr.msk.bf16.mxu1 %vm11832_vm13, %v11831_v46  ;;  %v11653_v5 = vld [vmem:[%s15325_s12 + $0x130] sm:$0xff]  }
 0x311   : > { %10738 = vmatprep.subr.bf16.mxu1 %v11831_v46 }
 0x314   : > { %10739 = vmatpush3.bf16.msra.mxu1 %v11604_v4  ;;  %v11655_v4 = vld [vmem:[%s15675_s4 + $0x140] sm:$0xff]  }
 0x315   : > { %10740 = vmatprep.subr.bf16.mxu1 %v11831_v46 }
 0x318   : > { %10741 = vmatpush3.bf16.msra.mxu1 %v11605_v51  ;;  %v11656_v51 = vld [vmem:[%s15675_s4 + $0x148] sm:$0xff]  }
 0x319   : > { %10742 = vmatprep.subr.bf16.mxu1 %v11831_v46 }
 0x31c   : > { %10743 = vmatpush3.bf16.msra.mxu1 %v11606_v48  ;;  %v11657_v48 = vld [vmem:[%s15675_s4 + $0x150] sm:$0xff]  }
 0x31d   : > { %10748 = vmatprep.subr.bf16.mxu1 %v11831_v46 }
 0x31f   : > { %10745 = vmatmul.mubr.msk.bf16.vlgmr.msra.gmra.mrb[4].mxu1 %vm807_vm3, %v6421_v54  ;;  %v11654_v54 = vld [vmem:[%s15325_s12 + $0x138] sm:$0xff]  }
 0x320   : > { %10749 = vmatpush3.bf16.msra.mxu1 %v11607_v9  ;;  %10756 = vmatprep.mubr.msk.bf16.mxu1 %vm11832_vm13, %v11831_v46  ;;  %v11658_v9 = vld [vmem:[%s15675_s4 + $0x158] sm:$0xff]  }
 0x321   : > { %10750 = vmatprep.subr.bf16.mxu1 %v11831_v46 }
 0x324   : > { %10751 = vmatpush3.bf16.msra.mxu1 %v11608_v29  ;;  %v9770_v29 = vld [vmem:[%s14486_s23 + $0xa] sm:$0x1] }
 0x325   : > { %10752 = vmatprep.subr.bf16.mxu1 %v11831_v46 }
 0x328   : > { %10753 = vmatpush3.bf16.msra.mxu1 %v11609_v35  ;;  %v11659_v35 = vld [vmem:[%s15325_s12 + $0x140] sm:$0xff]  }
 0x329   : > { %10754 = vmatprep.subr.bf16.mxu1 %v11831_v46 }
 0x32c   : > { %10755 = vmatpush3.bf16.msra.mxu1 %v11610_v3  ;;  %v7480_v3 = vpack.c.bf16 %v9770_v29, %v9770_v29  ;;  %v11710_v29 = vld [vmem:[%s15320_s7 + $0x38] sm:$0xff]  }
 0x32d   : > { %10760 = vmatprep.subr.bf16.mxu1 %v11831_v46 }
 0x32f   : > { %10757 = vmatmul.mubr.msk.bf16.vlgmr.msra.gmra.mrb[0].mxu1 %vm807_vm3, %v6573_v25 }
 0x330   : > { %10761 = vmatpush3.bf16.msra.mxu1 %v11611_v12  ;;  %10768 = vmatprep.mubr.msk.bf16.mxu1 %vm11832_vm13, %v11831_v46  ;;  %v11661_v12 = vld [vmem:[%s15325_s12 + $0x150] sm:$0xff]  }
 0x331   : > { %10762 = vmatprep.subr.bf16.mxu1 %v11831_v46 }
 0x334   : > { %10763 = vmatpush3.bf16.msra.mxu1 %v11612_v43  ;;  %v11663_v43 = vld [vmem:[%s15675_s4 + $0x160] sm:$0xff]  }
 0x335   : > { %10764 = vmatprep.subr.bf16.mxu1 %v11831_v46 }
 0x338   : > { %10765 = vmatpush3.bf16.msra.mxu1 %v11613_v0  ;;  %v11664_v0 = vld [vmem:[%s15675_s4 + $0x168] sm:$0xff]  }
 0x339   : > { %10766 = vmatprep.subr.bf16.mxu1 %v11831_v46 }
 0x33c   : > { %10767 = vmatpush3.bf16.msra.mxu1 %v11614_v10  ;;  %v11665_v10 = vld [vmem:[%s15675_s4 + $0x170] sm:$0xff]  }
 0x33d   : > { %10772 = vmatprep.subr.bf16.mxu1 %v11831_v46 }
 0x33f   : > { %10769 = vmatmul.mubr.msk.bf16.vlgmr.msra.gmra.mrb[4].mxu1 %vm807_vm3, %v6573_v25  ;;  %v11662_v25 = vld [vmem:[%s15325_s12 + $0x158] sm:$0xff]  }
 0x340   : > { %10773 = vmatpush3.bf16.msra.mxu1 %v11615_v18  ;;  %10780 = vmatprep.mubr.msk.bf16.mxu1 %vm11832_vm13, %v11831_v46  ;;  %v11666_v18 = vld [vmem:[%s15675_s4 + $0x178] sm:$0xff]  }
 0x341   : > { %10774 = vmatprep.subr.bf16.mxu1 %v11831_v46 }
 0x344   : > { %10775 = vmatpush3.bf16.msra.mxu1 %v11616_v2  ;;  %v9781_v2 = vld [vmem:[%s14486_s23 + $0xb] sm:$0x1] }
 0x345   : > { %10776 = vmatprep.subr.bf16.mxu1 %v11831_v46 }
 0x348   : > { %10777 = vmatpush3.bf16.msra.mxu1 %v11617_v55  ;;  %v11667_v55 = vld [vmem:[%s15325_s12 + $0x160] sm:$0xff]  }
 0x349   : > { %10778 = vmatprep.subr.bf16.mxu1 %v11831_v46 }
 0x34c   : > { %10779 = vmatpush3.bf16.msra.mxu1 %v11618_v28  ;;  %v7631_v28 = vpack.c.bf16 %v9781_v2, %v9781_v2  ;;  %v11711_v2 = vld [vmem:[%s15323_s10] sm:$0xff]  }
 0x34d   : > { %10784 = vmatprep.subr.bf16.mxu1 %v11831_v46 }
 0x34f   : > { %10781 = vmatmul.mubr.msk.bf16.vlgmr.msra.gmra.mrb[0].mxu1 %vm807_vm3, %v6724_v20 }
 0x350   : > { %10785 = vmatpush3.bf16.msra.mxu1 %v11619_v49  ;;  %10792 = vmatprep.mubr.msk.bf16.mxu1 %vm11832_vm13, %v11831_v46  ;;  %v11669_v49 = vld [vmem:[%s15325_s12 + $0x170] sm:$0xff]  }
 0x351   : > { %10786 = vmatprep.subr.bf16.mxu1 %v11831_v46 }
 0x354   : > { %10787 = vmatpush3.bf16.msra.mxu1 %v11620_v59  ;;  %v11671_v59 = vld [vmem:[%s15675_s4 + $0x180] sm:$0xff]  }
 0x355   : > { %10788 = vmatprep.subr.bf16.mxu1 %v11831_v46 }
 0x358   : > { %10789 = vmatpush3.bf16.msra.mxu1 %v11621_v57  ;;  %v11703_v57 = vld [vmem:[%s15320_s7] sm:$0xff]  }
 0x359   : > { %10790 = vmatprep.subr.bf16.mxu1 %v11831_v46  ;;  %11037 = vmatpush3.bf16.msra.mxu0 %v11703_v57  ;;  %v11714_v57 = vld [vmem:[%s15323_s10 + $0x18] sm:$0xff]  }
 0x35a   : > { %11038 = vmatprep.subr.bf16.mxu0 %v11831_v46 }
 0x35c   : > { %10791 = vmatpush3.bf16.msra.mxu1 %v11622_v24  ;;  %v11672_v24 = vld [vmem:[%s15675_s4 + $0x188] sm:$0xff]  }
 0x35d   : > { %10796 = vmatprep.subr.bf16.mxu1 %v11831_v46 }
 0x35f   : > { %10793 = vmatmul.mubr.msk.bf16.vlgmr.msra.gmra.mrb[4].mxu1 %vm807_vm3, %v6724_v20  ;;  %v11670_v20 = vld [vmem:[%s15325_s12 + $0x178] sm:$0xff]  }
 0x360   : > { %10797 = vmatpush3.bf16.msra.mxu1 %v11623_v6  ;;  %10804 = vmatprep.mubr.msk.bf16.mxu1 %vm11832_vm13, %v11831_v46  ;;  %v11704_v6 = vld [vmem:[%s15320_s7 + $0x8] sm:$0xff]  }
 0x361   : > { %10798 = vmatprep.subr.bf16.mxu1 %v11831_v46  ;;  %11039 = vmatpush3.bf16.msra.mxu0 %v11704_v6  ;;  %v11715_v6 = vld [vmem:[%s15323_s10 + $0x20] sm:$0xff]  }
 0x362   : > { %11040 = vmatprep.subr.bf16.mxu0 %v11831_v46 }
 0x364   : > { %10799 = vmatpush3.bf16.msra.mxu1 %v11624_v21  ;;  %v11673_v21 = vld [vmem:[%s15675_s4 + $0x190] sm:$0xff]  }
 0x365   : > { %10800 = vmatprep.subr.bf16.mxu1 %v11831_v46 }
 0x368   : > { %10801 = vmatpush3.bf16.msra.mxu1 %v11625_v26  ;;  %v11705_v26 = vld [vmem:[%s15320_s7 + $0x10] sm:$0xff]  }
 0x369   : > { %10802 = vmatprep.subr.bf16.mxu1 %v11831_v46  ;;  %11041 = vmatpush3.bf16.msra.mxu0 %v11705_v26  ;;  %v11717_v26 = vld [vmem:[%s15323_s10 + $0x30] sm:$0xff]  }
 0x36a   : > { %11042 = vmatprep.subr.bf16.mxu0 %v11831_v46 }
 0x36c   : > { %10803 = vmatpush3.bf16.msra.mxu1 %v11626_v15  ;;  %v11674_v15 = vld [vmem:[%s15675_s4 + $0x198] sm:$0xff]  }
 0x36d   : > { %10808 = vmatprep.subr.bf16.mxu1 %v11831_v46  ;;  %11043 = vmatpush3.bf16.msra.mxu0 %v11706_v17  ;;  %v8496_v17 = vld [vmem:[%s15321_s8] sm:$0x1] }
 0x36e   : > { %11044 = vmatprep.subr.bf16.mxu0 %v11831_v46 }
 0x36f   : > { %10805 = vmatmul.mubr.msk.bf16.vlgmr.msra.gmra.mrb[0].mxu1 %vm807_vm3, %v6875_v47 }
 0x370   : > { %10809 = vmatpush3.bf16.msra.mxu1 %v11627_v16  ;;  %10816 = vmatprep.mubr.msk.bf16.mxu1 %vm11832_vm13, %v11831_v46  ;;  %v9792_v16 = vld [vmem:[%s14486_s23 + $0xc] sm:$0x1] }
 0x371   : > { %10810 = vmatprep.subr.bf16.mxu1 %v11831_v46 }
 0x374   : > { %10811 = vmatpush3.bf16.msra.mxu1 %v11628_v13  ;;  %v7783_v13 = vpack.c.bf16 %v9792_v16, %v9792_v16 }
 0x375   : > { %10812 = vmatprep.subr.bf16.mxu1 %v11831_v46 }
 0x378   : > { %10813 = vmatpush3.bf16.msra.mxu1 %v11629_v44  ;;  %v11707_v44 = vld [vmem:[%s15320_s7 + $0x20] sm:$0xff]  }
 0x379   : > { %10814 = vmatprep.subr.bf16.mxu1 %v11831_v46  ;;  %11045 = vmatpush3.bf16.msra.mxu0 %v11707_v44 }
 0x37a   : > { %11046 = vmatprep.subr.bf16.mxu0 %v11831_v46 }
 0x37c   : > { %10815 = vmatpush3.bf16.msra.mxu1 %v11630_v56  ;;  %v11676_v56 = vld [vmem:[%s15325_s12 + $0x188] sm:$0xff]  }
 0x37d   : > { %10820 = vmatprep.subr.bf16.mxu1 %v11831_v46 }
 0x37f   : > { %10817 = vmatmul.mubr.msk.bf16.vlgmr.msra.gmra.mrb[4].mxu1 %vm807_vm3, %v6875_v47  ;;  %v11675_v47 = vld [vmem:[%s15325_s12 + $0x180] sm:$0xff]  }
 0x380   : > { %10821 = vmatpush3.bf16.msra.mxu1 %v11631_v1  ;;  %10828 = vmatprep.mubr.msk.bf16.mxu1 %vm11832_vm13, %v11831_v46  ;;  %v11708_v1 = vld [vmem:[%s15320_s7 + $0x28] sm:$0xff]  }
 0x381   : > { %10822 = vmatprep.subr.bf16.mxu1 %v11831_v46  ;;  %11047 = vmatpush3.bf16.msra.mxu0 %v11708_v1 }
 0x382   : > { %11048 = vmatprep.subr.bf16.mxu0 %v11831_v46 }
 0x384   : > { %10823 = vmatpush3.bf16.msra.mxu1 %v11632_v14  ;;  %v11677_v14 = vld [vmem:[%s15325_s12 + $0x190] sm:$0xff]  }
 0x385   : > { %10824 = vmatprep.subr.bf16.mxu1 %v11831_v46 }
 0x388   : > { %10825 = vmatpush3.bf16.msra.mxu1 %v11633_v33  ;;  %v11678_v33 = vld [vmem:[%s15325_s12 + $0x198] sm:$0xff]  }
 0x389   : > { %10826 = vmatprep.subr.bf16.mxu1 %v11831_v46 }
 0x38c   : > { %10827 = vmatpush3.bf16.msra.mxu1 %v11634_v22  ;;  %v11679_v22 = vld [vmem:[%s15675_s4 + $0x1a0] sm:$0xff]  }
 0x38d   : > { %10832 = vmatprep.subr.bf16.mxu1 %v11831_v46 }
 0x38f   : > { %10829 = vmatmul.mubr.msk.bf16.vlgmr.msra.gmra.mrb[0].mxu1 %vm807_vm3, %v7026_v45 }
 0x390   : > { %10833 = vmatpush3.bf16.msra.mxu1 %v11635_v30  ;;  %10840 = vmatprep.mubr.msk.bf16.mxu1 %vm11832_vm13, %v11831_v46  ;;  %v11681_v30 = vld [vmem:[%s15675_s4 + $0x1b0] sm:$0xff]  }
 0x391   : > { %10834 = vmatprep.subr.bf16.mxu1 %v11831_v46 }
 0x394   : > { %10835 = vmatpush3.bf16.msra.mxu1 %v11636_v42  ;;  %v9803_v42 = vld [vmem:[%s14486_s23 + $0xd] sm:$0x1] }
 0x395   : > { %10836 = vmatprep.subr.bf16.mxu1 %v11831_v46 }
 0x398   : > { %10837 = vmatpush3.bf16.msra.mxu1 %v11637_v61  ;;  %v11683_v61 = vld [vmem:[%s15325_s12 + $0x1a0] sm:$0xff]  }
 0x399   : > { %10838 = vmatprep.subr.bf16.mxu1 %v11831_v46 }
 0x39c   : > { %10839 = vmatpush3.bf16.msra.mxu1 %v11638_v27  ;;  %v7934_v27 = vpack.c.bf16 %v9803_v42, %v9803_v42  ;;  %v11722_v42 = vld [vmem:[%s15328_s15 + $0x18] sm:$0xff]  }
 0x39d   : > { %10844 = vmatprep.subr.bf16.mxu1 %v11831_v46 }
 0x39f   : > { %10841 = vmatmul.mubr.msk.bf16.vlgmr.msra.gmra.mrb[4].mxu1 %vm807_vm3, %v7026_v45  ;;  %v11682_v45 = vld [vmem:[%s15675_s4 + $0x1b8] sm:$0xff]  }
 0x3a0   : > { %10845 = vmatpush3.bf16.msra.mxu1 %v11639_v38  ;;  %10852 = vmatprep.mubr.msk.bf16.mxu1 %vm11832_vm13, %v11831_v46  ;;  %v11684_v38 = vld [vmem:[%s15325_s12 + $0x1a8] sm:$0xff]  }
 0x3a1   : > { %10846 = vmatprep.subr.bf16.mxu1 %v11831_v46 }
 0x3a4   : > { %10847 = vmatpush3.bf16.msra.mxu1 %v11640_v63  ;;  %v11685_v63 = vld [vmem:[%s15325_s12 + $0x1b0] sm:$0xff]  }
 0x3a5   : > { %10848 = vmatprep.subr.bf16.mxu1 %v11831_v46 }
 0x3a8   : > { %10849 = vmatpush3.bf16.msra.mxu1 %v11641_v19  ;;  %v11686_v19 = vld [vmem:[%s15325_s12 + $0x1b8] sm:$0xff]  }
 0x3a9   : > { %10850 = vmatprep.subr.bf16.mxu1 %v11831_v46 }
 0x3ac   : > { %10851 = vmatpush3.bf16.msra.mxu1 %v11642_v37  ;;  %v11687_v37 = vld [vmem:[%s15675_s4 + $0x1c0] sm:$0xff]  }
 0x3ad   : > { %10856 = vmatprep.subr.bf16.mxu1 %v11831_v46 }
 0x3af   : > { %10853 = vmatmul.mubr.msk.bf16.vlgmr.msra.gmra.mrb[0].mxu1 %vm807_vm3, %v7178_v8 }
 0x3b0   : > { %10857 = vmatpush3.bf16.msra.mxu1 %v11643_v36  ;;  %10864 = vmatprep.mubr.msk.bf16.mxu1 %vm11832_vm13, %v11831_v46  ;;  %v11689_v36 = vld [vmem:[%s15675_s4 + $0x1d0] sm:$0xff]  }
 0x3b1   : > { %10858 = vmatprep.subr.bf16.mxu1 %v11831_v46 }
 0x3b4   : > { %10859 = vmatpush3.bf16.msra.mxu1 %v11644_v11  ;;  %v9814_v11 = vld [vmem:[%s14486_s23 + $0xe] sm:$0x1] }
 0x3b5   : > { %10860 = vmatprep.subr.bf16.mxu1 %v11831_v46 }
 0x3b8   : > { %10861 = vmatpush3.bf16.msra.mxu1 %v11645_v39  ;;  %v11691_v39 = vld [vmem:[%s15325_s12 + $0x1c0] sm:$0xff]  }
 0x3b9   : > { %10862 = vmatprep.subr.bf16.mxu1 %v11831_v46 }
 0x3bc   : > { %10863 = vmatpush3.bf16.msra.mxu1 %v11646_v52  ;;  %v8085_v52 = vpack.c.bf16 %v9814_v11, %v9814_v11 }
 0x3bd   : > { %10868 = vmatprep.subr.bf16.mxu1 %v11831_v46 }
 0x3bf   : > { %10865 = vmatmul.mubr.msk.bf16.vlgmr.msra.gmra.mrb[4].mxu1 %vm807_vm3, %v7178_v8  ;;  %v11690_v8 = vld [vmem:[%s15675_s4 + $0x1d8] sm:$0xff]  }
 0x3c0   : > { %10869 = vmatpush3.bf16.msra.mxu1 %v11647_v23  ;;  %10876 = vmatprep.mubr.msk.bf16.mxu1 %vm11832_vm13, %v11831_v46  ;;  %v11692_v23 = vld [vmem:[%s15325_s12 + $0x1c8] sm:$0xff]  }
 0x3c1   : > { %10870 = vmatprep.subr.bf16.mxu1 %v11831_v46 }
 0x3c4   : > { %10871 = vmatpush3.bf16.msra.mxu1 %v11648_v62  ;;  %v11693_v62 = vld [vmem:[%s15325_s12 + $0x1d0] sm:$0xff]  }
 0x3c5   : > { %10872 = vmatprep.subr.bf16.mxu1 %v11831_v46 }
 0x3c8   : > { %10873 = vmatpush3.bf16.msra.mxu1 %v11649_v31  ;;  %v11694_v31 = vld [vmem:[%s15325_s12 + $0x1d8] sm:$0xff]  }
 0x3c9   : > { %10874 = vmatprep.subr.bf16.mxu1 %v11831_v46 }
 0x3cc   : > { %10875 = vmatpush3.bf16.msra.mxu1 %v11650_v40  ;;  %v11695_v40 = vld [vmem:[%s15675_s4 + $0x1e0] sm:$0xff]  }
 0x3cd   : > { %10880 = vmatprep.subr.bf16.mxu1 %v11831_v46 }
 0x3cf   : > { %10877 = vmatmul.mubr.msk.bf16.vlgmr.msra.gmra.mrb[0].mxu1 %vm807_vm3, %v7329_v58 }
 0x3d0   : > { %10881 = vmatpush3.bf16.msra.mxu1 %v11651_v32  ;;  %10888 = vmatprep.mubr.msk.bf16.mxu1 %vm11832_vm13, %v11831_v46  ;;  %v11697_v32 = vld [vmem:[%s15675_s4 + $0x1f0] sm:$0xff]  }
 0x3d1   : > { %10882 = vmatprep.subr.bf16.mxu1 %v11831_v46 }
 0x3d4   : > { %10883 = vmatpush3.bf16.msra.mxu1 %v11652_v34  ;;  %v9825_v34 = vld [vmem:[%s14486_s23 + $0xf] sm:$0x1]  ;;  %s11739_s23 = sshll.u32 %s11833_s21, 4  ;;  %s11740_s23 = int_to_ptr.vmem [resolvable:$false] %s11739_s23 }
 0x3d5   : > { %10884 = vmatprep.subr.bf16.mxu1 %v11831_v46  ;;  %p11742_p0 = scmp.lt.s32.totalorder %s15240_s22, %s11740_s23 }
 0x3d8   : > { %10885 = vmatpush3.bf16.msra.mxu1 %v11653_v5  ;;  %v11699_v5 = vld [vmem:[%s15325_s12 + $0x1e0] sm:$0xff]  }
 0x3d9   : > { %10886 = vmatprep.subr.bf16.mxu1 %v11831_v46 }
 0x3dc   : > { %10887 = vmatpush3.bf16.msra.mxu1 %v11654_v54  ;;  %v8236_v54 = vpack.c.bf16 %v9825_v34, %v9825_v34 }
 0x3dd   : > { %10892 = vmatprep.subr.bf16.mxu1 %v11831_v46 }
 0x3df   : > { %10889 = vmatmul.mubr.msk.bf16.vlgmr.msra.gmra.mrb[4].mxu1 %vm807_vm3, %v7329_v58  ;;  %v11698_v58 = vld [vmem:[%s15675_s4 + $0x1f8] sm:$0xff]   ;;  %s11741_s4 = scalar_lea.vmem %s11740_s23, 32 }
 0x3e0   : > { %10893 = vmatpush3.bf16.msra.mxu1 %v11655_v4  ;;  %10900 = vmatprep.mubr.msk.bf16.mxu1 %vm11832_vm13, %v11831_v46  ;;  %v11700_v4 = vld [vmem:[%s15325_s12 + $0x1e8] sm:$0xff]   ;;  %p11743_p1 = scmp.lt.s32.totalorder %s11741_s4, %s11735_s20 }
 0x3e1   : > { %10894 = vmatprep.subr.bf16.mxu1 %v11831_v46 }
 0x3e2   : > { %p11744_p2 = por %p11743_p1, %p11742_p0 }
 0x3e4   : > { %10895 = vmatpush3.bf16.msra.mxu1 %v11656_v51  ;;  %v11701_v51 = vld [vmem:[%s15325_s12 + $0x1f0] sm:$0xff]   ;;  %p11745_p3 = pnand %p11744_p2, %p11738_p13 }
 0x3e5   : > { %10896 = vmatprep.subr.bf16.mxu1 %v11831_v46 }
 0x3e8   : > { %10897 = vmatpush3.bf16.msra.mxu1 %v11657_v48  ;;  %v11702_v48 = vld [vmem:[%s15325_s12 + $0x1f8] sm:$0xff]  }
 0x3e9   : > { %10898 = vmatprep.subr.bf16.mxu1 %v11831_v46 }
 0x3ec   : > { %10899 = vmatpush3.bf16.msra.mxu1 %v11658_v9  ;;  %v11709_v9 = vld [vmem:[%s15320_s7 + $0x30] sm:$0xff]  }
 0x3ed   : > { %10904 = vmatprep.subr.bf16.mxu1 %v11831_v46  ;;  %11049 = vmatpush3.bf16.msra.mxu0 %v11709_v9 }
 0x3ee   : > { %11050 = vmatprep.subr.bf16.mxu0 %v11831_v46 }
 0x3ef   : > { %10901 = vmatmul.mubr.msk.bf16.vlgmr.msra.gmra.mrb[0].mxu1 %vm807_vm3, %v7480_v3 }
 0x3f0   : > { %10905 = vmatpush3.bf16.msra.mxu1 %v11659_v35  ;;  %10912 = vmatprep.mubr.msk.bf16.mxu1 %vm11832_vm13, %v11831_v46  ;;  %v8386_v35 = vld [vmem:[%s15318_s5] sm:$0x1] }
 0x3f1   : > { %10906 = vmatprep.subr.bf16.mxu1 %v11831_v46  ;;  %11051 = vmatpush3.bf16.msra.mxu0 %v11710_v29 }
 0x3f2   : > { %11056 = vmatprep.subr.bf16.mxu0 %v11831_v46 }
 0x3f4   : > { %10907 = vmatpush3.bf16.msra.mxu1 %v11660_v50  ;;  %v8388_v50 = vld [vmem:[%s15319_s6] sm:$0x1] }
 0x3f5   : > { %10908 = vmatprep.subr.bf16.mxu1 %v11831_v46 }
 0x3f8   : > { %10909 = vmatpush3.bf16.msra.mxu1 %v11661_v12 }
 0x3f9   : > { %10910 = vmatprep.subr.bf16.mxu1 %v11831_v46 }
 0x3fc   : > { %10911 = vmatpush3.bf16.msra.mxu1 %v11662_v25 }
 0x3fd   : > { %10916 = vmatprep.subr.bf16.mxu1 %v11831_v46 }
 0x3ff   : > { %10913 = vmatmul.mubr.msk.bf16.vlgmr.msra.gmra.mrb[4].mxu1 %vm807_vm3, %v7480_v3 }
 0x400   : > { %10917 = vmatpush3.bf16.msra.mxu1 %v11663_v43  ;;  %10924 = vmatprep.mubr.msk.bf16.mxu1 %vm11832_vm13, %v11831_v46 }
 0x401   : > { %10918 = vmatprep.subr.bf16.mxu1 %v11831_v46 }
 0x404   : > { %10919 = vmatpush3.bf16.msra.mxu1 %v11664_v0 }
 0x405   : > { %10920 = vmatprep.subr.bf16.mxu1 %v11831_v46 }
 0x408   : > { %10921 = vmatpush3.bf16.msra.mxu1 %v11665_v10 }
 0x409   : > { %10922 = vmatprep.subr.bf16.mxu1 %v11831_v46 }
 0x40c   : > { %10923 = vmatpush3.bf16.msra.mxu1 %v11666_v18 }
 0x40d   : > { %10928 = vmatprep.subr.bf16.mxu1 %v11831_v46 }
 0x40f   : > { %10925 = vmatmul.mubr.msk.bf16.vlgmr.msra.gmra.mrb[0].mxu1 %vm807_vm3, %v7631_v28 }
 0x410   : > { %10929 = vmatpush3.bf16.msra.mxu1 %v11667_v55  ;;  %10936 = vmatprep.mubr.msk.bf16.mxu1 %vm11832_vm13, %v11831_v46 }
 0x411   : > { %10930 = vmatprep.subr.bf16.mxu1 %v11831_v46 }
 0x414   : > { %10931 = vmatpush3.bf16.msra.mxu1 %v11668_v41  ;;  %v11713_v41 = vld [vmem:[%s15323_s10 + $0x10] sm:$0xff]  }
 0x415   : > { %10932 = vmatprep.subr.bf16.mxu1 %v11831_v46 }
 0x418   : > { %10933 = vmatpush3.bf16.msra.mxu1 %v11669_v49 }
 0x419   : > { %10934 = vmatprep.subr.bf16.mxu1 %v11831_v46 }
 0x41c   : > { %10935 = vmatpush3.bf16.msra.mxu1 %v11670_v20 }
 0x41d   : > { %10940 = vmatprep.subr.bf16.mxu1 %v11831_v46 }
 0x41f   : > { %10937 = vmatmul.mubr.msk.bf16.vlgmr.msra.gmra.mrb[4].mxu1 %vm807_vm3, %v7631_v28  ;;  %v11712_v28 = vld [vmem:[%s15323_s10 + $0x8] sm:$0xff]  }
 0x420   : > { %10941 = vmatpush3.bf16.msra.mxu1 %v11671_v59  ;;  %10948 = vmatprep.mubr.msk.bf16.mxu1 %vm11832_vm13, %v11831_v46 }
 0x421   : > { %10942 = vmatprep.subr.bf16.mxu1 %v11831_v46 }
 0x424   : > { %10943 = vmatpush3.bf16.msra.mxu1 %v11672_v24 }
 0x425   : > { %10944 = vmatprep.subr.bf16.mxu1 %v11831_v46 }
 0x428   : > { %10945 = vmatpush3.bf16.msra.mxu1 %v11673_v21  ;;  %v11716_v21 = vld [vmem:[%s15323_s10 + $0x28] sm:$0xff]  }
 0x429   : > { %10946 = vmatprep.subr.bf16.mxu1 %v11831_v46 }
 0x42c   : > { %10947 = vmatpush3.bf16.msra.mxu1 %v11674_v15  ;;  %v11718_v15 = vld [vmem:[%s15323_s10 + $0x38] sm:$0xff]  }
 0x42d   : > { %10952 = vmatprep.subr.bf16.mxu1 %v11831_v46 }
 0x42f   : > { %10949 = vmatmul.mubr.msk.bf16.vlgmr.msra.gmra.mrb[0].mxu1 %vm807_vm3, %v7783_v13 }
 0x430   : > { %10953 = vmatpush3.bf16.msra.mxu1 %v11675_v47  ;;  %10960 = vmatprep.mubr.msk.bf16.mxu1 %vm11832_vm13, %v11831_v46  ;;  %v8498_v47 = vld [vmem:[%s15322_s9] sm:$0x1] }
 0x431   : > { %10954 = vmatprep.subr.bf16.mxu1 %v11831_v46 }
 0x434   : > { %10955 = vmatpush3.bf16.msra.mxu1 %v11676_v56 }
 0x435   : > { %10956 = vmatprep.subr.bf16.mxu1 %v11831_v46 }
 0x438   : > { %10957 = vmatpush3.bf16.msra.mxu1 %v11677_v14 }
 0x439   : > { %10958 = vmatprep.subr.bf16.mxu1 %v11831_v46 }
 0x43c   : > { %10959 = vmatpush3.bf16.msra.mxu1 %v11678_v33 }
 0x43d   : > { %10964 = vmatprep.subr.bf16.mxu1 %v11831_v46 }
 0x43f   : > { %10961 = vmatmul.mubr.msk.bf16.vlgmr.msra.gmra.mrb[4].mxu1 %vm807_vm3, %v7783_v13 }
 0x440   : > { %10965 = vmatpush3.bf16.msra.mxu1 %v11679_v22  ;;  %10972 = vmatprep.mubr.msk.bf16.mxu1 %vm11832_vm13, %v11831_v46  ;;  %v11719_v22 = vld [vmem:[%s15328_s15] sm:$0xff]  }
 0x441   : > { %10966 = vmatprep.subr.bf16.mxu1 %v11831_v46 }
 0x444   : > { %10967 = vmatpush3.bf16.msra.mxu1 %v11680_v7 }
 0x445   : > { %10968 = vmatprep.subr.bf16.mxu1 %v11831_v46 }
 0x448   : > { %10969 = vmatpush3.bf16.msra.mxu1 %v11681_v30  ;;  %v11720_v30 = vld [vmem:[%s15328_s15 + $0x8] sm:$0xff]  }
 0x449   : > { %10970 = vmatprep.subr.bf16.mxu1 %v11831_v46 }
 0x44c   : > { %10971 = vmatpush3.bf16.msra.mxu1 %v11682_v45  ;;  %v11721_v45 = vld [vmem:[%s15328_s15 + $0x10] sm:$0xff]  }
 0x44d   : > { %10976 = vmatprep.subr.bf16.mxu1 %v11831_v46 }
 0x44f   : > { %10973 = vmatmul.mubr.msk.bf16.vlgmr.msra.gmra.mrb[0].mxu1 %vm807_vm3, %v7934_v27 }
 0x450   : > { %10977 = vmatpush3.bf16.msra.mxu1 %v11683_v61  ;;  %10984 = vmatprep.mubr.msk.bf16.mxu1 %vm11832_vm13, %v11831_v46  ;;  %v11723_v61 = vld [vmem:[%s15328_s15 + $0x20] sm:$0xff]  }
 0x451   : > { %10978 = vmatprep.subr.bf16.mxu1 %v11831_v46 }
 0x454   : > { %10979 = vmatpush3.bf16.msra.mxu1 %v11684_v38  ;;  %v11724_v38 = vld [vmem:[%s15328_s15 + $0x28] sm:$0xff]  }
 0x455   : > { %10980 = vmatprep.subr.bf16.mxu1 %v11831_v46 }
 0x458   : > { %10981 = vmatpush3.bf16.msra.mxu1 %v11685_v63 }
 0x459   : > { %10982 = vmatprep.subr.bf16.mxu1 %v11831_v46 }
 0x45c   : > { %10983 = vmatpush3.bf16.msra.mxu1 %v11686_v19  ;;  %v8623_v19 = vld [vmem:[%s15327_s14] sm:$0x1] }
 0x45d   : > { %10988 = vmatprep.subr.bf16.mxu1 %v11831_v46 }
 0x45f   : > { %10985 = vmatmul.mubr.msk.bf16.vlgmr.msra.gmra.mrb[4].mxu1 %vm807_vm3, %v7934_v27  ;;  %v8621_v27 = vld [vmem:[%s15326_s13] sm:$0x1] }
 0x460   : > { %10989 = vmatpush3.bf16.msra.mxu1 %v11687_v37  ;;  %10996 = vmatprep.mubr.msk.bf16.mxu1 %vm11832_vm13, %v11831_v46  ;;  %v11725_v37 = vld [vmem:[%s15328_s15 + $0x30] sm:$0xff]  }
 0x461   : > { %10990 = vmatprep.subr.bf16.mxu1 %v11831_v46 }
 0x464   : > { %10991 = vmatpush3.bf16.msra.mxu1 %v11688_v53 }
 0x465   : > { %10992 = vmatprep.subr.bf16.mxu1 %v11831_v46 }
 0x468   : > { %10993 = vmatpush3.bf16.msra.mxu1 %v11689_v36  ;;  %v11726_v36 = vld [vmem:[%s15328_s15 + $0x38] sm:$0xff]  }
 0x469   : > { %10994 = vmatprep.subr.bf16.mxu1 %v11831_v46 }
 0x46c   : > { %10995 = vmatpush3.bf16.msra.mxu1 %v11690_v8 }
 0x46d   : > { %11000 = vmatprep.subr.bf16.mxu1 %v11831_v46 }
 0x46f   : > { %10997 = vmatmul.mubr.msk.bf16.vlgmr.msra.gmra.mrb[0].mxu1 %vm807_vm3, %v8085_v52 }
 0x470   : > { %11001 = vmatpush3.bf16.msra.mxu1 %v11691_v39  ;;  %11008 = vmatprep.mubr.msk.bf16.mxu1 %vm11832_vm13, %v11831_v46  ;;  %v8518_v39 = vld [vmem:[%s15324_s11] sm:$0x1] }
 0x471   : > { %11002 = vmatprep.subr.bf16.mxu1 %v11831_v46 }
 0x474   : > { %11003 = vmatpush3.bf16.msra.mxu1 %v11692_v23 }
 0x475   : > { %11004 = vmatprep.subr.bf16.mxu1 %v11831_v46 }
 0x478   : > { %11005 = vmatpush3.bf16.msra.mxu1 %v11693_v62 }
 0x479   : > { %11006 = vmatprep.subr.bf16.mxu1 %v11831_v46 }
 0x47c   : > { %11007 = vmatpush3.bf16.msra.mxu1 %v11694_v31 }
 0x47d   : > { %11012 = vmatprep.subr.bf16.mxu1 %v11831_v46 }
 0x47f   : > { %11009 = vmatmul.mubr.msk.bf16.vlgmr.msra.gmra.mrb[4].mxu1 %vm807_vm3, %v8085_v52 }
 0x480   : > { %11013 = vmatpush3.bf16.msra.mxu1 %v11695_v40  ;;  %11020 = vmatprep.mubr.msk.bf16.mxu1 %vm11832_vm13, %v11831_v46 }
 0x481   : > { %11014 = vmatprep.subr.bf16.mxu1 %v11831_v46 }
 0x484   : > { %11015 = vmatpush3.bf16.msra.mxu1 %v11696_v60 }
 0x485   : > { %11016 = vmatprep.subr.bf16.mxu1 %v11831_v46 }
 0x488   : > { %11017 = vmatpush3.bf16.msra.mxu1 %v11697_v32 }
 0x489   : > { %11018 = vmatprep.subr.bf16.mxu1 %v11831_v46 }
 0x48c   : > { %11019 = vmatpush3.bf16.msra.mxu1 %v11698_v58 }
 0x48d   : > { %11024 = vmatprep.subr.bf16.mxu1 %v11831_v46 }
 0x48f   : > { %11021 = vmatmul.mubr.msk.bf16.vlgmr.msra.gmra.mrb[0].mxu1 %vm807_vm3, %v8236_v54 }
 0x490   : > { %11025 = vmatpush3.bf16.msra.mxu1 %v11699_v5  ;;  %11032 = vmatprep.mubr.msk.bf16.mxu1 %vm11832_vm13, %v11831_v46 }
 0x491   : > { %11026 = vmatprep.subr.bf16.mxu1 %v11831_v46 }
 0x494   : > { %11027 = vmatpush3.bf16.msra.mxu1 %v11700_v4 }
 0x495   : > { %11028 = vmatprep.subr.bf16.mxu1 %v11831_v46 }
 0x498   : > { %11029 = vmatpush3.bf16.msra.mxu1 %v11701_v51 }
 0x499   : > { %11030 = vmatprep.subr.bf16.mxu1 %v11831_v46 }
 0x49c   : > { %11031 = vmatpush3.bf16.msra.mxu1 %v11702_v48 }
 0x49f   : > { %11033 = vmatmul.mubr.msk.bf16.vlgmr.msra.gmra.mrb[4].mxu1 %vm807_vm3, %v8236_v54 }
 0x562   : > { %v8306_v3 = vpop.f32.mrb[0].mxu1 }
 0x563   : > { %v8387_v12 = vmul.f32 %v8386_v35, %v8306_v3  ;;  %v11022_v25 = vpop.f32.mrb[1].mxu1 }
 0x564   : > { %v8309_v43 = vpop.f32.mrb[2].mxu1 }
 0x565   : > { %v8389_v0 = vadd.f32 %v8388_v50, %v8387_v12  ;;  %v11023_v10 = vpop.f32.mrb[3].mxu1 }
 0x567   : > { %v8390_v18 = vmax.f32 %v8389_v0, 0.0 }
 0x569   : > { %v8391_v55 = vpack.c.bf16 %v8390_v18, %v8390_v18 }
 0x56b   : > { %11053 = vmatmul.mubr.bf16.vlgmr.msra.gmra.mrb[8].mxu0 %v8391_v55 }
 0x56c   : > { %11057 = vmatpush3.bf16.msra.mxu0 %v11711_v2  ;;  %11072 = vmatprep.mubr.msk.bf16.mxu0 %vm11832_vm13, %v11831_v46 }
 0x56d   : > { %11058 = vmatprep.subr.bf16.mxu0 %v11831_v46 }
 0x570   : > { %11059 = vmatpush3.bf16.msra.mxu0 %v11712_v28 }
 0x571   : > { %11060 = vmatprep.subr.bf16.mxu0 %v11831_v46 }
 0x572   : > { %v8379_v49 = vpop.f32.mrb[4].mxu1 }
 0x573   : > { %v11034_v20 = vpop.f32.mrb[5].mxu1  ;;  %v8622_v63 = vmul.f32 %v8621_v27, %v8379_v49 }
 0x574   : > { %v8382_v59 = vpop.f32.mrb[6].mxu1  ;;  %11061 = vmatpush3.bf16.msra.mxu0 %v11713_v41 }
 0x575   : > { %v11035_v24 = vpop.f32.mrb[7].mxu1  ;;  %11062 = vmatprep.subr.bf16.mxu0 %v11831_v46  ;;  %v8624_v53 = vadd.f32 %v8623_v19, %v8622_v63 }
 0x577   : > { %v8625_v8 = vmax.f32 %v8624_v53, 0.0 }
 0x578   : > { %11063 = vmatpush3.bf16.msra.mxu0 %v11714_v57 }
 0x579   : > { %11064 = vmatprep.subr.bf16.mxu0 %v11831_v46  ;;  %v8626_v11 = vpack.c.bf16 %v8625_v8, %v8625_v8 }
 0x57c   : > { %11065 = vmatpush3.bf16.msra.mxu0 %v11715_v6 }
 0x57d   : > { %11066 = vmatprep.subr.bf16.mxu0 %v11831_v46 }
 0x580   : > { %11067 = vmatpush3.bf16.msra.mxu0 %v11716_v21 }
 0x581   : > { %11068 = vmatprep.subr.bf16.mxu0 %v11831_v46 }
 0x584   : > { %11069 = vmatpush3.bf16.msra.mxu0 %v11717_v26 }
 0x585   : > { %11070 = vmatprep.subr.bf16.mxu0 %v11831_v46 }
 0x588   : > { %11071 = vmatpush3.bf16.msra.mxu0 %v11718_v15 }
 0x589   : > { %11076 = vmatprep.subr.bf16.mxu0 %v11831_v46 }
 0x63e   : > { %v8490_v16 = vpop.f32.mrb[8].mxu0 }
 0x63f   : > { %v8497_v13 = vmul.f32 %v8496_v17, %v8490_v16  ;;  %v11054_v44 = vpop.f32.mrb[9].mxu0 }
 0x640   : > { %v8493_v56 = vpop.f32.mrb[10].mxu0 }
 0x641   : > { %v8499_v1 = vadd.f32 %v8498_v47, %v8497_v13  ;;  %v11055_v14 = vpop.f32.mrb[11].mxu0 }
 0x643   : > { %v8500_v33 = vmax.f32 %v8499_v1, 0.0 }
 0x645   : > { %v8501_v7 = vpack.c.bf16 %v8500_v33, %v8500_v33 }
 0x647   : > { %11073 = vmatmul.mubr.bf16.vlgmr.msra.gmra.mrb[12].mxu0 %v8501_v7 }
 0x648   : > { %11077 = vmatpush3.bf16.msra.mxu0 %v11719_v22  ;;  %11092 = vmatprep.mubr.msk.bf16.mxu0 %vm11832_vm13, %v11831_v46 }
 0x649   : > { %11078 = vmatprep.subr.bf16.mxu0 %v11831_v46 }
 0x64c   : > { %11079 = vmatpush3.bf16.msra.mxu0 %v11720_v30 }
 0x64d   : > { %11080 = vmatprep.subr.bf16.mxu0 %v11831_v46 }
 0x650   : > { %11081 = vmatpush3.bf16.msra.mxu0 %v11721_v45 }
 0x651   : > { %11082 = vmatprep.subr.bf16.mxu0 %v11831_v46 }
 0x654   : > { %11083 = vmatpush3.bf16.msra.mxu0 %v11722_v42 }
 0x655   : > { %11084 = vmatprep.subr.bf16.mxu0 %v11831_v46 }
 0x658   : > { %11085 = vmatpush3.bf16.msra.mxu0 %v11723_v61 }
 0x659   : > { %11086 = vmatprep.subr.bf16.mxu0 %v11831_v46 }
 0x65c   : > { %11087 = vmatpush3.bf16.msra.mxu0 %v11724_v38 }
 0x65d   : > { %11088 = vmatprep.subr.bf16.mxu0 %v11831_v46 }
 0x660   : > { %11089 = vmatpush3.bf16.msra.mxu0 %v11725_v37 }
 0x661   : > { %11090 = vmatprep.subr.bf16.mxu0 %v11831_v46  ;;  %v8643_v46 = vld [vmem:[%s15329_s16] sm:$0x1] }
 0x664   : > { %11091 = vmatpush3.bf16.msra.mxu0 %v11726_v36 }
 0x667   : > { %11093 = vmatmul.mubr.bf16.vlgmr.msra.gmra.mrb[16].mxu0 %v8626_v11 }
 0x71a   : > { %v8601_v52 = vpop.f32.mrb[12].mxu0 }
 0x71b   : > { %v8602_v23 = vadd.f32 %v8601_v52, %v8518_v39  ;;  %v11074_v62 = vpop.f32.mrb[13].mxu0 }
 0x71c   : > { %v8604_v31 = vpop.f32.mrb[14].mxu0 }
 0x71d   : > { %v11075_v40 = vpop.f32.mrb[15].mxu0  ;;  %v8608_v60 = vsel %vm8607_vm15, %v8602_v23, -inf }
 0x71e   : > { %8609 = vmax.xlane.f32.xlu0 %v8608_v60 }
 0x73a   : > { %v8726_v32 = vpop.f32.mrb[16].mxu0 }
 0x73b   : > { %v8727_v58 = vadd.f32 %v8726_v32, %v8643_v46  ;;  %v11094_v34 = vpop.f32.mrb[17].mxu0 }
 0x73c   : > { %v8729_v5 = vpop.f32.mrb[18].mxu0 }
 0x73d   : > { %v11095_v54 = vpop.f32.mrb[19].mxu0  ;;  %v8732_v4 = vsel %vm8607_vm15, %v8727_v58, -inf }
 0x73e   : > { %8733 = vmax.xlane.f32.xlu0 %v8732_v4 }
 0x7ab   : > { %v8610_v51 = vpop.xlane.xlu0 %8609 }
 0x7ac   : > { %v8611_v48 = vsub.f32 %v8602_v23, %v8610_v51 }
 0x7ae   : > { %v8612_v9 = vmul.f32 1.442695, %v8611_v48 }
 0x7b0   : > { %11727 = vpow2.f32 %v8612_v9 }
 0x7ba   : > { %v11728_v29 = vpop.eup %11727 }
 0x7bb   : > { %v8614_v35 = vsel %vm8607_vm15, %v11728_v29, 0.0 }
 0x7bc   : > { %8615 = vadd.xlane.f32.xlu1 %v8614_v35 }
 0x7cb   : > { %v8734_v3 = vpop.xlane.xlu0 %8733 }
 0x7cc   : > { %v8735_v50 = vsub.f32 %v8727_v58, %v8734_v3 }
 0x7ce   : > { %v8736_v12 = vmul.f32 1.442695, %v8735_v50 }
 0x7d0   : > { %11729 = vpow2.f32 %v8736_v12 }
 0x7da   : > { %v11730_v25 = vpop.eup %11729 }
 0x7db   : > { %v8738_v43 = vsel %vm8607_vm15, %v11730_v25, 0.0 }
 0x7dc   : > { %8739 = vadd.xlane.f32.xlu1 %v8738_v43 }
 0x849   : > { %v8616_v0 = vpop.xlane.xlu1 %8615 }
 0x84a   : > { %11731 = vlog2.f32 %v8616_v0 }
 0x854   : > { %v11732_v10 = vpop.eup %11731 }
 0x855   : > { %v8618_v18 = vmul.f32 0.6931472, %v11732_v10 }
 0x857   : > { %v8619_v2 = vsub.f32 %v8611_v48, %v8618_v18 }
 0x859   : > { %8620 = vst [vmem:[%s598_s26] sm:$0x1] %v8619_v2 }
 0x85a   : > { %11748 = shalt.err (!%p11745_p3)
}
 0x85b   : > { %s11749_s26 = scalar_lea.hbm %s15238_s28, 16  ;;  %s11753_s21 = scalar_lea.hbm %s15330_s17, 32 }
 0x85c   : > { %p11750_p4 = scmp.ne.s32.totalorder %s15238_s28, %s11749_s26  ;;  %p11754_p9 = scmp.lt.u32.totalorder %s15238_s28, %s15330_s17 }
 0x85d   : > { %p11755_p10 = scmp.lt.u32.totalorder %s11753_s21, %s11749_s26  ;;  %p11757_p12 = scmp.lt.u32.totalorder %s11749_s26, %s15238_s28 }
 0x85e   : > { %p11751_p7 = pnand %p11750_p4, %p11973_p5 }
 0x85f   : > { %p11756_p11 = por %p11755_p10, %p11754_p9 }
 0x860   : > { %p11752_p8 = pneg %p11751_p7 }
 0x861   : > { %p11758_p13 = por %p11757_p12, %p11756_p11 }
 0x863   : > { %p11759_p0 = pnand %p11758_p13, %p11752_p8 }
 0x865   : > { %11762 = shalt.err (!%p11759_p0)
}
 0x866   : > { %11409 = dma.vmem_to_hbm [thread:$0]  (%p11973_p5), %s15240_s22, 16, %s15238_s28, %s8746_s0  }
 0x867   : > { %s604_s4 = scalar_lea.vmem [#allocation5], %s15229_s2  ;;  %s15678_s20 = sshll.u32 %s11956_s1, 4 }
 0x868   : > { %s8780_s25 = sshll.u32 %s604_s4, 4  ;;  %s15270_s27 = scalar_lea.hbm %s15331_s18, %s15678_s20  ;;  %s15272_s25 = int_to_ptr.vmem [resolvable:$true] %s8780_s25 }
 0x869   : > { %v8740_v55 = vpop.xlane.xlu1 %8739  ;;  %s8750_s22 = scalar_lea.sflag [#allocation6], %s15229_s2  ;;  %s11763_s28 = scalar_lea.vmem %s15272_s25, 16 }
 0x86a   : > { %11733 = vlog2.f32 %v8740_v55  ;;  %p11764_p1 = scmp.ne.s32.totalorder %s15272_s25, %s11763_s28  ;;  %s11834_s0 = smov [#allocation5]  }
 0x86b   : > { %s11767_s21 = sshll.u32 %s11834_s0, 4  ;;  %s11768_s21 = int_to_ptr.vmem [resolvable:$false] %s11767_s21 }
 0x86c   : > { %p11765_p2 = pnand %p11764_p1, %p11973_p5  ;;  %s11769_s1 = scalar_lea.vmem %s11768_s21, 32 }
 0x86d   : > { %p11770_p4 = scmp.lt.s32.totalorder %s15272_s25, %s11768_s21  ;;  %p11771_p7 = scmp.lt.s32.totalorder %s11769_s1, %s11763_s28 }
 0x86e   : > { %p11766_p3 = pneg %p11765_p2 }
 0x86f   : > { %p11772_p8 = por %p11771_p7, %p11770_p4 }
 0x871   : > { %p11773_p9 = pnand %p11772_p8, %p11766_p3 }
 0x874   : > { %v11734_v28 = vpop.eup %11733 }
 0x875   : > { %v8742_v41 = vmul.f32 0.6931472, %v11734_v28 }
 0x877   : > { %v8743_v49 = vsub.f32 %v8735_v50, %v8742_v41 }
 0x879   : > { %8744 = vst [vmem:[%s604_s4] sm:$0x1] %v8743_v49 }
 0x87a   : > { %11776 = shalt.err (!%p11773_p9)
}
 0x87b   : > { %s11777_s2 = scalar_lea.hbm %s15270_s27, 16  ;;  %s11781_s20 = scalar_lea.hbm %s15331_s18, 32 }
 0x87c   : > { %p11778_p10 = scmp.ne.s32.totalorder %s15270_s27, %s11777_s2  ;;  %p11782_p13 = scmp.lt.u32.totalorder %s15270_s27, %s15331_s18 }
 0x87d   : > { %p11783_p0 = scmp.lt.u32.totalorder %s11781_s20, %s11777_s2  ;;  %p11785_p2 = scmp.lt.u32.totalorder %s11777_s2, %s15270_s27 }
 0x87e   : > { %p11779_p11 = pnand %p11778_p10, %p11973_p5 }
 0x87f   : > { %p11784_p1 = por %p11783_p0, %p11782_p13 }
 0x880   : > { %p11780_p12 = pneg %p11779_p11 }
 0x881   : > { %p11786_p3 = por %p11785_p2, %p11784_p1 }
 0x883   : > { %p11787_p4 = pnand %p11786_p3, %p11780_p12 }
 0x885   : > { %11790 = shalt.err (!%p11787_p4)
}
 0x886   : > { %11410 = dma.vmem_to_hbm [thread:$0]  (%p11973_p5), %s15272_s25, 16, %s15270_s27, %s8750_s22  }
 0x887 PF: > { %s15679_s28 = sld [smem:[#allocation11_spill]]  ;;  %s15680_s0 = sld [smem:[#allocation9_spill]] }
 0x88d   : > { %p11420_p7 = scmp.ge.s32.totalorder %s15679_s28, 2  ;;  %s8795_s1 = sand.u32 1, %s15680_s0  }
 0x88e   : > { %s8796_s23 = scalar_lea.sflag [#allocation4], %s8795_s1 }
 0x88f   : > { %p11414_p8 = pnand %p11420_p7, %p11977_p6 }
 0x891   : > { %11808 = dma.done.wait (!%p11414_p8), %s8796_s23, 16  }
 0x892   : > { %11810 = vsyncadd (!%p11414_p8), %s8796_s23, 4294967280  ;;  %s8804_s2 = scalar_lea.sflag [#allocation6], %s8795_s1 }
 0x893   : > { %11812 = dma.done.wait (!%p11414_p8), %s8804_s2, 16  }
 0x894   : > { %11814 = vsyncadd (!%p11414_p8), %s8804_s2, 4294967280  ;;  %s15682_s21 = sld [smem:[#allocation12_spill]]  ;;  %s15683_s3 = sld [smem:[#allocation10_spill]] }
 0x895   : > { %s15684_s20 = sld [smem:[#allocation13_spill]]  ;;  %s15685_s0 = smov %s11821_s30 }
 0x89a   : > { %p33_p5 = scmp.ge.s32.totalorder %s15682_s21, 4   ;;  %s15686_s30 = smov %s15683_s3 }
 0x89c   :  { %35 = sbr.rel (!%p33_p5) target bundleno = 11 (0xb), region = 190 }
 0x8a3   :  { %8816 = vsyncpa [#allocation4], 1 }
 0x8a4   :  { %8818 = vsyncpa [#allocation4 + $0x1], 1 }
 0x8a5   :  { %8819 = vsyncpa [#allocation6], 1 }
 0x8a6   :  { %8821 = vsyncpa [#allocation6 + $0x1], 1 }

</bundles_post_ra>
